<compile_context>
chip_gen: v7x
topology: tpu7x:2x2x1
jax: 0.10.0
libtpu: 0.0.40
codegen_flags: <defaults>
</compile_context>

<pallas_src>
import functools

import jax
import jax.numpy as jnp
from jax.experimental import pallas as pl
from jax.experimental.pallas import tpu as pltpu

_VMEM_LIMIT = 56 * 1024 * 1024  # <= v7x's 64 MiB physical VMEM; fine on v5e/v6e too


# ---------------------------------------------------------------------------
# Pallas kernels
# ---------------------------------------------------------------------------
def _conv3x3_relu_kernel(x_ref, w_ref, b_ref, o_ref, *, wp):
    # x_ref: (1, (H+3)*(W+2), Cin)   zero-padded activation, flattened rows (bf16)
    # w_ref: (3, 3, Cin, TILE_CO)    bf16, resident across the batch sweep
    # b_ref: (1, TILE_CO)            f32
    # o_ref: (1, H*(W+2), TILE_CO)   bf16 (rows are W+2 wide; wrapper strips 2 junk cols)
    m = o_ref.shape[1]
    tc = o_ref.shape[2]
    acc = jnp.zeros((m, tc), jnp.float32)
    for di in range(3):
        for dj in range(3):
            off = di * wp + dj                        # flat shift of tap (di, dj)
            patch = x_ref[0, pl.ds(off, m), :]        # (m, Cin) contiguous rows
            acc = acc + jnp.dot(patch, w_ref[di, dj],
                                preferred_element_type=jnp.float32)
    acc = acc + b_ref[...]                            # (1, TC) broadcasts over (m, TC)
    o_ref[0] = jnp.maximum(acc, 0.0).astype(o_ref.dtype)


def _maxpool2x2_kernel(x_ref, o_ref):
    # x_ref: (1, H, Wo, 2*C)   o_ref: (1, Ho, Wo, C)
    _, h, wo, c2 = x_ref.shape
    c = c2 // 2
    x = x_ref[0].reshape(h // 2, 2, wo, c2)           # major-dim split only (layout-free)
    a = jnp.maximum(x[:, 0], x[:, 1])                 # max over the row pair
    o_ref[0] = jnp.maximum(a[:, :, :c], a[:, :, c:])  # max over the column pair


# ---------------------------------------------------------------------------
# Wrappers (pallas_call plumbing + thin XLA glue)
# ---------------------------------------------------------------------------
def conv3x3_relu(x, w, b):
    """3x3 conv (stride 1, padding 1) + bias + ReLU.

    x: (N, H, W, Cin) bfloat16; w: (Cout, Cin, 3, 3) f32 (PyTorch layout); b: (Cout,) f32.
    Returns (N, H, W, Cout) bfloat16.
    """
    N, H, W, Cin = x.shape
    Cout = w.shape[0]
    cpad = (-Cin) % 8                 # lane-friendly channel pad (first layer Cin=3 -> 8)
    Cin_p = Cin + cpad
    Wp = W + 2
    Lp = (H + 3) * Wp                 # +3 rows: 1 top halo, 2 bottom (slack for flat shifts)
    M = H * Wp

    xp = jnp.pad(x, ((0, 0), (1, 2), (1, 1), (0, cpad)))     # one pad: halo + channel pad
    xflat = xp.reshape(N, Lp, Cin_p)                          # row-major regroup, free

    wt = jnp.transpose(w, (2, 3, 1, 0))                       # (3, 3, Cin, Cout)
    if cpad:
        wt = jnp.pad(wt, ((0, 0), (0, 0), (0, cpad), (0, 0)))
    wt = wt.astype(jnp.bfloat16)
    b2 = b.reshape(1, Cout).astype(jnp.float32)

    tile_co = Cout if Cout <= 128 else 128                    # lane-dense output tiles
    n_co = Cout // tile_co

    out = pl.pallas_call(
        functools.partial(_conv3x3_relu_kernel, wp=Wp),
        out_shape=jax.ShapeDtypeStruct((N, M, Cout), jnp.bfloat16),
        grid=(n_co, N),        # Cout tiles slowest -> weight slab stays VMEM-resident over N
        in_specs=[
            pl.BlockSpec((1, Lp, Cin_p), lambda co, n: (n, 0, 0)),
            pl.BlockSpec((3, 3, Cin_p, tile_co), lambda co, n: (0, 0, 0, co)),
            pl.BlockSpec((1, tile_co), lambda co, n: (0, co)),
        ],
        out_specs=pl.BlockSpec((1, M, tile_co), lambda co, n: (n, 0, co)),
        compiler_params=pltpu.CompilerParams(
            dimension_semantics=("parallel", "parallel"),
            vmem_limit_bytes=_VMEM_LIMIT),
    )(xflat, wt, b2)

    # Drop the 2 junk columns per image row created by the flattened-shift trick.
    return out.reshape(N, H, Wp, Cout)[:, :, :W, :]


def maxpool2x2(x):
    """x: (N, H, W, C) -> (N, H//2, W//2, C), kernel=2, stride=2 (nn.MaxPool2d(2, 2))."""
    N, H, W, C = x.shape
    assert H % 2 == 0 and W % 2 == 0, "maxpool2x2 expects even spatial dims"
    Ho, Wo = H // 2, W // 2
    xr = x.reshape(N, H, Wo, 2 * C)                           # row-major regroup, free
    out = pl.pallas_call(
        _maxpool2x2_kernel,
        out_shape=jax.ShapeDtypeStruct((N, Ho, Wo, C), x.dtype),
        grid=(N,),
        in_specs=[pl.BlockSpec((1, H, Wo, 2 * C), lambda n: (n, 0, 0, 0))],
        out_specs=pl.BlockSpec((1, Ho, Wo, C), lambda n: (n, 0, 0, 0)),
        compiler_params=pltpu.CompilerParams(
            dimension_semantics=("parallel",),
            vmem_limit_bytes=_VMEM_LIMIT),
    )(xr)
    return out


# ---------------------------------------------------------------------------
# VGG19 slices (torchvision vgg19.features indices [0,2),[2,7),[7,12),[12,21),[21,30))
# ---------------------------------------------------------------------------
_VGG19_LEVELS = [
    [("conv", 3, 64)],                                                            # relu1_1
    [("conv", 64, 64), ("pool",), ("conv", 64, 128)],                             # relu2_1
    [("conv", 128, 128), ("pool",), ("conv", 128, 256)],                          # relu3_1
    [("conv", 256, 256), ("conv", 256, 256), ("conv", 256, 256),
     ("pool",), ("conv", 256, 512)],                                              # relu4_1
    [("conv", 512, 512), ("conv", 512, 512), ("conv", 512, 512),
     ("pool",), ("conv", 512, 512)],                                              # relu5_1
]


def init_vgg19_params(key):
    params = []
    for level in _VGG19_LEVELS:
        plist = []
        for item in level:
            if item[0] == "conv":
                cin, cout = item[1], item[2]
                key, kw, kb = jax.random.split(key, 3)
                w = jax.random.normal(kw, (cout, cin, 3, 3), jnp.float32) * (2.0 / (9 * cin)) ** 0.5
                b = jax.random.normal(kb, (cout,), jnp.float32) * 0.01
                plist.append(("conv", (w, b)))
            else:
                plist.append(("pool", None))
        params.append(plist)
    return params


def vgg19_forward(x_nchw, params, level=5, start_level=0):
    """Matches VGG19.forward: returns a list of per-level outputs (NCHW, float32)."""
    x = jnp.transpose(x_nchw, (0, 2, 3, 1)).astype(jnp.bfloat16)   # NCHW -> NHWC, bf16
    outs = []
    for i in range(start_level, level):
        for op, p in params[i]:
            if op == "conv":
                x = conv3x3_relu(x, p[0], p[1])
            else:
                x = maxpool2x2(x)
        outs.append(jnp.transpose(x, (0, 3, 1, 2)).astype(jnp.float32))  # NCHW f32 like torch
    return outs


if __name__ == "__main__":
    key = jax.random.PRNGKey(0)
    kx, kp = jax.random.split(key)
    x = jax.random.normal(kx, (2, 3, 32, 32), jnp.float32)   # small NCHW image batch
    params = init_vgg19_params(kp)

    outs = vgg19_forward(x, params, level=5, start_level=0)
    for o in outs:
        jax.block_until_ready(o)

    expected = [(2, 64, 32, 32), (2, 128, 16, 16), (2, 256, 8, 8),
                (2, 512, 4, 4), (2, 512, 2, 2)]
    assert [tuple(o.shape) for o in outs] == expected
    assert all(o.dtype == jnp.float32 for o in outs)
    assert all(bool(jnp.all(jnp.isfinite(o))) for o in outs)
    print("KERNEL_OK")
</pallas_src>

<mosaic_0001>
module attributes {stable_mosaic.version = 11 : i64} {
  func.func @_conv3x3_relu_kernel(%arg0: i32, %arg1: i32, %arg2: memref<1x1190x8xbf16, #tpu.memory_space<vmem>>, %arg3: memref<3x3x8x64xbf16, #tpu.memory_space<vmem>>, %arg4: memref<1x64xf32, #tpu.memory_space<vmem>>, %arg5: memref<1x1088x64xbf16, #tpu.memory_space<vmem>>) attributes {dimension_semantics = [#tpu.dimension_semantics<parallel>, #tpu.dimension_semantics<parallel>], iteration_bounds = array<i64: 1, 2>, scalar_prefetch = 0 : i64, scratch_operands = 0 : i64, tpu.core_type = #tpu.core_type<tc>, window_params = [{transform_indices = @transform_0, window_bounds = array<i64: 1, 1190, 8>}, {transform_indices = @transform_1, window_bounds = array<i64: 3, 3, 8, 64>}, {transform_indices = @transform_2, window_bounds = array<i64: 1, 64>}, {transform_indices = @transform_3, window_bounds = array<i64: 1, 1088, 64>}]} {
    %cst = arith.constant 0.000000e+00 : f32
    %0 = vector.broadcast %cst : f32 to vector<1088x64xf32>
    %c0 = arith.constant 0 : index
    %c0_0 = arith.constant 0 : index
    %c0_1 = arith.constant 0 : index
    %1 = vector.load %arg2[%c0, %c0_0, %c0_1] : memref<1x1190x8xbf16, #tpu.memory_space<vmem>>, vector<1x1088x8xbf16>
    %2 = vector.shape_cast %1 : vector<1x1088x8xbf16> to vector<1088x8xbf16>
    %c0_2 = arith.constant 0 : index
    %c0_3 = arith.constant 0 : index
    %c0_4 = arith.constant 0 : index
    %c0_5 = arith.constant 0 : index
    %3 = vector.load %arg3[%c0_2, %c0_3, %c0_4, %c0_5] : memref<3x3x8x64xbf16, #tpu.memory_space<vmem>>, vector<1x1x8x64xbf16>
    %4 = vector.shape_cast %3 : vector<1x1x8x64xbf16> to vector<8x64xbf16>
    %cst_6 = arith.constant dense<0.000000e+00> : vector<1088x64xf32>
    %5 = tpu.matmul %2, %4, %cst_6 {dimension_numbers = #tpu.dot_dimension_numbers<[1], [0], [0], [1], [0, 0, 1, 1], [], []>} : vector<1088x8xbf16>, vector<8x64xbf16>, vector<1088x64xf32> -> vector<1088x64xf32>
    %6 = arith.addf %0, %5 : vector<1088x64xf32>
    %c0_7 = arith.constant 0 : index
    %c1 = arith.constant 1 : index
    %c0_8 = arith.constant 0 : index
    %7 = vector.load %arg2[%c0_7, %c1, %c0_8] : memref<1x1190x8xbf16, #tpu.memory_space<vmem>>, vector<1x1088x8xbf16>
    %8 = vector.shape_cast %7 : vector<1x1088x8xbf16> to vector<1088x8xbf16>
    %c0_9 = arith.constant 0 : index
    %c1_10 = arith.constant 1 : index
    %c0_11 = arith.constant 0 : index
    %c0_12 = arith.constant 0 : index
    %9 = vector.load %arg3[%c0_9, %c1_10, %c0_11, %c0_12] : memref<3x3x8x64xbf16, #tpu.memory_space<vmem>>, vector<1x1x8x64xbf16>
    %10 = vector.shape_cast %9 : vector<1x1x8x64xbf16> to vector<8x64xbf16>
    %cst_13 = arith.constant dense<0.000000e+00> : vector<1088x64xf32>
    %11 = tpu.matmul %8, %10, %cst_13 {dimension_numbers = #tpu.dot_dimension_numbers<[1], [0], [0], [1], [0, 0, 1, 1], [], []>} : vector<1088x8xbf16>, vector<8x64xbf16>, vector<1088x64xf32> -> vector<1088x64xf32>
    %12 = arith.addf %6, %11 : vector<1088x64xf32>
    %c0_14 = arith.constant 0 : index
    %c2 = arith.constant 2 : index
    %c0_15 = arith.constant 0 : index
    %13 = vector.load %arg2[%c0_14, %c2, %c0_15] : memref<1x1190x8xbf16, #tpu.memory_space<vmem>>, vector<1x1088x8xbf16>
    %14 = vector.shape_cast %13 : vector<1x1088x8xbf16> to vector<1088x8xbf16>
    %c0_16 = arith.constant 0 : index
    %c2_17 = arith.constant 2 : index
    %c0_18 = arith.constant 0 : index
    %c0_19 = arith.constant 0 : index
    %15 = vector.load %arg3[%c0_16, %c2_17, %c0_18, %c0_19] : memref<3x3x8x64xbf16, #tpu.memory_space<vmem>>, vector<1x1x8x64xbf16>
    %16 = vector.shape_cast %15 : vector<1x1x8x64xbf16> to vector<8x64xbf16>
    %cst_20 = arith.constant dense<0.000000e+00> : vector<1088x64xf32>
    %17 = tpu.matmul %14, %16, %cst_20 {dimension_numbers = #tpu.dot_dimension_numbers<[1], [0], [0], [1], [0, 0, 1, 1], [], []>} : vector<1088x8xbf16>, vector<8x64xbf16>, vector<1088x64xf32> -> vector<1088x64xf32>
    %18 = arith.addf %12, %17 : vector<1088x64xf32>
    %c0_21 = arith.constant 0 : index
    %c34 = arith.constant 34 : index
    %c0_22 = arith.constant 0 : index
    %19 = vector.load %arg2[%c0_21, %c34, %c0_22] : memref<1x1190x8xbf16, #tpu.memory_space<vmem>>, vector<1x1088x8xbf16>
    %20 = vector.shape_cast %19 : vector<1x1088x8xbf16> to vector<1088x8xbf16>
    %c1_23 = arith.constant 1 : index
    %c0_24 = arith.constant 0 : index
    %c0_25 = arith.constant 0 : index
    %c0_26 = arith.constant 0 : index
    %21 = vector.load %arg3[%c1_23, %c0_24, %c0_25, %c0_26] : memref<3x3x8x64xbf16, #tpu.memory_space<vmem>>, vector<1x1x8x64xbf16>
    %22 = vector.shape_cast %21 : vector<1x1x8x64xbf16> to vector<8x64xbf16>
    %cst_27 = arith.constant dense<0.000000e+00> : vector<1088x64xf32>
    %23 = tpu.matmul %20, %22, %cst_27 {dimension_numbers = #tpu.dot_dimension_numbers<[1], [0], [0], [1], [0, 0, 1, 1], [], []>} : vector<1088x8xbf16>, vector<8x64xbf16>, vector<1088x64xf32> -> vector<1088x64xf32>
    %24 = arith.addf %18, %23 : vector<1088x64xf32>
    %c0_28 = arith.constant 0 : index
    %c35 = arith.constant 35 : index
    %c0_29 = arith.constant 0 : index
    %25 = vector.load %arg2[%c0_28, %c35, %c0_29] : memref<1x1190x8xbf16, #tpu.memory_space<vmem>>, vector<1x1088x8xbf16>
    %26 = vector.shape_cast %25 : vector<1x1088x8xbf16> to vector<1088x8xbf16>
    %c1_30 = arith.constant 1 : index
    %c1_31 = arith.constant 1 : index
    %c0_32 = arith.constant 0 : index
    %c0_33 = arith.constant 0 : index
    %27 = vector.load %arg3[%c1_30, %c1_31, %c0_32, %c0_33] : memref<3x3x8x64xbf16, #tpu.memory_space<vmem>>, vector<1x1x8x64xbf16>
    %28 = vector.shape_cast %27 : vector<1x1x8x64xbf16> to vector<8x64xbf16>
    %cst_34 = arith.constant dense<0.000000e+00> : vector<1088x64xf32>
    %29 = tpu.matmul %26, %28, %cst_34 {dimension_numbers = #tpu.dot_dimension_numbers<[1], [0], [0], [1], [0, 0, 1, 1], [], []>} : vector<1088x8xbf16>, vector<8x64xbf16>, vector<1088x64xf32> -> vector<1088x64xf32>
    %30 = arith.addf %24, %29 : vector<1088x64xf32>
    %c0_35 = arith.constant 0 : index
    %c36 = arith.constant 36 : index
    %c0_36 = arith.constant 0 : index
    %31 = vector.load %arg2[%c0_35, %c36, %c0_36] : memref<1x1190x8xbf16, #tpu.memory_space<vmem>>, vector<1x1088x8xbf16>
    %32 = vector.shape_cast %31 : vector<1x1088x8xbf16> to vector<1088x8xbf16>
    %c1_37 = arith.constant 1 : index
    %c2_38 = arith.constant 2 : index
    %c0_39 = arith.constant 0 : index
    %c0_40 = arith.constant 0 : index
    %33 = vector.load %arg3[%c1_37, %c2_38, %c0_39, %c0_40] : memref<3x3x8x64xbf16, #tpu.memory_space<vmem>>, vector<1x1x8x64xbf16>
    %34 = vector.shape_cast %33 : vector<1x1x8x64xbf16> to vector<8x64xbf16>
    %cst_41 = arith.constant dense<0.000000e+00> : vector<1088x64xf32>
    %35 = tpu.matmul %32, %34, %cst_41 {dimension_numbers = #tpu.dot_dimension_numbers<[1], [0], [0], [1], [0, 0, 1, 1], [], []>} : vector<1088x8xbf16>, vector<8x64xbf16>, vector<1088x64xf32> -> vector<1088x64xf32>
    %36 = arith.addf %30, %35 : vector<1088x64xf32>
    %c0_42 = arith.constant 0 : index
    %c68 = arith.constant 68 : index
    %c0_43 = arith.constant 0 : index
    %37 = vector.load %arg2[%c0_42, %c68, %c0_43] : memref<1x1190x8xbf16, #tpu.memory_space<vmem>>, vector<1x1088x8xbf16>
    %38 = vector.shape_cast %37 : vector<1x1088x8xbf16> to vector<1088x8xbf16>
    %c2_44 = arith.constant 2 : index
    %c0_45 = arith.constant 0 : index
    %c0_46 = arith.constant 0 : index
    %c0_47 = arith.constant 0 : index
    %39 = vector.load %arg3[%c2_44, %c0_45, %c0_46, %c0_47] : memref<3x3x8x64xbf16, #tpu.memory_space<vmem>>, vector<1x1x8x64xbf16>
    %40 = vector.shape_cast %39 : vector<1x1x8x64xbf16> to vector<8x64xbf16>
    %cst_48 = arith.constant dense<0.000000e+00> : vector<1088x64xf32>
    %41 = tpu.matmul %38, %40, %cst_48 {dimension_numbers = #tpu.dot_dimension_numbers<[1], [0], [0], [1], [0, 0, 1, 1], [], []>} : vector<1088x8xbf16>, vector<8x64xbf16>, vector<1088x64xf32> -> vector<1088x64xf32>
    %42 = arith.addf %36, %41 : vector<1088x64xf32>
    %c0_49 = arith.constant 0 : index
    %c69 = arith.constant 69 : index
    %c0_50 = arith.constant 0 : index
    %43 = vector.load %arg2[%c0_49, %c69, %c0_50] : memref<1x1190x8xbf16, #tpu.memory_space<vmem>>, vector<1x1088x8xbf16>
    %44 = vector.shape_cast %43 : vector<1x1088x8xbf16> to vector<1088x8xbf16>
    %c2_51 = arith.constant 2 : index
    %c1_52 = arith.constant 1 : index
    %c0_53 = arith.constant 0 : index
    %c0_54 = arith.constant 0 : index
    %45 = vector.load %arg3[%c2_51, %c1_52, %c0_53, %c0_54] : memref<3x3x8x64xbf16, #tpu.memory_space<vmem>>, vector<1x1x8x64xbf16>
    %46 = vector.shape_cast %45 : vector<1x1x8x64xbf16> to vector<8x64xbf16>
    %cst_55 = arith.constant dense<0.000000e+00> : vector<1088x64xf32>
    %47 = tpu.matmul %44, %46, %cst_55 {dimension_numbers = #tpu.dot_dimension_numbers<[1], [0], [0], [1], [0, 0, 1, 1], [], []>} : vector<1088x8xbf16>, vector<8x64xbf16>, vector<1088x64xf32> -> vector<1088x64xf32>
    %48 = arith.addf %42, %47 : vector<1088x64xf32>
    %c0_56 = arith.constant 0 : index
    %c70 = arith.constant 70 : index
    %c0_57 = arith.constant 0 : index
    %49 = vector.load %arg2[%c0_56, %c70, %c0_57] : memref<1x1190x8xbf16, #tpu.memory_space<vmem>>, vector<1x1088x8xbf16>
    %50 = vector.shape_cast %49 : vector<1x1088x8xbf16> to vector<1088x8xbf16>
    %c2_58 = arith.constant 2 : index
    %c2_59 = arith.constant 2 : index
    %c0_60 = arith.constant 0 : index
    %c0_61 = arith.constant 0 : index
    %51 = vector.load %arg3[%c2_58, %c2_59, %c0_60, %c0_61] : memref<3x3x8x64xbf16, #tpu.memory_space<vmem>>, vector<1x1x8x64xbf16>
    %52 = vector.shape_cast %51 : vector<1x1x8x64xbf16> to vector<8x64xbf16>
    %cst_62 = arith.constant dense<0.000000e+00> : vector<1088x64xf32>
    %53 = tpu.matmul %50, %52, %cst_62 {dimension_numbers = #tpu.dot_dimension_numbers<[1], [0], [0], [1], [0, 0, 1, 1], [], []>} : vector<1088x8xbf16>, vector<8x64xbf16>, vector<1088x64xf32> -> vector<1088x64xf32>
    %54 = arith.addf %48, %53 : vector<1088x64xf32>
    %c0_63 = arith.constant 0 : index
    %c0_64 = arith.constant 0 : index
    %55 = vector.load %arg4[%c0_63, %c0_64] : memref<1x64xf32, #tpu.memory_space<vmem>>, vector<1x64xf32>
    %56 = vector.broadcast %55 : vector<1x64xf32> to vector<1088x64xf32>
    %57 = arith.addf %54, %56 : vector<1088x64xf32>
    %cst_65 = arith.constant 0.000000e+00 : f32
    %58 = vector.broadcast %cst_65 : f32 to vector<1088x64xf32>
    %59 = arith.maximumf %57, %58 : vector<1088x64xf32>
    %60 = arith.truncf %59 : vector<1088x64xf32> to vector<1088x64xbf16>
    %c0_66 = arith.constant 0 : index
    %c0_67 = arith.constant 0 : index
    %c0_68 = arith.constant 0 : index
    %61 = vector.load %arg5[%c0_66, %c0_67, %c0_68] : memref<1x1088x64xbf16, #tpu.memory_space<vmem>>, vector<1x1088x64xbf16>
    %62 = vector.shape_cast %61 : vector<1x1088x64xbf16> to vector<1088x64xbf16>
    %63 = vector.shape_cast %60 : vector<1088x64xbf16> to vector<1x1088x64xbf16>
    tpu.vector_store %arg5[%c0_66, %c0_67, %c0_68], %63 {strides = array<i32>} : memref<1x1088x64xbf16, #tpu.memory_space<vmem>>, vector<1x1088x64xbf16>,
    return
  }
  func.func @transform_0(%arg0: i32, %arg1: i32) -> (i32, i32, i32) {
    %c0_i32 = arith.constant 0 : i32
    %c0_i32_0 = arith.constant 0 : i32
    %c0_i32_1 = arith.constant 0 : i32
    return %arg1, %c0_i32, %c0_i32_0 : i32, i32, i32
  }
  func.func @transform_1(%arg0: i32, %arg1: i32) -> (i32, i32, i32, i32) {
    %c0_i32 = arith.constant 0 : i32
    %c0_i32_0 = arith.constant 0 : i32
    %c0_i32_1 = arith.constant 0 : i32
    %c0_i32_2 = arith.constant 0 : i32
    return %c0_i32, %c0_i32_0, %c0_i32_1, %arg0 : i32, i32, i32, i32
  }
  func.func @transform_2(%arg0: i32, %arg1: i32) -> (i32, i32) {
    %c0_i32 = arith.constant 0 : i32
    %c0_i32_0 = arith.constant 0 : i32
    return %c0_i32, %arg0 : i32, i32
  }
  func.func @transform_3(%arg0: i32, %arg1: i32) -> (i32, i32, i32) {
    %c0_i32 = arith.constant 0 : i32
    %c0_i32_0 = arith.constant 0 : i32
    return %arg1, %c0_i32, %arg0 : i32, i32, i32
  }
}

</mosaic_0001>

<bundles_post_ra>
// kernel: tpu_custom_call.1
= control target key start
LH: loop header
LB: loop body
LE: loop exit
PB: predicated region body
PF: predicated region fallthrough
CT: control target
= control target key end

     0   :  { %s17841_s12 = smov 0   ;;  %s17843_s13 = smov 0   ;;  %s20802_s0 = inlined_call_operand.vmem [shape: bf16[2,1190,8], index: 0, kind: input, shape index: {}]   ;;  %s20803_s1 = inlined_call_operand.vmem [shape: bf16[3,3,8,64], index: 1, kind: input, shape index: {}]   ;;  %s20804_s2 = inlined_call_operand.vmem [shape: f32[1,64], index: 2, kind: input, shape index: {}]   ;;  %s20805_s3 = inlined_call_operand.vmem [shape: bf16[2,1088,64], index: 3, kind: output, shape index: {}]  }
   0x1   :  { %s17845_s14 = smov 0  }
   0x2 LB: > { %s22_s15 = sadd.s32 1, %s17815_s13  ;;  %p13192_p0 = scmp.ge.s32.totalorder %s17819_s14, 1  ;;  %s17819_s14 = sphi %s17845_s14, %s13_s14   ;;  %s17815_s13 = sphi %s17843_s13, %s21009_s13   ;;  %s17811_s12 = sphi %s17841_s12, %s21008_s12  }
   0x3   : > { %p23_p1 = scmp.ge.s32.totalorder %s22_s15, 2  ;;  %p168_p2 = scmp.lt.s32.totalorder %s17819_s14, 3 }
   0x5   : > { %s21011_s15 = smov (%p23_p1, %s22_s15), 0  ;;  %p169_p3 = pnand %p13192_p0, %p168_p2 }
   0x7   : > { %172 = sbr.rel (%p169_p3) target bundleno = 1474 (0x5c2), region = 32 }
   0xe   : > { %v13195_v0 = vld [vmem:[%s20803_s1 + $0x4] sm:$0xf]  ;;  %vm1460_vm0 = vcmask 1043456   ;;  %v13609_v1 = vld [vmem:[%s20803_s1 + $0x10] sm:$0xf]  ;;  %p202_p4 = scmp.lt.s32.totalorder %s17811_s12, 1 }
   0xf   : > { %17255 = vmatprep.subr.msk.bf16.mxu1 %vm1460_vm0, %v13195_v0  ;;  %17259 = vmatprep.subr.msk.bf16.mxu0 %vm1460_vm0, %v13609_v1  ;;  %v1462_v2 = vsel %vm1460_vm0, %v13195_v0, 0  ;;  %v17869_v3 = vsel %vm1460_vm0, %v13609_v1, 0  ;;  %v359_v4 = vld [vmem:[%s20803_s1] sm:$0xf]  ;;  %v13679_v5 = vld [vmem:[%s20803_s1 + $0x14] sm:$0xf] }
  0x10   : > { %20860 = vst [vmem:[#allocation2_spill] sm:$0xff] %v17869_v3  ;;  %14924 = vmatpush3.bf16.msra.mxu1 %v1462_v2  ;;  %15476 = vmatpush3.bf16.msra.mxu0 %v17869_v3  ;;  %s21013_s12 = smov (!%p202_p4, %s17811_s12), 1  ;;  %vm706_vm1 = vsmask.f32 7424  ;;  %vm1255_vm2 = vcmask 64512   ;;  %v2178_v6 = vsel %vm1460_vm0, %v359_v4, 0 }
  0x11   : > { %17256 = vmatprep.subr.msk.bf16.mxu1 %vm1460_vm0, %v359_v4  ;;  %s17265_s24 = smul.u32 596, %s21013_s12  ;;  %17261 = vmatprep.subr.msk.bf16.mxu0 %vm1460_vm0, %v13679_v5  ;;  %vm5366_vm3 = vsmask.f32 6400  ;;  %v17896_v12 = vsel %vm1460_vm0, %v13679_v5, 0  ;;  %vm6913_vm4 = vcmask 1045504   ;;  %vm2763_vm5 = vcmask 1046528  }
  0x12   : > { %vm9516_vm6 = vsmask.f32 5376  ;;  %vm11063_vm7 = vcmask 1044480   ;;  %vm12944_vm8 = vcmask 519168   ;;  %s17266_s19 = smul.u32 544, %s21013_s12 }
  0x13   : > { %s17886_s27 = scalar_lea.vmem %s20802_s0, %s17265_s24 }
  0x14   : > { %v223_v7 = vld [vmem:[%s17886_s27] sm:$0xf]  ;;  %v224_v8 = vld [vmem:[%s17886_s27 + $0x4] sm:$0xf]  ;;  %v17292_v10 = vld [vmem:[%s17886_s27 + $0x8] sm:$0xff]   ;;  %s20237_s21 = scalar_lea.vmem %s20805_s3, %s17266_s19 }
  0x15   : > { %v17891_v9 = vcombine.low %v223_v7, %v224_v8  ;;  %v3821_v11 = vld [vmem:[%s17886_s27 + $0x10] sm:$0xe]  ;;  %v3822_v13 = vld [vmem:[%s17886_s27 + $0x14] sm:$0xf]  ;;  %v715_v16 = vshll.u32 %v17292_v10, 16  ;;  %v719_v17 = vshrl.u32 %v17292_v10, 16 }
  0x16   : > { %v17294_v18 = vld [vmem:[%s17886_s27 + $0x18] sm:$0xff]   ;;  %v17295_v19 = vld [vmem:[%s17886_s27 + $0x10] sm:$0xff]   ;;  %v17903_v20 = vcombine.low %v3821_v11, %v3822_v13  ;;  %v17296_v28 = vld [vmem:[%s17886_s27 + $0x20] sm:$0xff]  }
  0x17   : > { %v708_v14 = vshrl.u32 %v17891_v9, 16  ;;  %v710_v15 = vshll.u32 %v17891_v9, 16  ;;  %v717_v22 = vrot.slane %v715_v16, 1  ;;  %v5376_v23 = vshrl.u32 %v17294_v18, 16  ;;  %v17297_v33 = vld [vmem:[%s17886_s27 + $0x18] sm:$0xff]   ;;  %v17298_v34 = vld [vmem:[%s17886_s27 + $0x28] sm:$0xff]  }
  0x18   : > { %20861 = vst [vmem:[#allocation3_spill] sm:$0xff] %v17903_v20  ;;  %v5379_v24 = vshll.u32 %v17294_v18, 16  ;;  %v5368_v25 = vshrl.u32 %v17903_v20, 16  ;;  %v5371_v26 = vshll.u32 %v17903_v20, 16  ;;  %v723_v27 = vshll.u32 %v17295_v19, 16  ;;  %v17299_v47 = vld [vmem:[%s17886_s27 + $0x20] sm:$0xff]  }
  0x19   : > { %v712_v21 = vrot.slane %v710_v15, 1  ;;  %v721_v30 = vor.u32 %v719_v17, %v717_v22  ;;  %v5378_v31 = vrot.slane %v5376_v23, 1  ;;  %v5385_v38 = vshrl.u32 %v17296_v28, 16  ;;  %v17300_v48 = vld [vmem:[%s17886_s27 + $0x30] sm:$0xff]   ;;  %v17301_v53 = vld [vmem:[%s17886_s27 + $0x28] sm:$0xff]   ;;  %v17302_v58 = vld [vmem:[%s17886_s27 + $0x38] sm:$0xff]  }
  0x1a   : > { %v5381_v32 = vrot.slane %v5379_v24, 2  ;;  %v5370_v35 = vrot.slane %v5368_v25, 1  ;;  %v5373_v36 = vrot.slane %v5371_v26, 2  ;;  %v725_v37 = vrot.slane %v723_v27, 1  ;;  %v17303_v63 = vld [vmem:[%s17886_s27 + $0x30] sm:$0xff]   ;;  %v17304_v15 = vld [vmem:[%s17886_s27 + $0x40] sm:$0xff]  }
  0x1b   : > { %v713_v29 = vor.u32 %v712_v21, %v708_v14  ;;  %v5388_v41 = vshll.u32 %v17296_v28, 16  ;;  %v727_v42 = vshrl.u32 %v17295_v19, 16  ;;  %v5387_v45 = vrot.slane %v5385_v38, 1  ;;  %v17305_v25 = vld [vmem:[%s17886_s27 + $0x38] sm:$0xff]   ;;  %v17307_v38 = vld [vmem:[%s17886_s27 + $0x40] sm:$0xff]  }
  0x1c   : > { %v5382_v40 = vor.u32 %v5381_v32, %v5378_v31  ;;  %v5374_v43 = vor.u32 %v5373_v36, %v5370_v35  ;;  %v726_v44 = vsel %vm706_vm1, %v721_v30, %v725_v37  ;;  %v731_v46 = vshll.u32 %v17297_v33, 16 }
  0x1d   : > { %v718_v39 = vsel %vm706_vm1, %v713_v29, %v717_v22  ;;  %v5390_v49 = vrot.slane %v5388_v41, 2  ;;  %v729_v50 = vor.u32 %v727_v42, %v725_v37  ;;  %v5394_v51 = vshrl.u32 %v17298_v34, 16 }
  0x1e   : > { %14925 = vmatprep.mubr.msk.bf16.mxu1 %vm1255_vm2, %v718_v39  ;;  %v5397_v52 = vshll.u32 %v17298_v34, 16  ;;  %v5383_v54 = vsel %vm5366_vm3, %v5374_v43, %v5382_v40  ;;  %v733_v55 = vrot.slane %v731_v46, 1  ;;  %v735_v56 = vshrl.u32 %v17297_v33, 16  ;;  %v17306_v33 = vld [vmem:[%s17886_s27 + $0x48] sm:$0xff]   ;;  %v17308_v46 = vld [vmem:[%s17886_s27 + $0x50] sm:$0xff]  }
  0x1f   : > { %14926 = vmatmul.mubr.msk.bf16.vlgmr.msra.gmra.mrb[0].mxu1 %vm1255_vm2, %v726_v44  ;;  %v739_v57 = vshll.u32 %v17299_v47, 16  ;;  %15477 = vmatprep.mubr.msk.bf16.mxu0 %vm1255_vm2, %v5383_v54  ;;  %v5391_v59 = vor.u32 %v5390_v49, %v5387_v45  ;;  %v5396_v60 = vrot.slane %v5394_v51, 1  ;;  %v5403_v62 = vshrl.u32 %v17300_v48, 16 }
  0x20   : > { %15062 = vmatpush3.bf16.msra.mxu1 %v2178_v6  ;;  %v5399_v61 = vrot.slane %v5397_v52, 2  ;;  %v734_v0 = vsel %vm706_vm1, %v729_v50, %v733_v55  ;;  %v737_v1 = vor.u32 %v735_v56, %v733_v55  ;;  %v5406_v4 = vshll.u32 %v17300_v48, 16  ;;  %v17310_v55 = vld [vmem:[%s17886_s27 + $0x58] sm:$0xff]  }
  0x21   : > { %v741_v2 = vrot.slane %v739_v57, 1  ;;  %v5392_v5 = vsel %vm5366_vm3, %v5382_v40, %v5391_v59  ;;  %14929 = vmatprep.mubr.msk.bf16.mxu1 %vm1255_vm2, %v734_v0  ;;  %v5405_v7 = vrot.slane %v5403_v62, 1  ;;  %v743_v8 = vshrl.u32 %v17299_v47, 16  ;;  %v17309_v47 = vld [vmem:[%s17886_s27 + $0x48] sm:$0xff]  }
  0x22   : > { %v5400_v6 = vor.u32 %v5399_v61, %v5396_v60  ;;  %15478 = vmatmul.mubr.msk.bf16.vlgmr.msra.gmra.mrb[0].mxu0 %vm1255_vm2, %v5392_v5  ;;  %v5408_v11 = vrot.slane %v5406_v4, 2  ;;  %v747_v13 = vshll.u32 %v17301_v53, 16  ;;  %v5412_v14 = vshrl.u32 %v17302_v58, 16 }
  0x23   : > { %v742_v10 = vsel %vm706_vm1, %v737_v1, %v741_v2  ;;  %15614 = vmatpush3.bf16.msra.mxu0 %v17896_v12  ;;  %v745_v17 = vor.u32 %v743_v8, %v741_v2  ;;  %v5415_v18 = vshll.u32 %v17302_v58, 16  ;;  %v751_v19 = vshrl.u32 %v17301_v53, 16  ;;  %v17312_v2 = vld [vmem:[%s17886_s27 + $0x60] sm:$0xff]  }
  0x24   : > { %v5401_v16 = vsel %vm5366_vm3, %v5391_v59, %v5400_v6  ;;  %v5409_v21 = vor.u32 %v5408_v11, %v5405_v7  ;;  %v749_v22 = vrot.slane %v747_v13, 1  ;;  %v5414_v23 = vrot.slane %v5412_v14, 1  ;;  %v17313_v13 = vld [vmem:[%s17886_s27 + $0x58] sm:$0xff]  }
  0x25   : > { %15481 = vmatprep.mubr.msk.bf16.mxu0 %vm1255_vm2, %v5401_v16  ;;  %v755_v24 = vshll.u32 %v17303_v63, 16  ;;  %v5417_v26 = vrot.slane %v5415_v18, 2  ;;  %v5421_v27 = vshrl.u32 %v17304_v15, 16  ;;  %v5424_v28 = vshll.u32 %v17304_v15, 16  ;;  %v17314_v18 = vld [vmem:[%s17886_s27 + $0x68] sm:$0xff]  }
  0x26   : > { %v759_v12 = vshrl.u32 %v17303_v63, 16  ;;  %v5410_v29 = vsel %vm5366_vm3, %v5400_v6, %v5409_v21  ;;  %v750_v30 = vsel %vm706_vm1, %v745_v17, %v749_v22  ;;  %v753_v31 = vor.u32 %v751_v19, %v749_v22  ;;  %v17311_v63 = vld [vmem:[%s17886_s27 + $0x50] sm:$0xff]  }
  0x27   : > { %14930 = vmatmul.mubr.msk.bf16.gmra.mrb[4].mxu1 %vm1255_vm2, %v742_v10  ;;  %v757_v32 = vrot.slane %v755_v24, 1  ;;  %v5418_v34 = vor.u32 %v5417_v26, %v5414_v23  ;;  %v5423_v35 = vrot.slane %v5421_v27, 1  ;;  %v5426_v36 = vrot.slane %v5424_v28, 2  ;;  %v17315_v28 = vld [vmem:[%s17886_s27 + $0x60] sm:$0xff]  }
  0x28   : > { %14933 = vmatprep.mubr.msk.bf16.mxu1 %vm1255_vm2, %v750_v30  ;;  %v763_v37 = vshll.u32 %v17305_v25, 16  ;;  %v5430_v40 = vshrl.u32 %v17306_v33, 16  ;;  %v5433_v41 = vshll.u32 %v17306_v33, 16  ;;  %v767_v45 = vshrl.u32 %v17305_v25, 16 }
  0x29   : > { %v761_v39 = vor.u32 %v759_v12, %v757_v32  ;;  %v5419_v42 = vsel %vm5366_vm3, %v5409_v21, %v5418_v34  ;;  %v758_v43 = vsel %vm706_vm1, %v753_v31, %v757_v32  ;;  %v771_v50 = vshll.u32 %v17307_v38, 16  ;;  %v17316_v12 = vld [vmem:[%s17886_s27 + $0x70] sm:$0xff]   ;;  %v17317_v31 = vld [vmem:[%s17886_s27 + $0x68] sm:$0xff]  }
  0x2a   : > { %v765_v44 = vrot.slane %v763_v37, 1  ;;  %15482 = vmatmul.mubr.msk.bf16.gmra.mrb[4].mxu0 %vm1255_vm2, %v5410_v29  ;;  %v5432_v48 = vrot.slane %v5430_v40, 1  ;;  %v5435_v49 = vrot.slane %v5433_v41, 2  ;;  %v775_v51 = vshrl.u32 %v17307_v38, 16  ;;  %v17318_v40 = vld [vmem:[%s17886_s27 + $0x78] sm:$0xff]  }
  0x2b   : > { %15485 = vmatprep.mubr.msk.bf16.mxu0 %vm1255_vm2, %v5419_v42  ;;  %v5427_v52 = vor.u32 %v5426_v36, %v5423_v35  ;;  %v5439_v54 = vshrl.u32 %v17308_v46, 16  ;;  %v773_v57 = vrot.slane %v771_v50, 1  ;;  %v5442_v58 = vshll.u32 %v17308_v46, 16  ;;  %v17320_v50 = vld [vmem:[%s17886_s27 + $0x80] sm:$0xff]  }
  0x2c   : > { %v766_v53 = vsel %vm706_vm1, %v761_v39, %v765_v44  ;;  %v5436_v56 = vor.u32 %v5435_v49, %v5432_v48  ;;  %v779_v59 = vshll.u32 %v17309_v47, 16  ;;  %v5448_v61 = vshrl.u32 %v17310_v55, 16  ;;  %v17319_v49 = vld [vmem:[%s17886_s27 + $0x70] sm:$0xff]  }
  0x2d   : > { %v5441_v60 = vrot.slane %v5439_v54, 1  ;;  %v5451_v62 = vshll.u32 %v17310_v55, 16  ;;  %v769_v0 = vor.u32 %v767_v45, %v765_v44  ;;  %v5444_v1 = vrot.slane %v5442_v58, 2 }
  0x2e   : > { %v5428_v4 = vsel %vm5366_vm3, %v5418_v34, %v5427_v52  ;;  %v777_v5 = vor.u32 %v775_v51, %v773_v57  ;;  %v781_v6 = vrot.slane %v779_v59, 1  ;;  %v5437_v7 = vsel %vm5366_vm3, %v5427_v52, %v5436_v56 }
  0x2f   : > { %14934 = vmatmul.mubr.msk.bf16.gmra.mrb[8].mxu1 %vm1255_vm2, %v758_v43  ;;  %v5450_v8 = vrot.slane %v5448_v61, 1  ;;  %v5453_v10 = vrot.slane %v5451_v62, 2  ;;  %v787_v11 = vshll.u32 %v17311_v63, 16  ;;  %v774_v14 = vsel %vm706_vm1, %v769_v0, %v773_v57  ;;  %v17321_v62 = vld [vmem:[%s17886_s27 + $0x78] sm:$0xff]  }
  0x30   : > { %14937 = vmatprep.mubr.msk.bf16.mxu1 %vm1255_vm2, %v766_v53  ;;  %v5445_v15 = vor.u32 %v5444_v1, %v5441_v60  ;;  %v783_v16 = vshrl.u32 %v17309_v47, 16  ;;  %v5457_v17 = vshrl.u32 %v17312_v2, 16  ;;  %v782_v19 = vsel %vm706_vm1, %v777_v5, %v781_v6 }
  0x31   : > { %v5460_v21 = vshll.u32 %v17312_v2, 16  ;;  %v791_v22 = vshrl.u32 %v17311_v63, 16  ;;  %v795_v23 = vshll.u32 %v17313_v13, 16  ;;  %v5454_v24 = vor.u32 %v5453_v10, %v5450_v8 }
  0x32   : > { %15486 = vmatmul.mubr.msk.bf16.gmra.mrb[8].mxu0 %vm1255_vm2, %v5428_v4  ;;  %v5466_v25 = vshrl.u32 %v17314_v18, 16  ;;  %v5469_v26 = vshll.u32 %v17314_v18, 16  ;;  %v789_v27 = vrot.slane %v787_v11, 1  ;;  %v785_v29 = vor.u32 %v783_v16, %v781_v6  ;;  %v17322_v4 = vld [vmem:[%s17886_s27 + $0x88] sm:$0xff]  }
  0x33   : > { %15489 = vmatprep.mubr.msk.bf16.mxu0 %vm1255_vm2, %v5437_v7  ;;  %v5459_v30 = vrot.slane %v5457_v17, 1  ;;  %v5446_v32 = vsel %vm5366_vm3, %v5436_v56, %v5445_v15  ;;  %v5462_v33 = vrot.slane %v5460_v21, 2  ;;  %v797_v35 = vrot.slane %v795_v23, 1  ;;  %v17324_v23 = vld [vmem:[%s17886_s27 + $0x90] sm:$0xff]  }
  0x34   : > { %v793_v34 = vor.u32 %v791_v22, %v789_v27  ;;  %v5455_v36 = vsel %vm5366_vm3, %v5445_v15, %v5454_v24  ;;  %v5468_v37 = vrot.slane %v5466_v25, 1  ;;  %v5471_v38 = vrot.slane %v5469_v26, 2  ;;  %v17323_v22 = vld [vmem:[%s17886_s27 + $0x80] sm:$0xff]  }
  0x35   : > { %v799_v39 = vshrl.u32 %v17313_v13, 16  ;;  %v803_v41 = vshll.u32 %v17315_v28, 16  ;;  %v5475_v42 = vshrl.u32 %v17316_v12, 16  ;;  %v790_v43 = vsel %vm706_vm1, %v785_v29, %v789_v27 }
  0x36   : > { %v5478_v44 = vshll.u32 %v17316_v12, 16  ;;  %v811_v45 = vshll.u32 %v17317_v31, 16  ;;  %v5463_v46 = vor.u32 %v5462_v33, %v5459_v30  ;;  %v798_v47 = vsel %vm706_vm1, %v793_v34, %v797_v35 }
  0x37   : > { %14938 = vmatmul.mubr.msk.bf16.gmra.mrb[12].mxu1 %vm1255_vm2, %v774_v14  ;;  %v807_v48 = vshrl.u32 %v17315_v28, 16  ;;  %v5472_v51 = vor.u32 %v5471_v38, %v5468_v37  ;;  %v5484_v52 = vshrl.u32 %v17318_v40, 16  ;;  %v5487_v53 = vshll.u32 %v17318_v40, 16  ;;  %v17326_v28 = vld [vmem:[%s17886_s27 + $0x98] sm:$0xff]  }
  0x38   : > { %14941 = vmatprep.mubr.msk.bf16.mxu1 %vm1255_vm2, %v782_v19  ;;  %v805_v54 = vrot.slane %v803_v41, 1  ;;  %v5477_v55 = vrot.slane %v5475_v42, 1  ;;  %v801_v56 = vor.u32 %v799_v39, %v797_v35  ;;  %v5480_v57 = vrot.slane %v5478_v44, 2 }
  0x39   : > { %v813_v58 = vrot.slane %v811_v45, 1  ;;  %v5464_v59 = vsel %vm5366_vm3, %v5454_v24, %v5463_v46  ;;  %v819_v61 = vshll.u32 %v17319_v49, 16  ;;  %v5473_v63 = vsel %vm5366_vm3, %v5463_v46, %v5472_v51  ;;  %v17325_v24 = vld [vmem:[%s17886_s27 + $0x88] sm:$0xff]   ;;  %v17328_v45 = vld [vmem:[%s17886_s27 + $0xa0] sm:$0xff]  }
  0x3a   : > { %15490 = vmatmul.mubr.msk.bf16.gmra.mrb[12].mxu0 %vm1255_vm2, %v5446_v32  ;;  %v809_v60 = vor.u32 %v807_v48, %v805_v54  ;;  %v5486_v0 = vrot.slane %v5484_v52, 1  ;;  %v5489_v1 = vrot.slane %v5487_v53, 2  ;;  %v5493_v2 = vshrl.u32 %v17320_v50, 16  ;;  %v17329_v53 = vld [vmem:[%s17886_s27 + $0x98] sm:$0xff]  }
  0x3b   : > { %15493 = vmatprep.mubr.msk.bf16.mxu0 %vm1255_vm2, %v5455_v36  ;;  %v815_v5 = vshrl.u32 %v17317_v31, 16  ;;  %v5496_v6 = vshll.u32 %v17320_v50, 16  ;;  %v806_v7 = vsel %vm706_vm1, %v801_v56, %v805_v54  ;;  %v5481_v8 = vor.u32 %v5480_v57, %v5477_v55  ;;  %v17330_v56 = vld [vmem:[%s17886_s27 + $0xa8] sm:$0xff]  }
  0x3c   : > { %v814_v10 = vsel %vm706_vm1, %v809_v60, %v813_v58  ;;  %v821_v11 = vrot.slane %v819_v61, 1  ;;  %v823_v13 = vshrl.u32 %v17319_v49, 16  ;;  %v827_v14 = vshll.u32 %v17321_v62, 16 }
  0x3d   : > { %v5490_v15 = vor.u32 %v5489_v1, %v5486_v0  ;;  %v5495_v16 = vrot.slane %v5493_v2, 1  ;;  %v5502_v17 = vshrl.u32 %v17322_v4, 16  ;;  %v5505_v18 = vshll.u32 %v17322_v4, 16 }
  0x3e   : > { %v817_v19 = vor.u32 %v815_v5, %v813_v58  ;;  %v5498_v21 = vrot.slane %v5496_v6, 2  ;;  %v5482_v25 = vsel %vm5366_vm3, %v5472_v51, %v5481_v8  ;;  %v825_v26 = vor.u32 %v823_v13, %v821_v11  ;;  %v17332_v13 = vld [vmem:[%s17886_s27 + $0xb0] sm:$0xff]  }
  0x3f   : > { %14942 = vmatmul.mubr.msk.bf16.gmra.mrb[16].mxu1 %vm1255_vm2, %v790_v43  ;;  %v829_v27 = vrot.slane %v827_v14, 1  ;;  %v5491_v12 = vsel %vm5366_vm3, %v5481_v8, %v5490_v15  ;;  %v5504_v29 = vrot.slane %v5502_v17, 1  ;;  %v5507_v30 = vrot.slane %v5505_v18, 2  ;;  %v17327_v43 = vld [vmem:[%s17886_s27 + $0x90] sm:$0xff]   ;;  %v17333_v17 = vld [vmem:[%s17886_s27 + $0xa8] sm:$0xff]  }
  0x40   : > { %14945 = vmatprep.mubr.msk.bf16.mxu1 %vm1255_vm2, %v798_v47  ;;  %v822_v31 = vsel %vm706_vm1, %v817_v19, %v821_v11  ;;  %v5499_v32 = vor.u32 %v5498_v21, %v5495_v16  ;;  %v835_v33 = vshll.u32 %v17323_v22, 16  ;;  %v831_v34 = vshrl.u32 %v17321_v62, 16 }
  0x41   : > { %v5511_v35 = vshrl.u32 %v17324_v23, 16  ;;  %v5514_v36 = vshll.u32 %v17324_v23, 16  ;;  %v839_v37 = vshrl.u32 %v17323_v22, 16  ;;  %v830_v38 = vsel %vm706_vm1, %v825_v26, %v829_v27  ;;  %v17334_v22 = vld [vmem:[%s17886_s27 + $0xb8] sm:$0xff]  }
  0x42   : > { %15494 = vmatmul.mubr.msk.bf16.gmra.mrb[16].mxu0 %vm1255_vm2, %v5464_v59  ;;  %v843_v39 = vshll.u32 %v17325_v24, 16  ;;  %v5520_v40 = vshrl.u32 %v17326_v28, 16  ;;  %v5508_v41 = vor.u32 %v5507_v30, %v5504_v29  ;;  %v5523_v42 = vshll.u32 %v17326_v28, 16 }
  0x43   : > { %15497 = vmatprep.mubr.msk.bf16.mxu0 %vm1255_vm2, %v5473_v63  ;;  %v837_v44 = vrot.slane %v835_v33, 1  ;;  %v5500_v46 = vsel %vm5366_vm3, %v5490_v15, %v5499_v32  ;;  %v833_v47 = vor.u32 %v831_v34, %v829_v27  ;;  %v5513_v48 = vrot.slane %v5511_v35, 1  ;;  %v17335_v35 = vld [vmem:[%s17886_s27 + $0xb0] sm:$0xff]  }
  0x44   : > { %v5516_v49 = vrot.slane %v5514_v36, 2  ;;  %v845_v51 = vrot.slane %v843_v39, 1  ;;  %v5522_v52 = vrot.slane %v5520_v40, 1  ;;  %v5509_v54 = vsel %vm5366_vm3, %v5499_v32, %v5508_v41 }
  0x45   : > { %v841_v50 = vor.u32 %v839_v37, %v837_v44  ;;  %v5525_v55 = vrot.slane %v5523_v42, 2  ;;  %v847_v57 = vshrl.u32 %v17325_v24, 16  ;;  %v851_v58 = vshll.u32 %v17327_v43, 16 }
  0x46   : > { %v5529_v59 = vshrl.u32 %v17328_v45, 16  ;;  %v838_v60 = vsel %vm706_vm1, %v833_v47, %v837_v44  ;;  %v5532_v61 = vshll.u32 %v17328_v45, 16  ;;  %v5517_v62 = vor.u32 %v5516_v49, %v5513_v48  ;;  %v17338_v47 = vld [vmem:[%s17886_s27 + $0xc8] sm:$0xff]  }
  0x47   : > { %14946 = vmatmul.mubr.msk.bf16.gmra.mrb[20].mxu1 %vm1255_vm2, %v806_v7  ;;  %v846_v63 = vsel %vm706_vm1, %v841_v50, %v845_v51  ;;  %v855_v0 = vshrl.u32 %v17327_v43, 16  ;;  %v859_v1 = vshll.u32 %v17329_v53, 16  ;;  %v5526_v2 = vor.u32 %v5525_v55, %v5522_v52  ;;  %v17337_v43 = vld [vmem:[%s17886_s27 + $0xb8] sm:$0xff]  }
  0x48   : > { %14949 = vmatprep.mubr.msk.bf16.mxu1 %vm1255_vm2, %v814_v10  ;;  %v5538_v4 = vshrl.u32 %v17330_v56, 16  ;;  %v5541_v5 = vshll.u32 %v17330_v56, 16  ;;  %v849_v6 = vor.u32 %v847_v57, %v845_v51  ;;  %v853_v7 = vrot.slane %v851_v58, 1  ;;  %v17331_v10 = vld [vmem:[%s17886_s27 + $0xa0] sm:$0xff]  }
  0x49   : > { %v5531_v8 = vrot.slane %v5529_v59, 1  ;;  %v5534_v11 = vrot.slane %v5532_v61, 2  ;;  %v5518_v14 = vsel %vm5366_vm3, %v5508_v41, %v5517_v62  ;;  %v861_v16 = vrot.slane %v859_v1, 1  ;;  %v17339_v61 = vld [vmem:[%s17886_s27 + $0xc0] sm:$0xff]  }
  0x4a   : > { %15498 = vmatmul.mubr.msk.bf16.gmra.mrb[20].mxu0 %vm1255_vm2, %v5482_v25  ;;  %v857_v15 = vor.u32 %v855_v0, %v853_v7  ;;  %v5527_v18 = vsel %vm5366_vm3, %v5517_v62, %v5526_v2  ;;  %v5540_v19 = vrot.slane %v5538_v4, 1  ;;  %v5543_v21 = vrot.slane %v5541_v5, 2  ;;  %v17340_v62 = vld [vmem:[%s17886_s27 + $0xd0] sm:$0xff]  }
  0x4b   : > { %15501 = vmatprep.mubr.msk.bf16.mxu0 %vm1255_vm2, %v5491_v12  ;;  %v854_v23 = vsel %vm706_vm1, %v849_v6, %v853_v7  ;;  %v867_v24 = vshll.u32 %v17331_v10, 16  ;;  %v5535_v25 = vor.u32 %v5534_v11, %v5531_v8  ;;  %v863_v26 = vshrl.u32 %v17329_v53, 16  ;;  %v17341_v6 = vld [vmem:[%s17886_s27 + $0xc8] sm:$0xff]   ;;  %v17342_v11 = vld [vmem:[%s17886_s27 + $0xd8] sm:$0xff]  }
  0x4c   : > { %v5547_v27 = vshrl.u32 %v17332_v13, 16  ;;  %v5550_v28 = vshll.u32 %v17332_v13, 16  ;;  %v862_v12 = vsel %vm706_vm1, %v857_v15, %v861_v16  ;;  %v871_v29 = vshrl.u32 %v17331_v10, 16 }
  0x4d   : > { %v875_v30 = vshll.u32 %v17333_v17, 16  ;;  %v5556_v32 = vshrl.u32 %v17334_v22, 16  ;;  %v5559_v33 = vshll.u32 %v17334_v22, 16  ;;  %v869_v34 = vrot.slane %v867_v24, 1 }
  0x4e   : > { %v5536_v36 = vsel %vm5366_vm3, %v5526_v2, %v5535_v25  ;;  %v865_v37 = vor.u32 %v863_v26, %v861_v16  ;;  %v5549_v39 = vrot.slane %v5547_v27, 1  ;;  %v5552_v40 = vrot.slane %v5550_v28, 2  ;;  %v17343_v28 = vld [vmem:[%s17886_s27 + $0xd0] sm:$0xff]  }
  0x4f   : > { %14950 = vmatmul.mubr.msk.bf16.gmra.mrb[24].mxu1 %vm1255_vm2, %v822_v31  ;;  %v5544_v31 = vor.u32 %v5543_v21, %v5540_v19  ;;  %v873_v41 = vor.u32 %v871_v29, %v869_v34  ;;  %v877_v42 = vrot.slane %v875_v30, 1  ;;  %v5558_v45 = vrot.slane %v5556_v32, 1 }
  0x50   : > { %14953 = vmatprep.mubr.msk.bf16.mxu1 %vm1255_vm2, %v830_v38  ;;  %v17336_v38 = vld [vmem:[%s17886_s27 + $0xc0] sm:$0xff]   ;;  %v883_v48 = vshll.u32 %v17335_v35, 16  ;;  %v870_v49 = vsel %vm706_vm1, %v865_v37, %v869_v34  ;;  %v879_v50 = vshrl.u32 %v17333_v17, 16  ;;  %v5553_v53 = vor.u32 %v5552_v40, %v5549_v39 }
  0x51   : > { %v5545_v44 = vsel %vm5366_vm3, %v5535_v25, %v5544_v31  ;;  %v5565_v51 = vshrl.u32 %v17336_v38, 16  ;;  %v5568_v52 = vshll.u32 %v17336_v38, 16  ;;  %v887_v55 = vshrl.u32 %v17335_v35, 16  ;;  %v17346_v35 = vld [vmem:[%s17886_s27 + $0xe8] sm:$0xff]  }
  0x52   : > { %15502 = vmatmul.mubr.msk.bf16.gmra.mrb[24].mxu0 %vm1255_vm2, %v5500_v46  ;;  %v5561_v46 = vrot.slane %v5559_v33, 2  ;;  %v891_v56 = vshll.u32 %v17337_v43, 16  ;;  %v5574_v58 = vshrl.u32 %v17338_v47, 16  ;;  %v5577_v59 = vshll.u32 %v17338_v47, 16 }
  0x53   : > { %15505 = vmatprep.mubr.msk.bf16.mxu0 %vm1255_vm2, %v5509_v54  ;;  %v878_v54 = vsel %vm706_vm1, %v873_v41, %v877_v42  ;;  %v5567_v0 = vrot.slane %v5565_v51, 1  ;;  %v5570_v1 = vrot.slane %v5568_v52, 2  ;;  %v5554_v2 = vsel %vm5366_vm3, %v5544_v31, %v5553_v53  ;;  %v17345_v31 = vld [vmem:[%s17886_s27 + $0xd8] sm:$0xff]   ;;  %v17347_v52 = vld [vmem:[%s17886_s27 + $0xe0] sm:$0xff]  }
  0x54   : > { %v5562_v57 = vor.u32 %v5561_v46, %v5558_v45  ;;  %v893_v5 = vrot.slane %v891_v56, 1  ;;  %v5576_v8 = vrot.slane %v5574_v58, 1  ;;  %v5579_v10 = vrot.slane %v5577_v59, 2 }
  0x55   : > { %v899_v13 = vshll.u32 %v17339_v61, 16  ;;  %v895_v16 = vshrl.u32 %v17337_v43, 16  ;;  %v5586_v17 = vshll.u32 %v17340_v62, 16  ;;  %v903_v21 = vshrl.u32 %v17339_v61, 16 }
  0x56   : > { %v5563_v7 = vsel %vm5366_vm3, %v5553_v53, %v5562_v57  ;;  %v907_v22 = vshll.u32 %v17341_v6, 16  ;;  %v5592_v24 = vshrl.u32 %v17342_v11, 16  ;;  %v5595_v25 = vshll.u32 %v17342_v11, 16  ;;  %v17348_v53 = vld [vmem:[%s17886_s27 + $0xf0] sm:$0xff]  }
  0x57   : > { %14954 = vmatmul.mubr.msk.bf16.gmra.mrb[28].mxu1 %vm1255_vm2, %v838_v60  ;;  %v885_v60 = vrot.slane %v883_v48, 1  ;;  %v901_v26 = vrot.slane %v899_v13, 1  ;;  %v897_v29 = vor.u32 %v895_v16, %v893_v5  ;;  %v5588_v30 = vrot.slane %v5586_v17, 2 }
  0x58   : > { %14957 = vmatprep.mubr.msk.bf16.mxu1 %vm1255_vm2, %v846_v63  ;;  %v881_v63 = vor.u32 %v879_v50, %v877_v42  ;;  %v909_v34 = vrot.slane %v907_v22, 1  ;;  %v5594_v37 = vrot.slane %v5592_v24, 1  ;;  %v5597_v38 = vrot.slane %v5595_v25, 2  ;;  %v17351_v22 = vld [vmem:[%s17886_s27 + $0xf0] sm:$0xff]  }
  0x59   : > { %v889_v4 = vor.u32 %v887_v55, %v885_v60  ;;  %v905_v33 = vor.u32 %v903_v21, %v901_v26  ;;  %v911_v39 = vshrl.u32 %v17341_v6, 16  ;;  %v915_v40 = vshll.u32 %v17343_v28, 16 }
  0x5a   : > { %15506 = vmatmul.mubr.msk.bf16.gmra.mrb[28].mxu0 %vm1255_vm2, %v5518_v14  ;;  %v5583_v14 = vshrl.u32 %v17340_v62, 16  ;;  %v886_v15 = vsel %vm706_vm1, %v881_v63, %v885_v60  ;;  %v902_v42 = vsel %vm706_vm1, %v897_v29, %v901_v26  ;;  %v919_v47 = vshrl.u32 %v17343_v28, 16  ;;  %v17349_v62 = vld [vmem:[%s17886_s27 + $0xe8] sm:$0xff]  }
  0x5b   : > { %15509 = vmatprep.mubr.msk.bf16.mxu0 %vm1255_vm2, %v5527_v18  ;;  %v5571_v18 = vor.u32 %v5570_v1, %v5567_v0  ;;  %v894_v19 = vsel %vm706_vm1, %v889_v4, %v893_v5  ;;  %v910_v46 = vsel %vm706_vm1, %v905_v33, %v909_v34  ;;  %v5610_v48 = vshrl.u32 %v17346_v35, 16  ;;  %v17350_v1 = vld [vmem:[%s17886_s27 + $0xf8] sm:$0xff]   ;;  %v17354_v28 = vld [vmem:[%s17886_s27 + $0x108] sm:$0xff]  }
  0x5c   : > { %v5585_v27 = vrot.slane %v5583_v14, 1  ;;  %v5613_v50 = vshll.u32 %v17346_v35, 16  ;;  %v917_v51 = vrot.slane %v915_v40, 1  ;;  %v913_v55 = vor.u32 %v911_v39, %v909_v34 }
  0x5d   : > { %v5572_v32 = vsel %vm5366_vm3, %v5562_v57, %v5571_v18  ;;  %v5612_v61 = vrot.slane %v5610_v48, 1  ;;  %v931_v4 = vshll.u32 %v17347_v52, 16  ;;  %v5619_v5 = vshrl.u32 %v17348_v53, 16  ;;  %v17356_v48 = vld [vmem:[%s17886_s27 + $0x110] sm:$0xff]  }
  0x5e   : > { %v5589_v45 = vor.u32 %v5588_v30, %v5585_v27  ;;  %v921_v60 = vor.u32 %v919_v47, %v917_v51  ;;  %v5615_v0 = vrot.slane %v5613_v50, 2  ;;  %v5622_v6 = vshll.u32 %v17348_v53, 16  ;;  %v17353_v27 = vld [vmem:[%s17886_s27 + $0xf8] sm:$0xff]   ;;  %v17357_v53 = vld [vmem:[%s17886_s27 + $0x108] sm:$0xff]  }
  0x5f   : > { %14958 = vmatmul.mubr.msk.bf16.gmra.mrb[32].mxu1 %vm1255_vm2, %v854_v23  ;;  %v5580_v23 = vor.u32 %v5579_v10, %v5576_v8  ;;  %v935_v11 = vshrl.u32 %v17347_v52, 16  ;;  %v939_v13 = vshll.u32 %v17349_v62, 16  ;;  %v5631_v16 = vshll.u32 %v17350_v1, 16 }
  0x60   : > { %14961 = vmatprep.mubr.msk.bf16.mxu1 %vm1255_vm2, %v862_v12  ;;  %v17344_v12 = vld [vmem:[%s17886_s27 + $0xe0] sm:$0xff]   ;;  %v5616_v14 = vor.u32 %v5615_v0, %v5612_v61  ;;  %v5624_v21 = vrot.slane %v5622_v6, 2  ;;  %v947_v33 = vshll.u32 %v17351_v22, 16  ;;  %v943_v34 = vshrl.u32 %v17349_v62, 16 }
  0x61   : > { %v5601_v41 = vshrl.u32 %v17344_v12, 16  ;;  %v5604_v43 = vshll.u32 %v17344_v12, 16  ;;  %v5590_v59 = vsel %vm5366_vm3, %v5580_v23, %v5589_v45  ;;  %v941_v26 = vrot.slane %v939_v13, 1 }
  0x62   : > { %15510 = vmatmul.mubr.msk.bf16.gmra.mrb[32].mxu0 %vm1255_vm2, %v5536_v36  ;;  %v5581_v36 = vsel %vm5366_vm3, %v5571_v18, %v5580_v23  ;;  %v933_v18 = vrot.slane %v931_v4, 1  ;;  %v17352_v23 = vld [vmem:[%s17886_s27 + $0x100] sm:$0xff]   ;;  %v5633_v30 = vrot.slane %v5631_v16, 2  ;;  %v955_v39 = vshll.u32 %v17353_v27, 16 }
  0x63   : > { %15513 = vmatprep.mubr.msk.bf16.mxu0 %vm1255_vm2, %v5545_v44  ;;  %v923_v44 = vshll.u32 %v17345_v31, 16  ;;  %v5603_v56 = vrot.slane %v5601_v41, 1  ;;  %v5606_v57 = vrot.slane %v5604_v43, 2  ;;  %v5637_v35 = vshrl.u32 %v17352_v23, 16 }
  0x64   : > { %v937_v25 = vor.u32 %v935_v11, %v933_v18  ;;  %v5646_v40 = vshrl.u32 %v17354_v28, 16  ;;  %v949_v43 = vrot.slane %v947_v33, 1  ;;  %v5655_v61 = vshrl.u32 %v17356_v48, 16  ;;  %v6907_v33 = vld [vmem:[%s17886_s27 + $0x10] sm:$0xc] }
  0x65   : > { %v925_v58 = vrot.slane %v923_v44, 1  ;;  %v5607_v8 = vor.u32 %v5606_v57, %v5603_v56  ;;  %v17355_v44 = vld [vmem:[%s17886_s27 + $0x100] sm:$0xff]   ;;  %v5639_v47 = vrot.slane %v5637_v35, 1  ;;  %v17358_v57 = vld [vmem:[%s17886_s27 + $0x118] sm:$0xff]   ;;  %v5658_v62 = vshll.u32 %v17356_v48, 16 }
  0x66   : > { %v5648_v52 = vrot.slane %v5646_v40, 1  ;;  %v5667_v6 = vshll.u32 %v17358_v57, 16  ;;  %v5657_v11 = vrot.slane %v5655_v61, 1 }
  0x67   : > { %14962 = vmatmul.mubr.msk.bf16.gmra.mrb[36].mxu1 %vm1255_vm2, %v870_v49  ;;  %v5598_v49 = vor.u32 %v5597_v38, %v5594_v37  ;;  %v926_v10 = vsel %vm706_vm1, %v921_v60, %v925_v58  ;;  %v5617_v12 = vsel %vm5366_vm3, %v5607_v8, %v5616_v14  ;;  %v951_v37 = vshrl.u32 %v17351_v22, 16 }
  0x68   : > { %14965 = vmatprep.mubr.msk.bf16.mxu1 %vm1255_vm2, %v878_v54  ;;  %v18059_v54 = vld [vmem:[%s20803_s1 + $0x18] sm:$0xf]  ;;  %v942_v38 = vsel %vm706_vm1, %v937_v25, %v941_v26  ;;  %v5660_v13 = vrot.slane %v5658_v62, 2  ;;  %v5669_v22 = vrot.slane %v5667_v6, 2 }
  0x69   : > { %17262 = vmatprep.subr.msk.bf16.mxu0 %vm1460_vm0, %v18059_v54  ;;  %v5599_v63 = vsel %vm5366_vm3, %v5589_v45, %v5598_v49  ;;  %v5608_v24 = vsel %vm5366_vm3, %v5598_v49, %v5607_v8  ;;  %v953_v50 = vor.u32 %v951_v37, %v949_v43  ;;  %v17359_v8 = vld [vmem:[%s17886_s27 + $0x110] sm:$0xff]   ;;  %v17366_v62 = vld [vmem:[%s17886_s27 + $0x138] sm:$0xff]  }
  0x6a   : > { %15514 = vmatmul.mubr.msk.bf16.gmra.mrb[36].mxu0 %vm1255_vm2, %v5554_v2  ;;  %v927_v2 = vshrl.u32 %v17345_v31, 16 }
  0x6b   : > { %15517 = vmatprep.mubr.msk.bf16.mxu0 %vm1255_vm2, %v5563_v7  ;;  %v918_v7 = vsel %vm706_vm1, %v913_v55, %v917_v51  ;;  %v957_v51 = vrot.slane %v955_v39, 1 }
  0x6c   : > { %v929_v17 = vor.u32 %v927_v2, %v925_v58  ;;  %v959_v58 = vshrl.u32 %v17353_v27, 16  ;;  %v971_v2 = vshll.u32 %v17357_v53, 16 }
  0x6d   : > { %v958_v0 = vsel %vm706_vm1, %v953_v50, %v957_v51 }
  0x6e   : > { %v934_v31 = vsel %vm706_vm1, %v929_v17, %v933_v18  ;;  %v973_v17 = vrot.slane %v971_v2, 1  ;;  %v17361_v18 = vld [vmem:[%s17886_s27 + $0x118] sm:$0xff]  }
  0x6f   : > { %14966 = vmatmul.mubr.msk.bf16.gmra.mrb[40].mxu1 %vm1255_vm2, %v886_v15  ;;  %v5628_v15 = vshrl.u32 %v17350_v1, 16  ;;  %v967_v1 = vshrl.u32 %v17355_v44, 16 }
  0x70   : > { %14969 = vmatprep.mubr.msk.bf16.mxu1 %vm1255_vm2, %v894_v19  ;;  %v5621_v19 = vrot.slane %v5619_v5, 1  ;;  %v5664_v5 = vshrl.u32 %v17358_v57, 16  ;;  %v17365_v57 = vld [vmem:[%s17886_s27 + $0x130] sm:$0xff]  }
  0x71   : > { %v5630_v29 = vrot.slane %v5628_v15, 1 }
  0x72   : > { %15518 = vmatmul.mubr.msk.bf16.gmra.mrb[40].mxu0 %vm1255_vm2, %v5572_v32  ;;  %v5625_v32 = vor.u32 %v5624_v21, %v5621_v19  ;;  %v5666_v21 = vrot.slane %v5664_v5, 1 }
  0x73   : > { %15521 = vmatprep.mubr.msk.bf16.mxu0 %vm1255_vm2, %v5581_v36  ;;  %v5640_v36 = vshll.u32 %v17352_v23, 16  ;;  %v5634_v41 = vor.u32 %v5633_v30, %v5630_v29  ;;  %v975_v23 = vshrl.u32 %v17357_v53, 16  ;;  %v983_v29 = vshrl.u32 %v17359_v8, 16  ;;  %v17504_v53 = vld [vmem:[%s17886_s27 + $0x18] sm:$0xff]  }
  0x74   : > { %v5626_v45 = vsel %vm5366_vm3, %v5616_v14, %v5625_v32  ;;  %v17360_v14 = vld [vmem:[%s17886_s27 + $0x120] sm:$0xff]   ;;  %v987_v30 = vshll.u32 %v17361_v18, 16 }
  0x75   : > { %v5642_v49 = vrot.slane %v5640_v36, 2  ;;  %v5635_v55 = vsel %vm5366_vm3, %v5625_v32, %v5634_v41  ;;  %v5673_v27 = vshrl.u32 %v17360_v14, 16  ;;  %v977_v36 = vor.u32 %v975_v23, %v973_v17 }
  0x76   : > { %v989_v40 = vrot.slane %v987_v30, 1  ;;  %v17508_v30 = vld [vmem:[%s17886_s27 + $0x38] sm:$0xff]  }
  0x77   : > { %14970 = vmatmul.mubr.msk.bf16.gmra.mrb[44].mxu1 %vm1255_vm2, %v902_v42  ;;  %v5649_v42 = vshll.u32 %v17354_v28, 16  ;;  %v5676_v28 = vshll.u32 %v17360_v14, 16  ;;  %v5675_v37 = vrot.slane %v5673_v27, 1  ;;  %v17367_v14 = vld [vmem:[%s17886_s27 + $0x140] sm:$0xff]   ;;  %v1023_v27 = vshrl.u32 %v17366_v62, 16 }
  0x78   : > { %14973 = vmatprep.mubr.msk.bf16.mxu1 %vm1255_vm2, %v910_v46  ;;  %v945_v46 = vor.u32 %v943_v34, %v941_v26  ;;  %v5661_v26 = vor.u32 %v5660_v13, %v5657_v11  ;;  %v17363_v34 = vld [vmem:[%s17886_s27 + $0x120] sm:$0xff]   ;;  %v1027_v23 = vshll.u32 %v17367_v14, 16 }
  0x79   : > { %v5651_v56 = vrot.slane %v5649_v42, 2  ;;  %v999_v50 = vshrl.u32 %v17363_v34, 16 }
  0x7a   : > { %15522 = vmatmul.mubr.msk.bf16.gmra.mrb[44].mxu0 %vm1255_vm2, %v5590_v59  ;;  %v963_v59 = vshll.u32 %v17355_v44, 16  ;;  %v950_v60 = vsel %vm706_vm1, %v945_v46, %v949_v43  ;;  %v17503_v43 = vld [vmem:[%s17886_s27 + $0x14] sm:$0xf] }
  0x7b   : > { %15525 = vmatprep.mubr.msk.bf16.mxu0 %vm1255_vm2, %v5599_v63  ;;  %v5643_v63 = vor.u32 %v5642_v49, %v5639_v47  ;;  %v5652_v4 = vor.u32 %v5651_v56, %v5648_v52  ;;  %v13680_v44 = vcombine.low %v6907_v33, %v17503_v43  ;;  %v991_v47 = vshrl.u32 %v17361_v18, 16  ;;  %v17369_v33 = vld [vmem:[%s17886_s27 + $0x150] sm:$0xff]  }
  0x7d   : > { %v5644_v15 = vsel %vm5366_vm3, %v5634_v41, %v5643_v63  ;;  %v5653_v19 = vsel %vm5366_vm3, %v5643_v63, %v5652_v4  ;;  %v5662_v35 = vsel %vm5366_vm3, %v5652_v4, %v5661_v26  ;;  %v17364_v41 = vld [vmem:[%s17886_s27 + $0x128] sm:$0xff]   ;;  %v6914_v52 = vrot.slane %v13680_v44, 2  ;;  %v17505_v4 = vld [vmem:[%s17886_s27 + $0x20] sm:$0xff]  }
  0x7e   : > { %v1007_v2 = vshrl.u32 %v17364_v41, 16  ;;  %v6917_v5 = vrot.slane %v17505_v4, 2  ;;  %v17509_v44 = vld [vmem:[%s17886_s27 + $0x40] sm:$0xff]  }
  0x7f   : > { %14974 = vmatmul.mubr.msk.bf16.gmra.mrb[48].mxu1 %vm1255_vm2, %v918_v7  ;;  %v965_v7 = vrot.slane %v963_v59, 1 }
  0x80   : > { %14977 = vmatprep.mubr.msk.bf16.mxu1 %vm1255_vm2, %v926_v10  ;;  %v961_v10 = vor.u32 %v959_v58, %v957_v51  ;;  %v1003_v51 = vshll.u32 %v17364_v41, 16  ;;  %v993_v58 = vor.u32 %v991_v47, %v989_v40  ;;  %v17371_v41 = vld [vmem:[%s17886_s27 + $0x160] sm:$0xff]   ;;  %v1047_v47 = vshrl.u32 %v17369_v33, 16 }
  0x81   : > { %v969_v16 = vor.u32 %v967_v1, %v965_v7  ;;  %v1063_v4 = vshrl.u32 %v17371_v41, 16 }
  0x82   : > { %15526 = vmatmul.mubr.msk.bf16.gmra.mrb[48].mxu0 %vm1255_vm2, %v5608_v24  ;;  %v979_v24 = vshll.u32 %v17359_v8, 16  ;;  %v966_v25 = vsel %vm706_vm1, %v961_v10, %v965_v7  ;;  %v1005_v61 = vrot.slane %v1003_v51, 1  ;;  %v1015_v7 = vshrl.u32 %v17365_v57, 16  ;;  %v17506_v10 = vld [vmem:[%s17886_s27 + $0x28] sm:$0xff]  }
  0x83   : > { %15529 = vmatprep.mubr.msk.bf16.mxu0 %vm1255_vm2, %v5617_v12  ;;  %v974_v12 = vsel %vm706_vm1, %v969_v16, %v973_v17  ;;  %v1019_v8 = vshll.u32 %v17366_v62, 16  ;;  %v6919_v11 = vrot.slane %v17506_v10, 2  ;;  %v17510_v51 = vld [vmem:[%s17886_s27 + $0x48] sm:$0xff]  }
  0x84   : > { %v981_v32 = vrot.slane %v979_v24, 1 }
  0x85   : > { %v1021_v18 = vrot.slane %v1019_v8, 1  ;;  %v17513_v8 = vld [vmem:[%s17886_s27 + $0x60] sm:$0xff]  }
  0x86   : > { %v985_v39 = vor.u32 %v983_v29, %v981_v32  ;;  %v982_v46 = vsel %vm706_vm1, %v977_v36, %v981_v32  ;;  %v1029_v32 = vrot.slane %v1027_v23, 1  ;;  %v6933_v10 = vrot.slane %v17513_v8, 2  ;;  %v17376_v23 = vld [vmem:[%s17886_s27 + $0x188] sm:$0xff]  }
  0x87   : > { %14978 = vmatmul.mubr.msk.bf16.gmra.mrb[52].mxu1 %vm1255_vm2, %v934_v31  ;;  %v5670_v31 = vor.u32 %v5669_v22, %v5666_v21  ;;  %v8795_v21 = vsel %vm1460_vm0, %v18059_v54, 0  ;;  %v6920_v22 = vsel %vm6913_vm4, %v6917_v5, %v6919_v11 }
  0x88   : > { %14981 = vmatprep.mubr.msk.bf16.mxu1 %vm1255_vm2, %v942_v38  ;;  %v5678_v38 = vrot.slane %v5676_v28, 2  ;;  %v990_v49 = vsel %vm706_vm1, %v985_v39, %v989_v40  ;;  %v18149_v28 = vld [vmem:[%s20803_s1 + $0x8] sm:$0xf]  ;;  %v1043_v40 = vshll.u32 %v17369_v33, 16 }
  0x89   : > { %v5671_v42 = vsel %vm5366_vm3, %v5661_v26, %v5670_v31  ;;  %17257 = vmatprep.subr.msk.bf16.mxu1 %vm1460_vm0, %v18149_v28 }
  0x8a   : > { %15530 = vmatmul.mubr.msk.bf16.gmra.mrb[52].mxu0 %vm1255_vm2, %v5626_v45  ;;  %v995_v45 = vshll.u32 %v17363_v34, 16  ;;  %v18118_v48 = vor.u32 %v5678_v38, %v5675_v37  ;;  %v1025_v34 = vor.u32 %v1023_v27, %v1021_v18  ;;  %v17370_v38 = vld [vmem:[%s17886_s27 + $0x158] sm:$0xff]  }
  0x8b   : > { %15533 = vmatprep.mubr.msk.bf16.mxu0 %vm1255_vm2, %v5635_v55  ;;  %v6915_v55 = vrot.slane %v17504_v53, 2  ;;  %v17511_v53 = vld [vmem:[%s17886_s27 + $0x50] sm:$0xff]  }
  0x8c   : > { %20862 = vst [vmem:[#allocation4_spill] sm:$0xff] %v18118_v48  ;;  %v997_v56 = vrot.slane %v995_v45, 1  ;;  %v5680_v59 = vsel %vm5366_vm3, %v5670_v31, %v18118_v48  ;;  %v6923_v31 = vrot.slane %v17508_v30, 2  ;;  %v6925_v45 = vrot.slane %v17509_v44, 2  ;;  %v17516_v44 = vld [vmem:[%s17886_s27 + $0x78] sm:$0xff]  }
  0x8d   : > { %v6916_v63 = vsel %vm6913_vm4, %v6914_v52, %v6915_v55  ;;  %v6918_v16 = vsel %vm6913_vm4, %v6915_v55, %v6917_v5  ;;  %v6927_v52 = vrot.slane %v17510_v51, 2  ;;  %v6929_v55 = vrot.slane %v17511_v53, 2  ;;  %v18723_v48 = vld [vmem:[%s17886_s27 + $0x58] sm:$0xff]  }
  0x8e   : > { %v998_v1 = vsel %vm706_vm1, %v993_v58, %v997_v56  ;;  %20867 = vst [vmem:[#allocation9_spill] sm:$0xff] %v18723_v48  ;;  %v8466_v20 = vrot.slane %v18723_v48, 2 }
  0x8f   : > { %14982 = vmatmul.mubr.msk.bf16.gmra.mrb[56].mxu1 %vm1255_vm2, %v950_v60  ;;  %v1001_v60 = vor.u32 %v999_v50, %v997_v56  ;;  %v17372_v50 = vld [vmem:[%s17886_s27 + $0x168] sm:$0xff]   ;;  %v1045_v56 = vrot.slane %v1043_v40, 1 }
  0x90   : > { %14985 = vmatprep.mubr.msk.bf16.mxu1 %vm1255_vm2, %v958_v0  ;;  %v1011_v0 = vshll.u32 %v17365_v57, 16  ;;  %v1059_v57 = vshll.u32 %v17371_v41, 16  ;;  %v1067_v62 = vshll.u32 %v17372_v50, 16 }
  0x91   : > { %v1006_v6 = vsel %vm706_vm1, %v1001_v60, %v1005_v61  ;;  %v1049_v60 = vor.u32 %v1047_v47, %v1045_v56 }
  0x92   : > { %15534 = vmatmul.mubr.msk.bf16.gmra.mrb[56].mxu0 %vm1255_vm2, %v5644_v15  ;;  %v1013_v13 = vrot.slane %v1011_v0, 1  ;;  %v1009_v15 = vor.u32 %v1007_v2, %v1005_v61  ;;  %v17373_v0 = vld [vmem:[%s17886_s27 + $0x170] sm:$0xff]   ;;  %v1055_v2 = vshrl.u32 %v17370_v38, 16 }
  0x93   : > { %15537 = vmatprep.mubr.msk.bf16.mxu0 %vm1255_vm2, %v5653_v19  ;;  %v17368_v19 = vld [vmem:[%s17886_s27 + $0x148] sm:$0xff]  }
  0x94   : > { %v1017_v17 = vor.u32 %v1015_v7, %v1013_v13  ;;  %v1014_v24 = vsel %vm706_vm1, %v1009_v15, %v1013_v13  ;;  %v1035_v29 = vshll.u32 %v17368_v19, 16  ;;  %v1039_v43 = vshrl.u32 %v17368_v19, 16 }
  0x95   : > { %v1061_v13 = vrot.slane %v1059_v57, 1  ;;  %v1075_v19 = vshll.u32 %v17373_v0, 16 }
  0x96   : > { %v1022_v54 = vsel %vm706_vm1, %v1017_v17, %v1021_v18  ;;  %v1037_v37 = vrot.slane %v1035_v29, 1  ;;  %v1071_v18 = vshrl.u32 %v17372_v50, 16  ;;  %v17515_v29 = vld [vmem:[%s17886_s27 + $0x70] sm:$0xff]  }
  0x97   : > { %14986 = vmatmul.mubr.msk.bf16.gmra.mrb[60].mxu1 %vm1255_vm2, %v966_v25  ;;  %v17507_v25 = vld [vmem:[%s17886_s27 + $0x30] sm:$0xff]   ;;  %v1065_v17 = vor.u32 %v1063_v4, %v1061_v13  ;;  %v6937_v30 = vrot.slane %v17515_v29, 2 }
  0x98   : > { %14989 = vmatprep.mubr.msk.bf16.mxu1 %vm1255_vm2, %v974_v12  ;;  %v6921_v26 = vrot.slane %v17507_v25, 2  ;;  %v1031_v12 = vshrl.u32 %v17367_v14, 16  ;;  %v1041_v58 = vor.u32 %v1039_v43, %v1037_v37  ;;  %v1069_v14 = vrot.slane %v1067_v62, 1  ;;  %v17519_v4 = vld [vmem:[%s17886_s27 + $0x90] sm:$0xff]  }
  0x99   : > { %v1079_v25 = vshrl.u32 %v17373_v0, 16 }
  0x9a   : > { %15538 = vmatmul.mubr.msk.bf16.gmra.mrb[60].mxu0 %vm1255_vm2, %v5662_v35  ;;  %v6922_v35 = vsel %vm6913_vm4, %v6919_v11, %v6921_v26  ;;  %v1033_v36 = vor.u32 %v1031_v12, %v1029_v32  ;;  %v6924_v39 = vsel %vm6913_vm4, %v6921_v26, %v6923_v31  ;;  %v17374_v11 = vld [vmem:[%s17886_s27 + $0x178] sm:$0xff]   ;;  %v1070_v27 = vsel %vm706_vm1, %v1065_v17, %v1069_v14 }
  0x9b   : > { %15541 = vmatprep.mubr.msk.bf16.mxu0 %vm1255_vm2, %v5671_v42  ;;  %v1030_v42 = vsel %vm706_vm1, %v1025_v34, %v1029_v32  ;;  %v1083_v26 = vshll.u32 %v17374_v11, 16  ;;  %v1073_v33 = vor.u32 %v1071_v18, %v1069_v14  ;;  %v1087_v41 = vshrl.u32 %v17374_v11, 16 }
  0x9f   : > { %14990 = vmatmul.mubr.msk.bf16.gmra.mrb[64].mxu1 %vm1255_vm2, %v982_v46  ;;  %v1038_v46 = vsel %vm706_vm1, %v1033_v36, %v1037_v37  ;;  %v1085_v36 = vrot.slane %v1083_v26, 1  ;;  %v1099_v37 = vshll.u32 %v17376_v23, 16  ;;  %v17382_v26 = vld [vmem:[%s17886_s27 + $0x1b8] sm:$0xff]  }
  0xa0   : > { %14993 = vmatprep.mubr.msk.bf16.mxu1 %vm1255_vm2, %v990_v49  ;;  %v1051_v49 = vshll.u32 %v17370_v38, 16 }
  0xa1   : > { %v1101_v51 = vrot.slane %v1099_v37, 1 }
  0xa2   : > { %15542 = vmatmul.mubr.msk.bf16.gmra.mrb[64].mxu0 %vm1255_vm2, %v5680_v59  ;;  %v6926_v59 = vsel %vm6913_vm4, %v6923_v31, %v6925_v45  ;;  %v1053_v61 = vrot.slane %v1051_v49, 1  ;;  %v1077_v31 = vrot.slane %v1075_v19, 1  ;;  %v17378_v49 = vld [vmem:[%s17886_s27 + $0x198] sm:$0xff]  }
  0xa3   : > { %15615 = vmatprep.mubr.msk.bf16.mxu0 %vm1255_vm2, %v6916_v63  ;;  %v6928_v63 = vsel %vm6913_vm4, %v6925_v45, %v6927_v52  ;;  %v6939_v45 = vrot.slane %v17516_v44, 2  ;;  %v1119_v18 = vshrl.u32 %v17378_v49, 16 }
  0xa4   : > { %v1054_v5 = vsel %vm706_vm1, %v1049_v60, %v1053_v61  ;;  %v1057_v15 = vor.u32 %v1055_v2, %v1053_v61  ;;  %v1078_v40 = vsel %vm706_vm1, %v1073_v33, %v1077_v31  ;;  %v17380_v60 = vld [vmem:[%s17886_s27 + $0x1a8] sm:$0xff]   ;;  %v17383_v33 = vld [vmem:[%s17886_s27 + $0x1c0] sm:$0xff]  }
  0xa5   : > { %v1131_v14 = vshll.u32 %v17380_v60, 16 }
  0xa7   : > { %14994 = vmatmul.mubr.msk.bf16.gmra.mrb[68].mxu1 %vm1255_vm2, %v998_v1  ;;  %v1046_v1 = vsel %vm706_vm1, %v1041_v58, %v1045_v56  ;;  %v1103_v56 = vshrl.u32 %v17376_v23, 16  ;;  %v17379_v58 = vld [vmem:[%s17886_s27 + $0x1a0] sm:$0xff]  }
  0xa8   : > { %14997 = vmatprep.mubr.msk.bf16.mxu1 %vm1255_vm2, %v1006_v6  ;;  %v17512_v6 = vld [vmem:[%s17886_s27 + $0x58] sm:$0xff]   ;;  %v1127_v19 = vshrl.u32 %v17379_v58, 16 }
  0xa9   : > { %v6931_v7 = vrot.slane %v17512_v6, 2  ;;  %v1105_v8 = vor.u32 %v1103_v56, %v1101_v51  ;;  %v1151_v56 = vshrl.u32 %v17382_v26, 16 }
  0xaa   : > { %15616 = vmatmul.mubr.msk.bf16.vlgmr.msra.gmra.mrb[0].mxu0 %vm1255_vm2, %v6918_v16  ;;  %v6930_v16 = vsel %vm6913_vm4, %v6927_v52, %v6929_v55  ;;  %v1089_v52 = vor.u32 %v1087_v41, %v1085_v36 }
  0xab   : > { %15752 = vmatpush3.bf16.msra.mxu0 %v8795_v21  ;;  %15619 = vmatprep.mubr.msk.bf16.mxu0 %vm1255_vm2, %v6920_v22  ;;  %v17375_v21 = vld [vmem:[%s17886_s27 + $0x180] sm:$0xff]   ;;  %v6932_v22 = vsel %vm6913_vm4, %v6929_v55, %v6931_v7  ;;  %v6934_v34 = vsel %vm6913_vm4, %v6931_v7, %v6933_v10  ;;  %v1123_v7 = vshll.u32 %v17379_v58, 16 }
  0xac   : > { %v1091_v32 = vshll.u32 %v17375_v21, 16 }
  0xae   : > { %v1093_v50 = vrot.slane %v1091_v32, 1 }
  0xaf   : > { %14998 = vmatmul.mubr.msk.bf16.gmra.mrb[72].mxu1 %vm1255_vm2, %v1014_v24  ;;  %v1062_v24 = vsel %vm706_vm1, %v1057_v15, %v1061_v13 }
  0xb0   : > { %15001 = vmatprep.mubr.msk.bf16.mxu1 %vm1255_vm2, %v1022_v54  ;;  %v17514_v54 = vld [vmem:[%s17886_s27 + $0x68] sm:$0xff]   ;;  %v1094_v61 = vsel %vm706_vm1, %v1089_v52, %v1093_v50 }
  0xb1   : > { %v6935_v12 = vrot.slane %v17514_v54, 2  ;;  %v1133_v54 = vrot.slane %v1131_v14, 1 }
  0xb2   : > { %15620 = vmatmul.mubr.msk.bf16.gmra.mrb[4].mxu0 %vm1255_vm2, %v6922_v35  ;;  %v1081_v35 = vor.u32 %v1079_v25, %v1077_v31  ;;  %v1135_v31 = vshrl.u32 %v17380_v60, 16 }
  0xb3   : > { %15623 = vmatprep.mubr.msk.bf16.mxu0 %vm1255_vm2, %v6924_v39  ;;  %v6936_v38 = vsel %vm6913_vm4, %v6933_v10, %v6935_v12  ;;  %v17377_v39 = vld [vmem:[%s17886_s27 + $0x190] sm:$0xff]   ;;  %v6938_v53 = vsel %vm6913_vm4, %v6935_v12, %v6937_v30 }
  0xb4   : > { %v1086_v43 = vsel %vm706_vm1, %v1081_v35, %v1085_v36  ;;  %v1107_v57 = vshll.u32 %v17377_v39, 16  ;;  %v1111_v62 = vshrl.u32 %v17377_v39, 16  ;;  %v17384_v35 = vld [vmem:[%s17886_s27 + $0x1c8] sm:$0xff]  }
  0xb6   : > { %v1109_v6 = vrot.slane %v1107_v57, 1  ;;  %v1159_v57 = vshrl.u32 %v17383_v33, 16 }
  0xb7   : > { %15002 = vmatmul.mubr.msk.bf16.gmra.mrb[76].mxu1 %vm1255_vm2, %v1030_v42  ;;  %v1095_v42 = vshrl.u32 %v17375_v21, 16 }
  0xb8   : > { %15005 = vmatprep.mubr.msk.bf16.mxu1 %vm1255_vm2, %v1038_v46  ;;  %v17517_v46 = vld [vmem:[%s17886_s27 + $0x80] sm:$0xff]   ;;  %v1113_v11 = vor.u32 %v1111_v62, %v1109_v6  ;;  %v1110_v17 = vsel %vm706_vm1, %v1105_v8, %v1109_v6  ;;  %v1167_v6 = vshrl.u32 %v17384_v35, 16 }
  0xb9   : > { %v6941_v47 = vrot.slane %v17517_v46, 2  ;;  %v1097_v55 = vor.u32 %v1095_v42, %v1093_v50  ;;  %v17523_v42 = vld [vmem:[%s17886_s27 + $0xb0] sm:$0xff]   ;;  %v1137_v46 = vor.u32 %v1135_v31, %v1133_v54 }
  0xba   : > { %15624 = vmatmul.mubr.msk.bf16.gmra.mrb[8].mxu0 %vm1255_vm2, %v6926_v59  ;;  %v6940_v59 = vsel %vm6913_vm4, %v6937_v30, %v6939_v45 }
  0xbb   : > { %15627 = vmatprep.mubr.msk.bf16.mxu0 %vm1255_vm2, %v6928_v63  ;;  %v1115_v63 = vshll.u32 %v17378_v49, 16  ;;  %v1102_v0 = vsel %vm706_vm1, %v1097_v55, %v1101_v51  ;;  %v6942_v10 = vsel %vm6913_vm4, %v6939_v45, %v6941_v47  ;;  %v1155_v45 = vshll.u32 %v17383_v33, 16  ;;  %v17528_v33 = vld [vmem:[%s17886_s27 + $0xd8] sm:$0xff]  }
  0xbc   : > { %v1163_v51 = vshll.u32 %v17384_v35, 16 }
  0xbd   : > { %v1117_v13 = vrot.slane %v1115_v63, 1  ;;  %v18257_v63 = vld [vmem:[%s17886_s27 + $0x1d8] sm:$0xff]  }
  0xbe   : > { %v1179_v14 = vshll.u32 %v18257_v63, 16 }
  0xbf   : > { %15006 = vmatmul.mubr.msk.bf16.gmra.mrb[80].mxu1 %vm1255_vm2, %v1046_v1  ;;  %v17518_v1 = vld [vmem:[%s17886_s27 + $0x88] sm:$0xff]   ;;  %v1118_v21 = vsel %vm706_vm1, %v1113_v11, %v1117_v13  ;;  %v1121_v12 = vor.u32 %v1119_v18, %v1117_v13  ;;  %v17527_v18 = vld [vmem:[%s17886_s27 + $0xd0] sm:$0xff]  }
  0xc0   : > { %15009 = vmatprep.mubr.msk.bf16.mxu1 %vm1255_vm2, %v1054_v5  ;;  %v6943_v2 = vrot.slane %v17518_v1, 2  ;;  %v6945_v5 = vrot.slane %v17519_v4, 2  ;;  %v1165_v1 = vrot.slane %v1163_v51, 1 }
  0xc2   : > { %15628 = vmatmul.mubr.msk.bf16.gmra.mrb[12].mxu0 %vm1255_vm2, %v6930_v16  ;;  %v6944_v15 = vsel %vm6913_vm4, %v6941_v47, %v6943_v2  ;;  %v17381_v16 = vld [vmem:[%s17886_s27 + $0x1b0] sm:$0xff]   ;;  %v6946_v29 = vsel %vm6913_vm4, %v6943_v2, %v6945_v5 }
  0xc3   : > { %15631 = vmatprep.mubr.msk.bf16.mxu0 %vm1255_vm2, %v6932_v22  ;;  %v17520_v22 = vld [vmem:[%s17886_s27 + $0x98] sm:$0xff]   ;;  %v1139_v32 = vshll.u32 %v17381_v16, 16  ;;  %v1143_v37 = vshrl.u32 %v17381_v16, 16  ;;  %v17526_v16 = vld [vmem:[%s17886_s27 + $0xc8] sm:$0xff]  }
  0xc4   : > { %v6947_v23 = vrot.slane %v17520_v22, 2 }
  0xc5   : > { %v1141_v44 = vrot.slane %v1139_v32, 1 }
  0xc7   : > { %15010 = vmatmul.mubr.msk.bf16.gmra.mrb[84].mxu1 %vm1255_vm2, %v1062_v24  ;;  %v17521_v24 = vld [vmem:[%s17886_s27 + $0xa0] sm:$0xff]   ;;  %v1145_v49 = vor.u32 %v1143_v37, %v1141_v44  ;;  %v1142_v55 = vsel %vm706_vm1, %v1137_v46, %v1141_v44 }
  0xc8   : > { %15013 = vmatprep.mubr.msk.bf16.mxu1 %vm1255_vm2, %v1070_v27  ;;  %v6949_v25 = vrot.slane %v17521_v24, 2  ;;  %v1125_v27 = vrot.slane %v1123_v7, 1  ;;  %v1169_v24 = vor.u32 %v1167_v6, %v1165_v1  ;;  %v17529_v46 = vld [vmem:[%s17886_s27 + $0xe0] sm:$0xff]  }
  0xca   : > { %15632 = vmatmul.mubr.msk.bf16.gmra.mrb[16].mxu0 %vm1255_vm2, %v6934_v34  ;;  %v1129_v30 = vor.u32 %v1127_v19, %v1125_v27  ;;  %v6948_v34 = vsel %vm6913_vm4, %v6945_v5, %v6947_v23  ;;  %v1126_v36 = vsel %vm706_vm1, %v1121_v12, %v1125_v27  ;;  %v6950_v47 = vsel %vm6913_vm4, %v6947_v23, %v6949_v25 }
  0xcb   : > { %15635 = vmatprep.mubr.msk.bf16.mxu0 %vm1255_vm2, %v6936_v38  ;;  %v1147_v38 = vshll.u32 %v17382_v26, 16  ;;  %v6961_v19 = vrot.slane %v17527_v18, 2  ;;  %v1183_v23 = vshrl.u32 %v18257_v63, 16  ;;  %v1181_v27 = vrot.slane %v1179_v14, 1 }
  0xcc   : > { %v1134_v39 = vsel %vm706_vm1, %v1129_v30, %v1133_v54 }
  0xcd   : > { %v1149_v50 = vrot.slane %v1147_v38, 1  ;;  %v1185_v37 = vor.u32 %v1183_v23, %v1181_v27  ;;  %v18338_v23 = vld [vmem:[%s17886_s27 + $0x218] sm:$0xff]  }
  0xcf   : > { %15014 = vmatmul.mubr.msk.bf16.gmra.mrb[88].mxu1 %vm1255_vm2, %v1078_v40  ;;  %v17522_v40 = vld [vmem:[%s17886_s27 + $0xa8] sm:$0xff]   ;;  %v1150_v58 = vsel %vm706_vm1, %v1145_v49, %v1149_v50  ;;  %v1153_v2 = vor.u32 %v1151_v56, %v1149_v50 }
  0xd0   : > { %15017 = vmatprep.mubr.msk.bf16.mxu1 %vm1255_vm2, %v1086_v43  ;;  %v6951_v41 = vrot.slane %v17522_v40, 2  ;;  %v6953_v43 = vrot.slane %v17523_v42, 2 }
  0xd2   : > { %15636 = vmatmul.mubr.msk.bf16.gmra.mrb[20].mxu0 %vm1255_vm2, %v6938_v53  ;;  %v6952_v52 = vsel %vm6913_vm4, %v6949_v25, %v6951_v41  ;;  %v18248_v53 = vld [vmem:[%s17886_s27 + $0x1d0] sm:$0xff]   ;;  %v6954_v4 = vsel %vm6913_vm4, %v6951_v41, %v6953_v43  ;;  %v18298_v41 = vld [vmem:[%s17886_s27 + $0x1f8] sm:$0xff]  }
  0xd3   : > { %15639 = vmatprep.mubr.msk.bf16.mxu0 %vm1255_vm2, %v6940_v59  ;;  %v17524_v59 = vld [vmem:[%s17886_s27 + $0xb8] sm:$0xff]   ;;  %v1171_v7 = vshll.u32 %v18248_v53, 16  ;;  %v1175_v13 = vshrl.u32 %v18248_v53, 16  ;;  %v1211_v51 = vshll.u32 %v18298_v41, 16 }
  0xd4   : > { %v6955_v60 = vrot.slane %v17524_v59, 2 }
  0xd5   : > { %v1173_v22 = vrot.slane %v1171_v7, 1 }
  0xd6   : > { %v6956_v8 = vsel %vm6913_vm4, %v6953_v43, %v6955_v60 }
  0xd7   : > { %15018 = vmatmul.mubr.msk.bf16.gmra.mrb[92].mxu1 %vm1255_vm2, %v1094_v61  ;;  %v17525_v61 = vld [vmem:[%s17886_s27 + $0xc0] sm:$0xff]   ;;  %v1177_v26 = vor.u32 %v1175_v13, %v1173_v22  ;;  %v17532_v13 = vld [vmem:[%s17886_s27 + $0xf8] sm:$0xff]  }
  0xd8   : > { %15021 = vmatprep.mubr.msk.bf16.mxu1 %vm1255_vm2, %v1102_v0  ;;  %v6957_v62 = vrot.slane %v17525_v61, 2  ;;  %v1157_v0 = vrot.slane %v1155_v45, 1  ;;  %v1213_v61 = vrot.slane %v1211_v51, 1  ;;  %v6971_v14 = vrot.slane %v17532_v13, 2  ;;  %v18384_v13 = vld [vmem:[%s17886_s27 + $0x8] sm:$0xff]  }
  0xd9   : > { %v1182_v32 = vsel %vm706_vm1, %v1177_v26, %v1181_v27 }
  0xda   : > { %15640 = vmatmul.mubr.msk.bf16.gmra.mrb[24].mxu0 %vm1255_vm2, %v6942_v10  ;;  %v1161_v5 = vor.u32 %v1159_v57, %v1157_v0  ;;  %v18265_v10 = vld [vmem:[%s17886_s27 + $0x1e0] sm:$0xff]   ;;  %v1158_v11 = vsel %vm706_vm1, %v1153_v2, %v1157_v0  ;;  %v6958_v25 = vsel %vm6913_vm4, %v6955_v60, %v6957_v62 }
  0xdb   : > { %15643 = vmatprep.mubr.msk.bf16.mxu0 %vm1255_vm2, %v6944_v15  ;;  %v1187_v54 = vshll.u32 %v18265_v10, 16  ;;  %v1191_v30 = vshrl.u32 %v18265_v10, 16  ;;  %v18313_v57 = vld [vmem:[%s17886_s27 + $0x200] sm:$0xff]  }
  0xdc   : > { %v1166_v15 = vsel %vm706_vm1, %v1161_v5, %v1165_v1  ;;  %v1219_v1 = vshll.u32 %v18313_v57, 16  ;;  %v17531_v5 = vld [vmem:[%s17886_s27 + $0xf0] sm:$0xff]  }
  0xdd   : > { %v1189_v35 = vrot.slane %v1187_v54, 1  ;;  %v6969_v6 = vrot.slane %v17531_v5, 2  ;;  %v17533_v54 = vld [vmem:[%s17886_s27 + $0x100] sm:$0xff]  }
  0xdf   : > { %15022 = vmatmul.mubr.msk.bf16.gmra.mrb[96].mxu1 %vm1255_vm2, %v1110_v17  ;;  %v6959_v17 = vrot.slane %v17526_v16, 2  ;;  %v1190_v44 = vsel %vm706_vm1, %v1185_v37, %v1189_v35  ;;  %v18333_v16 = vld [vmem:[%s17886_s27 + $0x210] sm:$0xff]   ;;  %v17395_v37 = vld [vmem:[%s17886_s27 + $0x220] ss:$0 sps:$4 sm:$0x11]  }
  0xe0   : > { %15025 = vmatprep.mubr.msk.bf16.mxu1 %vm1255_vm2, %v1118_v21  ;;  %v18276_v21 = vld [vmem:[%s17886_s27 + $0x1e8] sm:$0xff]  }
  0xe1   : > { %v6960_v12 = vsel %vm6913_vm4, %v6957_v62, %v6959_v17  ;;  %v1195_v31 = vshll.u32 %v18276_v21, 16  ;;  %v6962_v38 = vsel %vm6913_vm4, %v6959_v17, %v6961_v19  ;;  %v1199_v45 = vshrl.u32 %v18276_v21, 16  ;;  %v18318_v62 = vld [vmem:[%s17886_s27 + $0x208] sm:$0xff]  }
  0xe2   : > { %15644 = vmatmul.mubr.msk.bf16.gmra.mrb[28].mxu0 %vm1255_vm2, %v6946_v29  ;;  %v1174_v29 = vsel %vm706_vm1, %v1169_v24, %v1173_v22  ;;  %v6972_v24 = vsel %vm6913_vm4, %v6969_v6, %v6971_v14  ;;  %v1231_v27 = vshrl.u32 %v18318_v62, 16 }
  0xe3   : > { %15647 = vmatprep.mubr.msk.bf16.mxu0 %vm1255_vm2, %v6948_v34  ;;  %v6963_v34 = vrot.slane %v17528_v33, 2  ;;  %v1197_v40 = vrot.slane %v1195_v31, 1  ;;  %v1243_v31 = vshll.u32 %v18338_v23, 16 }
  0xe5   : > { %v6964_v42 = vsel %vm6913_vm4, %v6961_v19, %v6963_v34 }
  0xe7   : > { %15026 = vmatmul.mubr.msk.bf16.gmra.mrb[100].mxu1 %vm1255_vm2, %v1126_v36  ;;  %v18293_v36 = vld [vmem:[%s17886_s27 + $0x1f0] sm:$0xff]  }
  0xe8   : > { %15029 = vmatprep.mubr.msk.bf16.mxu1 %vm1255_vm2, %v1134_v39  ;;  %v1193_v39 = vor.u32 %v1191_v30, %v1189_v35  ;;  %v1203_v43 = vshll.u32 %v18293_v36, 16  ;;  %v1207_v50 = vshrl.u32 %v18293_v36, 16  ;;  %v1239_v30 = vshrl.u32 %v18333_v16, 16 }
  0xea   : > { %15648 = vmatmul.mubr.msk.bf16.gmra.mrb[32].mxu0 %vm1255_vm2, %v6950_v47  ;;  %v6965_v47 = vrot.slane %v17529_v46, 2  ;;  %v1198_v49 = vsel %vm706_vm1, %v1193_v39, %v1197_v40  ;;  %v1205_v56 = vrot.slane %v1203_v43, 1  ;;  %v17535_v46 = vld [vmem:[%s17886_s27 + $0x110] sm:$0xff]  }
  0xeb   : > { %15651 = vmatprep.mubr.msk.bf16.mxu0 %vm1255_vm2, %v6952_v52  ;;  %v17530_v52 = vld [vmem:[%s17886_s27 + $0xe8] sm:$0xff]  }
  0xec   : > { %v6966_v59 = vsel %vm6913_vm4, %v6963_v34, %v6965_v47  ;;  %v1209_v60 = vor.u32 %v1207_v50, %v1205_v56  ;;  %v17536_v50 = vld [vmem:[%s17886_s27 + $0x118] sm:$0xff]  }
  0xed   : > { %v6979_v51 = vrot.slane %v17536_v50, 2  ;;  %v18455_v50 = vld [vmem:[%s17886_s27 + $0x48] sm:$0xff]  }
  0xee   : > { %v1214_v7 = vsel %vm706_vm1, %v1209_v60, %v1213_v61 }
  0xef   : > { %15030 = vmatmul.mubr.msk.bf16.gmra.mrb[104].mxu1 %vm1255_vm2, %v1142_v55  ;;  %v6967_v55 = vrot.slane %v17530_v52, 2 }
  0xf0   : > { %15033 = vmatprep.mubr.msk.bf16.mxu1 %vm1255_vm2, %v1150_v58  ;;  %v1201_v58 = vor.u32 %v1199_v45, %v1197_v40  ;;  %v1245_v40 = vrot.slane %v1243_v31, 1  ;;  %v1251_v45 = vshll.u32 %v17395_v37, 16  ;;  %v18423_v31 = vld [vmem:[%s17886_s27 + $0x28] sm:$0xff]  }
  0xf1   : > { %v6968_v0 = vsel %vm6913_vm4, %v6965_v47, %v6967_v55  ;;  %v6970_v18 = vsel %vm6913_vm4, %v6967_v55, %v6969_v6  ;;  %v6977_v47 = vrot.slane %v17535_v46, 2  ;;  %v17398_v6 = vld [vmem:[%s17886_s27 + $0x138] sm:$0xff]   ;;  %v17404_v37 = vld [vmem:[%s17886_s27 + $0x168] sm:$0xff]  }
  0xf2   : > { %15652 = vmatmul.mubr.msk.bf16.gmra.mrb[36].mxu0 %vm1255_vm2, %v6954_v4  ;;  %v1206_v2 = vsel %vm706_vm1, %v1201_v58, %v1205_v56  ;;  %v1215_v4 = vshrl.u32 %v18298_v41, 16  ;;  %v1253_v55 = vrot.slane %v1251_v45, 1  ;;  %v17406_v46 = vld [vmem:[%s17886_s27 + $0x178] sm:$0xff]  }
  0xf3   : > { %15655 = vmatprep.mubr.msk.bf16.mxu0 %vm1255_vm2, %v6956_v8  ;;  %v1223_v8 = vshrl.u32 %v18313_v57, 16  ;;  %v6980_v58 = vsel %vm6913_vm4, %v6977_v47, %v6979_v51 }
  0xf4   : > { %v1217_v17 = vor.u32 %v1215_v4, %v1213_v61  ;;  %v17537_v61 = vld [vmem:[%s17886_s27 + $0x120] sm:$0xff]   ;;  %v17397_v4 = vld [vmem:[%s17886_s27 + $0x130] sm:$0xff]  }
  0xf7   : > { %15034 = vmatmul.mubr.msk.bf16.gmra.mrb[108].mxu1 %vm1255_vm2, %v1158_v11  ;;  %v1227_v11 = vshll.u32 %v18318_v62, 16 }
  0xf8   : > { %15037 = vmatprep.mubr.msk.bf16.mxu1 %vm1255_vm2, %v1166_v15  ;;  %v1221_v15 = vrot.slane %v1219_v1, 1 }
  0xf9   : > { %v1229_v22 = vrot.slane %v1227_v11, 1  ;;  %v6987_v11 = vrot.slane %v17398_v6, 2 }
  0xfa   : > { %15656 = vmatmul.mubr.msk.bf16.gmra.mrb[40].mxu0 %vm1255_vm2, %v6958_v25  ;;  %v1225_v19 = vor.u32 %v1223_v8, %v1221_v15  ;;  %v1235_v25 = vshll.u32 %v18333_v16, 16  ;;  %v1222_v26 = vsel %vm706_vm1, %v1217_v17, %v1221_v15  ;;  %v6985_v8 = vrot.slane %v17397_v4, 2  ;;  %v17399_v15 = vld [vmem:[%s17886_s27 + $0x140] sm:$0xff]   ;;  %v17400_v17 = vld [vmem:[%s17886_s27 + $0x148] sm:$0xff]  }
  0xfb   : > { %15659 = vmatprep.mubr.msk.bf16.mxu0 %vm1255_vm2, %v6960_v12  ;;  %v6973_v12 = vrot.slane %v17533_v54, 2  ;;  %v1233_v35 = vor.u32 %v1231_v27, %v1229_v22  ;;  %v17401_v27 = vld [vmem:[%s17886_s27 + $0x150] sm:$0xff]  }
  0xfc   : > { %v1237_v34 = vrot.slane %v1235_v25, 1  ;;  %v18412_v25 = vld [vmem:[%s17886_s27 + $0x20] sm:$0xff]  }
  0xfe   : > { %v1241_v39 = vor.u32 %v1239_v30, %v1237_v34  ;;  %v1238_v43 = vsel %vm706_vm1, %v1233_v35, %v1237_v34  ;;  %v17403_v34 = vld [vmem:[%s17886_s27 + $0x160] sm:$0xff]  }
  0xff   : > { %15038 = vmatmul.mubr.msk.bf16.gmra.mrb[112].mxu1 %vm1255_vm2, %v1174_v29  ;;  %v1230_v29 = vsel %vm706_vm1, %v1225_v19, %v1229_v22  ;;  %v18402_v19 = vld [vmem:[%s20803_s1 + $0x1c] sm:$0xf]  ;;  %v6991_v22 = vrot.slane %v17400_v17, 2  ;;  %v17412_v17 = vld [vmem:[%s17886_s27 + $0x1a8] sm:$0xff]  }
 0x100   : > { %15041 = vmatprep.mubr.msk.bf16.mxu1 %vm1255_vm2, %v1182_v32  ;;  %v17534_v32 = vld [vmem:[%s17886_s27 + $0x108] sm:$0xff]   ;;  %17263 = vmatprep.subr.msk.bf16.mxu0 %vm1460_vm0, %v18402_v19 }
 0x101   : > { %v6975_v33 = vrot.slane %v17534_v32, 2  ;;  %v18428_v32 = vld [vmem:[%s17886_s27 + $0x30] sm:$0xff]  }
 0x102   : > { %15660 = vmatmul.mubr.msk.bf16.gmra.mrb[44].mxu0 %vm1255_vm2, %v6962_v38  ;;  %v6974_v38 = vsel %vm6913_vm4, %v6971_v14, %v6973_v12 }
 0x103   : > { %15663 = vmatprep.mubr.msk.bf16.mxu0 %vm1255_vm2, %v6964_v42  ;;  %v6976_v42 = vsel %vm6913_vm4, %v6973_v12, %v6975_v33  ;;  %v6978_v56 = vsel %vm6913_vm4, %v6975_v33, %v6977_v47  ;;  %v17402_v12 = vld [vmem:[%s17886_s27 + $0x158] sm:$0xff]  }
 0x104   : > { %v6995_v30 = vrot.slane %v17402_v12, 2  ;;  %v17413_v12 = vld [vmem:[%s17886_s27 + $0x1b0] sm:$0xff]  }
 0x107   : > { %15042 = vmatmul.mubr.msk.bf16.gmra.mrb[116].mxu1 %vm1255_vm2, %v1190_v44  ;;  %v1247_v44 = vshrl.u32 %v18338_v23, 16 }
 0x108   : > { %15045 = vmatprep.mubr.msk.bf16.mxu1 %vm1255_vm2, %v1198_v49  ;;  %v1246_v49 = vsel %vm706_vm1, %v1241_v39, %v1245_v40  ;;  %v6999_v39 = vrot.slane %v17404_v37, 2  ;;  %v18524_v37 = vld [vmem:[%s17886_s27 + $0x90] sm:$0xff]  }
 0x109   : > { %v1249_v52 = vor.u32 %v1247_v44, %v1245_v40  ;;  %v18439_v40 = vld [vmem:[%s17886_s27 + $0x38] sm:$0xff]   ;;  %v17405_v44 = vld [vmem:[%s17886_s27 + $0x170] sm:$0xff]  }
 0x10a   : > { %15664 = vmatmul.mubr.msk.bf16.gmra.mrb[48].mxu0 %vm1255_vm2, %v6966_v59  ;;  %v17396_v59 = vld [vmem:[%s17886_s27 + $0x128] sm:$0xff]   ;;  %v7001_v47 = vrot.slane %v17405_v44, 2 }
 0x10b   : > { %15667 = vmatprep.mubr.msk.bf16.mxu0 %vm1255_vm2, %v6968_v0  ;;  %v1254_v60 = vsel %vm706_vm1, %v1249_v52, %v1253_v55  ;;  %v6981_v0 = vrot.slane %v17537_v61, 2  ;;  %v6983_v1 = vrot.slane %v17396_v59, 2  ;;  %v17407_v55 = vld [vmem:[%s17886_s27 + $0x180] sm:$0xff]   ;;  %v18471_v61 = vld [vmem:[%s17886_s27 + $0x58] sm:$0xff]   ;;  %v17416_v44 = vld [vmem:[%s17886_s27 + $0x1c8] sm:$0xff]  }
 0x10c   : > { %v7002_v52 = vsel %vm6913_vm4, %v6999_v39, %v7001_v47  ;;  %v7005_v59 = vrot.slane %v17407_v55, 2  ;;  %v17417_v55 = vld [vmem:[%s17886_s27 + $0x1d0] sm:$0xff]  }
 0x10d   : > { %v6984_v5 = vsel %vm6913_vm4, %v6981_v0, %v6983_v1  ;;  %v6986_v14 = vsel %vm6913_vm4, %v6983_v1, %v6985_v8 }
 0x10f   : > { %15046 = vmatmul.mubr.msk.bf16.gmra.mrb[120].mxu1 %vm1255_vm2, %v1206_v2  ;;  %v6982_v2 = vsel %vm6913_vm4, %v6979_v51, %v6981_v0  ;;  %v18460_v51 = vld [vmem:[%s17886_s27 + $0x50] sm:$0xff]   ;;  %v18476_v0 = vld [vmem:[%s17886_s27 + $0x60] sm:$0xff]  }
 0x110   : > { %15049 = vmatprep.mubr.msk.bf16.mxu1 %vm1255_vm2, %v1214_v7  ;;  %v3106_v7 = vsel %vm1460_vm0, %v18149_v28, 0  ;;  %v6988_v28 = vsel %vm6913_vm4, %v6985_v8, %v6987_v11  ;;  %v18487_v8 = vld [vmem:[%s17886_s27 + $0x68] sm:$0xff]  }
 0x112   : > { %15668 = vmatmul.mubr.msk.bf16.gmra.mrb[52].mxu0 %vm1255_vm2, %v6970_v18  ;;  %v6989_v18 = vrot.slane %v17399_v15, 2  ;;  %v17411_v15 = vld [vmem:[%s17886_s27 + $0x1a0] sm:$0xff]  }
 0x113   : > { %15671 = vmatprep.mubr.msk.bf16.mxu0 %vm1255_vm2, %v6972_v24  ;;  %v18407_v24 = vld [vmem:[%s17886_s27 + $0x18] sm:$0xff]  }
 0x114   : > { %v6992_v54 = vsel %vm6913_vm4, %v6989_v18, %v6991_v22 }
 0x117   : > { %15050 = vmatmul.mubr.msk.bf16.gmra.mrb[124].mxu1 %vm1255_vm2, %v1222_v26  ;;  %v6990_v26 = vsel %vm6913_vm4, %v6987_v11, %v6989_v18  ;;  %v18492_v11 = vld [vmem:[%s17886_s27 + $0x70] sm:$0xff]   ;;  %v7013_v18 = vrot.slane %v17411_v15, 2 }
 0x118   : > { %15053 = vmatprep.mubr.msk.bf16.mxu1 %vm1255_vm2, %v1230_v29  ;;  %v6993_v29 = vrot.slane %v17401_v27, 2  ;;  %v18508_v27 = vld [vmem:[%s17886_s27 + $0x80] sm:$0xff]  }
 0x11a   : > { %15672 = vmatmul.mubr.msk.bf16.gmra.mrb[56].mxu0 %vm1255_vm2, %v6974_v38  ;;  %v6994_v33 = vsel %vm6913_vm4, %v6991_v22, %v6993_v29  ;;  %v6996_v35 = vsel %vm6913_vm4, %v6993_v29, %v6995_v30  ;;  %v6997_v38 = vrot.slane %v17403_v34, 2  ;;  %v7015_v22 = vrot.slane %v17412_v17, 2  ;;  %v18572_v17 = vld [vmem:[%s17886_s27 + $0xc0] sm:$0xff]  }
 0x11b   : > { %15675 = vmatprep.mubr.msk.bf16.mxu0 %vm1255_vm2, %v6976_v42  ;;  %v18444_v42 = vld [vmem:[%s17886_s27 + $0x40] sm:$0xff]  }
 0x11c   : > { %v7000_v45 = vsel %vm6913_vm4, %v6997_v38, %v6999_v39  ;;  %v7016_v29 = vsel %vm6913_vm4, %v7013_v18, %v7015_v22  ;;  %v17415_v39 = vld [vmem:[%s17886_s27 + $0x1c0] sm:$0xff]  }
 0x11f   : > { %15054 = vmatmul.mubr.msk.bf16.gmra.mrb[128].mxu1 %vm1255_vm2, %v1238_v43  ;;  %v6998_v43 = vsel %vm6913_vm4, %v6995_v30, %v6997_v38  ;;  %v17414_v30 = vld [vmem:[%s17886_s27 + $0x1b8] sm:$0xff]  }
 0x120   : > { %15057 = vmatprep.mubr.msk.bf16.mxu1 %vm1255_vm2, %v1246_v49  ;;  %v7003_v49 = vrot.slane %v17406_v46, 2  ;;  %v7019_v34 = vrot.slane %v17414_v30, 2  ;;  %v7023_v46 = vrot.slane %v17416_v44, 2  ;;  %v17424_v44 = vld [vmem:[%s17886_s27 + $0x208] sm:$0xff]  }
 0x122   : > { %15676 = vmatmul.mubr.msk.bf16.gmra.mrb[60].mxu0 %vm1255_vm2, %v6978_v56  ;;  %v7004_v56 = vsel %vm6913_vm4, %v7001_v47, %v7003_v49  ;;  %v7006_v1 = vsel %vm6913_vm4, %v7003_v49, %v7005_v59  ;;  %v18535_v47 = vld [vmem:[%s17886_s27 + $0x98] sm:$0xff]   ;;  %v18540_v49 = vld [vmem:[%s17886_s27 + $0xa0] sm:$0xff]  }
 0x123   : > { %15679 = vmatprep.mubr.msk.bf16.mxu0 %vm1255_vm2, %v6980_v58  ;;  %v17408_v58 = vld [vmem:[%s17886_s27 + $0x188] sm:$0xff]  }
 0x127   : > { %15058 = vmatmul.mubr.msk.bf16.gmra.mrb[132].mxu1 %vm1255_vm2, %v1254_v60  ;;  %v7007_v60 = vrot.slane %v17408_v58, 2  ;;  %v17418_v58 = vld [vmem:[%s17886_s27 + $0x1d8] sm:$0xff]  }
 0x128   : > { %15063 = vmatprep.mubr.msk.bf16.mxu1 %vm1255_vm2, %v17891_v9  ;;  %v18389_v9 = vld [vmem:[%s17886_s27 + $0x10] sm:$0xff]  }
 0x129   : > { %v7008_v4 = vsel %vm6913_vm4, %v7005_v59, %v7007_v60  ;;  %v7025_v59 = vrot.slane %v17417_v55, 2  ;;  %v18604_v55 = vld [vmem:[%s17886_s27 + $0xe0] sm:$0xff]  }
 0x12a   : > { %15680 = vmatmul.mubr.msk.bf16.gmra.mrb[64].mxu0 %vm1255_vm2, %v6982_v2  ;;  %v17409_v2 = vld [vmem:[%s17886_s27 + $0x190] sm:$0xff]  }
 0x12b   : > { %15683 = vmatprep.mubr.msk.bf16.mxu0 %vm1255_vm2, %v6984_v5  ;;  %v17410_v5 = vld [vmem:[%s17886_s27 + $0x198] sm:$0xff]   ;;  %v7009_v6 = vrot.slane %v17409_v2, 2  ;;  %v18556_v2 = vld [vmem:[%s17886_s27 + $0xb0] sm:$0xff]  }
 0x12f   : > { %15064 = vmatmul.mubr.msk.bf16.vlgmr.msra.gmra.mrb[0].mxu1 %vm1255_vm2, %v18384_v13 }
 0x130   : > { %15200 = vmatpush3.bf16.msra.mxu1 %v3106_v7  ;;  %15067 = vmatprep.mubr.msk.bf16.mxu1 %vm1255_vm2, %v18389_v9  ;;  %v7011_v7 = vrot.slane %v17410_v5, 2  ;;  %v17419_v5 = vld [vmem:[%s17886_s27 + $0x1e0] sm:$0xff]  }
 0x132   : > { %15684 = vmatmul.mubr.msk.bf16.gmra.mrb[68].mxu0 %vm1255_vm2, %v6986_v14  ;;  %v7010_v14 = vsel %vm6913_vm4, %v7007_v60, %v7009_v6  ;;  %v7027_v60 = vrot.slane %v17418_v58, 2  ;;  %v17425_v58 = vld [vmem:[%s17886_s27 + $0x210] sm:$0xff]  }
 0x133   : > { %15687 = vmatprep.mubr.msk.bf16.mxu0 %vm1255_vm2, %v6988_v28  ;;  %v7012_v28 = vsel %vm6913_vm4, %v7009_v6, %v7011_v7 }
 0x134   : > { %v7028_v6 = vsel %vm6913_vm4, %v7025_v59, %v7027_v60 }
 0x137   : > { %15068 = vmatmul.mubr.msk.bf16.gmra.mrb[4].mxu1 %vm1255_vm2, %v18407_v24 }
 0x138   : > { %15071 = vmatprep.mubr.msk.bf16.mxu1 %vm1255_vm2, %v18412_v25 }
 0x13a   : > { %15688 = vmatmul.mubr.msk.bf16.gmra.mrb[72].mxu0 %vm1255_vm2, %v6990_v26  ;;  %v18503_v26 = vld [vmem:[%s17886_s27 + $0x78] sm:$0xff]  }
 0x13b   : > { %15691 = vmatprep.mubr.msk.bf16.mxu0 %vm1255_vm2, %v6992_v54  ;;  %v7014_v54 = vsel %vm6913_vm4, %v7011_v7, %v7013_v18  ;;  %v17420_v7 = vld [vmem:[%s17886_s27 + $0x1e8] sm:$0xff]  }
 0x13c   : > { %v7031_v15 = vrot.slane %v17420_v7, 2  ;;  %v18620_v7 = vld [vmem:[%s17886_s27 + $0xf0] sm:$0xff]  }
 0x13f   : > { %15072 = vmatmul.mubr.msk.bf16.gmra.mrb[8].mxu1 %vm1255_vm2, %v18423_v31 }
 0x140   : > { %15075 = vmatprep.mubr.msk.bf16.mxu1 %vm1255_vm2, %v18428_v32 }
 0x142   : > { %15692 = vmatmul.mubr.msk.bf16.gmra.mrb[76].mxu0 %vm1255_vm2, %v6994_v33  ;;  %v7017_v33 = vrot.slane %v17413_v12, 2  ;;  %v17422_v12 = vld [vmem:[%s17886_s27 + $0x1f8] sm:$0xff]  }
 0x143   : > { %15695 = vmatprep.mubr.msk.bf16.mxu0 %vm1255_vm2, %v6996_v35  ;;  %v18519_v35 = vld [vmem:[%s17886_s27 + $0x88] sm:$0xff]   ;;  %v7035_v30 = vrot.slane %v17422_v12, 2 }
 0x144   : > { %v7018_v38 = vsel %vm6913_vm4, %v7015_v22, %v7017_v33  ;;  %v17421_v22 = vld [vmem:[%s17886_s27 + $0x1f0] sm:$0xff]  }
 0x147   : > { %15076 = vmatmul.mubr.msk.bf16.gmra.mrb[12].mxu1 %vm1255_vm2, %v18439_v40 }
 0x148   : > { %15079 = vmatprep.mubr.msk.bf16.mxu1 %vm1255_vm2, %v18444_v42 }
 0x14a   : > { %15696 = vmatmul.mubr.msk.bf16.gmra.mrb[80].mxu0 %vm1255_vm2, %v6998_v43  ;;  %v7020_v43 = vsel %vm6913_vm4, %v7017_v33, %v7019_v34  ;;  %v18583_v33 = vld [vmem:[%s17886_s27 + $0xc8] sm:$0xff]  }
 0x14b   : > { %15699 = vmatprep.mubr.msk.bf16.mxu0 %vm1255_vm2, %v7000_v45  ;;  %v7021_v45 = vrot.slane %v17415_v39, 2  ;;  %v17423_v39 = vld [vmem:[%s17886_s27 + $0x200] sm:$0xff]  }
 0x14f   : > { %15080 = vmatmul.mubr.msk.bf16.gmra.mrb[16].mxu1 %vm1255_vm2, %v18455_v50 }
 0x150   : > { %15083 = vmatprep.mubr.msk.bf16.mxu1 %vm1255_vm2, %v18460_v51 }
 0x152   : > { %15700 = vmatmul.mubr.msk.bf16.gmra.mrb[84].mxu0 %vm1255_vm2, %v7002_v52  ;;  %v7022_v52 = vsel %vm6913_vm4, %v7019_v34, %v7021_v45  ;;  %v18588_v34 = vld [vmem:[%s17886_s27 + $0xd0] sm:$0xff]  }
 0x153   : > { %15703 = vmatprep.mubr.msk.bf16.mxu0 %vm1255_vm2, %v7004_v56  ;;  %v7024_v56 = vsel %vm6913_vm4, %v7021_v45, %v7023_v46  ;;  %v7037_v45 = vrot.slane %v17423_v39, 2  ;;  %v18638_v39 = vld [vmem:[%s17886_s27 + $0x100] sm:$0xff]  }
 0x157   : > { %15084 = vmatmul.mubr.msk.bf16.gmra.mrb[20].mxu1 %vm1255_vm2, %v18471_v61 }
 0x158   : > { %15087 = vmatprep.mubr.msk.bf16.mxu1 %vm1255_vm2, %v18476_v0 }
 0x15a   : > { %15704 = vmatmul.mubr.msk.bf16.gmra.mrb[88].mxu0 %vm1255_vm2, %v7006_v1  ;;  %v18551_v1 = vld [vmem:[%s17886_s27 + $0xa8] sm:$0xff]  }
 0x15b   : > { %15707 = vmatprep.mubr.msk.bf16.mxu0 %vm1255_vm2, %v7008_v4  ;;  %v7026_v4 = vsel %vm6913_vm4, %v7023_v46, %v7025_v59  ;;  %v7039_v46 = vrot.slane %v17424_v44, 2  ;;  %v17429_v44 = vld [vmem:[%s17886_s27 + $0x230] ss:$0 sps:$4 sm:$0x33]  }
 0x15d   : > { %v7040_v59 = vsel %vm6913_vm4, %v7037_v45, %v7039_v46 }
 0x15f   : > { %15088 = vmatmul.mubr.msk.bf16.gmra.mrb[24].mxu1 %vm1255_vm2, %v18487_v8 }
 0x160   : > { %15091 = vmatprep.mubr.msk.bf16.mxu1 %vm1255_vm2, %v18492_v11 }
 0x162   : > { %15708 = vmatmul.mubr.msk.bf16.gmra.mrb[92].mxu0 %vm1255_vm2, %v7010_v14  ;;  %v7029_v14 = vrot.slane %v17419_v5, 2 }
 0x163   : > { %15711 = vmatprep.mubr.msk.bf16.mxu0 %vm1255_vm2, %v7012_v28  ;;  %v18567_v28 = vld [vmem:[%s17886_s27 + $0xb8] sm:$0xff]  }
 0x164   : > { %v7030_v18 = vsel %vm6913_vm4, %v7027_v60, %v7029_v14  ;;  %v17426_v60 = vld [vmem:[%s17886_s27 + $0x218] sm:$0xff]  }
 0x165   : > { %v7043_v5 = vrot.slane %v17426_v60, 2 }
 0x167   : > { %15092 = vmatmul.mubr.msk.bf16.gmra.mrb[28].mxu1 %vm1255_vm2, %v18503_v26 }
 0x168   : > { %15095 = vmatprep.mubr.msk.bf16.mxu1 %vm1255_vm2, %v18508_v27 }
 0x16a   : > { %15712 = vmatmul.mubr.msk.bf16.gmra.mrb[96].mxu0 %vm1255_vm2, %v7014_v54  ;;  %v7032_v54 = vsel %vm6913_vm4, %v7029_v14, %v7031_v15 }
 0x16b   : > { %15715 = vmatprep.mubr.msk.bf16.mxu0 %vm1255_vm2, %v7016_v29  ;;  %v7033_v29 = vrot.slane %v17421_v22, 2  ;;  %v17428_v22 = vld [vmem:[%s17886_s27 + $0x228] sm:$0xff]  }
 0x16c   : > { %v7047_v12 = vrot.slane %v17428_v22, 2  ;;  %v18670_v22 = vld [vmem:[%s17886_s27 + $0x38] sm:$0xff]  }
 0x16f   : > { %15096 = vmatmul.mubr.msk.bf16.gmra.mrb[32].mxu1 %vm1255_vm2, %v18519_v35 }
 0x170   : > { %15099 = vmatprep.mubr.msk.bf16.mxu1 %vm1255_vm2, %v18524_v37 }
 0x172   : > { %15716 = vmatmul.mubr.msk.bf16.gmra.mrb[100].mxu0 %vm1255_vm2, %v7018_v38  ;;  %v7034_v38 = vsel %vm6913_vm4, %v7031_v15, %v7033_v29  ;;  %v17427_v15 = vld [vmem:[%s17886_s27 + $0x220] sm:$0xff]  }
 0x173   : > { %15719 = vmatprep.mubr.msk.bf16.mxu0 %vm1255_vm2, %v7020_v43  ;;  %v7036_v43 = vsel %vm6913_vm4, %v7033_v29, %v7035_v30  ;;  %v18631_v29 = vld [vmem:[%s17886_s27 + $0xf8] sm:$0xff]  }
 0x177   : > { %15100 = vmatmul.mubr.msk.bf16.gmra.mrb[36].mxu1 %vm1255_vm2, %v18535_v47 }
 0x178   : > { %15103 = vmatprep.mubr.msk.bf16.mxu1 %vm1255_vm2, %v18540_v49 }
 0x17a   : > { %15720 = vmatmul.mubr.msk.bf16.gmra.mrb[104].mxu0 %vm1255_vm2, %v7022_v52  ;;  %v18599_v52 = vld [vmem:[%s17886_s27 + $0xd8] sm:$0xff]  }
 0x17b   : > { %15723 = vmatprep.mubr.msk.bf16.mxu0 %vm1255_vm2, %v7024_v56  ;;  %v7038_v56 = vsel %vm6913_vm4, %v7035_v30, %v7037_v45  ;;  %v7971_v30 = vld [vmem:[%s17886_s27 + $0x20] sm:$0xc] }
 0x17f   : > { %15104 = vmatmul.mubr.msk.bf16.gmra.mrb[40].mxu1 %vm1255_vm2, %v18551_v1 }
 0x180   : > { %15107 = vmatprep.mubr.msk.bf16.mxu1 %vm1255_vm2, %v18556_v2 }
 0x182   : > { %15724 = vmatmul.mubr.msk.bf16.gmra.mrb[108].mxu0 %vm1255_vm2, %v7026_v4  ;;  %v7041_v4 = vrot.slane %v17425_v58, 2  ;;  %v7049_v58 = vrot.slane %v17429_v44, 2  ;;  %v18688_v44 = vld [vmem:[%s17886_s27 + $0x40] sm:$0xff]  }
 0x183   : > { %15727 = vmatprep.mubr.msk.bf16.mxu0 %vm1255_vm2, %v7028_v6  ;;  %v18615_v6 = vld [vmem:[%s17886_s27 + $0xe8] sm:$0xff]   ;;  %20863 = vst [vmem:[#allocation5_spill] sm:$0xff] %v18688_v44 }
 0x184   : > { %v7042_v14 = vsel %vm6913_vm4, %v7039_v46, %v7041_v4 }
 0x187   : > { %15108 = vmatmul.mubr.msk.bf16.gmra.mrb[44].mxu1 %vm1255_vm2, %v18567_v28 }
 0x188   : > { %15111 = vmatprep.mubr.msk.bf16.mxu1 %vm1255_vm2, %v18572_v17 }
 0x18a   : > { %15728 = vmatmul.mubr.msk.bf16.gmra.mrb[112].mxu0 %vm1255_vm2, %v7030_v18  ;;  %v7044_v18 = vsel %vm6913_vm4, %v7041_v4, %v7043_v5  ;;  %v18655_v4 = vld [vmem:[%s17886_s27 + $0x108] sm:$0xff]  }
 0x18b   : > { %15731 = vmatprep.mubr.msk.bf16.mxu0 %vm1255_vm2, %v7032_v54  ;;  %v7045_v54 = vrot.slane %v17427_v15, 2  ;;  %v18666_v15 = vld [vmem:[%s17886_s27 + $0x30] sm:$0xff]  }
 0x18d   : > { %v7048_v45 = vsel %vm6913_vm4, %v7045_v54, %v7047_v12 }
 0x18f   : > { %15112 = vmatmul.mubr.msk.bf16.gmra.mrb[48].mxu1 %vm1255_vm2, %v18583_v33 }
 0x190   : > { %15115 = vmatprep.mubr.msk.bf16.mxu1 %vm1255_vm2, %v18588_v34 }
 0x192   : > { %15732 = vmatmul.mubr.msk.bf16.gmra.mrb[116].mxu0 %vm1255_vm2, %v7034_v38  ;;  %v7972_v38 = vld [vmem:[%s17886_s27 + $0x24] sm:$0xf] }
 0x193   : > { %15735 = vmatprep.mubr.msk.bf16.mxu0 %vm1255_vm2, %v7036_v43  ;;  %v7046_v43 = vsel %vm6913_vm4, %v7043_v5, %v7045_v54  ;;  %v18645_v46 = vcombine.low %v7971_v30, %v7972_v38  ;;  %v18660_v5 = vld [vmem:[%s17886_s27 + $0x110] sm:$0xff]   ;;  %v8456_v54 = vrot.slane %v18666_v15, 2  ;;  %v8458_v30 = vrot.slane %v18670_v22, 2  ;;  %v18677_v38 = vld [vmem:[%s17886_s27 + $0x118] sm:$0xff]  }
 0x197   : > { %15116 = vmatmul.mubr.msk.bf16.gmra.mrb[52].mxu1 %vm1255_vm2, %v18599_v52 }
 0x198   : > { %15119 = vmatprep.mubr.msk.bf16.mxu1 %vm1255_vm2, %v18604_v55 }
 0x19a   : > { %15736 = vmatmul.mubr.msk.bf16.gmra.mrb[120].mxu0 %vm1255_vm2, %v7038_v56  ;;  %v18648_v56 = vld [vmem:[%s17886_s27 + $0x28] sm:$0xff]  }
 0x19b   : > { %15739 = vmatprep.mubr.msk.bf16.mxu0 %vm1255_vm2, %v7040_v59  ;;  %v8453_v59 = vrot.slane %v18645_v46, 2  ;;  %v8454_v60 = vrot.slane %v18648_v56, 2 }
 0x19f   : > { %15120 = vmatmul.mubr.msk.bf16.gmra.mrb[56].mxu1 %vm1255_vm2, %v18615_v6 }
 0x1a0   : > { %15123 = vmatprep.mubr.msk.bf16.mxu1 %vm1255_vm2, %v18620_v7 }
 0x1a2   : > { %15740 = vmatmul.mubr.msk.bf16.gmra.mrb[124].mxu0 %vm1255_vm2, %v7042_v14  ;;  %v7050_v14 = vsel %vm6913_vm4, %v7047_v12, %v7049_v58  ;;  %v18682_v12 = vld [vmem:[%s17886_s27 + $0x120] sm:$0xff]   ;;  %v8459_v58 = vsel %vm6913_vm4, %v8456_v54, %v8458_v30 }
 0x1a3   : > { %15743 = vmatprep.mubr.msk.bf16.mxu0 %vm1255_vm2, %v7044_v18  ;;  %v8455_v18 = vsel %vm6913_vm4, %v8453_v59, %v8454_v60  ;;  %v18694_v59 = vld [vmem:[%s17886_s27 + $0x48] sm:$0xff]  }
 0x1a4   : > { %20864 = vst [vmem:[#allocation6_spill] sm:$0xff] %v18694_v59 }
 0x1a7   : > { %15124 = vmatmul.mubr.msk.bf16.gmra.mrb[60].mxu1 %vm1255_vm2, %v18631_v29 }
 0x1a8   : > { %15127 = vmatprep.mubr.msk.bf16.mxu1 %vm1255_vm2, %v18638_v39 }
 0x1aa   : > { %15744 = vmatmul.mubr.msk.bf16.gmra.mrb[128].mxu0 %vm1255_vm2, %v7046_v43  ;;  %v8457_v43 = vsel %vm6913_vm4, %v8454_v60, %v8456_v54  ;;  %v8460_v60 = vrot.slane %v18688_v44, 2  ;;  %v18713_v54 = vld [vmem:[%s17886_s27 + $0x130] sm:$0xff]   ;;  %v17453_v44 = vld [vmem:[%s17886_s27 + $0xd8] sm:$0xff]  }
 0x1ab   : > { %15747 = vmatprep.mubr.msk.bf16.mxu0 %vm1255_vm2, %v7048_v45  ;;  %v10342_v45 = vsel %vm1460_vm0, %v18402_v19, 0  ;;  %v8462_v19 = vrot.slane %v18694_v59, 2  ;;  %20865 = vst [vmem:[#allocation7_spill] sm:$0xff] %v18713_v54  ;;  %v18878_v59 = vld [vmem:[%s17886_s27 + $0x1a8] sm:$0xff]  }
 0x1ac   : > { %20894 = vst [vmem:[#allocation36_spill] sm:$0xff] %v18878_v59 }
 0x1af   : > { %15128 = vmatmul.mubr.msk.bf16.gmra.mrb[64].mxu1 %vm1255_vm2, %v18655_v4 }
 0x1b0   : > { %15131 = vmatprep.mubr.msk.bf16.mxu1 %vm1255_vm2, %v18660_v5 }
 0x1b2   : > { %15748 = vmatmul.mubr.msk.bf16.gmra.mrb[132].mxu0 %vm1255_vm2, %v7050_v14  ;;  %v18700_v14 = vld [vmem:[%s20803_s1 + $0xc] sm:$0xf] }
 0x1b3   : > { %15753 = vmatprep.mubr.msk.bf16.mxu0 %vm1255_vm2, %v8455_v18  ;;  %17258 = vmatprep.subr.msk.bf16.mxu1 %vm1460_vm0, %v18700_v14  ;;  %v18708_v18 = vld [vmem:[%s17886_s27 + $0x128] sm:$0xff]  }
 0x1b7   : > { %15132 = vmatmul.mubr.msk.bf16.gmra.mrb[68].mxu1 %vm1255_vm2, %v18677_v38 }
 0x1b8   : > { %15135 = vmatprep.mubr.msk.bf16.mxu1 %vm1255_vm2, %v18682_v12 }
 0x1ba   : > { %15754 = vmatmul.mubr.msk.bf16.vlgmr.msra.gmra.mrb[0].mxu0 %vm1255_vm2, %v8457_v43  ;;  %v8461_v43 = vsel %vm6913_vm4, %v8458_v30, %v8460_v60  ;;  %v18735_v30 = vld [vmem:[%s17886_s27 + $0x140] sm:$0xff]  }
 0x1bb   : > { %15890 = vmatpush3.bf16.msra.mxu0 %v10342_v45  ;;  %15757 = vmatprep.mubr.msk.bf16.mxu0 %vm1255_vm2, %v8459_v58  ;;  %v18719_v45 = vld [vmem:[%s17886_s27 + $0x50] sm:$0xff]   ;;  %v8463_v58 = vsel %vm6913_vm4, %v8460_v60, %v8462_v19  ;;  %20869 = vst [vmem:[#allocation11_spill] sm:$0xff] %v18735_v30 }
 0x1bc   : > { %20866 = vst [vmem:[#allocation8_spill] sm:$0xff] %v18719_v45  ;;  %v8464_v3 = vrot.slane %v18719_v45, 2  ;;  %v18745_v45 = vld [vmem:[%s17886_s27 + $0x68] sm:$0xff]  }
 0x1bd   : > { %20871 = vst [vmem:[#allocation13_spill] sm:$0xff] %v18745_v45 }
 0x1be   : > { %v8465_v60 = vsel %vm6913_vm4, %v8462_v19, %v8464_v3  ;;  %v18757_v19 = vld [vmem:[%s17886_s27 + $0x150] sm:$0xff]  }
 0x1bf   : > { %15136 = vmatmul.mubr.msk.bf16.gmra.mrb[72].mxu1 %vm1255_vm2, %v18708_v18  ;;  %20873 = vst [vmem:[#allocation15_spill] sm:$0xff] %v18757_v19 }
 0x1c0   : > { %15139 = vmatprep.mubr.msk.bf16.mxu1 %vm1255_vm2, %v18713_v54  ;;  %v18730_v54 = vld [vmem:[%s17886_s27 + $0x138] sm:$0xff]  }
 0x1c1   : > { %20868 = vst [vmem:[#allocation10_spill] sm:$0xff] %v18730_v54 }
 0x1c2   : > { %15758 = vmatmul.mubr.msk.bf16.gmra.mrb[4].mxu0 %vm1255_vm2, %v8461_v43  ;;  %v18741_v43 = vld [vmem:[%s17886_s27 + $0x60] sm:$0xff]  }
 0x1c3   : > { %15761 = vmatprep.mubr.msk.bf16.mxu0 %vm1255_vm2, %v8463_v58  ;;  %20870 = vst [vmem:[#allocation12_spill] sm:$0xff] %v18741_v43  ;;  %v8467_v58 = vsel %vm6913_vm4, %v8464_v3, %v8466_v20  ;;  %v8468_v48 = vrot.slane %v18741_v43, 2  ;;  %v18767_v43 = vld [vmem:[%s17886_s27 + $0x78] sm:$0xff]  }
 0x1c4   : > { %20875 = vst [vmem:[#allocation17_spill] sm:$0xff] %v18767_v43 }
 0x1c5   : > { %v8469_v3 = vsel %vm6913_vm4, %v8466_v20, %v8468_v48  ;;  %v18779_v20 = vld [vmem:[%s17886_s27 + $0x160] sm:$0xff]  }
 0x1c6   : > { %20877 = vst [vmem:[#allocation19_spill] sm:$0xff] %v18779_v20 }
 0x1c7   : > { %15140 = vmatmul.mubr.msk.bf16.gmra.mrb[76].mxu1 %vm1255_vm2, %v18730_v54  ;;  %v8470_v54 = vrot.slane %v18745_v45, 2 }
 0x1c8   : > { %15143 = vmatprep.mubr.msk.bf16.mxu1 %vm1255_vm2, %v18735_v30  ;;  %v18752_v30 = vld [vmem:[%s17886_s27 + $0x148] sm:$0xff]  }
 0x1c9   : > { %20872 = vst [vmem:[#allocation14_spill] sm:$0xff] %v18752_v30 }
 0x1ca   : > { %15762 = vmatmul.mubr.msk.bf16.gmra.mrb[8].mxu0 %vm1255_vm2, %v8465_v60  ;;  %v18763_v60 = vld [vmem:[%s17886_s27 + $0x70] sm:$0xff]  }
 0x1cb   : > { %15765 = vmatprep.mubr.msk.bf16.mxu0 %vm1255_vm2, %v8467_v58  ;;  %20874 = vst [vmem:[#allocation16_spill] sm:$0xff] %v18763_v60  ;;  %v8471_v58 = vsel %vm6913_vm4, %v8468_v48, %v8470_v54  ;;  %v8472_v45 = vrot.slane %v18763_v60, 2  ;;  %v18789_v60 = vld [vmem:[%s17886_s27 + $0x88] sm:$0xff]  }
 0x1cc   : > { %20879 = vst [vmem:[#allocation21_spill] sm:$0xff] %v18789_v60 }
 0x1cd   : > { %v8473_v48 = vsel %vm6913_vm4, %v8470_v54, %v8472_v45  ;;  %v18801_v54 = vld [vmem:[%s17886_s27 + $0x170] sm:$0xff]  }
 0x1ce   : > { %20881 = vst [vmem:[#allocation23_spill] sm:$0xff] %v18801_v54 }
 0x1cf   : > { %15144 = vmatmul.mubr.msk.bf16.gmra.mrb[80].mxu1 %vm1255_vm2, %v18752_v30  ;;  %v8474_v30 = vrot.slane %v18767_v43, 2 }
 0x1d0   : > { %15147 = vmatprep.mubr.msk.bf16.mxu1 %vm1255_vm2, %v18757_v19  ;;  %v18774_v19 = vld [vmem:[%s17886_s27 + $0x158] sm:$0xff]  }
 0x1d1   : > { %20876 = vst [vmem:[#allocation18_spill] sm:$0xff] %v18774_v19 }
 0x1d2   : > { %15766 = vmatmul.mubr.msk.bf16.gmra.mrb[12].mxu0 %vm1255_vm2, %v8469_v3  ;;  %v18785_v3 = vld [vmem:[%s17886_s27 + $0x80] sm:$0xff]  }
 0x1d3   : > { %15769 = vmatprep.mubr.msk.bf16.mxu0 %vm1255_vm2, %v8471_v58  ;;  %20878 = vst [vmem:[#allocation20_spill] sm:$0xff] %v18785_v3  ;;  %v8475_v58 = vsel %vm6913_vm4, %v8472_v45, %v8474_v30  ;;  %v8476_v43 = vrot.slane %v18785_v3, 2  ;;  %v18811_v3 = vld [vmem:[%s17886_s27 + $0x98] sm:$0xff]  }
 0x1d4   : > { %20883 = vst [vmem:[#allocation25_spill] sm:$0xff] %v18811_v3 }
 0x1d5   : > { %v8477_v45 = vsel %vm6913_vm4, %v8474_v30, %v8476_v43  ;;  %v18823_v30 = vld [vmem:[%s17886_s27 + $0x180] sm:$0xff]  }
 0x1d6   : > { %20885 = vst [vmem:[#allocation27_spill] sm:$0xff] %v18823_v30 }
 0x1d7   : > { %15148 = vmatmul.mubr.msk.bf16.gmra.mrb[84].mxu1 %vm1255_vm2, %v18774_v19  ;;  %v8478_v19 = vrot.slane %v18789_v60, 2 }
 0x1d8   : > { %15151 = vmatprep.mubr.msk.bf16.mxu1 %vm1255_vm2, %v18779_v20  ;;  %v18796_v20 = vld [vmem:[%s17886_s27 + $0x168] sm:$0xff]  }
 0x1d9   : > { %20880 = vst [vmem:[#allocation22_spill] sm:$0xff] %v18796_v20 }
 0x1da   : > { %15770 = vmatmul.mubr.msk.bf16.gmra.mrb[16].mxu0 %vm1255_vm2, %v8473_v48  ;;  %v18807_v48 = vld [vmem:[%s17886_s27 + $0x90] sm:$0xff]  }
 0x1db   : > { %15773 = vmatprep.mubr.msk.bf16.mxu0 %vm1255_vm2, %v8475_v58  ;;  %20882 = vst [vmem:[#allocation24_spill] sm:$0xff] %v18807_v48  ;;  %v8479_v58 = vsel %vm6913_vm4, %v8476_v43, %v8478_v19  ;;  %v8480_v60 = vrot.slane %v18807_v48, 2  ;;  %v18833_v48 = vld [vmem:[%s17886_s27 + $0xa8] sm:$0xff]  }
 0x1dc   : > { %20887 = vst [vmem:[#allocation29_spill] sm:$0xff] %v18833_v48 }
 0x1dd   : > { %v8481_v43 = vsel %vm6913_vm4, %v8478_v19, %v8480_v60  ;;  %v18845_v19 = vld [vmem:[%s17886_s27 + $0x190] sm:$0xff]  }
 0x1de   : > { %20889 = vst [vmem:[#allocation31_spill] sm:$0xff] %v18845_v19 }
 0x1df   : > { %15152 = vmatmul.mubr.msk.bf16.gmra.mrb[88].mxu1 %vm1255_vm2, %v18796_v20  ;;  %v8482_v20 = vrot.slane %v18811_v3, 2 }
 0x1e0   : > { %15155 = vmatprep.mubr.msk.bf16.mxu1 %vm1255_vm2, %v18801_v54  ;;  %v18818_v54 = vld [vmem:[%s17886_s27 + $0x178] sm:$0xff]  }
 0x1e1   : > { %20884 = vst [vmem:[#allocation26_spill] sm:$0xff] %v18818_v54 }
 0x1e2   : > { %15774 = vmatmul.mubr.msk.bf16.gmra.mrb[20].mxu0 %vm1255_vm2, %v8477_v45  ;;  %v18829_v45 = vld [vmem:[%s17886_s27 + $0xa0] sm:$0xff]  }
 0x1e3   : > { %15777 = vmatprep.mubr.msk.bf16.mxu0 %vm1255_vm2, %v8479_v58  ;;  %20886 = vst [vmem:[#allocation28_spill] sm:$0xff] %v18829_v45  ;;  %v8483_v58 = vsel %vm6913_vm4, %v8480_v60, %v8482_v20  ;;  %v8484_v3 = vrot.slane %v18829_v45, 2  ;;  %v18855_v45 = vld [vmem:[%s17886_s27 + $0xb8] sm:$0xff]  }
 0x1e4   : > { %20891 = vst [vmem:[#allocation33_spill] sm:$0xff] %v18855_v45 }
 0x1e5   : > { %v8485_v60 = vsel %vm6913_vm4, %v8482_v20, %v8484_v3  ;;  %v18867_v20 = vld [vmem:[%s17886_s27 + $0x1a0] sm:$0xff]  }
 0x1e6   : > { %20893 = vst [vmem:[#allocation35_spill] sm:$0xff] %v18867_v20 }
 0x1e7   : > { %15156 = vmatmul.mubr.msk.bf16.gmra.mrb[92].mxu1 %vm1255_vm2, %v18818_v54  ;;  %v8486_v54 = vrot.slane %v18833_v48, 2 }
 0x1e8   : > { %15159 = vmatprep.mubr.msk.bf16.mxu1 %vm1255_vm2, %v18823_v30  ;;  %v18840_v30 = vld [vmem:[%s17886_s27 + $0x188] sm:$0xff]  }
 0x1e9   : > { %20888 = vst [vmem:[#allocation30_spill] sm:$0xff] %v18840_v30 }
 0x1ea   : > { %15778 = vmatmul.mubr.msk.bf16.gmra.mrb[24].mxu0 %vm1255_vm2, %v8481_v43  ;;  %v18851_v43 = vld [vmem:[%s17886_s27 + $0xb0] sm:$0xff]  }
 0x1eb   : > { %15781 = vmatprep.mubr.msk.bf16.mxu0 %vm1255_vm2, %v8483_v58  ;;  %20890 = vst [vmem:[#allocation32_spill] sm:$0xff] %v18851_v43  ;;  %v8487_v58 = vsel %vm6913_vm4, %v8484_v3, %v8486_v54  ;;  %v8488_v48 = vrot.slane %v18851_v43, 2  ;;  %v17451_v43 = vld [vmem:[%s17886_s27 + $0xc8] sm:$0xff]  }
 0x1ed   : > { %v8489_v3 = vsel %vm6913_vm4, %v8486_v54, %v8488_v48 }
 0x1ef   : > { %15160 = vmatmul.mubr.msk.bf16.gmra.mrb[96].mxu1 %vm1255_vm2, %v18840_v30  ;;  %v8490_v30 = vrot.slane %v18855_v45, 2 }
 0x1f0   : > { %15163 = vmatprep.mubr.msk.bf16.mxu1 %vm1255_vm2, %v18845_v19  ;;  %v18862_v19 = vld [vmem:[%s17886_s27 + $0x198] sm:$0xff]  }
 0x1f1   : > { %20892 = vst [vmem:[#allocation34_spill] sm:$0xff] %v18862_v19 }
 0x1f2   : > { %15782 = vmatmul.mubr.msk.bf16.gmra.mrb[28].mxu0 %vm1255_vm2, %v8485_v60  ;;  %v17450_v60 = vld [vmem:[%s17886_s27 + $0xc0] sm:$0xff]  }
 0x1f3   : > { %15785 = vmatprep.mubr.msk.bf16.mxu0 %vm1255_vm2, %v8487_v58  ;;  %v8491_v58 = vsel %vm6913_vm4, %v8488_v48, %v8490_v30  ;;  %v8492_v45 = vrot.slane %v17450_v60, 2  ;;  %v17452_v48 = vld [vmem:[%s17886_s27 + $0xd0] sm:$0xff]   ;;  %v8498_v60 = vrot.slane %v17453_v44, 2 }
 0x1f5   : > { %v8493_v54 = vsel %vm6913_vm4, %v8490_v30, %v8492_v45 }
 0x1f7   : > { %15164 = vmatmul.mubr.msk.bf16.gmra.mrb[100].mxu1 %vm1255_vm2, %v18862_v19  ;;  %v8494_v19 = vrot.slane %v17451_v43, 2  ;;  %v8496_v43 = vrot.slane %v17452_v48, 2 }
 0x1f8   : > { %15167 = vmatprep.mubr.msk.bf16.mxu1 %vm1255_vm2, %v18867_v20  ;;  %v17591_v20 = vld [vmem:[%s17886_s27 + $0x1b0] sm:$0xff]  }
 0x1f9   : > { %v8497_v30 = vsel %vm6913_vm4, %v8494_v19, %v8496_v43 }
 0x1fa   : > { %15786 = vmatmul.mubr.msk.bf16.gmra.mrb[32].mxu0 %vm1255_vm2, %v8489_v3  ;;  %v8495_v3 = vsel %vm6913_vm4, %v8492_v45, %v8494_v19  ;;  %v17454_v45 = vld [vmem:[%s17886_s27 + $0xe0] sm:$0xff]  }
 0x1fb   : > { %15789 = vmatprep.mubr.msk.bf16.mxu0 %vm1255_vm2, %v8491_v58  ;;  %v18891_v58 = vld [vmem:[%s17886_s27 + $0x1b8] sm:$0xff]   ;;  %v8500_v44 = vrot.slane %v17454_v45, 2 }
 0x1fc   : > { %20895 = vst [vmem:[#allocation37_spill] sm:$0xff] %v18891_v58 }
 0x1fd   : > { %v8501_v19 = vsel %vm6913_vm4, %v8498_v60, %v8500_v44 }
 0x1ff   : > { %15168 = vmatmul.mubr.msk.bf16.gmra.mrb[104].mxu1 %vm1255_vm2, %v18878_v59  ;;  %v17455_v59 = vld [vmem:[%s17886_s27 + $0xe8] sm:$0xff]  }
 0x200   : > { %15171 = vmatprep.mubr.msk.bf16.mxu1 %vm1255_vm2, %v17591_v20  ;;  %v17593_v20 = vld [vmem:[%s17886_s27 + $0x1c0] sm:$0xff]   ;;  %v8502_v48 = vrot.slane %v17455_v59, 2 }
 0x202   : > { %15790 = vmatmul.mubr.msk.bf16.gmra.mrb[36].mxu0 %vm1255_vm2, %v8493_v54  ;;  %v8499_v54 = vsel %vm6913_vm4, %v8496_v43, %v8498_v60  ;;  %v8503_v43 = vsel %vm6913_vm4, %v8500_v44, %v8502_v48  ;;  %v17458_v60 = vld [vmem:[%s17886_s27 + $0x100] sm:$0xff]  }
 0x203   : > { %15793 = vmatprep.mubr.msk.bf16.mxu0 %vm1255_vm2, %v8495_v3  ;;  %v17594_v3 = vld [vmem:[%s17886_s27 + $0x1c8] sm:$0xff]   ;;  %v8508_v44 = vrot.slane %v17458_v60, 2  ;;  %v17595_v60 = vld [vmem:[%s17886_s27 + $0x4] sm:$0xf] }
 0x207   : > { %15172 = vmatmul.mubr.msk.bf16.gmra.mrb[108].mxu1 %vm1255_vm2, %v18891_v58  ;;  %v17457_v58 = vld [vmem:[%s17886_s27 + $0xf8] sm:$0xff]  }
 0x208   : > { %15175 = vmatprep.mubr.msk.bf16.mxu1 %vm1255_vm2, %v17593_v20  ;;  %v17456_v20 = vld [vmem:[%s17886_s27 + $0xf0] sm:$0xff]   ;;  %v8506_v59 = vrot.slane %v17457_v58, 2 }
 0x20a   : > { %15794 = vmatmul.mubr.msk.bf16.gmra.mrb[40].mxu0 %vm1255_vm2, %v8497_v30  ;;  %v8504_v30 = vrot.slane %v17456_v20, 2 }
 0x20b   : > { %15797 = vmatprep.mubr.msk.bf16.mxu0 %vm1255_vm2, %v8499_v54  ;;  %v17459_v54 = vld [vmem:[%s17886_s27 + $0x108] sm:$0xff]  }
 0x20c   : > { %v8507_v45 = vsel %vm6913_vm4, %v8504_v30, %v8506_v59  ;;  %v8510_v58 = vrot.slane %v17459_v54, 2  ;;  %v17464_v54 = vld [vmem:[%s17886_s27 + $0x130] sm:$0xff]  }
 0x20f   : > { %15176 = vmatmul.mubr.msk.bf16.gmra.mrb[112].mxu1 %vm1255_vm2, %v17594_v3  ;;  %v17461_v3 = vld [vmem:[%s17886_s27 + $0x118] sm:$0xff]  }
 0x210   : > { %15179 = vmatprep.mubr.msk.bf16.mxu1 %vm1255_vm2, %v18248_v53  ;;  %v8505_v53 = vsel %vm6913_vm4, %v8502_v48, %v8504_v30  ;;  %v8511_v48 = vsel %vm6913_vm4, %v8508_v44, %v8510_v58  ;;  %v8514_v20 = vrot.slane %v17461_v3, 2  ;;  %v17463_v30 = vld [vmem:[%s17886_s27 + $0x128] sm:$0xff]  }
 0x212   : > { %15798 = vmatmul.mubr.msk.bf16.gmra.mrb[44].mxu0 %vm1255_vm2, %v8501_v19 }
 0x213   : > { %15801 = vmatprep.mubr.msk.bf16.mxu0 %vm1255_vm2, %v8503_v43 }
 0x217   : > { %15180 = vmatmul.mubr.msk.bf16.gmra.mrb[116].mxu1 %vm1255_vm2, %v18257_v63  ;;  %v8509_v63 = vsel %vm6913_vm4, %v8506_v59, %v8508_v44  ;;  %v2757_v59 = vld [vmem:[%s17886_s27] sm:$0xe] }
 0x218   : > { %15183 = vmatprep.mubr.msk.bf16.mxu1 %vm1255_vm2, %v18265_v10  ;;  %v17460_v10 = vld [vmem:[%s17886_s27 + $0x110] sm:$0xff]  }
 0x219   : > { %v8512_v19 = vrot.slane %v17460_v10, 2  ;;  %v17466_v10 = vld [vmem:[%s17886_s27 + $0x138] sm:$0xff]  }
 0x21a   : > { %15802 = vmatmul.mubr.msk.bf16.gmra.mrb[48].mxu0 %vm1255_vm2, %v8505_v53 }
 0x21b   : > { %15805 = vmatprep.mubr.msk.bf16.mxu0 %vm1255_vm2, %v8507_v45  ;;  %v8515_v43 = vsel %vm6913_vm4, %v8512_v19, %v8514_v20  ;;  %v13402_v45 = vcombine.low %v2757_v59, %v17595_v60  ;;  %v17469_v60 = vld [vmem:[%s17886_s27 + $0x150] sm:$0xff]  }
 0x21d   : > { %v2764_v44 = vrot.slane %v13402_v45, 1  ;;  %v2773_v45 = vrot.slane %v18423_v31, 1 }
 0x21f   : > { %15184 = vmatmul.mubr.msk.bf16.gmra.mrb[120].mxu1 %vm1255_vm2, %v18276_v21  ;;  %v8513_v21 = vsel %vm6913_vm4, %v8510_v58, %v8512_v19  ;;  %v2765_v58 = vrot.slane %v18384_v13, 1  ;;  %v2767_v13 = vrot.slane %v18389_v9, 1  ;;  %v17467_v19 = vld [vmem:[%s17886_s27 + $0x140] sm:$0xff]  }
 0x220   : > { %15187 = vmatprep.mubr.msk.bf16.mxu1 %vm1255_vm2, %v18293_v36  ;;  %v17462_v36 = vld [vmem:[%s17886_s27 + $0x120] sm:$0xff]   ;;  %v8524_v9 = vrot.slane %v17467_v19, 2 }
 0x221   : > { %v8516_v53 = vrot.slane %v17462_v36, 2  ;;  %v17468_v36 = vld [vmem:[%s17886_s27 + $0x148] sm:$0xff]  }
 0x222   : > { %15806 = vmatmul.mubr.msk.bf16.gmra.mrb[52].mxu0 %vm1255_vm2, %v8509_v63  ;;  %v8526_v59 = vrot.slane %v17468_v36, 2  ;;  %v17473_v36 = vld [vmem:[%s17886_s27 + $0x170] sm:$0xff]  }
 0x223   : > { %15809 = vmatprep.mubr.msk.bf16.mxu0 %vm1255_vm2, %v8511_v48  ;;  %v2766_v48 = vsel %vm2763_vm5, %v2764_v44, %v2765_v58  ;;  %v18991_v44 = vld [vmem:[%s20803_s1 + $0x20] sm:$0xf] }
 0x224   : > { %17264 = vmatprep.subr.msk.bf16.mxu0 %vm1460_vm0, %v18991_v44 }
 0x227   : > { %15188 = vmatmul.mubr.msk.bf16.gmra.mrb[124].mxu1 %vm1255_vm2, %v18298_v41  ;;  %v8518_v41 = vrot.slane %v17463_v30, 2 }
 0x228   : > { %15191 = vmatprep.mubr.msk.bf16.mxu1 %vm1255_vm2, %v18313_v57  ;;  %v8517_v57 = vsel %vm6913_vm4, %v8514_v20, %v8516_v53  ;;  %v2769_v20 = vrot.slane %v18407_v24, 1  ;;  %v2771_v24 = vrot.slane %v18412_v25, 1 }
 0x229   : > { %v8519_v63 = vsel %vm6913_vm4, %v8516_v53, %v8518_v41 }
 0x22a   : > { %15810 = vmatmul.mubr.msk.bf16.gmra.mrb[56].mxu0 %vm1255_vm2, %v8513_v21  ;;  %v2770_v30 = vsel %vm2763_vm5, %v2767_v13, %v2769_v20  ;;  %v2772_v25 = vsel %vm2763_vm5, %v2769_v20, %v2771_v24  ;;  %v2774_v31 = vsel %vm2763_vm5, %v2771_v24, %v2773_v45 }
 0x22b   : > { %15813 = vmatprep.mubr.msk.bf16.mxu0 %vm1255_vm2, %v8515_v43  ;;  %v2768_v43 = vsel %vm2763_vm5, %v2765_v58, %v2767_v13  ;;  %v17472_v13 = vld [vmem:[%s17886_s27 + $0x168] sm:$0xff]  }
 0x22f   : > { %15192 = vmatmul.mubr.msk.bf16.gmra.mrb[128].mxu1 %vm1255_vm2, %v18318_v62  ;;  %v8520_v62 = vrot.slane %v17464_v54, 2  ;;  %v8528_v54 = vrot.slane %v17469_v60, 2  ;;  %v17475_v60 = vld [vmem:[%s17886_s27 + $0x180] sm:$0xff]  }
 0x230   : > { %15195 = vmatprep.mubr.msk.bf16.mxu1 %vm1255_vm2, %v18333_v16  ;;  %v8522_v16 = vrot.slane %v17466_v10, 2 }
 0x231   : > { %v8521_v3 = vsel %vm6913_vm4, %v8518_v41, %v8520_v62  ;;  %v8527_v41 = vsel %vm6913_vm4, %v8524_v9, %v8526_v59  ;;  %v8529_v10 = vsel %vm6913_vm4, %v8526_v59, %v8528_v54  ;;  %v8536_v59 = vrot.slane %v17473_v36, 2 }
 0x232   : > { %15814 = vmatmul.mubr.msk.bf16.gmra.mrb[60].mxu0 %vm1255_vm2, %v8517_v57  ;;  %v8523_v21 = vsel %vm6913_vm4, %v8520_v62, %v8522_v16  ;;  %v8525_v53 = vsel %vm6913_vm4, %v8522_v16, %v8524_v9  ;;  %v17470_v57 = vld [vmem:[%s17886_s27 + $0x158] sm:$0xff]   ;;  %v17471_v62 = vld [vmem:[%s17886_s27 + $0x160] sm:$0xff]  }
 0x233   : > { %15817 = vmatprep.mubr.msk.bf16.mxu0 %vm1255_vm2, %v8519_v63  ;;  %v8530_v58 = vrot.slane %v17470_v57, 2  ;;  %v2775_v63 = vrot.slane %v18428_v32, 1  ;;  %v8532_v19 = vrot.slane %v17471_v62, 2  ;;  %v8534_v32 = vrot.slane %v17472_v13, 2  ;;  %v17474_v9 = vld [vmem:[%s17886_s27 + $0x178] sm:$0xff]  }
 0x234   : > { %v17478_v62 = vld [vmem:[%s17886_s27 + $0x198] sm:$0xff]  }
 0x235   : > { %v8531_v16 = vsel %vm6913_vm4, %v8528_v54, %v8530_v58 }
 0x237   : > { %15196 = vmatmul.mubr.msk.bf16.gmra.mrb[132].mxu1 %vm1255_vm2, %v18338_v23  ;;  %v4645_v23 = vsel %vm1460_vm0, %v18700_v14, 0  ;;  %v17596_v14 = vld [vmem:[%s20803_s1 + $0x10] sm:$0xf] }
 0x238   : > { %15201 = vmatprep.mubr.msk.bf16.mxu1 %vm1255_vm2, %v2766_v48  ;;  %v2777_v48 = vrot.slane %v18439_v40, 1  ;;  %v2779_v40 = vrot.slane %v18444_v42, 1  ;;  %v8538_v42 = vrot.slane %v17474_v9, 2  ;;  %v17481_v9 = vld [vmem:[%s17886_s27 + $0x1b0] sm:$0xff]  }
 0x23a   : > { %15818 = vmatmul.mubr.msk.bf16.gmra.mrb[64].mxu0 %vm1255_vm2, %v8521_v3  ;;  %v2776_v3 = vsel %vm2763_vm5, %v2773_v45, %v2775_v63  ;;  %v2778_v20 = vsel %vm2763_vm5, %v2775_v63, %v2777_v48  ;;  %v2785_v45 = vrot.slane %v18471_v61, 1  ;;  %v2787_v61 = vrot.slane %v18476_v0, 1 }
 0x23b   : > { %15821 = vmatprep.mubr.msk.bf16.mxu0 %vm1255_vm2, %v8523_v21  ;;  %v8533_v21 = vsel %vm6913_vm4, %v8530_v58, %v8532_v19  ;;  %v17477_v58 = vld [vmem:[%s17886_s27 + $0x190] sm:$0xff]   ;;  %v2789_v63 = vrot.slane %v18487_v8, 1  ;;  %v8546_v0 = vrot.slane %v17478_v62, 2  ;;  %v2791_v8 = vrot.slane %v18492_v11, 1 }
 0x23d   : > { %v2790_v13 = vsel %vm2763_vm5, %v2787_v61, %v2789_v63 }
 0x23f   : > { %15202 = vmatmul.mubr.msk.bf16.vlgmr.msra.gmra.mrb[0].mxu1 %vm1255_vm2, %v2768_v43  ;;  %v2781_v43 = vrot.slane %v18455_v50, 1  ;;  %v2783_v50 = vrot.slane %v18460_v51, 1 }
 0x240   : > { %15338 = vmatpush3.bf16.msra.mxu1 %v4645_v23  ;;  %15205 = vmatprep.mubr.msk.bf16.mxu1 %vm1255_vm2, %v2770_v30  ;;  %v8535_v23 = vsel %vm6913_vm4, %v8532_v19, %v8534_v32  ;;  %v2780_v30 = vsel %vm2763_vm5, %v2777_v48, %v2779_v40  ;;  %v2788_v48 = vsel %vm2763_vm5, %v2785_v45, %v2787_v61  ;;  %v17479_v19 = vld [vmem:[%s17886_s27 + $0x1a0] sm:$0xff]  }
 0x241   : > { %17260 = vmatprep.subr.msk.bf16.mxu1 %vm1460_vm0, %v17596_v14  ;;  %v2782_v24 = vsel %vm2763_vm5, %v2779_v40, %v2781_v43  ;;  %v8539_v14 = vsel %vm6913_vm4, %v8536_v59, %v8538_v42  ;;  %v2784_v57 = vsel %vm2763_vm5, %v2781_v43, %v2783_v50  ;;  %v2786_v54 = vsel %vm2763_vm5, %v2783_v50, %v2785_v45  ;;  %v17480_v40 = vld [vmem:[%s17886_s27 + $0x1a8] sm:$0xff]   ;;  %v17483_v45 = vld [vmem:[%s17886_s27 + $0x1c0] sm:$0xff]  }
 0x242   : > { %15822 = vmatmul.mubr.msk.bf16.gmra.mrb[68].mxu0 %vm1255_vm2, %v8525_v53  ;;  %v8537_v53 = vsel %vm6913_vm4, %v8534_v32, %v8536_v59  ;;  %v8548_v36 = vrot.slane %v17479_v19, 2  ;;  %v8550_v11 = vrot.slane %v17480_v40, 2  ;;  %v8552_v50 = vrot.slane %v17481_v9, 2  ;;  %v17488_v19 = vld [vmem:[%s17886_s27 + $0x1e8] sm:$0xff]  }
 0x243   : > { %15825 = vmatprep.mubr.msk.bf16.mxu0 %vm1255_vm2, %v8527_v41  ;;  %v17476_v41 = vld [vmem:[%s17886_s27 + $0x188] sm:$0xff]  }
 0x244   : > { %v8542_v51 = vrot.slane %v17476_v41, 2  ;;  %v8551_v59 = vsel %vm6913_vm4, %v8548_v36, %v8550_v11 }
 0x247   : > { %15206 = vmatmul.mubr.msk.bf16.gmra.mrb[4].mxu1 %vm1255_vm2, %v2772_v25  ;;  %v8540_v25 = vrot.slane %v17475_v60, 2  ;;  %v8553_v60 = vsel %vm6913_vm4, %v8550_v11, %v8552_v50 }
 0x248   : > { %15209 = vmatprep.mubr.msk.bf16.mxu1 %vm1255_vm2, %v2774_v31 }
 0x249   : > { %v8541_v31 = vsel %vm6913_vm4, %v8538_v42, %v8540_v25 }
 0x24a   : > { %15826 = vmatmul.mubr.msk.bf16.gmra.mrb[72].mxu0 %vm1255_vm2, %v8529_v10  ;;  %v8543_v10 = vsel %vm6913_vm4, %v8540_v25, %v8542_v51 }
 0x24b   : > { %15829 = vmatprep.mubr.msk.bf16.mxu0 %vm1255_vm2, %v8531_v16  ;;  %v8544_v16 = vrot.slane %v17477_v58, 2  ;;  %v2805_v58 = vrot.slane %v18551_v1, 1  ;;  %v2807_v1 = vrot.slane %v18556_v2, 1  ;;  %v8566_v2 = vrot.slane %v17488_v19, 2 }
 0x24d   : > { %v8547_v32 = vsel %vm6913_vm4, %v8544_v16, %v8546_v0 }
 0x24f   : > { %15210 = vmatmul.mubr.msk.bf16.gmra.mrb[8].mxu1 %vm1255_vm2, %v2776_v3  ;;  %v8545_v3 = vsel %vm6913_vm4, %v8542_v51, %v8544_v16 }
 0x250   : > { %15213 = vmatprep.mubr.msk.bf16.mxu1 %vm1255_vm2, %v2778_v20  ;;  %v2793_v20 = vrot.slane %v18503_v26, 1  ;;  %v2795_v26 = vrot.slane %v18508_v27, 1 }
 0x252   : > { %15830 = vmatmul.mubr.msk.bf16.gmra.mrb[76].mxu0 %vm1255_vm2, %v8533_v21  ;;  %v2792_v21 = vsel %vm2763_vm5, %v2789_v63, %v2791_v8  ;;  %v2794_v43 = vsel %vm2763_vm5, %v2791_v8, %v2793_v20  ;;  %v2796_v42 = vsel %vm2763_vm5, %v2793_v20, %v2795_v26  ;;  %v2809_v8 = vrot.slane %v18567_v28, 1 }
 0x253   : > { %15833 = vmatprep.mubr.msk.bf16.mxu0 %vm1255_vm2, %v8535_v23  ;;  %v8549_v23 = vsel %vm6913_vm4, %v8546_v0, %v8548_v36  ;;  %v17487_v0 = vld [vmem:[%s17886_s27 + $0x1e0] sm:$0xff]   ;;  %v2808_v20 = vsel %vm2763_vm5, %v2805_v58, %v2807_v1  ;;  %v2811_v28 = vrot.slane %v18572_v17, 1  ;;  %v17489_v36 = vld [vmem:[%s17886_s27 + $0x1f0] sm:$0xff]  }
 0x254   : > { %v2810_v40 = vsel %vm2763_vm5, %v2807_v1, %v2809_v8  ;;  %v8568_v9 = vrot.slane %v17489_v36, 2  ;;  %v2829_v1 = vrot.slane %v18655_v4, 1  ;;  %v9526_v4 = vshrl.u32 %v18648_v56, 16  ;;  %v17499_v36 = vld [vmem:[%s17886_s27 + $0x240] ss:$0 sps:$4 sm:$0x33]  }
 0x257   : > { %15214 = vmatmul.mubr.msk.bf16.gmra.mrb[12].mxu1 %vm1255_vm2, %v2780_v30  ;;  %v2797_v30 = vrot.slane %v18519_v35, 1  ;;  %v2799_v35 = vrot.slane %v18524_v37, 1 }
 0x258   : > { %15217 = vmatprep.mubr.msk.bf16.mxu1 %vm1255_vm2, %v2782_v24  ;;  %v17482_v24 = vld [vmem:[%s17886_s27 + $0x1b8] sm:$0xff]  }
 0x259   : > { %v8554_v27 = vrot.slane %v17482_v24, 2  ;;  %v2800_v25 = vsel %vm2763_vm5, %v2797_v30, %v2799_v35  ;;  %v17491_v24 = vld [vmem:[%s17886_s27 + $0x200] sm:$0xff]  }
 0x25a   : > { %15834 = vmatmul.mubr.msk.bf16.gmra.mrb[80].mxu0 %vm1255_vm2, %v8537_v53  ;;  %v2798_v53 = vsel %vm2763_vm5, %v2795_v26, %v2797_v30  ;;  %v17490_v26 = vld [vmem:[%s17886_s27 + $0x1f8] sm:$0xff]  }
 0x25b   : > { %15837 = vmatprep.mubr.msk.bf16.mxu0 %vm1255_vm2, %v8539_v14  ;;  %v2801_v14 = vrot.slane %v18535_v47, 1  ;;  %v8555_v41 = vsel %vm6913_vm4, %v8552_v50, %v8554_v27  ;;  %v2803_v47 = vrot.slane %v18540_v49, 1  ;;  %v8570_v17 = vrot.slane %v17490_v26, 2 }
 0x25d   : > { %v2802_v51 = vsel %vm2763_vm5, %v2799_v35, %v2801_v14  ;;  %v2804_v62 = vsel %vm2763_vm5, %v2801_v14, %v2803_v47  ;;  %v2806_v16 = vsel %vm2763_vm5, %v2803_v47, %v2805_v58  ;;  %v8571_v50 = vsel %vm6913_vm4, %v8568_v9, %v8570_v17  ;;  %v17493_v14 = vld [vmem:[%s17886_s27 + $0x210] sm:$0xff]  }
 0x25e   : > { %v8572_v35 = vrot.slane %v17491_v24, 2  ;;  %v9547_v24 = vshll.u32 %v18670_v22, 16 }
 0x25f   : > { %15218 = vmatmul.mubr.msk.bf16.gmra.mrb[16].mxu1 %vm1255_vm2, %v2784_v57  ;;  %v17484_v57 = vld [vmem:[%s17886_s27 + $0x1c8] sm:$0xff]  }
 0x260   : > { %15221 = vmatprep.mubr.msk.bf16.mxu1 %vm1255_vm2, %v2786_v54  ;;  %v8556_v54 = vrot.slane %v17483_v45, 2  ;;  %v8558_v37 = vrot.slane %v17484_v57, 2  ;;  %v8573_v45 = vsel %vm6913_vm4, %v8570_v17, %v8572_v35  ;;  %v9538_v17 = vshll.u32 %v18666_v15, 16 }
 0x262   : > { %15838 = vmatmul.mubr.msk.bf16.gmra.mrb[84].mxu0 %vm1255_vm2, %v8541_v31  ;;  %v8557_v61 = vsel %vm6913_vm4, %v8554_v27, %v8556_v54  ;;  %v17485_v31 = vld [vmem:[%s17886_s27 + $0x1d0] sm:$0xff]   ;;  %v8559_v63 = vsel %vm6913_vm4, %v8556_v54, %v8558_v37 }
 0x263   : > { %15841 = vmatprep.mubr.msk.bf16.mxu0 %vm1255_vm2, %v8543_v10  ;;  %v17486_v10 = vld [vmem:[%s17886_s27 + $0x1d8] sm:$0xff]  }
 0x264   : > { %v8562_v49 = vrot.slane %v17486_v10, 2 }
 0x267   : > { %15222 = vmatmul.mubr.msk.bf16.gmra.mrb[20].mxu1 %vm1255_vm2, %v2788_v48  ;;  %v8560_v48 = vrot.slane %v17485_v31, 2  ;;  %v2825_v31 = vrot.slane %v18631_v29, 1 }
 0x268   : > { %15225 = vmatprep.mubr.msk.bf16.mxu1 %vm1255_vm2, %v2790_v13 }
 0x269   : > { %v8561_v13 = vsel %vm6913_vm4, %v8558_v37, %v8560_v48 }
 0x26a   : > { %15842 = vmatmul.mubr.msk.bf16.gmra.mrb[88].mxu0 %vm1255_vm2, %v8545_v3  ;;  %v8563_v3 = vsel %vm6913_vm4, %v8560_v48, %v8562_v49 }
 0x26b   : > { %15845 = vmatprep.mubr.msk.bf16.mxu0 %vm1255_vm2, %v8547_v32  ;;  %v8564_v32 = vrot.slane %v17487_v0, 2 }
 0x26d   : > { %v8567_v11 = vsel %vm6913_vm4, %v8564_v32, %v8566_v2 }
 0x26f   : > { %15226 = vmatmul.mubr.msk.bf16.gmra.mrb[24].mxu1 %vm1255_vm2, %v2792_v21  ;;  %v8565_v21 = vsel %vm6913_vm4, %v8562_v49, %v8564_v32  ;;  %v17497_v49 = vld [vmem:[%s17886_s27 + $0x230] sm:$0xff]   ;;  %v9521_v32 = vshll.u32 %v18645_v46, 16 }
 0x270   : > { %15229 = vmatprep.mubr.msk.bf16.mxu1 %vm1255_vm2, %v2794_v43  ;;  %v2813_v43 = vrot.slane %v18583_v33, 1  ;;  %v2815_v33 = vrot.slane %v18588_v34, 1 }
 0x271   : > { %v9523_v26 = vrot.slane %v9521_v32, 3 }
 0x272   : > { %15846 = vmatmul.mubr.msk.bf16.gmra.mrb[92].mxu0 %vm1255_vm2, %v8549_v23  ;;  %v2812_v23 = vsel %vm2763_vm5, %v2809_v8, %v2811_v28  ;;  %v2814_v30 = vsel %vm2763_vm5, %v2811_v28, %v2813_v43  ;;  %v2816_v27 = vsel %vm2763_vm5, %v2813_v43, %v2815_v33  ;;  %v2833_v43 = vrot.slane %v18677_v38, 1 }
 0x273   : > { %15849 = vmatprep.mubr.msk.bf16.mxu0 %vm1255_vm2, %v8551_v59  ;;  %v8569_v59 = vsel %vm6913_vm4, %v8566_v2, %v8568_v9  ;;  %v2831_v2 = vrot.slane %v18660_v5, 1  ;;  %v8588_v9 = vrot.slane %v17499_v36, 2  ;;  %v9544_v38 = vshrl.u32 %v18670_v22, 16 }
 0x275   : > { %v2834_v5 = vsel %vm2763_vm5, %v2831_v2, %v2833_v43 }
 0x277   : > { %15230 = vmatmul.mubr.msk.bf16.gmra.mrb[28].mxu1 %vm1255_vm2, %v2796_v42  ;;  %v2817_v42 = vrot.slane %v18599_v52, 1  ;;  %v2819_v52 = vrot.slane %v18604_v55, 1 }
 0x278   : > { %15233 = vmatprep.mubr.msk.bf16.mxu1 %vm1255_vm2, %v2798_v53  ;;  %v17492_v53 = vld [vmem:[%s17886_s27 + $0x208] sm:$0xff]  }
 0x279   : > { %v8574_v34 = vrot.slane %v17492_v53, 2  ;;  %v2820_v54 = vsel %vm2763_vm5, %v2817_v42, %v2819_v52 }
 0x27a   : > { %15850 = vmatmul.mubr.msk.bf16.gmra.mrb[96].mxu0 %vm1255_vm2, %v8553_v60  ;;  %v2818_v60 = vsel %vm2763_vm5, %v2815_v33, %v2817_v42  ;;  %v2835_v42 = vrot.slane %v18682_v12, 1  ;;  %v20896_v12 = vld [vmem:[#allocation5_spill] sm:$0xff] }
 0x27b   : > { %15853 = vmatprep.mubr.msk.bf16.mxu0 %vm1255_vm2, %v8555_v41  ;;  %v2821_v41 = vrot.slane %v18615_v6, 1  ;;  %v8575_v57 = vsel %vm6913_vm4, %v8572_v35, %v8574_v34  ;;  %v2823_v6 = vrot.slane %v18620_v7, 1  ;;  %v2837_v35 = vrot.slane %v18708_v18, 1 }
 0x27c   : > { %v2836_v22 = vsel %vm2763_vm5, %v2833_v43, %v2835_v42 }
 0x27d   : > { %v2822_v37 = vsel %vm2763_vm5, %v2819_v52, %v2821_v41  ;;  %v2824_v10 = vsel %vm2763_vm5, %v2821_v41, %v2823_v6  ;;  %v2826_v48 = vsel %vm2763_vm5, %v2823_v6, %v2825_v31  ;;  %v9556_v41 = vshll.u32 %v20896_v12, 16 }
 0x27f   : > { %15234 = vmatmul.mubr.msk.bf16.gmra.mrb[32].mxu1 %vm1255_vm2, %v2800_v25  ;;  %v17494_v25 = vld [vmem:[%s17886_s27 + $0x218] sm:$0xff]  }
 0x280   : > { %15237 = vmatprep.mubr.msk.bf16.mxu1 %vm1255_vm2, %v2802_v51  ;;  %v8576_v51 = vrot.slane %v17493_v14, 2  ;;  %v8578_v55 = vrot.slane %v17494_v25, 2  ;;  %v9553_v14 = vshrl.u32 %v20896_v12, 16  ;;  %v20897_v25 = vld [vmem:[#allocation6_spill] sm:$0xff] }
 0x281   : > { %v9562_v18 = vshrl.u32 %v20897_v25, 16 }
 0x282   : > { %15854 = vmatmul.mubr.msk.bf16.gmra.mrb[100].mxu0 %vm1255_vm2, %v8557_v61  ;;  %v8577_v47 = vsel %vm6913_vm4, %v8574_v34, %v8576_v51  ;;  %v17495_v61 = vld [vmem:[%s17886_s27 + $0x220] sm:$0xff]   ;;  %v8579_v58 = vsel %vm6913_vm4, %v8576_v51, %v8578_v55  ;;  %v9549_v34 = vrot.slane %v9547_v24, 3  ;;  %v20898_v51 = vld [vmem:[#allocation7_spill] sm:$0xff]  ;;  %v9555_v6 = vrot.slane %v9553_v14, 2  ;;  %v20909_v14 = vld [vmem:[#allocation17_spill] sm:$0xff] }
 0x283   : > { %15857 = vmatprep.mubr.msk.bf16.mxu0 %vm1255_vm2, %v8559_v63  ;;  %v17496_v63 = vld [vmem:[%s17886_s27 + $0x228] sm:$0xff]  }
 0x284   : > { %v8582_v7 = vrot.slane %v17496_v63, 2 }
 0x287   : > { %15238 = vmatmul.mubr.msk.bf16.gmra.mrb[36].mxu1 %vm1255_vm2, %v2804_v62  ;;  %v8580_v62 = vrot.slane %v17495_v61, 2  ;;  %v20899_v61 = vld [vmem:[#allocation10_spill] sm:$0xff] }
 0x288   : > { %15241 = vmatprep.mubr.msk.bf16.mxu1 %vm1255_vm2, %v2806_v16  ;;  %v2827_v16 = vrot.slane %v18638_v39, 1  ;;  %v9518_v39 = vshrl.u32 %v18645_v46, 16  ;;  %v9528_v46 = vrot.slane %v9526_v4, 2  ;;  %v20903_v4 = vld [vmem:[#allocation14_spill] sm:$0xff] }
 0x289   : > { %v8581_v29 = vsel %vm6913_vm4, %v8578_v55, %v8580_v62  ;;  %v8583_v0 = vsel %vm6913_vm4, %v8580_v62, %v8582_v7 }
 0x28a   : > { %15858 = vmatmul.mubr.msk.bf16.gmra.mrb[104].mxu0 %vm1255_vm2, %v8561_v13  ;;  %v17498_v13 = vld [vmem:[%s17886_s27 + $0x238] sm:$0xff]   ;;  %v2828_v8 = vsel %vm2763_vm5, %v2825_v31, %v2827_v16  ;;  %v2830_v19 = vsel %vm2763_vm5, %v2827_v16, %v2829_v1  ;;  %v2841_v31 = vrot.slane %v20899_v61, 1 }
 0x28b   : > { %15861 = vmatprep.mubr.msk.bf16.mxu0 %vm1255_vm2, %v8563_v3  ;;  %v8584_v3 = vrot.slane %v17497_v49, 2 }
 0x28d   : > { %v8585_v28 = vsel %vm6913_vm4, %v8582_v7, %v8584_v3 }
 0x28f   : > { %15242 = vmatmul.mubr.msk.bf16.gmra.mrb[40].mxu1 %vm1255_vm2, %v2808_v20  ;;  %v8586_v20 = vrot.slane %v17498_v13, 2 }
 0x290   : > { %15245 = vmatprep.mubr.msk.bf16.mxu1 %vm1255_vm2, %v2810_v40  ;;  %v9529_v40 = vshll.u32 %v18648_v56, 16  ;;  %v2832_v56 = vsel %vm2763_vm5, %v2829_v1, %v2831_v2 }
 0x292   : > { %15862 = vmatmul.mubr.msk.bf16.gmra.mrb[108].mxu0 %vm1255_vm2, %v8565_v21  ;;  %v8587_v21 = vsel %vm6913_vm4, %v8584_v3, %v8586_v20  ;;  %v20902_v3 = vld [vmem:[#allocation11_spill] sm:$0xff] }
 0x293   : > { %15865 = vmatprep.mubr.msk.bf16.mxu0 %vm1255_vm2, %v8567_v11  ;;  %v9520_v11 = vrot.slane %v9518_v39, 2 }
 0x295   : > { %v9524_v33 = vor.u32 %v9523_v26, %v9520_v11  ;;  %v20904_v26 = vld [vmem:[#allocation12_spill] sm:$0xff] }
 0x297   : > { %15246 = vmatmul.mubr.msk.bf16.gmra.mrb[44].mxu1 %vm1255_vm2, %v2812_v23  ;;  %v9531_v23 = vrot.slane %v9529_v40, 3  ;;  %v2845_v40 = vrot.slane %v20903_v4, 1 }
 0x298   : > { %15249 = vmatprep.mubr.msk.bf16.mxu1 %vm1255_vm2, %v2814_v30  ;;  %v9535_v30 = vshrl.u32 %v18666_v15, 16 }
 0x29a   : > { %15866 = vmatmul.mubr.msk.bf16.gmra.mrb[112].mxu0 %vm1255_vm2, %v8569_v59  ;;  %v9532_v59 = vor.u32 %v9531_v23, %v9528_v46  ;;  %v9537_v53 = vrot.slane %v9535_v30, 2  ;;  %v9589_v46 = vshrl.u32 %v20904_v26, 16  ;;  %v9592_v23 = vshll.u32 %v20904_v26, 16  ;;  %v20917_v26 = vld [vmem:[#allocation25_spill] sm:$0xff] }
 0x29b   : > { %15869 = vmatprep.mubr.msk.bf16.mxu0 %vm1255_vm2, %v8571_v50  ;;  %v8589_v50 = vsel %vm6913_vm4, %v8586_v20, %v8588_v9  ;;  %v20905_v9 = vld [vmem:[#allocation13_spill] sm:$0xff] }
 0x29c   : > { %v9533_v15 = vsel %vm9516_vm6, %v9524_v33, %v9532_v59  ;;  %v9601_v30 = vshll.u32 %v20905_v9, 16  ;;  %v9594_v24 = vrot.slane %v9592_v23, 3  ;;  %v9655_v23 = vshll.u32 %v20917_v26, 16 }
 0x29f   : > { %15250 = vmatmul.mubr.msk.bf16.gmra.mrb[48].mxu1 %vm1255_vm2, %v2816_v27  ;;  %v9540_v27 = vrot.slane %v9538_v17, 3  ;;  %v20906_v17 = vld [vmem:[#allocation15_spill] sm:$0xff] }
 0x2a0   : > { %15253 = vmatprep.mubr.msk.bf16.mxu1 %vm1255_vm2, %v2818_v60  ;;  %v9546_v60 = vrot.slane %v9544_v38, 2  ;;  %v2847_v33 = vrot.slane %v20906_v17, 1  ;;  %v9591_v38 = vrot.slane %v9589_v46, 2  ;;  %v9652_v46 = vshrl.u32 %v20917_v26, 16 }
 0x2a1   : > { %v9541_v52 = vor.u32 %v9540_v27, %v9537_v53 }
 0x2a2   : > { %15870 = vmatmul.mubr.msk.bf16.gmra.mrb[116].mxu0 %vm1255_vm2, %v8573_v45  ;;  %v2838_v45 = vsel %vm2763_vm5, %v2835_v42, %v2837_v35  ;;  %v20907_v42 = vld [vmem:[#allocation18_spill] sm:$0xff] }
 0x2a3   : > { %15873 = vmatprep.mubr.msk.bf16.mxu0 %vm1255_vm2, %v8575_v57  ;;  %v9550_v57 = vor.u32 %v9549_v34, %v9546_v60  ;;  %v9542_v55 = vsel %vm9516_vm6, %v9532_v59, %v9541_v52  ;;  %v9595_v60 = vor.u32 %v9594_v24, %v9591_v38  ;;  %v9654_v24 = vrot.slane %v9652_v46, 2 }
 0x2a5   : > { %v9551_v63 = vsel %vm9516_vm6, %v9541_v52, %v9550_v57 }
 0x2a7   : > { %15254 = vmatmul.mubr.msk.bf16.gmra.mrb[52].mxu1 %vm1255_vm2, %v2820_v54  ;;  %v9565_v54 = vshll.u32 %v20897_v25, 16  ;;  %v20910_v25 = vld [vmem:[#allocation19_spill] sm:$0xff] }
 0x2a8   : > { %15257 = vmatprep.mubr.msk.bf16.mxu1 %vm1255_vm2, %v2822_v37  ;;  %v2839_v37 = vrot.slane %v20898_v51, 1 }
 0x2a9   : > { %v9567_v62 = vrot.slane %v9565_v54, 3 }
 0x2aa   : > { %15874 = vmatmul.mubr.msk.bf16.gmra.mrb[120].mxu0 %vm1255_vm2, %v8577_v47  ;;  %v9558_v47 = vrot.slane %v9556_v41, 3  ;;  %v2842_v16 = vsel %vm2763_vm5, %v2839_v37, %v2841_v31  ;;  %v9616_v41 = vshrl.u32 %v20909_v14, 16 }
 0x2ab   : > { %15877 = vmatprep.mubr.msk.bf16.mxu0 %vm1255_vm2, %v8579_v58  ;;  %v11406_v58 = vsel %vm1460_vm0, %v18991_v44, 0  ;;  %v20901_v44 = vld [vmem:[#allocation9_spill] sm:$0xff] }
 0x2ac   : > { %v9559_v7 = vor.u32 %v9558_v47, %v9555_v6  ;;  %v9618_v61 = vrot.slane %v9616_v41, 2 }
 0x2ae   : > { %v9560_v20 = vsel %vm9516_vm6, %v9550_v57, %v9559_v7  ;;  %v9619_v57 = vshll.u32 %v20909_v14, 16 }
 0x2af   : > { %15258 = vmatmul.mubr.msk.bf16.gmra.mrb[56].mxu1 %vm1255_vm2, %v2824_v10  ;;  %v9564_v10 = vrot.slane %v9562_v18, 2  ;;  %v2851_v18 = vrot.slane %v20910_v25, 1 }
 0x2b0   : > { %15261 = vmatprep.mubr.msk.bf16.mxu1 %vm1255_vm2, %v2826_v48  ;;  %v2840_v48 = vsel %vm2763_vm5, %v2837_v35, %v2839_v37  ;;  %v9603_v35 = vrot.slane %v9601_v30, 3 }
 0x2b1   : > { %v9568_v13 = vor.u32 %v9567_v62, %v9564_v10  ;;  %v20912_v62 = vld [vmem:[#allocation20_spill] sm:$0xff] }
 0x2b2   : > { %15878 = vmatmul.mubr.msk.bf16.gmra.mrb[124].mxu0 %vm1255_vm2, %v8581_v29  ;;  %v20900_v29 = vld [vmem:[#allocation8_spill] sm:$0xff] }
 0x2b3   : > { %15881 = vmatprep.mubr.msk.bf16.mxu0 %vm1255_vm2, %v8583_v0  ;;  %v9571_v49 = vshrl.u32 %v20900_v29, 16  ;;  %v9574_v1 = vshll.u32 %v20900_v29, 16  ;;  %v9580_v0 = vshrl.u32 %v20901_v44, 16  ;;  %v9569_v2 = vsel %vm9516_vm6, %v9559_v7, %v9568_v13  ;;  %v20913_v29 = vld [vmem:[#allocation21_spill] sm:$0xff] }
 0x2b4   : > { %v9628_v7 = vshll.u32 %v20912_v62, 16 }
 0x2b5   : > { %v9573_v39 = vrot.slane %v9571_v49, 2  ;;  %v9576_v32 = vrot.slane %v9574_v1, 3  ;;  %v9634_v49 = vshrl.u32 %v20913_v29, 16  ;;  %v9637_v1 = vshll.u32 %v20913_v29, 16 }
 0x2b7   : > { %15262 = vmatmul.mubr.msk.bf16.gmra.mrb[60].mxu1 %vm1255_vm2, %v2828_v8  ;;  %v9583_v8 = vshll.u32 %v20901_v44, 16  ;;  %v9577_v43 = vor.u32 %v9576_v32, %v9573_v39  ;;  %v9636_v32 = vrot.slane %v9634_v49, 2  ;;  %v9639_v4 = vrot.slane %v9637_v1, 3 }
 0x2b8   : > { %15265 = vmatprep.mubr.msk.bf16.mxu1 %vm1255_vm2, %v2830_v19  ;;  %v2843_v19 = vrot.slane %v20902_v3, 1  ;;  %v9630_v3 = vrot.slane %v9628_v7, 3 }
 0x2b9   : > { %v9578_v59 = vsel %vm9516_vm6, %v9568_v13, %v9577_v43  ;;  %v20914_v13 = vld [vmem:[#allocation23_spill] sm:$0xff] }
 0x2ba   : > { %15882 = vmatmul.mubr.msk.bf16.gmra.mrb[128].mxu0 %vm1255_vm2, %v8585_v28  ;;  %v9582_v28 = vrot.slane %v9580_v0, 2  ;;  %v2844_v36 = vsel %vm2763_vm5, %v2841_v31, %v2843_v19  ;;  %v2846_v11 = vsel %vm2763_vm5, %v2843_v19, %v2845_v40  ;;  %v9621_v31 = vrot.slane %v9619_v57, 3  ;;  %v20915_v19 = vld [vmem:[#allocation26_spill] sm:$0xff] }
 0x2bb   : > { %15885 = vmatprep.mubr.msk.bf16.mxu0 %vm1255_vm2, %v8587_v21  ;;  %v9585_v21 = vrot.slane %v9583_v8, 3  ;;  %v2855_v44 = vrot.slane %v20914_v13, 1 }
 0x2bf   : > { %15266 = vmatmul.mubr.msk.bf16.gmra.mrb[64].mxu1 %vm1255_vm2, %v2832_v56  ;;  %v9586_v56 = vor.u32 %v9585_v21, %v9582_v28  ;;  %v20916_v21 = vld [vmem:[#allocation24_spill] sm:$0xff] }
 0x2c0   : > { %15269 = vmatprep.mubr.msk.bf16.mxu1 %vm1255_vm2, %v2834_v5  ;;  %v9598_v5 = vshrl.u32 %v20905_v9, 16 }
 0x2c1   : > { %v9587_v53 = vsel %vm9516_vm6, %v9577_v43, %v9586_v56  ;;  %v9596_v54 = vsel %vm9516_vm6, %v9586_v56, %v9595_v60  ;;  %v9646_v43 = vshll.u32 %v20916_v21, 16  ;;  %v20918_v56 = vld [vmem:[#allocation27_spill] sm:$0xff] }
 0x2c2   : > { %15886 = vmatmul.mubr.msk.bf16.gmra.mrb[132].mxu0 %vm1255_vm2, %v8589_v50  ;;  %v2849_v50 = vrot.slane %v20907_v42, 1  ;;  %v9600_v27 = vrot.slane %v9598_v5, 2  ;;  %v2859_v9 = vrot.slane %v20918_v56, 1  ;;  %v9657_v42 = vrot.slane %v9655_v23, 3 }
 0x2c3   : > { %15891 = vmatprep.mubr.msk.bf16.mxu0 %vm1255_vm2, %v9533_v15  ;;  %v2848_v15 = vsel %vm2763_vm5, %v2845_v40, %v2847_v33  ;;  %v9648_v17 = vrot.slane %v9646_v43, 3 }
 0x2c4   : > { %v2850_v34 = vsel %vm2763_vm5, %v2847_v33, %v2849_v50  ;;  %v9604_v12 = vor.u32 %v9603_v35, %v9600_v27  ;;  %v20919_v33 = vld [vmem:[#allocation30_spill] sm:$0xff]  ;;  %v20920_v35 = vld [vmem:[#allocation28_spill] sm:$0xff] }
 0x2c6   : > { %v9605_v47 = vsel %vm9516_vm6, %v9595_v60, %v9604_v12  ;;  %v9664_v60 = vshll.u32 %v20920_v35, 16 }
 0x2c7   : > { %15270 = vmatmul.mubr.msk.bf16.gmra.mrb[68].mxu1 %vm1255_vm2, %v2836_v22  ;;  %v20908_v22 = vld [vmem:[#allocation16_spill] sm:$0xff] }
 0x2c8   : > { %15273 = vmatprep.mubr.msk.bf16.mxu1 %vm1255_vm2, %v2838_v45  ;;  %v9607_v52 = vshrl.u32 %v20908_v22, 16  ;;  %v9610_v45 = vshll.u32 %v20908_v22, 16  ;;  %v20921_v22 = vld [vmem:[#allocation29_spill] sm:$0xff]  ;;  %v9666_v25 = vrot.slane %v9664_v60, 3 }
 0x2ca   : > { %15892 = vmatmul.mubr.msk.bf16.vlgmr.msra.gmra.mrb[0].mxu0 %vm1255_vm2, %v9542_v55  ;;  %v9609_v51 = vrot.slane %v9607_v52, 2  ;;  %v9612_v37 = vrot.slane %v9610_v45, 3  ;;  %v20911_v55 = vld [vmem:[#allocation22_spill] sm:$0xff]  ;;  %v9670_v52 = vshrl.u32 %v20921_v22, 16  ;;  %v9673_v45 = vshll.u32 %v20921_v22, 16 }
 0x2cb   : > { %16028 = vmatpush3.bf16.msra.mxu0 %v11406_v58  ;;  %15895 = vmatprep.mubr.msk.bf16.mxu0 %vm1255_vm2, %v9551_v63  ;;  %v2853_v6 = vrot.slane %v20911_v55, 1  ;;  %v2852_v58 = vsel %vm2763_vm5, %v2849_v50, %v2851_v18 }
 0x2cc   : > { %v9613_v63 = vor.u32 %v9612_v37, %v9609_v51  ;;  %v9672_v37 = vrot.slane %v9670_v52, 2  ;;  %v9675_v55 = vrot.slane %v9673_v45, 3 }
 0x2cd   : > { %v2854_v10 = vsel %vm2763_vm5, %v2851_v18, %v2853_v6  ;;  %v2856_v40 = vsel %vm2763_vm5, %v2853_v6, %v2855_v44  ;;  %v20923_v18 = vld [vmem:[#allocation34_spill] sm:$0xff] }
 0x2ce   : > { %v9614_v0 = vsel %vm9516_vm6, %v9604_v12, %v9613_v63  ;;  %v20922_v12 = vld [vmem:[#allocation31_spill] sm:$0xff] }
 0x2cf   : > { %15274 = vmatmul.mubr.msk.bf16.gmra.mrb[72].mxu1 %vm1255_vm2, %v2840_v48  ;;  %v9625_v48 = vshrl.u32 %v20912_v62, 16  ;;  %v2863_v14 = vrot.slane %v20922_v12, 1  ;;  %v20925_v62 = vld [vmem:[#allocation33_spill] sm:$0xff] }
 0x2d0   : > { %15277 = vmatprep.mubr.msk.bf16.mxu1 %vm1255_vm2, %v2842_v16  ;;  %v9622_v16 = vor.u32 %v9621_v31, %v9618_v61  ;;  %v20924_v31 = vld [vmem:[#allocation32_spill] sm:$0xff]  ;;  %v9691_v7 = vshll.u32 %v20925_v62, 16 }
 0x2d1   : > { %v9627_v8 = vrot.slane %v9625_v48, 2  ;;  %v9688_v48 = vshrl.u32 %v20925_v62, 16 }
 0x2d2   : > { %15896 = vmatmul.mubr.msk.bf16.gmra.mrb[4].mxu0 %vm1255_vm2, %v9560_v20  ;;  %v2857_v20 = vrot.slane %v20915_v19, 1  ;;  %v9623_v39 = vsel %vm9516_vm6, %v9613_v63, %v9622_v16  ;;  %v9682_v63 = vshll.u32 %v20924_v31, 16  ;;  %v9693_v19 = vrot.slane %v9691_v7, 3 }
 0x2d3   : > { %15899 = vmatprep.mubr.msk.bf16.mxu0 %vm1255_vm2, %v9569_v2  ;;  %v9631_v2 = vor.u32 %v9630_v3, %v9627_v8  ;;  %v9690_v3 = vrot.slane %v9688_v48, 2 }
 0x2d4   : > { %v2858_v28 = vsel %vm2763_vm5, %v2855_v44, %v2857_v20  ;;  %v2860_v50 = vsel %vm2763_vm5, %v2857_v20, %v2859_v9  ;;  %v9684_v13 = vrot.slane %v9682_v63, 3  ;;  %v20927_v44 = vld [vmem:[#allocation36_spill] sm:$0xff] }
 0x2d5   : > { %v9632_v5 = vsel %vm9516_vm6, %v9622_v16, %v9631_v2  ;;  %v20926_v16 = vld [vmem:[#allocation35_spill] sm:$0xff] }
 0x2d6   : > { %v2867_v29 = vrot.slane %v20926_v16, 1 }
 0x2d7   : > { %15278 = vmatmul.mubr.msk.bf16.gmra.mrb[76].mxu1 %vm1255_vm2, %v2844_v36  ;;  %v9643_v36 = vshrl.u32 %v20916_v21, 16  ;;  %v17598_v21 = vld [vmem:[%s17886_s27 + $0xc8] sm:$0xff]  }
 0x2d8   : > { %15281 = vmatprep.mubr.msk.bf16.mxu1 %vm1255_vm2, %v2846_v11  ;;  %v9640_v11 = vor.u32 %v9639_v4, %v9636_v32  ;;  %v17597_v4 = vld [vmem:[%s17886_s27 + $0xc0] sm:$0xff]   ;;  %v9709_v43 = vshll.u32 %v17598_v21, 16 }
 0x2d9   : > { %v9645_v30 = vrot.slane %v9643_v36, 2  ;;  %v9706_v36 = vshrl.u32 %v17598_v21, 16 }
 0x2da   : > { %15900 = vmatmul.mubr.msk.bf16.gmra.mrb[8].mxu0 %vm1255_vm2, %v9578_v59  ;;  %v2861_v59 = vrot.slane %v20919_v33, 1  ;;  %v9641_v38 = vsel %vm9516_vm6, %v9631_v2, %v9640_v11  ;;  %v9700_v2 = vshll.u32 %v17597_v4, 16  ;;  %v9711_v33 = vrot.slane %v9709_v43, 3 }
 0x2db   : > { %15903 = vmatprep.mubr.msk.bf16.mxu0 %vm1255_vm2, %v9587_v53  ;;  %v9649_v53 = vor.u32 %v9648_v17, %v9645_v30  ;;  %v9708_v17 = vrot.slane %v9706_v36, 2 }
 0x2dc   : > { %v2862_v27 = vsel %vm2763_vm5, %v2859_v9, %v2861_v59  ;;  %v2864_v6 = vsel %vm2763_vm5, %v2861_v59, %v2863_v14  ;;  %v9702_v56 = vrot.slane %v9700_v2, 3  ;;  %v20928_v9 = vld [vmem:[#allocation37_spill] sm:$0xff] }
 0x2dd   : > { %v9650_v41 = vsel %vm9516_vm6, %v9640_v11, %v9649_v53  ;;  %v17599_v11 = vld [vmem:[%s17886_s27 + $0x1b0] sm:$0xff]  }
 0x2de   : > { %v2871_v26 = vrot.slane %v17599_v11, 1 }
 0x2df   : > { %15282 = vmatmul.mubr.msk.bf16.gmra.mrb[80].mxu1 %vm1255_vm2, %v2848_v15  ;;  %v9661_v15 = vshrl.u32 %v20920_v35, 16  ;;  %v17601_v35 = vld [vmem:[%s17886_s27 + $0xd8] sm:$0xff]  }
 0x2e0   : > { %15285 = vmatprep.mubr.msk.bf16.mxu1 %vm1255_vm2, %v2850_v34  ;;  %v9658_v34 = vor.u32 %v9657_v42, %v9654_v24  ;;  %v17600_v42 = vld [vmem:[%s17886_s27 + $0xd0] sm:$0xff]   ;;  %v9727_v60 = vshll.u32 %v17601_v35, 16 }
 0x2e1   : > { %v9663_v57 = vrot.slane %v9661_v15, 2  ;;  %v9724_v15 = vshrl.u32 %v17601_v35, 16 }
 0x2e2   : > { %15904 = vmatmul.mubr.msk.bf16.gmra.mrb[12].mxu0 %vm1255_vm2, %v9596_v54  ;;  %v2865_v54 = vrot.slane %v20923_v18, 1  ;;  %v9659_v51 = vsel %vm9516_vm6, %v9649_v53, %v9658_v34  ;;  %v9718_v53 = vshll.u32 %v17600_v42, 16  ;;  %v9729_v18 = vrot.slane %v9727_v60, 3 }
 0x2e3   : > { %15907 = vmatprep.mubr.msk.bf16.mxu0 %vm1255_vm2, %v9605_v47  ;;  %v9667_v47 = vor.u32 %v9666_v25, %v9663_v57  ;;  %v9726_v25 = vrot.slane %v9724_v15, 2 }
 0x2e4   : > { %v2866_v61 = vsel %vm2763_vm5, %v2863_v14, %v2865_v54  ;;  %v2868_v20 = vsel %vm2763_vm5, %v2865_v54, %v2867_v29  ;;  %v9720_v12 = vrot.slane %v9718_v53, 3  ;;  %v17603_v14 = vld [vmem:[%s17886_s27 + $0x1c8] sm:$0xff]  }
 0x2e5   : > { %v9668_v49 = vsel %vm9516_vm6, %v9658_v34, %v9667_v47  ;;  %v17602_v34 = vld [vmem:[%s17886_s27 + $0x1c0] sm:$0xff]  }
 0x2e6   : > { %v2875_v22 = vrot.slane %v17602_v34, 1 }
 0x2e7   : > { %15286 = vmatmul.mubr.msk.bf16.gmra.mrb[84].mxu1 %vm1255_vm2, %v2852_v58  ;;  %v9679_v58 = vshrl.u32 %v20924_v31, 16  ;;  %v17605_v31 = vld [vmem:[%s17886_s27 + $0xe8] sm:$0xff]  }
 0x2e8   : > { %15289 = vmatprep.mubr.msk.bf16.mxu1 %vm1255_vm2, %v2854_v10  ;;  %v9676_v10 = vor.u32 %v9675_v55, %v9672_v37  ;;  %v17604_v55 = vld [vmem:[%s17886_s27 + $0xe0] sm:$0xff]   ;;  %v9745_v63 = vshll.u32 %v17605_v31, 16 }
 0x2e9   : > { %v9681_v1 = vrot.slane %v9679_v58, 2  ;;  %v9742_v58 = vshrl.u32 %v17605_v31, 16 }
 0x2ea   : > { %15908 = vmatmul.mubr.msk.bf16.gmra.mrb[16].mxu0 %vm1255_vm2, %v9614_v0  ;;  %v2869_v0 = vrot.slane %v20927_v44, 1  ;;  %v9677_v8 = vsel %vm9516_vm6, %v9667_v47, %v9676_v10  ;;  %v9736_v47 = vshll.u32 %v17604_v55, 16  ;;  %v9747_v44 = vrot.slane %v9745_v63, 3 }
 0x2eb   : > { %15911 = vmatprep.mubr.msk.bf16.mxu0 %vm1255_vm2, %v9623_v39  ;;  %v9685_v39 = vor.u32 %v9684_v13, %v9681_v1  ;;  %v9744_v13 = vrot.slane %v9742_v58, 2 }
 0x2ec   : > { %v2870_v32 = vsel %vm2763_vm5, %v2867_v29, %v2869_v0  ;;  %v2872_v59 = vsel %vm2763_vm5, %v2869_v0, %v2871_v26  ;;  %v9738_v16 = vrot.slane %v9736_v47, 3  ;;  %v17607_v29 = vld [vmem:[%s17886_s27 + $0x1d8] sm:$0xff]  }
 0x2ed   : > { %v9686_v46 = vsel %vm9516_vm6, %v9676_v10, %v9685_v39  ;;  %v17606_v10 = vld [vmem:[%s17886_s27 + $0x1d0] sm:$0xff]  }
 0x2ee   : > { %v2879_v62 = vrot.slane %v17606_v10, 1 }
 0x2ef   : > { %15290 = vmatmul.mubr.msk.bf16.gmra.mrb[88].mxu1 %vm1255_vm2, %v2856_v40  ;;  %v9697_v40 = vshrl.u32 %v17597_v4, 16  ;;  %v17609_v4 = vld [vmem:[%s17886_s27 + $0xf8] sm:$0xff]  }
 0x2f0   : > { %15293 = vmatprep.mubr.msk.bf16.mxu1 %vm1255_vm2, %v2858_v28  ;;  %v9694_v28 = vor.u32 %v9693_v19, %v9690_v3  ;;  %v17608_v19 = vld [vmem:[%s17886_s27 + $0xf0] sm:$0xff]   ;;  %v9763_v2 = vshll.u32 %v17609_v4, 16 }
 0x2f1   : > { %v9699_v23 = vrot.slane %v9697_v40, 2  ;;  %v9760_v40 = vshrl.u32 %v17609_v4, 16 }
 0x2f2   : > { %15912 = vmatmul.mubr.msk.bf16.gmra.mrb[20].mxu0 %vm1255_vm2, %v9632_v5  ;;  %v2873_v5 = vrot.slane %v20928_v9, 1  ;;  %v9695_v30 = vsel %vm9516_vm6, %v9685_v39, %v9694_v28  ;;  %v9754_v39 = vshll.u32 %v17608_v19, 16  ;;  %v9765_v9 = vrot.slane %v9763_v2, 3 }
 0x2f3   : > { %15915 = vmatprep.mubr.msk.bf16.mxu0 %vm1255_vm2, %v9641_v38  ;;  %v9703_v38 = vor.u32 %v9702_v56, %v9699_v23  ;;  %v9762_v56 = vrot.slane %v9760_v40, 2 }
 0x2f4   : > { %v2874_v24 = vsel %vm2763_vm5, %v2871_v26, %v2873_v5  ;;  %v2876_v54 = vsel %vm2763_vm5, %v2873_v5, %v2875_v22  ;;  %v9756_v11 = vrot.slane %v9754_v39, 3  ;;  %v17611_v26 = vld [vmem:[%s17886_s27 + $0x1e8] sm:$0xff]  }
 0x2f5   : > { %v9704_v52 = vsel %vm9516_vm6, %v9694_v28, %v9703_v38  ;;  %v17610_v28 = vld [vmem:[%s17886_s27 + $0x1e0] sm:$0xff]  }
 0x2f6   : > { %v2883_v21 = vrot.slane %v17610_v28, 1 }
 0x2f7   : > { %15294 = vmatmul.mubr.msk.bf16.gmra.mrb[92].mxu1 %vm1255_vm2, %v2860_v50  ;;  %v9715_v50 = vshrl.u32 %v17600_v42, 16  ;;  %v17613_v42 = vld [vmem:[%s17886_s27 + $0x108] sm:$0xff]  }
 0x2f8   : > { %15297 = vmatprep.mubr.msk.bf16.mxu1 %vm1255_vm2, %v2862_v27  ;;  %v9712_v27 = vor.u32 %v9711_v33, %v9708_v17  ;;  %v17612_v33 = vld [vmem:[%s17886_s27 + $0x100] sm:$0xff]   ;;  %v9781_v53 = vshll.u32 %v17613_v42, 16 }
 0x2f9   : > { %v9717_v45 = vrot.slane %v9715_v50, 2  ;;  %v9778_v50 = vshrl.u32 %v17613_v42, 16  ;;  %v17626_v42 = vld [vmem:[%s17886_s27 + $0x220] ss:$0 sps:$4 sm:$0x11]  }
 0x2fa   : > { %15916 = vmatmul.mubr.msk.bf16.gmra.mrb[24].mxu0 %vm1255_vm2, %v9650_v41  ;;  %v2877_v41 = vrot.slane %v17603_v14, 1  ;;  %v9713_v57 = vsel %vm9516_vm6, %v9703_v38, %v9712_v27  ;;  %v9772_v38 = vshll.u32 %v17612_v33, 16  ;;  %v9783_v14 = vrot.slane %v9781_v53, 3 }
 0x2fb   : > { %15919 = vmatprep.mubr.msk.bf16.mxu0 %vm1255_vm2, %v9659_v51  ;;  %v9721_v51 = vor.u32 %v9720_v12, %v9717_v45  ;;  %v9780_v12 = vrot.slane %v9778_v50, 2  ;;  %v2899_v50 = vrot.slane %v17626_v42, 1 }
 0x2fc   : > { %v2878_v37 = vsel %vm2763_vm5, %v2875_v22, %v2877_v41  ;;  %v2880_v0 = vsel %vm2763_vm5, %v2877_v41, %v2879_v62  ;;  %v9774_v34 = vrot.slane %v9772_v38, 3  ;;  %v17615_v22 = vld [vmem:[%s17886_s27 + $0x1f8] sm:$0xff]  }
 0x2fd   : > { %v9722_v48 = vsel %vm9516_vm6, %v9712_v27, %v9721_v51  ;;  %v17614_v27 = vld [vmem:[%s17886_s27 + $0x1f0] sm:$0xff]  }
 0x2fe   : > { %v2887_v35 = vrot.slane %v17614_v27, 1 }
 0x2ff   : > { %15298 = vmatmul.mubr.msk.bf16.gmra.mrb[96].mxu1 %vm1255_vm2, %v2864_v6  ;;  %v9733_v6 = vshrl.u32 %v17604_v55, 16  ;;  %v17617_v55 = vld [vmem:[%s17886_s27 + $0x118] sm:$0xff]  }
 0x300   : > { %15301 = vmatprep.mubr.msk.bf16.mxu1 %vm1255_vm2, %v2866_v61  ;;  %v9730_v61 = vor.u32 %v9729_v18, %v9726_v25  ;;  %v17616_v18 = vld [vmem:[%s17886_s27 + $0x110] sm:$0xff]   ;;  %v9799_v47 = vshll.u32 %v17617_v55, 16 }
 0x301   : > { %v9735_v7 = vrot.slane %v9733_v6, 2  ;;  %v9796_v6 = vshrl.u32 %v17617_v55, 16 }
 0x302   : > { %15920 = vmatmul.mubr.msk.bf16.gmra.mrb[28].mxu0 %vm1255_vm2, %v9668_v49  ;;  %v2881_v49 = vrot.slane %v17607_v29, 1  ;;  %v9731_v1 = vsel %vm9516_vm6, %v9721_v51, %v9730_v61  ;;  %v9790_v51 = vshll.u32 %v17616_v18, 16  ;;  %v9801_v29 = vrot.slane %v9799_v47, 3 }
 0x303   : > { %15923 = vmatprep.mubr.msk.bf16.mxu0 %vm1255_vm2, %v9677_v8  ;;  %v9739_v8 = vor.u32 %v9738_v16, %v9735_v7  ;;  %v9798_v16 = vrot.slane %v9796_v6, 2  ;;  %v17630_v6 = vld [vmem:[%s17886_s27 + $0x20] sm:$0xff]  }
 0x304   : > { %v2882_v3 = vsel %vm2763_vm5, %v2879_v62, %v2881_v49  ;;  %v2884_v5 = vsel %vm2763_vm5, %v2881_v49, %v2883_v21  ;;  %v9792_v10 = vrot.slane %v9790_v51, 3  ;;  %v17619_v62 = vld [vmem:[%s17886_s27 + $0x208] sm:$0xff]   ;;  %v4306_v47 = vrot.slane %v17630_v6, 1 }
 0x305   : > { %v9740_v36 = vsel %vm9516_vm6, %v9730_v61, %v9739_v8  ;;  %v17618_v61 = vld [vmem:[%s17886_s27 + $0x200] sm:$0xff]   ;;  %v17629_v51 = vld [vmem:[%s17886_s27 + $0x148] sm:$0xff]  }
 0x306   : > { %v2891_v31 = vrot.slane %v17618_v61, 1  ;;  %v9853_v55 = vshll.u32 %v17629_v51, 16 }
 0x307   : > { %15302 = vmatmul.mubr.msk.bf16.gmra.mrb[100].mxu1 %vm1255_vm2, %v2868_v20  ;;  %v9751_v20 = vshrl.u32 %v17608_v19, 16  ;;  %v17621_v19 = vld [vmem:[%s17886_s27 + $0x128] sm:$0xff]  }
 0x308   : > { %15305 = vmatprep.mubr.msk.bf16.mxu1 %vm1255_vm2, %v2870_v32  ;;  %v9748_v32 = vor.u32 %v9747_v44, %v9744_v13  ;;  %v9817_v39 = vshll.u32 %v17621_v19, 16 }
 0x309   : > { %v9753_v43 = vrot.slane %v9751_v20, 2  ;;  %v9814_v20 = vshrl.u32 %v17621_v19, 16 }
 0x30a   : > { %15924 = vmatmul.mubr.msk.bf16.gmra.mrb[32].mxu0 %vm1255_vm2, %v9686_v46  ;;  %v2885_v46 = vrot.slane %v17611_v26, 1  ;;  %v9749_v23 = vsel %vm9516_vm6, %v9739_v8, %v9748_v32  ;;  %v9819_v26 = vrot.slane %v9817_v39, 3  ;;  %v17634_v39 = vld [vmem:[%s17886_s27 + $0x30] sm:$0xff]  }
 0x30b   : > { %15927 = vmatprep.mubr.msk.bf16.mxu0 %vm1255_vm2, %v9695_v30  ;;  %v9757_v30 = vor.u32 %v9756_v11, %v9753_v43  ;;  %v9816_v11 = vrot.slane %v9814_v20, 2  ;;  %v20930_v20 = vld [vmem:[#allocation2_spill] sm:$0xff] }
 0x30c   : > { %v2886_v17 = vsel %vm2763_vm5, %v2883_v21, %v2885_v46  ;;  %v2888_v41 = vsel %vm2763_vm5, %v2885_v46, %v2887_v35  ;;  %v17623_v21 = vld [vmem:[%s17886_s27 + $0x218] sm:$0xff]  }
 0x30d   : > { %v9758_v15 = vsel %vm9516_vm6, %v9748_v32, %v9757_v30  ;;  %v17622_v32 = vld [vmem:[%s17886_s27 + $0x210] sm:$0xff]  }
 0x30e   : > { %v2895_v4 = vrot.slane %v17622_v32, 1  ;;  %v4310_v32 = vrot.slane %v17634_v39, 1 }
 0x30f   : > { %15306 = vmatmul.mubr.msk.bf16.gmra.mrb[104].mxu1 %vm1255_vm2, %v2872_v59  ;;  %v9769_v59 = vshrl.u32 %v17612_v33, 16  ;;  %v17625_v33 = vld [vmem:[%s17886_s27 + $0x138] sm:$0xff]  }
 0x310   : > { %15309 = vmatprep.mubr.msk.bf16.mxu1 %vm1255_vm2, %v2874_v24  ;;  %v9766_v24 = vor.u32 %v9765_v9, %v9762_v56  ;;  %v17624_v9 = vld [vmem:[%s17886_s27 + $0x130] sm:$0xff]   ;;  %v9835_v38 = vshll.u32 %v17625_v33, 16 }
 0x311   : > { %v9771_v60 = vrot.slane %v9769_v59, 2  ;;  %v9832_v59 = vshrl.u32 %v17625_v33, 16 }
 0x312   : > { %15928 = vmatmul.mubr.msk.bf16.gmra.mrb[36].mxu0 %vm1255_vm2, %v9704_v52  ;;  %v2889_v52 = vrot.slane %v17615_v22, 1  ;;  %v9767_v45 = vsel %vm9516_vm6, %v9757_v30, %v9766_v24  ;;  %v9826_v30 = vshll.u32 %v17624_v9, 16 }
 0x313   : > { %15931 = vmatprep.mubr.msk.bf16.mxu0 %vm1255_vm2, %v9713_v57  ;;  %v9775_v57 = vor.u32 %v9774_v34, %v9771_v60  ;;  %v17627_v60 = vld [vmem:[%s17886_s27 + $0x18] sm:$0xff]  }
 0x314   : > { %v2890_v25 = vsel %vm2763_vm5, %v2887_v35, %v2889_v52  ;;  %v2892_v49 = vsel %vm2763_vm5, %v2889_v52, %v2891_v31  ;;  %v9828_v27 = vrot.slane %v9826_v30, 3  ;;  %v20929_v35 = vld [vmem:[#allocation3_spill] sm:$0xff]  ;;  %v4304_v34 = vrot.slane %v17627_v60, 1 }
 0x315   : > { %v9776_v58 = vsel %vm9516_vm6, %v9766_v24, %v9775_v57  ;;  %v9834_v52 = vrot.slane %v9832_v59, 2 }
 0x317   : > { %15310 = vmatmul.mubr.msk.bf16.gmra.mrb[108].mxu1 %vm1255_vm2, %v2876_v54  ;;  %v9787_v54 = vshrl.u32 %v17616_v18, 16 }
 0x318   : > { %15313 = vmatprep.mubr.msk.bf16.mxu1 %vm1255_vm2, %v2878_v37  ;;  %v9784_v37 = vor.u32 %v9783_v14, %v9780_v12 }
 0x319   : > { %v9789_v63 = vrot.slane %v9787_v54, 2 }
 0x31a   : > { %15932 = vmatmul.mubr.msk.bf16.gmra.mrb[40].mxu0 %vm1255_vm2, %v9722_v48  ;;  %v2893_v48 = vrot.slane %v17619_v62, 1  ;;  %v9785_v7 = vsel %vm9516_vm6, %v9775_v57, %v9784_v37  ;;  %v17628_v57 = vld [vmem:[%s17886_s27 + $0x140] sm:$0xff]  }
 0x31b   : > { %15935 = vmatprep.mubr.msk.bf16.mxu0 %vm1255_vm2, %v9731_v1  ;;  %v17620_v1 = vld [vmem:[%s17886_s27 + $0x120] sm:$0xff]   ;;  %v9844_v18 = vshll.u32 %v17628_v57, 16 }
 0x31c   : > { %v9805_v13 = vshrl.u32 %v17620_v1, 16  ;;  %v9808_v44 = vshll.u32 %v17620_v1, 16  ;;  %v2894_v8 = vsel %vm2763_vm5, %v2891_v31, %v2893_v48  ;;  %v2896_v46 = vsel %vm2763_vm5, %v2893_v48, %v2895_v4  ;;  %v17632_v1 = vld [vmem:[%s17886_s27 + $0x150] sm:$0xff]  }
 0x31e   : > { %v9807_v40 = vrot.slane %v9805_v13, 2  ;;  %v9810_v2 = vrot.slane %v9808_v44, 3  ;;  %v9859_v13 = vshrl.u32 %v17632_v1, 16  ;;  %v9862_v44 = vshll.u32 %v17632_v1, 16 }
 0x31f   : > { %15314 = vmatmul.mubr.msk.bf16.gmra.mrb[112].mxu1 %vm1255_vm2, %v2880_v0  ;;  %v9793_v0 = vor.u32 %v9792_v10, %v9789_v63  ;;  %v17631_v63 = vld [vmem:[%s17886_s27 + $0x28] sm:$0xff]  }
 0x320   : > { %15317 = vmatprep.mubr.msk.bf16.mxu1 %vm1255_vm2, %v2882_v3  ;;  %v9802_v3 = vor.u32 %v9801_v29, %v9798_v16  ;;  %v4308_v10 = vrot.slane %v17631_v63, 1  ;;  %v4307_v16 = vsel %vm2763_vm5, %v4304_v34, %v4306_v47 }
 0x321   : > { %v9794_v28 = vsel %vm9516_vm6, %v9784_v37, %v9793_v0  ;;  %v9850_v37 = vshrl.u32 %v17629_v51, 16  ;;  %v17642_v51 = vld [vmem:[%s17886_s27 + $0x50] sm:$0xff]  }
 0x322   : > { %15936 = vmatmul.mubr.msk.bf16.gmra.mrb[44].mxu0 %vm1255_vm2, %v9740_v36  ;;  %v2897_v36 = vrot.slane %v17623_v21, 1  ;;  %v9803_v43 = vsel %vm9516_vm6, %v9793_v0, %v9802_v3 }
 0x323   : > { %15939 = vmatprep.mubr.msk.bf16.mxu0 %vm1255_vm2, %v9749_v23  ;;  %v9811_v23 = vor.u32 %v9810_v2, %v9807_v40  ;;  %v9852_v48 = vrot.slane %v9850_v37, 2  ;;  %v9861_v40 = vrot.slane %v9859_v13, 2  ;;  %v9864_v2 = vrot.slane %v9862_v44, 3  ;;  %v17645_v13 = vld [vmem:[%s17886_s27 + $0x188] sm:$0xff]  }
 0x324   : > { %v2898_v56 = vsel %vm2763_vm5, %v2895_v4, %v2897_v36  ;;  %v2900_v12 = vsel %vm2763_vm5, %v2897_v36, %v2899_v50  ;;  %v4318_v37 = vrot.slane %v17642_v51, 1  ;;  %v9922_v44 = vshrl.u32 %v17645_v13, 16 }
 0x325   : > { %v9812_v24 = vsel %vm9516_vm6, %v9802_v3, %v9811_v23 }
 0x327   : > { %15318 = vmatmul.mubr.msk.bf16.gmra.mrb[116].mxu1 %vm1255_vm2, %v2884_v5  ;;  %v9823_v5 = vshrl.u32 %v17624_v9, 16 }
 0x328   : > { %15321 = vmatprep.mubr.msk.bf16.mxu1 %vm1255_vm2, %v2886_v17  ;;  %v9820_v17 = vor.u32 %v9819_v26, %v9816_v11  ;;  %v4311_v26 = vsel %vm2763_vm5, %v4308_v10, %v4310_v32 }
 0x329   : > { %v9825_v53 = vrot.slane %v9823_v5, 2 }
 0x32a   : > { %15940 = vmatmul.mubr.msk.bf16.gmra.mrb[48].mxu0 %vm1255_vm2, %v9758_v15  ;;  %v4303_v15 = vrot.slane %v20929_v35, 1  ;;  %v9821_v22 = vsel %vm9516_vm6, %v9811_v23, %v9820_v17 }
 0x32b   : > { %15943 = vmatprep.mubr.msk.bf16.mxu0 %vm1255_vm2, %v9767_v45  ;;  %v9837_v45 = vrot.slane %v9835_v38, 3  ;;  %v9829_v14 = vor.u32 %v9828_v27, %v9825_v53  ;;  %v17638_v38 = vld [vmem:[%s17886_s27 + $0x40] sm:$0xff]   ;;  %v17639_v27 = vld [vmem:[%s17886_s27 + $0x48] sm:$0xff]  }
 0x32c   : > { %v4316_v35 = vrot.slane %v17639_v27, 1 }
 0x32d   : > { %v9838_v54 = vor.u32 %v9837_v45, %v9834_v52  ;;  %v9830_v61 = vsel %vm9516_vm6, %v9820_v17, %v9829_v14  ;;  %v17637_v17 = vld [vmem:[%s17886_s27 + $0x168] sm:$0xff]  }
 0x32e   : > { %v9886_v33 = vshrl.u32 %v17637_v17, 16  ;;  %v9889_v59 = vshll.u32 %v17637_v17, 16 }
 0x32f   : > { %15322 = vmatmul.mubr.msk.bf16.gmra.mrb[120].mxu1 %vm1255_vm2, %v2888_v41  ;;  %v4305_v41 = vsel %vm2763_vm5, %v4303_v15, %v4304_v34  ;;  %v9839_v62 = vsel %vm9516_vm6, %v9829_v14, %v9838_v54 }
 0x330   : > { %15325 = vmatprep.mubr.msk.bf16.mxu1 %vm1255_vm2, %v2890_v25  ;;  %v9841_v25 = vshrl.u32 %v17628_v57, 16  ;;  %v9888_v60 = vrot.slane %v9886_v33, 2  ;;  %v9891_v34 = vrot.slane %v9889_v59, 3 }
 0x332   : > { %15944 = vmatmul.mubr.msk.bf16.gmra.mrb[52].mxu0 %vm1255_vm2, %v9776_v58  ;;  %v9843_v31 = vrot.slane %v9841_v25, 2  ;;  %v9846_v58 = vrot.slane %v9844_v18, 3  ;;  %v9892_v57 = vor.u32 %v9891_v34, %v9888_v60  ;;  %v17641_v25 = vld [vmem:[%s17886_s27 + $0x178] sm:$0xff]   ;;  %v17652_v34 = vld [vmem:[%s17886_s27 + $0x1a0] sm:$0xff]  }
 0x333   : > { %15947 = vmatprep.mubr.msk.bf16.mxu0 %vm1255_vm2, %v9785_v7  ;;  %v9855_v7 = vrot.slane %v9853_v55, 3  ;;  %v9904_v18 = vshrl.u32 %v17641_v25, 16 }
 0x334   : > { %v9847_v29 = vor.u32 %v9846_v58, %v9843_v31 }
 0x335   : > { %v9856_v0 = vor.u32 %v9855_v7, %v9852_v48  ;;  %v9906_v63 = vrot.slane %v9904_v18, 2 }
 0x336   : > { %v9848_v4 = vsel %vm9516_vm6, %v9838_v54, %v9847_v29  ;;  %v9907_v54 = vshll.u32 %v17641_v25, 16 }
 0x337   : > { %15326 = vmatmul.mubr.msk.bf16.gmra.mrb[124].mxu1 %vm1255_vm2, %v2892_v49  ;;  %v4309_v49 = vsel %vm2763_vm5, %v4306_v47, %v4308_v10  ;;  %v9857_v36 = vsel %vm9516_vm6, %v9847_v29, %v9856_v0 }
 0x338   : > { %15329 = vmatprep.mubr.msk.bf16.mxu1 %vm1255_vm2, %v2894_v8  ;;  %v17633_v8 = vld [vmem:[%s17886_s27 + $0x158] sm:$0xff]   ;;  %v9909_v10 = vrot.slane %v9907_v54, 3 }
 0x339   : > { %v9868_v3 = vshrl.u32 %v17633_v8, 16  ;;  %v9871_v19 = vshll.u32 %v17633_v8, 16  ;;  %v17646_v8 = vld [vmem:[%s17886_s27 + $0x60] sm:$0xff]  }
 0x33a   : > { %15948 = vmatmul.mubr.msk.bf16.gmra.mrb[56].mxu0 %vm1255_vm2, %v9794_v28  ;;  %v17635_v28 = vld [vmem:[%s17886_s27 + $0x38] sm:$0xff]   ;;  %v9910_v1 = vor.u32 %v9909_v10, %v9906_v63  ;;  %v17656_v10 = vld [vmem:[%s17886_s27 + $0x1b0] sm:$0xff]  }
 0x33b   : > { %15951 = vmatprep.mubr.msk.bf16.mxu0 %vm1255_vm2, %v9803_v43  ;;  %v4312_v21 = vrot.slane %v17635_v28, 1  ;;  %v9870_v43 = vrot.slane %v9868_v3, 2  ;;  %v9873_v11 = vrot.slane %v9871_v19, 3  ;;  %v4322_v3 = vrot.slane %v17646_v8, 1 }
 0x33d   : > { %v4313_v23 = vsel %vm2763_vm5, %v4310_v32, %v4312_v21  ;;  %v9874_v30 = vor.u32 %v9873_v11, %v9870_v43  ;;  %v17647_v32 = vld [vmem:[%s17886_s27 + $0x68] sm:$0xff]   ;;  %v17648_v11 = vld [vmem:[%s17886_s27 + $0x190] sm:$0xff]  }
 0x33f   : > { %15330 = vmatmul.mubr.msk.bf16.gmra.mrb[128].mxu1 %vm1255_vm2, %v2896_v46  ;;  %v9865_v46 = vor.u32 %v9864_v2, %v9861_v40  ;;  %v9924_v2 = vrot.slane %v9922_v44, 2 }
 0x340   : > { %15333 = vmatprep.mubr.msk.bf16.mxu1 %vm1255_vm2, %v2898_v56  ;;  %v17636_v56 = vld [vmem:[%s17886_s27 + $0x160] sm:$0xff]  }
 0x341   : > { %v9877_v9 = vshrl.u32 %v17636_v56, 16  ;;  %v9880_v5 = vshll.u32 %v17636_v56, 16  ;;  %v9866_v42 = vsel %vm9516_vm6, %v9856_v0, %v9865_v46  ;;  %v9875_v15 = vsel %vm9516_vm6, %v9865_v46, %v9874_v30  ;;  %v17649_v56 = vld [vmem:[%s17886_s27 + $0x198] sm:$0xff]  }
 0x342   : > { %15952 = vmatmul.mubr.msk.bf16.gmra.mrb[60].mxu0 %vm1255_vm2, %v9812_v24  ;;  %v4314_v24 = vrot.slane %v17638_v38, 1  ;;  %v9925_v0 = vshll.u32 %v17645_v13, 16  ;;  %v9934_v46 = vshll.u32 %v17648_v11, 16 }
 0x343   : > { %15955 = vmatprep.mubr.msk.bf16.mxu0 %vm1255_vm2, %v9821_v22  ;;  %v9879_v50 = vrot.slane %v9877_v9, 2  ;;  %v9882_v53 = vrot.slane %v9880_v5, 3  ;;  %v9940_v9 = vshrl.u32 %v17649_v56, 16  ;;  %v9943_v5 = vshll.u32 %v17649_v56, 16 }
 0x344   : > { %v4315_v22 = vsel %vm2763_vm5, %v4312_v21, %v4314_v24  ;;  %v4317_v45 = vsel %vm2763_vm5, %v4314_v24, %v4316_v35  ;;  %v9927_v28 = vrot.slane %v9925_v0, 3  ;;  %v9936_v38 = vrot.slane %v9934_v46, 3  ;;  %v17651_v24 = vld [vmem:[%s17886_s27 + $0x78] sm:$0xff]  }
 0x345   : > { %v9883_v52 = vor.u32 %v9882_v53, %v9879_v50  ;;  %v9942_v53 = vrot.slane %v9940_v9, 2  ;;  %v9945_v27 = vrot.slane %v9943_v5, 3 }
 0x347   : > { %15334 = vmatmul.mubr.msk.bf16.gmra.mrb[132].mxu1 %vm1255_vm2, %v2900_v12  ;;  %v17640_v12 = vld [vmem:[%s17886_s27 + $0x170] sm:$0xff]   ;;  %v9884_v55 = vsel %vm9516_vm6, %v9874_v30, %v9883_v52  ;;  %v9893_v58 = vsel %vm9516_vm6, %v9883_v52, %v9892_v57  ;;  %v9952_v52 = vshll.u32 %v17652_v34, 16 }
 0x348   : > { %15339 = vmatprep.mubr.msk.bf16.mxu1 %vm1255_vm2, %v4305_v41  ;;  %v9895_v14 = vshrl.u32 %v17640_v12, 16  ;;  %v9898_v41 = vshll.u32 %v17640_v12, 16  ;;  %v17650_v30 = vld [vmem:[%s17886_s27 + $0x70] sm:$0xff]   ;;  %v17653_v12 = vld [vmem:[%s17886_s27 + $0x1a8] sm:$0xff]  }
 0x349   : > { %v4326_v17 = vrot.slane %v17650_v30, 1  ;;  %v9954_v51 = vrot.slane %v9952_v52, 3 }
 0x34a   : > { %15956 = vmatmul.mubr.msk.bf16.gmra.mrb[64].mxu0 %vm1255_vm2, %v9830_v61  ;;  %v9897_v6 = vrot.slane %v9895_v14, 2  ;;  %v9900_v47 = vrot.slane %v9898_v41, 3  ;;  %v17643_v61 = vld [vmem:[%s17886_s27 + $0x58] sm:$0xff]   ;;  %v9958_v14 = vshrl.u32 %v17653_v12, 16  ;;  %v9961_v41 = vshll.u32 %v17653_v12, 16 }
 0x34b   : > { %15959 = vmatprep.mubr.msk.bf16.mxu0 %vm1255_vm2, %v9839_v62  ;;  %v4320_v31 = vrot.slane %v17643_v61, 1  ;;  %v4319_v62 = vsel %vm2763_vm5, %v4316_v35, %v4318_v37 }
 0x34c   : > { %v9901_v48 = vor.u32 %v9900_v47, %v9897_v6  ;;  %v9960_v47 = vrot.slane %v9958_v14, 2  ;;  %v9963_v61 = vrot.slane %v9961_v41, 3 }
 0x34d   : > { %v4321_v7 = vsel %vm2763_vm5, %v4318_v37, %v4320_v31  ;;  %v4323_v21 = vsel %vm2763_vm5, %v4320_v31, %v4322_v3  ;;  %v17655_v37 = vld [vmem:[%s17886_s27 + $0x88] sm:$0xff]  }
 0x34e   : > { %v9902_v19 = vsel %vm9516_vm6, %v9892_v57, %v9901_v48  ;;  %v9911_v40 = vsel %vm9516_vm6, %v9901_v48, %v9910_v1  ;;  %v17654_v57 = vld [vmem:[%s17886_s27 + $0x80] sm:$0xff]   ;;  %v9970_v48 = vshll.u32 %v17656_v10, 16 }
 0x34f   : > { %15340 = vmatmul.mubr.msk.bf16.vlgmr.msra.gmra.mrb[0].mxu1 %vm1255_vm2, %v4307_v16  ;;  %v17644_v16 = vld [vmem:[%s17886_s27 + $0x180] sm:$0xff]   ;;  %v4330_v25 = vrot.slane %v17654_v57, 1 }
 0x350   : > { %16166 = vmatpush3.bf16.msra.mxu1 %v20930_v20  ;;  %15343 = vmatprep.mubr.msk.bf16.mxu1 %vm1255_vm2, %v4309_v49  ;;  %v9913_v29 = vshrl.u32 %v17644_v16, 16  ;;  %v9916_v49 = vshll.u32 %v17644_v16, 16  ;;  %v17657_v16 = vld [vmem:[%s17886_s27 + $0x1b8] sm:$0xff]   ;;  %v9972_v8 = vrot.slane %v9970_v48, 3 }
 0x352   : > { %15960 = vmatmul.mubr.msk.bf16.gmra.mrb[68].mxu0 %vm1255_vm2, %v9848_v4  ;;  %v9915_v20 = vrot.slane %v9913_v29, 2  ;;  %v9918_v39 = vrot.slane %v9916_v49, 3  ;;  %v4324_v4 = vrot.slane %v17647_v32, 1  ;;  %v9976_v29 = vshrl.u32 %v17657_v16, 16 }
 0x353   : > { %15963 = vmatprep.mubr.msk.bf16.mxu0 %vm1255_vm2, %v9857_v36  ;;  %v9979_v49 = vshll.u32 %v17657_v16, 16 }
 0x354   : > { %v9919_v36 = vor.u32 %v9918_v39, %v9915_v20  ;;  %v4325_v43 = vsel %vm2763_vm5, %v4322_v3, %v4324_v4  ;;  %v4327_v35 = vsel %vm2763_vm5, %v4324_v4, %v4326_v17  ;;  %v17659_v3 = vld [vmem:[%s17886_s27 + $0x98] sm:$0xff]   ;;  %v9978_v39 = vrot.slane %v9976_v29, 2 }
 0x355   : > { %v9981_v32 = vrot.slane %v9979_v49, 3 }
 0x356   : > { %v9920_v33 = vsel %vm9516_vm6, %v9910_v1, %v9919_v36  ;;  %v17658_v1 = vld [vmem:[%s17886_s27 + $0x90] sm:$0xff]  }
 0x357   : > { %15344 = vmatmul.mubr.msk.bf16.gmra.mrb[4].mxu1 %vm1255_vm2, %v4311_v26  ;;  %v9931_v26 = vshrl.u32 %v17648_v11, 16  ;;  %v4334_v13 = vrot.slane %v17658_v1, 1  ;;  %v17661_v11 = vld [vmem:[%s17886_s27 + $0x1c8] sm:$0xff]  }
 0x358   : > { %15347 = vmatprep.mubr.msk.bf16.mxu1 %vm1255_vm2, %v4313_v23  ;;  %v9928_v23 = vor.u32 %v9927_v28, %v9924_v2  ;;  %v17660_v28 = vld [vmem:[%s17886_s27 + $0x1c0] sm:$0xff]   ;;  %v9997_v46 = vshll.u32 %v17661_v11, 16 }
 0x359   : > { %v9933_v59 = vrot.slane %v9931_v26, 2  ;;  %v9994_v26 = vshrl.u32 %v17661_v11, 16 }
 0x35a   : > { %15964 = vmatmul.mubr.msk.bf16.gmra.mrb[72].mxu0 %vm1255_vm2, %v9866_v42  ;;  %v4328_v42 = vrot.slane %v17651_v24, 1  ;;  %v9929_v50 = vsel %vm9516_vm6, %v9919_v36, %v9928_v23  ;;  %v9988_v36 = vshll.u32 %v17660_v28, 16  ;;  %v9999_v24 = vrot.slane %v9997_v46, 3 }
 0x35b   : > { %15967 = vmatprep.mubr.msk.bf16.mxu0 %vm1255_vm2, %v9875_v15  ;;  %v9937_v15 = vor.u32 %v9936_v38, %v9933_v59  ;;  %v9996_v38 = vrot.slane %v9994_v26, 2 }
 0x35c   : > { %v4329_v60 = vsel %vm2763_vm5, %v4326_v17, %v4328_v42  ;;  %v4331_v31 = vsel %vm2763_vm5, %v4328_v42, %v4330_v25  ;;  %v9990_v30 = vrot.slane %v9988_v36, 3  ;;  %v17663_v17 = vld [vmem:[%s17886_s27 + $0xa8] sm:$0xff]  }
 0x35d   : > { %v9938_v18 = vsel %vm9516_vm6, %v9928_v23, %v9937_v15  ;;  %v17662_v23 = vld [vmem:[%s17886_s27 + $0xa0] sm:$0xff]  }
 0x35e   : > { %v4338_v56 = vrot.slane %v17662_v23, 1 }
 0x35f   : > { %15348 = vmatmul.mubr.msk.bf16.gmra.mrb[8].mxu1 %vm1255_vm2, %v4315_v22  ;;  %v9949_v22 = vshrl.u32 %v17652_v34, 16  ;;  %v17665_v34 = vld [vmem:[%s17886_s27 + $0x1d8] sm:$0xff]  }
 0x360   : > { %15351 = vmatprep.mubr.msk.bf16.mxu1 %vm1255_vm2, %v4317_v45  ;;  %v9946_v45 = vor.u32 %v9945_v27, %v9942_v53  ;;  %v17664_v27 = vld [vmem:[%s17886_s27 + $0x1d0] sm:$0xff]   ;;  %v10015_v52 = vshll.u32 %v17665_v34, 16 }
 0x361   : > { %v9951_v54 = vrot.slane %v9949_v22, 2  ;;  %v10012_v22 = vshrl.u32 %v17665_v34, 16 }
 0x362   : > { %15968 = vmatmul.mubr.msk.bf16.gmra.mrb[76].mxu0 %vm1255_vm2, %v9884_v55  ;;  %v4332_v55 = vrot.slane %v17655_v37, 1  ;;  %v9947_v6 = vsel %vm9516_vm6, %v9937_v15, %v9946_v45  ;;  %v10006_v15 = vshll.u32 %v17664_v27, 16  ;;  %v10017_v37 = vrot.slane %v10015_v52, 3 }
 0x363   : > { %15971 = vmatprep.mubr.msk.bf16.mxu0 %vm1255_vm2, %v9893_v58  ;;  %v9955_v58 = vor.u32 %v9954_v51, %v9951_v54  ;;  %v10014_v51 = vrot.slane %v10012_v22, 2 }
 0x364   : > { %v4333_v63 = vsel %vm2763_vm5, %v4330_v25, %v4332_v55  ;;  %v4335_v4 = vsel %vm2763_vm5, %v4332_v55, %v4334_v13  ;;  %v10008_v57 = vrot.slane %v10006_v15, 3  ;;  %v17667_v25 = vld [vmem:[%s17886_s27 + $0xb8] sm:$0xff]  }
 0x365   : > { %v9956_v44 = vsel %vm9516_vm6, %v9946_v45, %v9955_v58  ;;  %v17666_v45 = vld [vmem:[%s17886_s27 + $0xb0] sm:$0xff]  }
 0x366   : > { %v4342_v12 = vrot.slane %v17666_v45, 1 }
 0x367   : > { %15352 = vmatmul.mubr.msk.bf16.gmra.mrb[12].mxu1 %vm1255_vm2, %v4319_v62  ;;  %v9967_v62 = vshrl.u32 %v17656_v10, 16  ;;  %v17669_v10 = vld [vmem:[%s17886_s27 + $0x1e8] sm:$0xff]  }
 0x368   : > { %15355 = vmatprep.mubr.msk.bf16.mxu1 %vm1255_vm2, %v4321_v7  ;;  %v9964_v7 = vor.u32 %v9963_v61, %v9960_v47  ;;  %v17668_v61 = vld [vmem:[%s17886_s27 + $0x1e0] sm:$0xff]   ;;  %v10033_v48 = vshll.u32 %v17669_v10, 16 }
 0x369   : > { %v9969_v0 = vrot.slane %v9967_v62, 2  ;;  %v10030_v62 = vshrl.u32 %v17669_v10, 16 }
 0x36a   : > { %15972 = vmatmul.mubr.msk.bf16.gmra.mrb[80].mxu0 %vm1255_vm2, %v9902_v19  ;;  %v4336_v19 = vrot.slane %v17659_v3, 1  ;;  %v9965_v20 = vsel %vm9516_vm6, %v9955_v58, %v9964_v7  ;;  %v10024_v58 = vshll.u32 %v17668_v61, 16  ;;  %v10035_v3 = vrot.slane %v10033_v48, 3 }
 0x36b   : > { %15975 = vmatprep.mubr.msk.bf16.mxu0 %vm1255_vm2, %v9911_v40  ;;  %v9973_v40 = vor.u32 %v9972_v8, %v9969_v0  ;;  %v10032_v8 = vrot.slane %v10030_v62, 2 }
 0x36c   : > { %v4337_v2 = vsel %vm2763_vm5, %v4334_v13, %v4336_v19  ;;  %v4339_v42 = vsel %vm2763_vm5, %v4336_v19, %v4338_v56  ;;  %v10026_v1 = vrot.slane %v10024_v58, 3  ;;  %v17671_v13 = vld [vmem:[%s17886_s27 + $0xc8] sm:$0xff]  }
 0x36d   : > { %v9974_v9 = vsel %vm9516_vm6, %v9964_v7, %v9973_v40  ;;  %v17670_v7 = vld [vmem:[%s17886_s27 + $0xc0] sm:$0xff]  }
 0x36e   : > { %v4346_v16 = vrot.slane %v17670_v7, 1 }
 0x36f   : > { %15356 = vmatmul.mubr.msk.bf16.gmra.mrb[16].mxu1 %vm1255_vm2, %v4323_v21  ;;  %v9985_v21 = vshrl.u32 %v17660_v28, 16  ;;  %v17673_v28 = vld [vmem:[%s17886_s27 + $0x1f8] sm:$0xff]  }
 0x370   : > { %15359 = vmatprep.mubr.msk.bf16.mxu1 %vm1255_vm2, %v4325_v43  ;;  %v9982_v43 = vor.u32 %v9981_v32, %v9978_v39  ;;  %v17672_v32 = vld [vmem:[%s17886_s27 + $0x1f0] sm:$0xff]   ;;  %v10051_v36 = vshll.u32 %v17673_v28, 16 }
 0x371   : > { %v9987_v5 = vrot.slane %v9985_v21, 2  ;;  %v10048_v21 = vshrl.u32 %v17673_v28, 16 }
 0x372   : > { %15976 = vmatmul.mubr.msk.bf16.gmra.mrb[84].mxu0 %vm1255_vm2, %v9920_v33  ;;  %v4340_v33 = vrot.slane %v17663_v17, 1  ;;  %v9983_v59 = vsel %vm9516_vm6, %v9973_v40, %v9982_v43  ;;  %v10042_v40 = vshll.u32 %v17672_v32, 16  ;;  %v10053_v17 = vrot.slane %v10051_v36, 3 }
 0x373   : > { %15979 = vmatprep.mubr.msk.bf16.mxu0 %vm1255_vm2, %v9929_v50  ;;  %v9991_v50 = vor.u32 %v9990_v30, %v9987_v5  ;;  %v10050_v30 = vrot.slane %v10048_v21, 2 }
 0x374   : > { %v4341_v53 = vsel %vm2763_vm5, %v4338_v56, %v4340_v33  ;;  %v4343_v55 = vsel %vm2763_vm5, %v4340_v33, %v4342_v12  ;;  %v10044_v23 = vrot.slane %v10042_v40, 3  ;;  %v17675_v56 = vld [vmem:[%s17886_s27 + $0xd8] sm:$0xff]  }
 0x375   : > { %v9992_v14 = vsel %vm9516_vm6, %v9982_v43, %v9991_v50  ;;  %v17674_v43 = vld [vmem:[%s17886_s27 + $0xd0] sm:$0xff]  }
 0x376   : > { %v4350_v11 = vrot.slane %v17674_v43, 1 }
 0x377   : > { %15360 = vmatmul.mubr.msk.bf16.gmra.mrb[20].mxu1 %vm1255_vm2, %v4327_v35  ;;  %v10003_v35 = vshrl.u32 %v17664_v27, 16  ;;  %v17677_v27 = vld [vmem:[%s17886_s27 + $0x208] sm:$0xff]  }
 0x378   : > { %15363 = vmatprep.mubr.msk.bf16.mxu1 %vm1255_vm2, %v4329_v60  ;;  %v10000_v60 = vor.u32 %v9999_v24, %v9996_v38  ;;  %v17676_v24 = vld [vmem:[%s17886_s27 + $0x200] sm:$0xff]   ;;  %v10069_v15 = vshll.u32 %v17677_v27, 16 }
 0x379   : > { %v10005_v41 = vrot.slane %v10003_v35, 2  ;;  %v10066_v35 = vshrl.u32 %v17677_v27, 16 }
 0x37a   : > { %15980 = vmatmul.mubr.msk.bf16.gmra.mrb[88].mxu0 %vm1255_vm2, %v9938_v18  ;;  %v4344_v18 = vrot.slane %v17667_v25, 1  ;;  %v10001_v54 = vsel %vm9516_vm6, %v9991_v50, %v10000_v60  ;;  %v10060_v50 = vshll.u32 %v17676_v24, 16  ;;  %v10071_v25 = vrot.slane %v10069_v15, 3 }
 0x37b   : > { %15983 = vmatprep.mubr.msk.bf16.mxu0 %vm1255_vm2, %v9947_v6  ;;  %v10009_v6 = vor.u32 %v10008_v57, %v10005_v41  ;;  %v10068_v57 = vrot.slane %v10066_v35, 2 }
 0x37c   : > { %v4345_v47 = vsel %vm2763_vm5, %v4342_v12, %v4344_v18  ;;  %v4347_v19 = vsel %vm2763_vm5, %v4344_v18, %v4346_v16  ;;  %v10062_v45 = vrot.slane %v10060_v50, 3  ;;  %v17679_v12 = vld [vmem:[%s17886_s27 + $0xe8] sm:$0xff]  }
 0x37d   : > { %v10010_v29 = vsel %vm9516_vm6, %v10000_v60, %v10009_v6  ;;  %v17678_v60 = vld [vmem:[%s17886_s27 + $0xe0] sm:$0xff]  }
 0x37e   : > { %v4354_v34 = vrot.slane %v17678_v60, 1 }
 0x37f   : > { %15364 = vmatmul.mubr.msk.bf16.gmra.mrb[24].mxu1 %vm1255_vm2, %v4331_v31  ;;  %v10021_v31 = vshrl.u32 %v17668_v61, 16  ;;  %v17681_v61 = vld [vmem:[%s17886_s27 + $0x218] sm:$0xff]  }
 0x380   : > { %15367 = vmatprep.mubr.msk.bf16.mxu1 %vm1255_vm2, %v4333_v63  ;;  %v10018_v63 = vor.u32 %v10017_v37, %v10014_v51  ;;  %v17680_v37 = vld [vmem:[%s17886_s27 + $0x210] sm:$0xff]   ;;  %v10087_v58 = vshll.u32 %v17681_v61, 16 }
 0x381   : > { %v10023_v49 = vrot.slane %v10021_v31, 2  ;;  %v10084_v31 = vshrl.u32 %v17681_v61, 16 }
 0x382   : > { %15984 = vmatmul.mubr.msk.bf16.gmra.mrb[92].mxu0 %vm1255_vm2, %v9956_v44  ;;  %v4348_v44 = vrot.slane %v17671_v13, 1  ;;  %v10019_v0 = vsel %vm9516_vm6, %v10009_v6, %v10018_v63  ;;  %v10078_v6 = vshll.u32 %v17680_v37, 16  ;;  %v10089_v13 = vrot.slane %v10087_v58, 3  ;;  %v19603_v58 = vld [vmem:[%s17886_s27 + $0x128] sm:$0xff]  }
 0x383   : > { %15987 = vmatprep.mubr.msk.bf16.mxu0 %vm1255_vm2, %v9965_v20  ;;  %v10027_v20 = vor.u32 %v10026_v1, %v10023_v49  ;;  %v10086_v1 = vrot.slane %v10084_v31, 2 }
 0x384   : > { %v4349_v39 = vsel %vm2763_vm5, %v4346_v16, %v4348_v44  ;;  %v4351_v33 = vsel %vm2763_vm5, %v4348_v44, %v4350_v11  ;;  %v10080_v7 = vrot.slane %v10078_v6, 3  ;;  %v17683_v16 = vld [vmem:[%s17886_s27 + $0xf8] sm:$0xff]  }
 0x385   : > { %v10028_v26 = vsel %vm9516_vm6, %v10018_v63, %v10027_v20  ;;  %v17682_v63 = vld [vmem:[%s17886_s27 + $0xf0] sm:$0xff]  }
 0x386   : > { %v4358_v10 = vrot.slane %v17682_v63, 1  ;;  %v4372_v63 = vrot.slane %v19603_v58, 1 }
 0x387   : > { %15368 = vmatmul.mubr.msk.bf16.gmra.mrb[28].mxu1 %vm1255_vm2, %v4335_v4  ;;  %v10039_v4 = vshrl.u32 %v17672_v32, 16  ;;  %v17685_v32 = vld [vmem:[%s17886_s27 + $0x228] sm:$0xff]  }
 0x388   : > { %15371 = vmatprep.mubr.msk.bf16.mxu1 %vm1255_vm2, %v4337_v2  ;;  %v10036_v2 = vor.u32 %v10035_v3, %v10032_v8  ;;  %v17684_v3 = vld [vmem:[%s17886_s27 + $0x220] sm:$0xff]   ;;  %v10105_v40 = vshll.u32 %v17685_v32, 16 }
 0x389   : > { %v10041_v46 = vrot.slane %v10039_v4, 2  ;;  %v10102_v4 = vshrl.u32 %v17685_v32, 16  ;;  %v17698_v32 = vld [vmem:[%s17886_s27 + $0x30] sm:$0xff]  }
 0x38a   : > { %15988 = vmatmul.mubr.msk.bf16.gmra.mrb[96].mxu0 %vm1255_vm2, %v9974_v9  ;;  %v4352_v9 = vrot.slane %v17675_v56, 1  ;;  %v10037_v5 = vsel %vm9516_vm6, %v10027_v20, %v10036_v2  ;;  %v10096_v20 = vshll.u32 %v17684_v3, 16  ;;  %v10107_v56 = vrot.slane %v10105_v40, 3 }
 0x38b   : > { %15991 = vmatprep.mubr.msk.bf16.mxu0 %vm1255_vm2, %v9983_v59  ;;  %v10045_v59 = vor.u32 %v10044_v23, %v10041_v46  ;;  %v10104_v23 = vrot.slane %v10102_v4, 2  ;;  %v11067_v4 = vrot.slane %v17698_v32, 3 }
 0x38c   : > { %v4353_v38 = vsel %vm2763_vm5, %v4350_v11, %v4352_v9  ;;  %v4355_v18 = vsel %vm2763_vm5, %v4352_v9, %v4354_v34  ;;  %v10098_v43 = vrot.slane %v10096_v20, 3  ;;  %v17687_v11 = vld [vmem:[%s17886_s27 + $0x108] sm:$0xff]  }
 0x38d   : > { %v10046_v22 = vsel %vm9516_vm6, %v10036_v2, %v10045_v59  ;;  %v17686_v2 = vld [vmem:[%s17886_s27 + $0x100] sm:$0xff]  }
 0x38e   : > { %v4362_v28 = vrot.slane %v17686_v2, 1  ;;  %v17699_v2 = vld [vmem:[%s17886_s27 + $0x38] sm:$0xff]  }
 0x38f   : > { %15372 = vmatmul.mubr.msk.bf16.gmra.mrb[32].mxu1 %vm1255_vm2, %v4339_v42  ;;  %v10057_v42 = vshrl.u32 %v17676_v24, 16  ;;  %v17689_v24 = vld [vmem:[%s17886_s27 + $0x238] sm:$0xff]  }
 0x390   : > { %15375 = vmatprep.mubr.msk.bf16.mxu1 %vm1255_vm2, %v4341_v53  ;;  %v10054_v53 = vor.u32 %v10053_v17, %v10050_v30  ;;  %v17688_v17 = vld [vmem:[%s17886_s27 + $0x230] sm:$0xff]   ;;  %v10123_v50 = vshll.u32 %v17689_v24, 16 }
 0x391   : > { %v10059_v52 = vrot.slane %v10057_v42, 2  ;;  %v10120_v42 = vshrl.u32 %v17689_v24, 16  ;;  %v19657_v24 = vld [vmem:[%s17886_s27 + $0x158] sm:$0xff]  }
 0x392   : > { %15992 = vmatmul.mubr.msk.bf16.gmra.mrb[100].mxu0 %vm1255_vm2, %v9992_v14  ;;  %v4356_v14 = vrot.slane %v17679_v12, 1  ;;  %v10055_v41 = vsel %vm9516_vm6, %v10045_v59, %v10054_v53  ;;  %v10114_v59 = vshll.u32 %v17688_v17, 16 }
 0x393   : > { %15995 = vmatprep.mubr.msk.bf16.mxu0 %vm1255_vm2, %v10001_v54  ;;  %v10063_v54 = vor.u32 %v10062_v45, %v10059_v52  ;;  %v17500_v52 = vld [vmem:[%s17886_s27 + $0x240] ss:$0 sps:$4 sm:$0x77]   ;;  %v10122_v12 = vrot.slane %v10120_v42, 2  ;;  %v4384_v42 = vrot.slane %v19657_v24, 1 }
 0x394   : > { %v4357_v51 = vsel %vm2763_vm5, %v4354_v34, %v4356_v14  ;;  %v4359_v44 = vsel %vm2763_vm5, %v4356_v14, %v4358_v10  ;;  %v10116_v60 = vrot.slane %v10114_v59, 3  ;;  %v17691_v34 = vld [vmem:[%s17886_s27 + $0x118] sm:$0xff]   ;;  %v10125_v14 = vrot.slane %v10123_v50, 3 }
 0x395   : > { %v10064_v62 = vsel %vm9516_vm6, %v10054_v53, %v10063_v54  ;;  %v17690_v53 = vld [vmem:[%s17886_s27 + $0x110] sm:$0xff]  }
 0x396   : > { %v4366_v27 = vrot.slane %v17690_v53, 1 }
 0x397   : > { %15376 = vmatmul.mubr.msk.bf16.gmra.mrb[36].mxu1 %vm1255_vm2, %v4343_v55  ;;  %v10075_v55 = vshrl.u32 %v17680_v37, 16  ;;  %v11057_v37 = vld [vmem:[%s17886_s27 + $0x20] sm:$0x8] }
 0x398   : > { %15379 = vmatprep.mubr.msk.bf16.mxu1 %vm1255_vm2, %v4345_v47  ;;  %v10072_v47 = vor.u32 %v10071_v25, %v10068_v57 }
 0x399   : > { %v10077_v48 = vrot.slane %v10075_v55, 2  ;;  %v17692_v55 = vld [vmem:[%s17886_s27 + $0x120] sm:$0xff]  }
 0x39a   : > { %15996 = vmatmul.mubr.msk.bf16.gmra.mrb[104].mxu0 %vm1255_vm2, %v10010_v29  ;;  %v4360_v29 = vrot.slane %v17683_v16, 1  ;;  %v10073_v49 = vsel %vm9516_vm6, %v10063_v54, %v10072_v47  ;;  %v10132_v54 = vshll.u32 %v17500_v52, 16  ;;  %v4370_v6 = vrot.slane %v17692_v55, 1  ;;  %v19688_v55 = vld [vmem:[%s17886_s27 + $0x170] sm:$0xff]  }
 0x39b   : > { %15999 = vmatprep.mubr.msk.bf16.mxu0 %vm1255_vm2, %v10019_v0  ;;  %v10081_v0 = vor.u32 %v10080_v7, %v10077_v48 }
 0x39c   : > { %v4361_v8 = vsel %vm2763_vm5, %v4358_v10, %v4360_v29  ;;  %v4363_v9 = vsel %vm2763_vm5, %v4360_v29, %v4362_v28  ;;  %v10134_v31 = vrot.slane %v10132_v54, 3  ;;  %v4373_v29 = vsel %vm2763_vm5, %v4370_v6, %v4372_v63 }
 0x39d   : > { %v10082_v21 = vsel %vm9516_vm6, %v10072_v47, %v10081_v0 }
 0x39f   : > { %15380 = vmatmul.mubr.msk.bf16.gmra.mrb[40].mxu1 %vm1255_vm2, %v4347_v19  ;;  %v10093_v19 = vshrl.u32 %v17684_v3, 16  ;;  %v19621_v3 = vld [vmem:[%s17886_s27 + $0x138] sm:$0xff]  }
 0x3a0   : > { %15383 = vmatprep.mubr.msk.bf16.mxu1 %vm1255_vm2, %v4349_v39  ;;  %v10090_v39 = vor.u32 %v10089_v13, %v10086_v1  ;;  %v17695_v1 = vld [vmem:[%s17886_s27 + $0x28] sm:$0xff]  }
 0x3a1   : > { %v10095_v36 = vrot.slane %v10093_v19, 2  ;;  %v11065_v13 = vrot.slane %v17695_v1, 3  ;;  %v4376_v19 = vrot.slane %v19621_v3, 1 }
 0x3a2   : > { %16000 = vmatmul.mubr.msk.bf16.gmra.mrb[108].mxu0 %vm1255_vm2, %v10028_v26  ;;  %v4364_v26 = vrot.slane %v17687_v11, 1  ;;  %v10091_v46 = vsel %vm9516_vm6, %v10081_v0, %v10090_v39  ;;  %v19639_v11 = vld [vmem:[%s17886_s27 + $0x148] sm:$0xff]  }
 0x3a3   : > { %16003 = vmatprep.mubr.msk.bf16.mxu0 %vm1255_vm2, %v10037_v5  ;;  %v10099_v5 = vor.u32 %v10098_v43, %v10095_v36  ;;  %v11068_v43 = vsel %vm11063_vm7, %v11065_v13, %v11067_v4 }
 0x3a4   : > { %v4365_v30 = vsel %vm2763_vm5, %v4362_v28, %v4364_v26  ;;  %v11069_v28 = vrot.slane %v17699_v2, 3 }
 0x3a5   : > { %v10100_v35 = vsel %vm9516_vm6, %v10090_v39, %v10099_v5 }
 0x3a7   : > { %15384 = vmatmul.mubr.msk.bf16.gmra.mrb[44].mxu1 %vm1255_vm2, %v4351_v33  ;;  %v10111_v33 = vshrl.u32 %v17688_v17, 16 }
 0x3a8   : > { %15387 = vmatprep.mubr.msk.bf16.mxu1 %vm1255_vm2, %v4353_v38  ;;  %v10108_v38 = vor.u32 %v10107_v56, %v10104_v23  ;;  %v17702_v56 = vld [vmem:[%s17886_s27 + $0x40] sm:$0xff]  }
 0x3a9   : > { %v10113_v15 = vrot.slane %v10111_v33, 2  ;;  %v19652_v33 = vld [vmem:[%s17886_s27 + $0x150] sm:$0xff]  }
 0x3aa   : > { %16004 = vmatmul.mubr.msk.bf16.gmra.mrb[112].mxu0 %vm1255_vm2, %v10046_v22  ;;  %v4368_v22 = vrot.slane %v17691_v34, 1  ;;  %v10109_v45 = vsel %vm9516_vm6, %v10099_v5, %v10108_v38  ;;  %v4382_v59 = vrot.slane %v19652_v33, 1 }
 0x3ab   : > { %16007 = vmatprep.mubr.msk.bf16.mxu0 %vm1255_vm2, %v10055_v41  ;;  %v4367_v41 = vsel %vm2763_vm5, %v4364_v26, %v4366_v27  ;;  %v10117_v57 = vor.u32 %v10116_v60, %v10113_v15  ;;  %v4380_v26 = vrot.slane %v19639_v11, 1  ;;  %v17707_v60 = vld [vmem:[%s17886_s27 + $0x58] sm:$0xff]  }
 0x3ac   : > { %v4369_v25 = vsel %vm2763_vm5, %v4366_v27, %v4368_v22  ;;  %v4371_v7 = vsel %vm2763_vm5, %v4368_v22, %v4370_v6  ;;  %v17706_v27 = vld [vmem:[%s17886_s27 + $0x50] sm:$0xff]   ;;  %v4385_v15 = vsel %vm2763_vm5, %v4382_v59, %v4384_v42  ;;  %v11077_v34 = vrot.slane %v17707_v60, 3  ;;  %v19670_v22 = vld [vmem:[%s17886_s27 + $0x160] sm:$0xff]  }
 0x3ad   : > { %v10118_v47 = vsel %vm9516_vm6, %v10108_v38, %v10117_v57  ;;  %v4383_v53 = vsel %vm2763_vm5, %v4380_v26, %v4382_v59  ;;  %v4390_v6 = vrot.slane %v19688_v55, 1  ;;  %v17726_v60 = vld [vmem:[%s17886_s27 + $0xa0] sm:$0xff]  }
 0x3af   : > { %15388 = vmatmul.mubr.msk.bf16.gmra.mrb[48].mxu1 %vm1255_vm2, %v4355_v18  ;;  %v10129_v18 = vshrl.u32 %v17500_v52, 16  ;;  %v4386_v52 = vrot.slane %v19670_v22, 1 }
 0x3b0   : > { %15391 = vmatprep.mubr.msk.bf16.mxu1 %vm1255_vm2, %v4357_v51  ;;  %v10126_v51 = vor.u32 %v10125_v14, %v10122_v12  ;;  %v19675_v12 = vld [vmem:[%s17886_s27 + $0x168] sm:$0xff]  }
 0x3b1   : > { %v10131_v61 = vrot.slane %v10129_v18, 2  ;;  %v4388_v14 = vrot.slane %v19675_v12, 1 }
 0x3b2   : > { %16008 = vmatmul.mubr.msk.bf16.gmra.mrb[116].mxu0 %vm1255_vm2, %v10064_v62  ;;  %v10127_v10 = vsel %vm9516_vm6, %v10117_v57, %v10126_v51  ;;  %v17694_v62 = vld [vmem:[%s17886_s27 + $0x24] sm:$0xf]  ;;  %v4387_v57 = vsel %vm2763_vm5, %v4384_v42, %v4386_v52 }
 0x3b3   : > { %16011 = vmatprep.mubr.msk.bf16.mxu0 %vm1255_vm2, %v10073_v49  ;;  %v13958_v48 = vcombine.low %v11057_v37, %v17694_v62  ;;  %v10135_v16 = vor.u32 %v10134_v31, %v10131_v61  ;;  %v4389_v54 = vsel %vm2763_vm5, %v4386_v52, %v4388_v14  ;;  %v19693_v61 = vld [vmem:[%s17886_s27 + $0x178] sm:$0xff]   ;;  %v17714_v62 = vld [vmem:[%s17886_s27 + $0x70] sm:$0xff]  }
 0x3b4   : > { %v4392_v31 = vrot.slane %v19693_v61, 1 }
 0x3b5   : > { %v11064_v49 = vrot.slane %v13958_v48, 3  ;;  %v11083_v48 = vrot.slane %v17714_v62, 3  ;;  %v19778_v62 = vld [vmem:[%s17886_s27 + $0x1c0] sm:$0xff]  }
 0x3b7   : > { %15392 = vmatmul.mubr.msk.bf16.gmra.mrb[52].mxu1 %vm1255_vm2, %v4359_v44  ;;  %v19616_v44 = vld [vmem:[%s17886_s27 + $0x130] sm:$0xff]   ;;  %v11066_v20 = vsel %vm11063_vm7, %v11064_v49, %v11065_v13  ;;  %v19706_v49 = vld [vmem:[%s17886_s27 + $0x180] sm:$0xff]  }
 0x3b8   : > { %15395 = vmatprep.mubr.msk.bf16.mxu1 %vm1255_vm2, %v4361_v8  ;;  %v4374_v0 = vrot.slane %v19616_v44, 1  ;;  %v10136_v8 = vsel %vm9516_vm6, %v10126_v51, %v10135_v16  ;;  %v17711_v51 = vld [vmem:[%s17886_s27 + $0x68] sm:$0xff]   ;;  %v17715_v16 = vld [vmem:[%s17886_s27 + $0x78] sm:$0xff]   ;;  %v4394_v1 = vrot.slane %v19706_v49, 1 }
 0x3b9   : > { %v11081_v37 = vrot.slane %v17711_v51, 3 }
 0x3ba   : > { %16012 = vmatmul.mubr.msk.bf16.gmra.mrb[120].mxu0 %vm1255_vm2, %v10082_v21  ;;  %v4375_v39 = vsel %vm2763_vm5, %v4372_v63, %v4374_v0  ;;  %v4377_v40 = vsel %vm2763_vm5, %v4374_v0, %v4376_v19  ;;  %v19634_v21 = vld [vmem:[%s17886_s27 + $0x140] sm:$0xff]   ;;  %v19711_v0 = vld [vmem:[%s17886_s27 + $0x188] sm:$0xff]  }
 0x3bb   : > { %16015 = vmatprep.mubr.msk.bf16.mxu0 %vm1255_vm2, %v10091_v46  ;;  %v4378_v36 = vrot.slane %v19634_v21, 1  ;;  %v11070_v46 = vsel %vm11063_vm7, %v11067_v4, %v11069_v28  ;;  %v11084_v13 = vsel %vm11063_vm7, %v11081_v37, %v11083_v48 }
 0x3bd   : > { %v4379_v23 = vsel %vm2763_vm5, %v4376_v19, %v4378_v36  ;;  %v4381_v5 = vsel %vm2763_vm5, %v4378_v36, %v4380_v26  ;;  %v19729_v26 = vld [vmem:[%s17886_s27 + $0x198] sm:$0xff]  }
 0x3bf   : > { %15396 = vmatmul.mubr.msk.bf16.gmra.mrb[56].mxu1 %vm1255_vm2, %v4363_v9  ;;  %v11071_v9 = vrot.slane %v17702_v56, 3 }
 0x3c0   : > { %15399 = vmatprep.mubr.msk.bf16.mxu1 %vm1255_vm2, %v4365_v30  ;;  %v17703_v30 = vld [vmem:[%s17886_s27 + $0x48] sm:$0xff]  }
 0x3c1   : > { %v11073_v17 = vrot.slane %v17703_v30, 3  ;;  %v11072_v38 = vsel %vm11063_vm7, %v11069_v28, %v11071_v9  ;;  %v19724_v28 = vld [vmem:[%s17886_s27 + $0x190] sm:$0xff]  }
 0x3c2   : > { %16016 = vmatmul.mubr.msk.bf16.gmra.mrb[124].mxu0 %vm1255_vm2, %v10100_v35  ;;  %v11075_v35 = vrot.slane %v17706_v27, 3  ;;  %v4398_v36 = vrot.slane %v19724_v28, 1 }
 0x3c3   : > { %16019 = vmatprep.mubr.msk.bf16.mxu0 %vm1255_vm2, %v10109_v45  ;;  %v11074_v50 = vsel %vm11063_vm7, %v11071_v9, %v11073_v17  ;;  %v17722_v9 = vld [vmem:[%s17886_s27 + $0x90] sm:$0xff]  }
 0x3c4   : > { %v11076_v45 = vsel %vm11063_vm7, %v11073_v17, %v11075_v35  ;;  %v17723_v17 = vld [vmem:[%s17886_s27 + $0x98] sm:$0xff]  }
 0x3c5   : > { %v11093_v59 = vrot.slane %v17723_v17, 3  ;;  %v17738_v17 = vld [vmem:[%s17886_s27 + $0xd0] sm:$0xff]  }
 0x3c7   : > { %15400 = vmatmul.mubr.msk.bf16.gmra.mrb[60].mxu1 %vm1255_vm2, %v4367_v41  ;;  %v11078_v41 = vsel %vm11063_vm7, %v11075_v35, %v11077_v34 }
 0x3c8   : > { %15403 = vmatprep.mubr.msk.bf16.mxu1 %vm1255_vm2, %v4369_v25  ;;  %v17710_v25 = vld [vmem:[%s17886_s27 + $0x60] sm:$0xff]  }
 0x3c9   : > { %v11079_v18 = vrot.slane %v17710_v25, 3 }
 0x3ca   : > { %16020 = vmatmul.mubr.msk.bf16.gmra.mrb[128].mxu0 %vm1255_vm2, %v10118_v47 }
 0x3cb   : > { %16023 = vmatprep.mubr.msk.bf16.mxu0 %vm1255_vm2, %v10127_v10  ;;  %v11080_v47 = vsel %vm11063_vm7, %v11077_v34, %v11079_v18  ;;  %v11082_v63 = vsel %vm11063_vm7, %v11079_v18, %v11081_v37  ;;  %v4391_v10 = vsel %vm2763_vm5, %v4388_v14, %v4390_v6  ;;  %v11095_v34 = vrot.slane %v17726_v60, 3  ;;  %v19765_v18 = vld [vmem:[%s17886_s27 + $0x1b8] sm:$0xff]  }
 0x3cd   : > { %v11096_v25 = vsel %vm11063_vm7, %v11093_v59, %v11095_v34 }
 0x3cf   : > { %15404 = vmatmul.mubr.msk.bf16.gmra.mrb[64].mxu1 %vm1255_vm2, %v4371_v7  ;;  %v4393_v7 = vsel %vm2763_vm5, %v4390_v6, %v4392_v31  ;;  %v17730_v6 = vld [vmem:[%s17886_s27 + $0xb0] sm:$0xff]  }
 0x3d0   : > { %15407 = vmatprep.mubr.msk.bf16.mxu1 %vm1255_vm2, %v4373_v29  ;;  %v11085_v29 = vrot.slane %v17715_v16, 3  ;;  %v19783_v16 = vld [vmem:[%s17886_s27 + $0x1c8] sm:$0xff]  }
 0x3d2   : > { %16024 = vmatmul.mubr.msk.bf16.gmra.mrb[132].mxu0 %vm1255_vm2, %v10136_v8  ;;  %v4396_v8 = vrot.slane %v19711_v0, 1  ;;  %v11086_v19 = vsel %vm11063_vm7, %v11083_v48, %v11085_v29  ;;  %v4410_v48 = vrot.slane %v19778_v62, 1 }
 0x3d3   : > { %16029 = vmatprep.mubr.msk.bf16.mxu0 %vm1255_vm2, %v11066_v20  ;;  %v4395_v20 = vsel %vm2763_vm5, %v4392_v31, %v4394_v1 }
 0x3d4   : > { %v4397_v4 = vsel %vm2763_vm5, %v4394_v1, %v4396_v8  ;;  %v4399_v56 = vsel %vm2763_vm5, %v4396_v8, %v4398_v36  ;;  %v17734_v8 = vld [vmem:[%s17886_s27 + $0xc0] sm:$0xff]  }
 0x3d7   : > { %15408 = vmatmul.mubr.msk.bf16.gmra.mrb[68].mxu1 %vm1255_vm2, %v4375_v39  ;;  %v17718_v39 = vld [vmem:[%s17886_s27 + $0x80] sm:$0xff]  }
 0x3d8   : > { %15411 = vmatprep.mubr.msk.bf16.mxu1 %vm1255_vm2, %v4377_v40  ;;  %v11087_v32 = vrot.slane %v17718_v39, 3  ;;  %v17719_v40 = vld [vmem:[%s17886_s27 + $0x88] sm:$0xff]  }
 0x3d9   : > { %v11089_v2 = vrot.slane %v17719_v40, 3  ;;  %v17735_v39 = vld [vmem:[%s17886_s27 + $0xc8] sm:$0xff]  }
 0x3da   : > { %16030 = vmatmul.mubr.msk.bf16.vlgmr.msra.gmra.mrb[0].mxu0 %vm1255_vm2, %v11068_v43  ;;  %v11088_v43 = vsel %vm11063_vm7, %v11085_v29, %v11087_v32  ;;  %v4412_v29 = vrot.slane %v19783_v16, 1 }
 0x3db   : > { %16033 = vmatprep.mubr.msk.bf16.mxu0 %vm1255_vm2, %v11070_v46  ;;  %v4400_v46 = vrot.slane %v19729_v26, 1 }
 0x3dd   : > { %v4401_v30 = vsel %vm2763_vm5, %v4398_v36, %v4400_v46  ;;  %v19801_v36 = vld [vmem:[%s17886_s27 + $0x1d8] sm:$0xff]  }
 0x3df   : > { %15412 = vmatmul.mubr.msk.bf16.gmra.mrb[72].mxu1 %vm1255_vm2, %v4379_v23  ;;  %v11090_v23 = vsel %vm11063_vm7, %v11087_v32, %v11089_v2  ;;  %v11105_v32 = vrot.slane %v17735_v39, 3 }
 0x3e0   : > { %15415 = vmatprep.mubr.msk.bf16.mxu1 %vm1255_vm2, %v4381_v5  ;;  %v11091_v5 = vrot.slane %v17722_v9, 3 }
 0x3e2   : > { %16034 = vmatmul.mubr.msk.bf16.gmra.mrb[4].mxu0 %vm1255_vm2, %v11072_v38  ;;  %v19742_v38 = vld [vmem:[%s17886_s27 + $0x1a0] sm:$0xff]   ;;  %v11094_v35 = vsel %vm11063_vm7, %v11091_v5, %v11093_v59  ;;  %v11107_v59 = vrot.slane %v17738_v17, 3 }
 0x3e3   : > { %16037 = vmatprep.mubr.msk.bf16.mxu0 %vm1255_vm2, %v11074_v50  ;;  %v4402_v42 = vrot.slane %v19742_v38, 1  ;;  %v11092_v50 = vsel %vm11063_vm7, %v11089_v2, %v11091_v5  ;;  %v19874_v17 = vld [vmem:[%s17886_s27 + $0x200] sm:$0xff]  }
 0x3e4   : > { %v11108_v60 = vsel %vm11063_vm7, %v11105_v32, %v11107_v59 }
 0x3e7   : > { %15416 = vmatmul.mubr.msk.bf16.gmra.mrb[76].mxu1 %vm1255_vm2, %v4383_v53  ;;  %v19747_v53 = vld [vmem:[%s17886_s27 + $0x1a8] sm:$0xff]  }
 0x3e8   : > { %15419 = vmatprep.mubr.msk.bf16.mxu1 %vm1255_vm2, %v4385_v15  ;;  %v4404_v27 = vrot.slane %v19747_v53, 1  ;;  %v4403_v15 = vsel %vm2763_vm5, %v4400_v46, %v4402_v42 }
 0x3ea   : > { %16038 = vmatmul.mubr.msk.bf16.gmra.mrb[8].mxu0 %vm1255_vm2, %v11076_v45  ;;  %v4405_v52 = vsel %vm2763_vm5, %v4402_v42, %v4404_v27  ;;  %v17727_v45 = vld [vmem:[%s17886_s27 + $0xa8] sm:$0xff]  }
 0x3eb   : > { %16041 = vmatprep.mubr.msk.bf16.mxu0 %vm1255_vm2, %v11078_v41  ;;  %v11097_v14 = vrot.slane %v17727_v45, 3  ;;  %v19760_v41 = vld [vmem:[%s17886_s27 + $0x1b0] sm:$0xff]  }
 0x3ed   : > { %v11098_v51 = vsel %vm11063_vm7, %v11095_v34, %v11097_v14  ;;  %v19827_v34 = vld [vmem:[%s17886_s27 + $0x1e8] sm:$0xff]  }
 0x3ef   : > { %15420 = vmatmul.mubr.msk.bf16.gmra.mrb[80].mxu1 %vm1255_vm2, %v4387_v57  ;;  %v4406_v57 = vrot.slane %v19760_v41, 1 }
 0x3f0   : > { %15423 = vmatprep.mubr.msk.bf16.mxu1 %vm1255_vm2, %v4389_v54  ;;  %v4408_v54 = vrot.slane %v19765_v18, 1 }
 0x3f1   : > { %v4407_v37 = vsel %vm2763_vm5, %v4404_v27, %v4406_v57 }
 0x3f2   : > { %16042 = vmatmul.mubr.msk.bf16.gmra.mrb[12].mxu0 %vm1255_vm2, %v11080_v47  ;;  %v11099_v47 = vrot.slane %v17730_v6, 3  ;;  %v4409_v31 = vsel %vm2763_vm5, %v4406_v57, %v4408_v54 }
 0x3f3   : > { %16045 = vmatprep.mubr.msk.bf16.mxu0 %vm1255_vm2, %v11082_v63  ;;  %v17731_v63 = vld [vmem:[%s17886_s27 + $0xb8] sm:$0xff]  }
 0x3f7   : > { %15424 = vmatmul.mubr.msk.bf16.gmra.mrb[84].mxu1 %vm1255_vm2, %v4391_v10  ;;  %v11101_v10 = vrot.slane %v17731_v63, 3 }
 0x3f8   : > { %15427 = vmatprep.mubr.msk.bf16.mxu1 %vm1255_vm2, %v4393_v7  ;;  %v11100_v7 = vsel %vm11063_vm7, %v11097_v14, %v11099_v47 }
 0x3f9   : > { %v11102_v1 = vsel %vm11063_vm7, %v11099_v47, %v11101_v10 }
 0x3fa   : > { %16046 = vmatmul.mubr.msk.bf16.gmra.mrb[16].mxu0 %vm1255_vm2, %v11084_v13  ;;  %v4411_v13 = vsel %vm2763_vm5, %v4408_v54, %v4410_v48 }
 0x3fb   : > { %16049 = vmatprep.mubr.msk.bf16.mxu0 %vm1255_vm2, %v11086_v19  ;;  %v11103_v19 = vrot.slane %v17734_v8, 3 }
 0x3fd   : > { %v11104_v2 = vsel %vm11063_vm7, %v11101_v10, %v11103_v19  ;;  %v19848_v10 = vld [vmem:[%s17886_s27 + $0x1f0] sm:$0xff]  }
 0x3ff   : > { %15428 = vmatmul.mubr.msk.bf16.gmra.mrb[88].mxu1 %vm1255_vm2, %v4395_v20  ;;  %v4413_v20 = vsel %vm2763_vm5, %v4410_v48, %v4412_v29  ;;  %v4422_v48 = vrot.slane %v19848_v10, 1 }
 0x400   : > { %15431 = vmatprep.mubr.msk.bf16.mxu1 %vm1255_vm2, %v4397_v4  ;;  %v19796_v4 = vld [vmem:[%s17886_s27 + $0x1d0] sm:$0xff]  }
 0x401   : > { %v4414_v40 = vrot.slane %v19796_v4, 1 }
 0x402   : > { %16050 = vmatmul.mubr.msk.bf16.gmra.mrb[20].mxu0 %vm1255_vm2, %v11088_v43  ;;  %v4416_v43 = vrot.slane %v19801_v36, 1 }
 0x403   : > { %16053 = vmatprep.mubr.msk.bf16.mxu0 %vm1255_vm2, %v11090_v23  ;;  %v11106_v23 = vsel %vm11063_vm7, %v11103_v19, %v11105_v32  ;;  %v4415_v5 = vsel %vm2763_vm5, %v4412_v29, %v4414_v40  ;;  %v19853_v29 = vld [vmem:[%s17886_s27 + $0x1f8] sm:$0xff]  }
 0x404   : > { %v4417_v42 = vsel %vm2763_vm5, %v4414_v40, %v4416_v43  ;;  %v17746_v40 = vld [vmem:[%s17886_s27 + $0xf0] sm:$0xff]  }
 0x407   : > { %15432 = vmatmul.mubr.msk.bf16.gmra.mrb[92].mxu1 %vm1255_vm2, %v4399_v56 }
 0x408   : > { %15435 = vmatprep.mubr.msk.bf16.mxu1 %vm1255_vm2, %v4401_v30 }
 0x40a   : > { %16054 = vmatmul.mubr.msk.bf16.gmra.mrb[24].mxu0 %vm1255_vm2, %v11092_v50  ;;  %v17739_v50 = vld [vmem:[%s17886_s27 + $0xd8] sm:$0xff]  }
 0x40b   : > { %16057 = vmatprep.mubr.msk.bf16.mxu0 %vm1255_vm2, %v11094_v35  ;;  %v11109_v27 = vrot.slane %v17739_v50, 3  ;;  %v19822_v35 = vld [vmem:[%s17886_s27 + $0x1e0] sm:$0xff]   ;;  %v19879_v50 = vld [vmem:[%s17886_s27 + $0x208] sm:$0xff]  }
 0x40d   : > { %v11110_v14 = vsel %vm11063_vm7, %v11107_v59, %v11109_v27  ;;  %v4426_v59 = vrot.slane %v19874_v17, 1 }
 0x40f   : > { %15436 = vmatmul.mubr.msk.bf16.gmra.mrb[96].mxu1 %vm1255_vm2, %v4403_v15  ;;  %v4418_v15 = vrot.slane %v19822_v35, 1 }
 0x410   : > { %15439 = vmatprep.mubr.msk.bf16.mxu1 %vm1255_vm2, %v4405_v52  ;;  %v4420_v52 = vrot.slane %v19827_v34, 1 }
 0x411   : > { %v4419_v54 = vsel %vm2763_vm5, %v4416_v43, %v4418_v15 }
 0x412   : > { %16058 = vmatmul.mubr.msk.bf16.gmra.mrb[28].mxu0 %vm1255_vm2, %v11096_v25  ;;  %v4421_v47 = vsel %vm2763_vm5, %v4418_v15, %v4420_v52  ;;  %v4423_v39 = vsel %vm2763_vm5, %v4420_v52, %v4422_v48 }
 0x413   : > { %16061 = vmatprep.mubr.msk.bf16.mxu0 %vm1255_vm2, %v11098_v51 }
 0x417   : > { %15440 = vmatmul.mubr.msk.bf16.gmra.mrb[100].mxu1 %vm1255_vm2, %v4407_v37  ;;  %v17742_v37 = vld [vmem:[%s17886_s27 + $0xe0] sm:$0xff]  }
 0x418   : > { %15443 = vmatprep.mubr.msk.bf16.mxu1 %vm1255_vm2, %v4409_v31  ;;  %v11111_v6 = vrot.slane %v17742_v37, 3  ;;  %v17743_v31 = vld [vmem:[%s17886_s27 + $0xe8] sm:$0xff]  }
 0x419   : > { %v11113_v63 = vrot.slane %v17743_v31, 3 }
 0x41a   : > { %16062 = vmatmul.mubr.msk.bf16.gmra.mrb[32].mxu0 %vm1255_vm2, %v11100_v7  ;;  %v11112_v7 = vsel %vm11063_vm7, %v11109_v27, %v11111_v6  ;;  %v4428_v27 = vrot.slane %v19879_v50, 1 }
 0x41b   : > { %16065 = vmatprep.mubr.msk.bf16.mxu0 %vm1255_vm2, %v11102_v1  ;;  %v4424_v1 = vrot.slane %v19853_v29, 1  ;;  %v11114_v8 = vsel %vm11063_vm7, %v11111_v6, %v11113_v63  ;;  %v17750_v6 = vld [vmem:[%s17886_s27 + $0x100] sm:$0xff]  }
 0x41c   : > { %v4429_v31 = vsel %vm2763_vm5, %v4426_v59, %v4428_v27 }
 0x41d   : > { %v4425_v43 = vsel %vm2763_vm5, %v4422_v48, %v4424_v1 }
 0x41f   : > { %15444 = vmatmul.mubr.msk.bf16.gmra.mrb[104].mxu1 %vm1255_vm2, %v4411_v13 }
 0x420   : > { %15447 = vmatprep.mubr.msk.bf16.mxu1 %vm1255_vm2, %v4413_v20 }
 0x422   : > { %v19804_v46 = vpop.f32.mrb[0].mxu1  ;;  %16066 = vmatmul.mubr.msk.bf16.gmra.mrb[36].mxu0 %vm1255_vm2, %v11104_v2  ;;  %v11115_v2 = vrot.slane %v17746_v40, 3 }
 0x423   : > { %v19807_v56 = vpop.f32.mrb[1].mxu1  ;;  %16069 = vmatprep.mubr.msk.bf16.mxu0 %vm1255_vm2, %v11106_v23  ;;  %v17747_v23 = vld [vmem:[%s17886_s27 + $0xf8] sm:$0xff]  }
 0x424   : > { %v19810_v9 = vpop.f32.mrb[2].mxu1 }
 0x425   : > { %v19813_v30 = vpop.f32.mrb[3].mxu1 }
 0x427   : > { %15448 = vmatmul.mubr.msk.bf16.gmra.mrb[108].mxu1 %vm1255_vm2, %v4415_v5  ;;  %v11117_v5 = vrot.slane %v17747_v23, 3 }
 0x428   : > { %15451 = vmatprep.mubr.msk.bf16.mxu1 %vm1255_vm2, %v4417_v42  ;;  %v11116_v42 = vsel %vm11063_vm7, %v11113_v63, %v11115_v2  ;;  %v17751_v63 = vld [vmem:[%s17886_s27 + $0x108] sm:$0xff]  }
 0x429   : > { %v11121_v48 = vrot.slane %v17751_v63, 3 }
 0x42a   : > { %v19830_v45 = vpop.f32.mrb[4].mxu1  ;;  %16070 = vmatmul.mubr.msk.bf16.gmra.mrb[40].mxu0 %vm1255_vm2, %v11108_v60  ;;  %v11118_v60 = vsel %vm11063_vm7, %v11115_v2, %v11117_v5 }
 0x42b   : > { %v19833_v57 = vpop.f32.mrb[5].mxu1  ;;  %16073 = vmatprep.mubr.msk.bf16.mxu0 %vm1255_vm2, %v11110_v14 }
 0x42c   : > { %v19836_v25 = vpop.f32.mrb[6].mxu1 }
 0x42d   : > { %v19839_v51 = vpop.f32.mrb[7].mxu1 }
 0x42f   : > { %15452 = vmatmul.mubr.msk.bf16.gmra.mrb[112].mxu1 %vm1255_vm2, %v4419_v54  ;;  %v4427_v54 = vsel %vm2763_vm5, %v4424_v1, %v4426_v59 }
 0x430   : > { %15455 = vmatprep.mubr.msk.bf16.mxu1 %vm1255_vm2, %v4421_v47  ;;  %v11119_v47 = vrot.slane %v17750_v6, 3 }
 0x432   : > { %v19856_v13 = vpop.f32.mrb[8].mxu1  ;;  %16074 = vmatmul.mubr.msk.bf16.gmra.mrb[44].mxu0 %vm1255_vm2, %v11112_v7  ;;  %v19900_v7 = vld [vmem:[%s17886_s27 + $0x210] sm:$0xff]  }
 0x433   : > { %v19859_v19 = vpop.f32.mrb[9].mxu1  ;;  %16077 = vmatprep.mubr.msk.bf16.mxu0 %vm1255_vm2, %v11114_v8  ;;  %v4430_v1 = vrot.slane %v19900_v7, 1  ;;  %v11120_v8 = vsel %vm11063_vm7, %v11117_v5, %v11119_v47  ;;  %v17754_v5 = vld [vmem:[%s17886_s27 + $0x110] sm:$0xff]  }
 0x434   : > { %v19862_v20 = vpop.f32.mrb[10].mxu1 }
 0x435   : > { %v19865_v32 = vpop.f32.mrb[11].mxu1 }
 0x437   : > { %15456 = vmatmul.mubr.msk.bf16.gmra.mrb[116].mxu1 %vm1255_vm2, %v4423_v39  ;;  %v19905_v39 = vld [vmem:[%s17886_s27 + $0x218] sm:$0xff]  }
 0x438   : > { %15459 = vmatprep.mubr.msk.bf16.mxu1 %vm1255_vm2, %v4425_v43  ;;  %v4432_v40 = vrot.slane %v19905_v39, 1  ;;  %v11122_v43 = vsel %vm11063_vm7, %v11119_v47, %v11121_v48  ;;  %v19926_v47 = vld [vmem:[%s17886_s27 + $0x220] sm:$0xff]  }
 0x43a   : > { %v19882_v15 = vpop.f32.mrb[12].mxu1  ;;  %16078 = vmatmul.mubr.msk.bf16.gmra.mrb[48].mxu0 %vm1255_vm2, %v11116_v42  ;;  %v4431_v42 = vsel %vm2763_vm5, %v4428_v27, %v4430_v1  ;;  %v4433_v6 = vsel %vm2763_vm5, %v4430_v1, %v4432_v40  ;;  %v4434_v27 = vrot.slane %v19926_v47, 1  ;;  %v5682_v1 = vshrl.u32 %v19603_v58, 16 }
 0x43b   : > { %20931 = vst [vmem:[#allocation5_spill] sm:$0xff] %v19882_v15  ;;  %v19885_v52 = vpop.f32.mrb[13].mxu1  ;;  %16081 = vmatprep.mubr.msk.bf16.mxu0 %vm1255_vm2, %v11118_v60 }
 0x43c   : > { %20932 = vst [vmem:[#allocation6_spill] sm:$0xff] %v19885_v52  ;;  %v19888_v14 = vpop.f32.mrb[14].mxu1 }
 0x43d   : > { %20933 = vst [vmem:[#allocation7_spill] sm:$0xff] %v19888_v14  ;;  %v19891_v37 = vpop.f32.mrb[15].mxu1 }
 0x43e   : > { %20934 = vst [vmem:[#allocation10_spill] sm:$0xff] %v19891_v37  ;;  %v17758_v37 = vld [vmem:[%s17886_s27 + $0x120] sm:$0xff]  }
 0x43f   : > { %15460 = vmatmul.mubr.msk.bf16.gmra.mrb[120].mxu1 %vm1255_vm2, %v4427_v54  ;;  %v11123_v54 = vrot.slane %v17754_v5, 3  ;;  %v5685_v5 = vshll.u32 %v19603_v58, 16  ;;  %v11127_v14 = vrot.slane %v17758_v37, 3  ;;  %v5700_v37 = vshrl.u32 %v19621_v3, 16 }
 0x440   : > { %15463 = vmatprep.mubr.msk.bf16.mxu1 %vm1255_vm2, %v4429_v31  ;;  %v17755_v31 = vld [vmem:[%s17886_s27 + $0x118] sm:$0xff]  }
 0x441   : > { %v11125_v63 = vrot.slane %v17755_v31, 3 }
 0x442   : > { %v19908_v2 = vpop.f32.mrb[16].mxu1  ;;  %16082 = vmatmul.mubr.msk.bf16.gmra.mrb[52].mxu0 %vm1255_vm2, %v11120_v8  ;;  %v11124_v8 = vsel %vm11063_vm7, %v11121_v48, %v11123_v54  ;;  %v4435_v48 = vsel %vm2763_vm5, %v4432_v40, %v4434_v27  ;;  %v5691_v40 = vshrl.u32 %v19616_v44, 16 }
 0x443   : > { %20935 = vst [vmem:[#allocation8_spill] sm:$0xff] %v19908_v2  ;;  %v19911_v23 = vpop.f32.mrb[17].mxu1  ;;  %16085 = vmatprep.mubr.msk.bf16.mxu0 %vm1255_vm2, %v11122_v43 }
 0x444   : > { %20936 = vst [vmem:[#allocation9_spill] sm:$0xff] %v19911_v23  ;;  %v19914_v59 = vpop.f32.mrb[18].mxu1  ;;  %v17502_v23 = vld [vmem:[%s17886_s27 + $0x230] ss:$0 sps:$4 sm:$0x11]  }
 0x445   : > { %20937 = vst [vmem:[#allocation11_spill] sm:$0xff] %v19914_v59  ;;  %v19917_v60 = vpop.f32.mrb[19].mxu1 }
 0x446   : > { %20938 = vst [vmem:[#allocation14_spill] sm:$0xff] %v19917_v60  ;;  %v19931_v60 = vld [vmem:[%s17886_s27 + $0x228] sm:$0xff]  }
 0x447   : > { %15464 = vmatmul.mubr.msk.bf16.gmra.mrb[124].mxu1 %vm1255_vm2, %v4431_v42  ;;  %20939 = vst [vmem:[#allocation12_spill] sm:$0xff] %v19931_v60  ;;  %v4436_v43 = vrot.slane %v19931_v60, 1  ;;  %v11126_v42 = vsel %vm11063_vm7, %v11123_v54, %v11125_v63  ;;  %v5687_v60 = vrot.slane %v5685_v5, 2  ;;  %v17759_v54 = vld [vmem:[%s17886_s27 + $0x128] sm:$0xff]  }
 0x448   : > { %15467 = vmatprep.mubr.msk.bf16.mxu1 %vm1255_vm2, %v4433_v6  ;;  %v11129_v52 = vrot.slane %v17759_v54, 3  ;;  %v20946_v54 = vld [vmem:[#allocation4_spill] sm:$0xff] }
 0x449   : > { %v4437_v58 = vsel %vm2763_vm5, %v4434_v27, %v4436_v43  ;;  %v5703_v27 = vshll.u32 %v19621_v3, 16  ;;  %v17760_v3 = vld [vmem:[%s17886_s27 + $0x130] sm:$0xff]  }
 0x44a   : > { %v19936_v31 = vpop.f32.mrb[20].mxu1  ;;  %16086 = vmatmul.mubr.msk.bf16.gmra.mrb[56].mxu0 %vm1255_vm2, %v11124_v8  ;;  %v4438_v8 = vrot.slane %v17502_v23, 1  ;;  %v11130_v5 = vsel %vm11063_vm7, %v11127_v14, %v11129_v52 }
 0x44b   : > { %20940 = vst [vmem:[#allocation13_spill] sm:$0xff] %v19936_v31  ;;  %v19939_v6 = vpop.f32.mrb[21].mxu1  ;;  %16089 = vmatprep.mubr.msk.bf16.mxu0 %vm1255_vm2, %v11126_v42  ;;  %v5684_v31 = vrot.slane %v5682_v1, 1  ;;  %v11128_v42 = vsel %vm11063_vm7, %v11125_v63, %v11127_v14  ;;  %v5702_v14 = vrot.slane %v5700_v37, 1  ;;  %v5721_v37 = vshll.u32 %v19639_v11, 16 }
 0x44c   : > { %20941 = vst [vmem:[#allocation15_spill] sm:$0xff] %v19939_v6  ;;  %v19942_v59 = vpop.f32.mrb[22].mxu1  ;;  %v5705_v6 = vrot.slane %v5703_v27, 2 }
 0x44d   : > { %20942 = vst [vmem:[#allocation18_spill] sm:$0xff] %v19942_v59  ;;  %v19946_v2 = vpop.f32.mrb[23].mxu1  ;;  %v5688_v59 = vor.u32 %v5687_v60, %v5684_v31  ;;  %v11131_v31 = vrot.slane %v17760_v3, 3 }
 0x44e   : > { %20943 = vst [vmem:[#allocation16_spill] sm:$0xff] %v19946_v2  ;;  %v5694_v2 = vshll.u32 %v19616_v44, 16  ;;  %v4439_v44 = vsel %vm2763_vm5, %v4436_v43, %v4438_v8  ;;  %v5712_v8 = vshll.u32 %v19634_v21, 16 }
 0x44f   : > { %15468 = vmatmul.mubr.msk.bf16.gmra.mrb[128].mxu1 %vm1255_vm2, %v4435_v48 }
 0x450   : > { %15471 = vmatprep.mubr.msk.bf16.mxu1 %vm1255_vm2, %v4437_v58  ;;  %v5693_v58 = vrot.slane %v5691_v40, 1  ;;  %v5696_v63 = vrot.slane %v5694_v2, 2  ;;  %v5709_v2 = vshrl.u32 %v19634_v21, 16  ;;  %v11132_v40 = vsel %vm11063_vm7, %v11129_v52, %v11131_v31 }
 0x451   : > { %v5714_v52 = vrot.slane %v5712_v8, 2 }
 0x452   : > { %v19959_v1 = vpop.f32.mrb[24].mxu1  ;;  %16090 = vmatmul.mubr.msk.bf16.gmra.mrb[60].mxu0 %vm1255_vm2, %v11128_v42  ;;  %v5697_v43 = vor.u32 %v5696_v63, %v5693_v58  ;;  %v5706_v42 = vor.u32 %v5705_v6, %v5702_v14  ;;  %v5711_v58 = vrot.slane %v5709_v2, 1  ;;  %v17763_v14 = vld [vmem:[%s17886_s27 + $0x148] sm:$0xff]   ;;  %v5730_v2 = vshll.u32 %v19652_v33, 16 }
 0x453   : > { %20944 = vst [vmem:[#allocation17_spill] sm:$0xff] %v19959_v1  ;;  %v19962_v48 = vpop.f32.mrb[25].mxu1  ;;  %16093 = vmatprep.mubr.msk.bf16.mxu0 %vm1255_vm2, %v11130_v5  ;;  %v5689_v1 = vsel %vm5366_vm3, %v20946_v54, %v5688_v59  ;;  %v5718_v5 = vshrl.u32 %v19639_v11, 16  ;;  %v17762_v11 = vld [vmem:[%s17886_s27 + $0x140] sm:$0xff]  }
 0x454   : > { %20945 = vst [vmem:[#allocation19_spill] sm:$0xff] %v19962_v48  ;;  %v19965_v23 = vpop.f32.mrb[26].mxu1  ;;  %v17761_v48 = vld [vmem:[%s17886_s27 + $0x138] sm:$0xff]   ;;  %v5698_v21 = vsel %vm5366_vm3, %v5688_v59, %v5697_v43  ;;  %v11135_v63 = vrot.slane %v17762_v11, 3  ;;  %v5707_v3 = vsel %vm5366_vm3, %v5697_v43, %v5706_v42  ;;  %v5727_v59 = vshrl.u32 %v19652_v33, 16 }
 0x455   : > { %v19968_v60 = vpop.f32.mrb[27].mxu1  ;;  %v11133_v15 = vrot.slane %v17761_v48, 3  ;;  %v5720_v54 = vrot.slane %v5718_v5, 1  ;;  %v5736_v11 = vshrl.u32 %v19657_v24, 16  ;;  %v5739_v43 = vshll.u32 %v19657_v24, 16  ;;  %v17764_v24 = vld [vmem:[%s17886_s27 + $0x150] sm:$0xff]  }
 0x457   : > { %15472 = vmatmul.mubr.msk.bf16.gmra.mrb[132].mxu1 %vm1255_vm2, %v4439_v44  ;;  %v11134_v48 = vsel %vm11063_vm7, %v11131_v31, %v11133_v15  ;;  %v5723_v31 = vrot.slane %v5721_v37, 2  ;;  %v11136_v8 = vsel %vm11063_vm7, %v11133_v15, %v11135_v63  ;;  %v5732_v15 = vrot.slane %v5730_v2, 2 }
 0x458   : > { %15545 = vmatprep.mubr.msk.bf16.mxu1 %vm1255_vm2, %v5689_v1 }
 0x45a   : > { %v19982_v27 = vpop.f32.mrb[28].mxu1  ;;  %16094 = vmatmul.mubr.msk.bf16.gmra.mrb[64].mxu0 %vm1255_vm2, %v11132_v40  ;;  %v5715_v40 = vor.u32 %v5714_v52, %v5711_v58  ;;  %v5729_v52 = vrot.slane %v5727_v59, 1  ;;  %v5748_v59 = vshll.u32 %v19670_v22, 16 }
 0x45b   : > { %v19985_v44 = vpop.f32.mrb[29].mxu1  ;;  %16097 = vmatprep.mubr.msk.bf16.mxu0 %vm1255_vm2, %v11134_v48  ;;  %v5724_v48 = vor.u32 %v5723_v31, %v5720_v54  ;;  %v11139_v54 = vrot.slane %v17764_v24, 3  ;;  %v5754_v24 = vshrl.u32 %v19675_v12, 16 }
 0x45c   : > { %20947 = vst [vmem:[#allocation22_spill] sm:$0xff] %v19985_v44  ;;  %v19988_v1 = vpop.f32.mrb[30].mxu1  ;;  %v11137_v44 = vrot.slane %v17763_v14, 3  ;;  %v5716_v33 = vsel %vm5366_vm3, %v5706_v42, %v5715_v40  ;;  %v5738_v14 = vrot.slane %v5736_v11, 1  ;;  %v5745_v42 = vshrl.u32 %v19670_v22, 16 }
 0x45d   : > { %v19991_v6 = vpop.f32.mrb[31].mxu1  ;;  %v5725_v31 = vsel %vm5366_vm3, %v5715_v40, %v5724_v48  ;;  %v5757_v40 = vshll.u32 %v19675_v12, 16  ;;  %v17766_v12 = vld [vmem:[%s17886_s27 + $0x160] sm:$0xff]  }
 0x45e   : > { %v11138_v37 = vsel %vm11063_vm7, %v11135_v63, %v11137_v44  ;;  %v5741_v63 = vrot.slane %v5739_v43, 2  ;;  %v11140_v2 = vsel %vm11063_vm7, %v11137_v44, %v11139_v54  ;;  %v5750_v44 = vrot.slane %v5748_v59, 2 }
 0x45f   : > { %15546 = vmatmul.mubr.msk.bf16.vlgmr.msra.gmra.mrb[68].mxu1 %vm1255_vm2, %v5698_v21 }
 0x460   : > { %15549 = vmatprep.mubr.msk.bf16.mxu1 %vm1255_vm2, %v5707_v3 }
 0x462   : > { %v20004_v5 = vpop.f32.mrb[32].mxu1  ;;  %16098 = vmatmul.mubr.msk.bf16.gmra.mrb[68].mxu0 %vm1255_vm2, %v11136_v8  ;;  %v5733_v8 = vor.u32 %v5732_v15, %v5729_v52  ;;  %v5747_v52 = vrot.slane %v5745_v42, 1  ;;  %v5766_v42 = vshll.u32 %v19688_v55, 16 }
 0x463   : > { %20948 = vst [vmem:[#allocation20_spill] sm:$0xff] %v20004_v5  ;;  %v20007_v21 = vpop.f32.mrb[33].mxu1  ;;  %16101 = vmatprep.mubr.msk.bf16.mxu0 %vm1255_vm2, %v11138_v37  ;;  %v17765_v5 = vld [vmem:[%s17886_s27 + $0x158] sm:$0xff]   ;;  %v5742_v37 = vor.u32 %v5741_v63, %v5738_v14  ;;  %v5756_v63 = vrot.slane %v5754_v24, 1 }
 0x464   : > { %20949 = vst [vmem:[#allocation21_spill] sm:$0xff] %v20007_v21  ;;  %v20010_v58 = vpop.f32.mrb[34].mxu1  ;;  %v11141_v21 = vrot.slane %v17765_v5, 3  ;;  %v5734_v22 = vsel %vm5366_vm3, %v5724_v48, %v5733_v8  ;;  %v5763_v48 = vshrl.u32 %v19688_v55, 16 }
 0x465   : > { %v20013_v3 = vpop.f32.mrb[35].mxu1  ;;  %v5743_v14 = vsel %vm5366_vm3, %v5733_v8, %v5742_v37  ;;  %v5775_v8 = vshll.u32 %v19693_v61, 16 }
 0x466   : > { %v11142_v43 = vsel %vm11063_vm7, %v11139_v54, %v11141_v21  ;;  %v5759_v54 = vrot.slane %v5757_v40, 2 }
 0x467   : > { %15550 = vmatmul.mubr.msk.bf16.gmra.mrb[72].mxu1 %vm1255_vm2, %v5716_v33 }
 0x468   : > { %15553 = vmatprep.mubr.msk.bf16.mxu1 %vm1255_vm2, %v5725_v31  ;;  %v11143_v31 = vrot.slane %v17766_v12, 3  ;;  %v5772_v12 = vshrl.u32 %v19693_v61, 16  ;;  %v17768_v61 = vld [vmem:[%s17886_s27 + $0x170] sm:$0xff]  }
 0x46a   : > { %v20026_v11 = vpop.f32.mrb[36].mxu1  ;;  %16102 = vmatmul.mubr.msk.bf16.gmra.mrb[72].mxu0 %vm1255_vm2, %v11140_v2  ;;  %v5751_v2 = vor.u32 %v5750_v44, %v5747_v52  ;;  %v11144_v59 = vsel %vm11063_vm7, %v11141_v21, %v11143_v31  ;;  %v5765_v52 = vrot.slane %v5763_v48, 1  ;;  %v5768_v21 = vrot.slane %v5766_v42, 2 }
 0x46b   : > { %20950 = vst [vmem:[#allocation23_spill] sm:$0xff] %v20026_v11  ;;  %v20029_v5 = vpop.f32.mrb[37].mxu1  ;;  %16105 = vmatprep.mubr.msk.bf16.mxu0 %vm1255_vm2, %v11142_v43  ;;  %v17767_v11 = vld [vmem:[%s17886_s27 + $0x168] sm:$0xff]   ;;  %v5760_v43 = vor.u32 %v5759_v54, %v5756_v63  ;;  %v5774_v54 = vrot.slane %v5772_v12, 1  ;;  %v5784_v48 = vshll.u32 %v19706_v49, 16 }
 0x46c   : > { %20951 = vst [vmem:[#allocation26_spill] sm:$0xff] %v20029_v5  ;;  %v20032_v33 = vpop.f32.mrb[38].mxu1  ;;  %v11145_v5 = vrot.slane %v17767_v11, 3  ;;  %v5752_v55 = vsel %vm5366_vm3, %v5742_v37, %v5751_v2  ;;  %v5781_v37 = vshrl.u32 %v19706_v49, 16 }
 0x46d   : > { %v20035_v15 = vpop.f32.mrb[39].mxu1  ;;  %v5761_v63 = vsel %vm5366_vm3, %v5751_v2, %v5760_v43  ;;  %v5793_v2 = vshll.u32 %v19711_v0, 16 }
 0x46e   : > { %v11146_v40 = vsel %vm11063_vm7, %v11143_v31, %v11145_v5  ;;  %v5777_v31 = vrot.slane %v5775_v8, 2 }
 0x46f   : > { %15554 = vmatmul.mubr.msk.bf16.gmra.mrb[76].mxu1 %vm1255_vm2, %v5734_v22 }
 0x470   : > { %15557 = vmatprep.mubr.msk.bf16.mxu1 %vm1255_vm2, %v5743_v14  ;;  %v11147_v14 = vrot.slane %v17768_v61, 3  ;;  %v5790_v61 = vshrl.u32 %v19711_v0, 16  ;;  %v17770_v0 = vld [vmem:[%s17886_s27 + $0x180] sm:$0xff]  }
 0x472   : > { %v20048_v24 = vpop.f32.mrb[40].mxu1  ;;  %16106 = vmatmul.mubr.msk.bf16.gmra.mrb[76].mxu0 %vm1255_vm2, %v11144_v59  ;;  %v5769_v59 = vor.u32 %v5768_v21, %v5765_v52  ;;  %v11148_v42 = vsel %vm11063_vm7, %v11145_v5, %v11147_v14  ;;  %v5783_v52 = vrot.slane %v5781_v37, 1  ;;  %v5786_v5 = vrot.slane %v5784_v48, 2 }
 0x473   : > { %20952 = vst [vmem:[#allocation24_spill] sm:$0xff] %v20048_v24  ;;  %v20051_v11 = vpop.f32.mrb[41].mxu1  ;;  %16109 = vmatprep.mubr.msk.bf16.mxu0 %vm1255_vm2, %v11146_v40  ;;  %v17769_v24 = vld [vmem:[%s17886_s27 + $0x178] sm:$0xff]   ;;  %v5778_v40 = vor.u32 %v5777_v31, %v5774_v54  ;;  %v5792_v31 = vrot.slane %v5790_v61, 1  ;;  %v5802_v37 = vshll.u32 %v19724_v28, 16 }
 0x474   : > { %20953 = vst [vmem:[#allocation25_spill] sm:$0xff] %v20051_v11  ;;  %v20054_v22 = vpop.f32.mrb[42].mxu1  ;;  %v11149_v11 = vrot.slane %v17769_v24, 3  ;;  %v5770_v49 = vsel %vm5366_vm3, %v5760_v43, %v5769_v59  ;;  %v5799_v43 = vshrl.u32 %v19724_v28, 16 }
 0x475   : > { %v20057_v44 = vpop.f32.mrb[43].mxu1  ;;  %v5779_v54 = vsel %vm5366_vm3, %v5769_v59, %v5778_v40  ;;  %v5811_v59 = vshll.u32 %v19729_v26, 16 }
 0x476   : > { %v11150_v8 = vsel %vm11063_vm7, %v11147_v14, %v11149_v11  ;;  %v5795_v14 = vrot.slane %v5793_v2, 2 }
 0x477   : > { %15558 = vmatmul.mubr.msk.bf16.gmra.mrb[80].mxu1 %vm1255_vm2, %v5752_v55 }
 0x478   : > { %15561 = vmatprep.mubr.msk.bf16.mxu1 %vm1255_vm2, %v5761_v63  ;;  %v11151_v63 = vrot.slane %v17770_v0, 3  ;;  %v5808_v0 = vshrl.u32 %v19729_v26, 16  ;;  %v17772_v26 = vld [vmem:[%s17886_s27 + $0x190] sm:$0xff]  }
 0x47a   : > { %v20070_v12 = vpop.f32.mrb[44].mxu1  ;;  %16110 = vmatmul.mubr.msk.bf16.gmra.mrb[80].mxu0 %vm1255_vm2, %v11148_v42  ;;  %v5787_v42 = vor.u32 %v5786_v5, %v5783_v52  ;;  %v11152_v48 = vsel %vm11063_vm7, %v11149_v11, %v11151_v63  ;;  %v5801_v52 = vrot.slane %v5799_v43, 1  ;;  %v5804_v11 = vrot.slane %v5802_v37, 2 }
 0x47b   : > { %20954 = vst [vmem:[#allocation27_spill] sm:$0xff] %v20070_v12  ;;  %v20073_v24 = vpop.f32.mrb[45].mxu1  ;;  %16113 = vmatprep.mubr.msk.bf16.mxu0 %vm1255_vm2, %v11150_v8  ;;  %v17771_v12 = vld [vmem:[%s17886_s27 + $0x188] sm:$0xff]   ;;  %v5796_v8 = vor.u32 %v5795_v14, %v5792_v31  ;;  %v5810_v14 = vrot.slane %v5808_v0, 1  ;;  %v5820_v43 = vshll.u32 %v19742_v38, 16 }
 0x47c   : > { %20955 = vst [vmem:[#allocation30_spill] sm:$0xff] %v20073_v24  ;;  %v20076_v55 = vpop.f32.mrb[46].mxu1  ;;  %v11153_v24 = vrot.slane %v17771_v12, 3  ;;  %v5788_v28 = vsel %vm5366_vm3, %v5778_v40, %v5787_v42  ;;  %v5817_v40 = vshrl.u32 %v19742_v38, 16 }
 0x47d   : > { %v20079_v21 = vpop.f32.mrb[47].mxu1  ;;  %v5797_v31 = vsel %vm5366_vm3, %v5787_v42, %v5796_v8  ;;  %v5829_v42 = vshll.u32 %v19747_v53, 16 }
 0x47e   : > { %v11154_v2 = vsel %vm11063_vm7, %v11151_v63, %v11153_v24  ;;  %v5813_v63 = vrot.slane %v5811_v59, 2 }
 0x47f   : > { %15562 = vmatmul.mubr.msk.bf16.gmra.mrb[84].mxu1 %vm1255_vm2, %v5770_v49 }
 0x480   : > { %15565 = vmatprep.mubr.msk.bf16.mxu1 %vm1255_vm2, %v5779_v54  ;;  %v11155_v54 = vrot.slane %v17772_v26, 3  ;;  %v5826_v26 = vshrl.u32 %v19747_v53, 16  ;;  %v17774_v53 = vld [vmem:[%s17886_s27 + $0x1a0] sm:$0xff]  }
 0x482   : > { %v20092_v61 = vpop.f32.mrb[48].mxu1  ;;  %16114 = vmatmul.mubr.msk.bf16.gmra.mrb[84].mxu0 %vm1255_vm2, %v11152_v48  ;;  %v5805_v48 = vor.u32 %v5804_v11, %v5801_v52  ;;  %v11156_v37 = vsel %vm11063_vm7, %v11153_v24, %v11155_v54  ;;  %v5819_v52 = vrot.slane %v5817_v40, 1  ;;  %v5822_v24 = vrot.slane %v5820_v43, 2 }
 0x483   : > { %20956 = vst [vmem:[#allocation28_spill] sm:$0xff] %v20092_v61  ;;  %v20095_v12 = vpop.f32.mrb[49].mxu1  ;;  %16117 = vmatprep.mubr.msk.bf16.mxu0 %vm1255_vm2, %v11154_v2  ;;  %v17773_v61 = vld [vmem:[%s17886_s27 + $0x198] sm:$0xff]   ;;  %v5814_v2 = vor.u32 %v5813_v63, %v5810_v14  ;;  %v5828_v63 = vrot.slane %v5826_v26, 1  ;;  %v5838_v40 = vshll.u32 %v19760_v41, 16 }
 0x484   : > { %20957 = vst [vmem:[#allocation29_spill] sm:$0xff] %v20095_v12  ;;  %v20098_v49 = vpop.f32.mrb[50].mxu1  ;;  %v11157_v12 = vrot.slane %v17773_v61, 3  ;;  %v5806_v38 = vsel %vm5366_vm3, %v5796_v8, %v5805_v48  ;;  %v5835_v8 = vshrl.u32 %v19760_v41, 16 }
 0x485   : > { %v20101_v5 = vpop.f32.mrb[51].mxu1  ;;  %v5815_v14 = vsel %vm5366_vm3, %v5805_v48, %v5814_v2  ;;  %v5847_v48 = vshll.u32 %v19765_v18, 16 }
 0x486   : > { %v11158_v59 = vsel %vm11063_vm7, %v11155_v54, %v11157_v12  ;;  %v5831_v54 = vrot.slane %v5829_v42, 2 }
 0x487   : > { %15566 = vmatmul.mubr.msk.bf16.gmra.mrb[88].mxu1 %vm1255_vm2, %v5788_v28 }
 0x488   : > { %15569 = vmatprep.mubr.msk.bf16.mxu1 %vm1255_vm2, %v5797_v31  ;;  %v11159_v31 = vrot.slane %v17774_v53, 3  ;;  %v5844_v53 = vshrl.u32 %v19765_v18, 16  ;;  %v17776_v18 = vld [vmem:[%s17886_s27 + $0x1b0] sm:$0xff]  }
 0x48a   : > { %v20114_v0 = vpop.f32.mrb[52].mxu1  ;;  %16118 = vmatmul.mubr.msk.bf16.gmra.mrb[88].mxu0 %vm1255_vm2, %v11156_v37  ;;  %v5823_v37 = vor.u32 %v5822_v24, %v5819_v52  ;;  %v11160_v43 = vsel %vm11063_vm7, %v11157_v12, %v11159_v31  ;;  %v5837_v52 = vrot.slane %v5835_v8, 1  ;;  %v5840_v12 = vrot.slane %v5838_v40, 2 }
 0x48b   : > { %20958 = vst [vmem:[#allocation31_spill] sm:$0xff] %v20114_v0  ;;  %v20117_v61 = vpop.f32.mrb[53].mxu1  ;;  %16121 = vmatprep.mubr.msk.bf16.mxu0 %vm1255_vm2, %v11158_v59  ;;  %v17775_v0 = vld [vmem:[%s17886_s27 + $0x1a8] sm:$0xff]   ;;  %v5832_v59 = vor.u32 %v5831_v54, %v5828_v63  ;;  %v5846_v54 = vrot.slane %v5844_v53, 1  ;;  %v5856_v8 = vshll.u32 %v19778_v62, 16 }
 0x48c   : > { %20959 = vst [vmem:[#allocation34_spill] sm:$0xff] %v20117_v61  ;;  %v20120_v28 = vpop.f32.mrb[54].mxu1  ;;  %v11161_v61 = vrot.slane %v17775_v0, 3  ;;  %v5824_v41 = vsel %vm5366_vm3, %v5814_v2, %v5823_v37  ;;  %v5853_v2 = vshrl.u32 %v19778_v62, 16 }
 0x48d   : > { %v20123_v11 = vpop.f32.mrb[55].mxu1  ;;  %v5833_v63 = vsel %vm5366_vm3, %v5823_v37, %v5832_v59  ;;  %v5865_v37 = vshll.u32 %v19783_v16, 16 }
 0x48e   : > { %v11162_v42 = vsel %vm11063_vm7, %v11159_v31, %v11161_v61  ;;  %v5849_v31 = vrot.slane %v5847_v48, 2 }
 0x48f   : > { %15570 = vmatmul.mubr.msk.bf16.gmra.mrb[92].mxu1 %vm1255_vm2, %v5806_v38 }
 0x490   : > { %15573 = vmatprep.mubr.msk.bf16.mxu1 %vm1255_vm2, %v5815_v14  ;;  %v11163_v14 = vrot.slane %v17776_v18, 3  ;;  %v5862_v18 = vshrl.u32 %v19783_v16, 16  ;;  %v17778_v16 = vld [vmem:[%s17886_s27 + $0x1c0] sm:$0xff]  }
 0x492   : > { %v20136_v26 = vpop.f32.mrb[56].mxu1  ;;  %16122 = vmatmul.mubr.msk.bf16.gmra.mrb[92].mxu0 %vm1255_vm2, %v11160_v43  ;;  %v5841_v43 = vor.u32 %v5840_v12, %v5837_v52  ;;  %v11164_v40 = vsel %vm11063_vm7, %v11161_v61, %v11163_v14  ;;  %v5855_v52 = vrot.slane %v5853_v2, 1  ;;  %v5858_v61 = vrot.slane %v5856_v8, 2 }
 0x493   : > { %20960 = vst [vmem:[#allocation32_spill] sm:$0xff] %v20136_v26  ;;  %v20139_v0 = vpop.f32.mrb[57].mxu1  ;;  %16125 = vmatprep.mubr.msk.bf16.mxu0 %vm1255_vm2, %v11162_v42  ;;  %v17777_v26 = vld [vmem:[%s17886_s27 + $0x1b8] sm:$0xff]   ;;  %v5850_v42 = vor.u32 %v5849_v31, %v5846_v54  ;;  %v5864_v31 = vrot.slane %v5862_v18, 1  ;;  %v5874_v2 = vshll.u32 %v19796_v4, 16 }
 0x494   : > { %20961 = vst [vmem:[#allocation33_spill] sm:$0xff] %v20139_v0  ;;  %v20142_v38 = vpop.f32.mrb[58].mxu1  ;;  %v11165_v0 = vrot.slane %v17777_v26, 3  ;;  %v5842_v62 = vsel %vm5366_vm3, %v5832_v59, %v5841_v43  ;;  %v5871_v59 = vshrl.u32 %v19796_v4, 16 }
 0x495   : > { %v20145_v24 = vpop.f32.mrb[59].mxu1  ;;  %v5851_v54 = vsel %vm5366_vm3, %v5841_v43, %v5850_v42  ;;  %v5883_v43 = vshll.u32 %v19801_v36, 16 }
 0x496   : > { %v11166_v48 = vsel %vm11063_vm7, %v11163_v14, %v11165_v0  ;;  %v5867_v14 = vrot.slane %v5865_v37, 2 }
 0x497   : > { %15574 = vmatmul.mubr.msk.bf16.gmra.mrb[96].mxu1 %vm1255_vm2, %v5824_v41 }
 0x498   : > { %15577 = vmatprep.mubr.msk.bf16.mxu1 %vm1255_vm2, %v5833_v63  ;;  %v11167_v63 = vrot.slane %v17778_v16, 3  ;;  %v5880_v16 = vshrl.u32 %v19801_v36, 16  ;;  %v17780_v36 = vld [vmem:[%s17886_s27 + $0x1d0] sm:$0xff]  }
 0x49a   : > { %v20158_v53 = vpop.f32.mrb[60].mxu1  ;;  %16126 = vmatmul.mubr.msk.bf16.gmra.mrb[96].mxu0 %vm1255_vm2, %v11164_v40  ;;  %v5859_v40 = vor.u32 %v5858_v61, %v5855_v52  ;;  %v11168_v8 = vsel %vm11063_vm7, %v11165_v0, %v11167_v63  ;;  %v5873_v52 = vrot.slane %v5871_v59, 1  ;;  %v5876_v0 = vrot.slane %v5874_v2, 2 }
 0x49b   : > { %20962 = vst [vmem:[#allocation35_spill] sm:$0xff] %v20158_v53  ;;  %v20161_v26 = vpop.f32.mrb[61].mxu1  ;;  %16129 = vmatprep.mubr.msk.bf16.mxu0 %vm1255_vm2, %v11166_v48  ;;  %v17779_v53 = vld [vmem:[%s17886_s27 + $0x1c8] sm:$0xff]   ;;  %v5868_v48 = vor.u32 %v5867_v14, %v5864_v31  ;;  %v5882_v14 = vrot.slane %v5880_v16, 1  ;;  %v5901_v16 = vshll.u32 %v19827_v34, 16 }
 0x49c   : > { %20963 = vst [vmem:[#allocation36_spill] sm:$0xff] %v20161_v26  ;;  %v20164_v41 = vpop.f32.mrb[62].mxu1  ;;  %v11169_v26 = vrot.slane %v17779_v53, 3  ;;  %v5860_v4 = vsel %vm5366_vm3, %v5850_v42, %v5859_v40  ;;  %v5877_v42 = vor.u32 %v5876_v0, %v5873_v52 }
 0x49d   : > { %20964 = vst [vmem:[#allocation37_spill] sm:$0xff] %v20164_v41  ;;  %v20167_v12 = vpop.f32.mrb[63].mxu1  ;;  %v5869_v31 = vsel %vm5366_vm3, %v5859_v40, %v5868_v48  ;;  %v5898_v40 = vshrl.u32 %v19827_v34, 16 }
 0x49e   : > { %20965 = vst [vmem:[#allocation3_spill] sm:$0xff] %v20167_v12  ;;  %v11170_v37 = vsel %vm11063_vm7, %v11167_v63, %v11169_v26  ;;  %v5885_v63 = vrot.slane %v5883_v43, 2  ;;  %v17785_v12 = vld [vmem:[%s17886_s27 + $0x1f8] sm:$0xff]  }
 0x49f   : > { %15578 = vmatmul.mubr.msk.bf16.gmra.mrb[100].mxu1 %vm1255_vm2, %v5842_v62  ;;  %v5900_v0 = vrot.slane %v5898_v40, 1  ;;  %v5919_v40 = vshll.u32 %v19853_v29, 16 }
 0x4a0   : > { %15581 = vmatprep.mubr.msk.bf16.mxu1 %vm1255_vm2, %v5851_v54  ;;  %v11171_v54 = vrot.slane %v17780_v36, 3  ;;  %v5886_v2 = vor.u32 %v5885_v63, %v5882_v14  ;;  %v17782_v36 = vld [vmem:[%s17886_s27 + $0x1e0] sm:$0xff]   ;;  %v5910_v63 = vshll.u32 %v19848_v10, 16 }
 0x4a1   : > { %v20213_v14 = vld [vmem:[%s20804_s2] ss:$0 sm:$0xff] }
 0x4a2   : > { %v20180_v18 = vpop.f32.mrb[64].mxu1  ;;  %16130 = vmatmul.mubr.msk.bf16.gmra.mrb[100].mxu0 %vm1255_vm2, %v11168_v8  ;;  %v5889_v8 = vshrl.u32 %v19822_v35, 16  ;;  %v11172_v59 = vsel %vm11063_vm7, %v11169_v26, %v11171_v54  ;;  %v17783_v26 = vld [vmem:[%s17886_s27 + $0x1e8] sm:$0xff]  }
 0x4a3   : > { %20966 = vst [vmem:[#allocation2_spill] sm:$0xff] %v20180_v18  ;;  %v20183_v53 = vpop.f32.mrb[65].mxu1  ;;  %16133 = vmatprep.mubr.msk.bf16.mxu0 %vm1255_vm2, %v11170_v37  ;;  %v11177_v52 = vrot.slane %v17783_v26, 3 }
 0x4a4   : > { %20967 = vst [vmem:[#allocation4_spill] sm:$0xff] %v20183_v53  ;;  %v20186_v62 = vpop.f32.mrb[66].mxu1  ;;  %v17781_v53 = vld [vmem:[%s17886_s27 + $0x1d8] sm:$0xff]   ;;  %v5891_v37 = vrot.slane %v5889_v8, 1 }
 0x4a5   : > { %20968 = vst [vmem:[#allocation38_spill] sm:$0xff] %v20186_v62  ;;  %v20189_v61 = vpop.f32.mrb[67].mxu1  ;;  %v11173_v18 = vrot.slane %v17781_v53, 3  ;;  %v5892_v62 = vshll.u32 %v19822_v35, 16  ;;  %v5878_v35 = vsel %vm5366_vm3, %v5868_v48, %v5877_v42 }
 0x4a6   : > { %20969 = vst [vmem:[#allocation39_spill] sm:$0xff] %v20189_v61  ;;  %v11175_v61 = vrot.slane %v17782_v36, 3 }
 0x4a7   : > { %15582 = vmatmul.mubr.msk.bf16.gmra.mrb[104].mxu1 %vm1255_vm2, %v5860_v4  ;;  %v11174_v43 = vsel %vm11063_vm7, %v11171_v54, %v11173_v18  ;;  %v5894_v53 = vrot.slane %v5892_v62, 2  ;;  %v5887_v4 = vsel %vm5366_vm3, %v5877_v42, %v5886_v2  ;;  %v5907_v54 = vshrl.u32 %v19848_v10, 16 }
 0x4a8   : > { %15585 = vmatprep.mubr.msk.bf16.mxu1 %vm1255_vm2, %v5869_v31  ;;  %v5903_v31 = vrot.slane %v5901_v16, 2  ;;  %v11176_v48 = vsel %vm11063_vm7, %v11173_v18, %v11175_v61  ;;  %v17784_v18 = vld [vmem:[%s17886_s27 + $0x1f0] sm:$0xff]  }
 0x4a9   : > { %v5895_v34 = vor.u32 %v5894_v53, %v5891_v37  ;;  %v11178_v37 = vsel %vm11063_vm7, %v11175_v61, %v11177_v52  ;;  %v11179_v53 = vrot.slane %v17784_v18, 3  ;;  %v5909_v26 = vrot.slane %v5907_v54, 1  ;;  %v20247_v18 = vld [vmem:[%s17886_s27 + $0x200] sm:$0xff]  }
 0x4aa   : > { %16134 = vmatmul.mubr.msk.bf16.gmra.mrb[104].mxu0 %vm1255_vm2, %v11172_v59  ;;  %v5916_v59 = vshrl.u32 %v19853_v29, 16  ;;  %v5904_v10 = vor.u32 %v5903_v31, %v5900_v0  ;;  %v5921_v31 = vrot.slane %v5919_v40, 2 }
 0x4ab   : > { %16137 = vmatprep.mubr.msk.bf16.mxu0 %vm1255_vm2, %v11174_v43 }
 0x4ac   : > { %v5918_v0 = vrot.slane %v5916_v59, 1 }
 0x4ad   : > { %v16031_v62 = vpop.f32.mrb[0].mxu0 }
 0x4ae   : > { %v16167_v8 = vadd.f32 %v16031_v62, %v19804_v46  ;;  %v11442_v42 = vpop.f32.mrb[1].mxu0 }
 0x4af   : > { %15586 = vmatmul.mubr.msk.bf16.gmra.mrb[108].mxu1 %vm1255_vm2, %v5878_v35  ;;  %v16168_v16 = vadd.f32 %v11442_v42, %v19807_v56  ;;  %v16032_v43 = vpop.f32.mrb[2].mxu0  ;;  %v11181_v56 = vrot.slane %v17785_v12, 3  ;;  %v5912_v42 = vrot.slane %v5910_v63, 2  ;;  %v11180_v12 = vsel %vm11063_vm7, %v11177_v52, %v11179_v53 }
 0x4b0   : > { %15589 = vmatprep.mubr.msk.bf16.mxu1 %vm1255_vm2, %v5887_v4  ;;  %v12130_v46 = vadd.f32 %v16167_v8, %v20213_v14  ;;  %v16169_v36 = vadd.f32 %v16032_v43, %v19810_v9  ;;  %v11445_v35 = vpop.f32.mrb[3].mxu0  ;;  %v5896_v4 = vsel %vm5366_vm3, %v5886_v2, %v5895_v34  ;;  %v5905_v2 = vsel %vm5366_vm3, %v5895_v34, %v5904_v10 }
 0x4b1   : > { %v12128_v62 = vadd.f32 %v16168_v16, %v20213_v14  ;;  %v16170_v29 = vadd.f32 %v11445_v35, %v19813_v30  ;;  %v5925_v63 = vshrl.u32 %v19874_v17, 16  ;;  %v5928_v8 = vshll.u32 %v19874_v17, 16 }
 0x4b2   : > { %v12266_v41 = vmax.f32 %v12130_v46, 0.0  ;;  %v12131_v61 = vadd.f32 %v16169_v36, %v20213_v14  ;;  %16138 = vmatmul.mubr.msk.bf16.gmra.mrb[108].mxu0 %vm1255_vm2, %v11176_v48  ;;  %v5913_v43 = vor.u32 %v5912_v42, %v5909_v26  ;;  %v11183_v52 = vrot.slane %v20247_v18, 3 }
 0x4b3   : > { %v12264_v9 = vmax.f32 %v12128_v62, 0.0  ;;  %v12129_v30 = vadd.f32 %v16170_v29, %v20213_v14  ;;  %16141 = vmatprep.mubr.msk.bf16.mxu0 %vm1255_vm2, %v11178_v37  ;;  %v11182_v17 = vsel %vm11063_vm7, %v11179_v53, %v11181_v56  ;;  %v5922_v46 = vor.u32 %v5921_v31, %v5918_v0 }
 0x4b4   : > { %v14168_v54 = vpack.c.bf16 %v12266_v41, %v12266_v41  ;;  %v12267_v48 = vmax.f32 %v12131_v61, 0.0  ;;  %v5934_v26 = vshrl.u32 %v19879_v50, 16  ;;  %v5937_v62 = vshll.u32 %v19879_v50, 16 }
 0x4b5   : > { %v14166_v59 = vpack.c.bf16 %v12264_v9, %v12264_v9  ;;  %v12265_v40 = vmax.f32 %v12129_v30, 0.0  ;;  %v16035_v16 = vpop.f32.mrb[4].mxu0  ;;  %v5927_v61 = vrot.slane %v5925_v63, 1  ;;  %v5930_v53 = vrot.slane %v5928_v8, 2  ;;  %v17787_v8 = vld [vmem:[%s17886_s27 + $0x208] sm:$0xff]  }
 0x4b6   : > { %12947 = vst.msk [vmem:[%s20237_s21 + $0x8] sm:$0xf] %vm12944_vm8, %v14168_v54  ;;  %v14169_v41 = vpack.c.bf16 %v12267_v48, %v12267_v48  ;;  %v16171_v34 = vadd.f32 %v16035_v16, %v19830_v45  ;;  %v11458_v37 = vpop.f32.mrb[5].mxu0  ;;  %v5914_v31 = vsel %vm5366_vm3, %v5904_v10, %v5913_v43  ;;  %v5923_v30 = vsel %vm5366_vm3, %v5913_v43, %v5922_v46 }
 0x4b7   : > { %15590 = vmatmul.mubr.msk.bf16.gmra.mrb[112].mxu1 %vm1255_vm2, %v5896_v4  ;;  %12945 = vst.msk [vmem:[%s20237_s21] sm:$0xf] %vm12944_vm8, %v14166_v59  ;;  %v14167_v36 = vpack.c.bf16 %v12265_v40, %v12265_v40  ;;  %v16172_v35 = vadd.f32 %v11458_v37, %v19833_v57  ;;  %v16036_v4 = vpop.f32.mrb[6].mxu0  ;;  %v5939_v48 = vrot.slane %v5937_v62, 2  ;;  %v11185_v59 = vrot.slane %v17787_v8, 3 }
 0x4b8   : > { %15593 = vmatprep.mubr.msk.bf16.mxu1 %vm1255_vm2, %v5905_v2  ;;  %12948 = vst.msk [vmem:[%s20237_s21 + $0xc] sm:$0xf] %vm12944_vm8, %v14169_v41  ;;  %v12134_v45 = vadd.f32 %v16171_v34, %v20213_v14  ;;  %v16173_v29 = vadd.f32 %v16036_v4, %v19836_v25  ;;  %v11461_v42 = vpop.f32.mrb[7].mxu0  ;;  %v11184_v25 = vsel %vm11063_vm7, %v11181_v56, %v11183_v52  ;;  %v5943_v43 = vshrl.u32 %v19900_v7, 16 }
 0x4b9   : > { %12946 = vst.msk [vmem:[%s20237_s21 + $0x4] sm:$0xf] %vm12944_vm8, %v14167_v36  ;;  %v12132_v0 = vadd.f32 %v16172_v35, %v20213_v14  ;;  %v16174_v57 = vadd.f32 %v11461_v42, %v19839_v51  ;;  %v5936_v51 = vrot.slane %v5934_v26, 1  ;;  %v5946_v41 = vshll.u32 %v19900_v7, 16  ;;  %v17788_v7 = vld [vmem:[%s17886_s27 + $0x210] sm:$0xff]  }
 0x4ba   : > { %v12270_v9 = vmax.f32 %v12134_v45, 0.0  ;;  %v12135_v50 = vadd.f32 %v16173_v29, %v20213_v14  ;;  %16142 = vmatmul.mubr.msk.bf16.gmra.mrb[112].mxu0 %vm1255_vm2, %v11180_v12  ;;  %v5931_v12 = vor.u32 %v5930_v53, %v5927_v61  ;;  %v5952_v36 = vshrl.u32 %v19905_v39, 16 }
 0x4bb   : > { %v12268_v2 = vmax.f32 %v12132_v0, 0.0  ;;  %v12133_v54 = vadd.f32 %v16174_v57, %v20213_v14  ;;  %16145 = vmatprep.mubr.msk.bf16.mxu0 %vm1255_vm2, %v11182_v17  ;;  %v5955_v35 = vshll.u32 %v19905_v39, 16  ;;  %v11187_v45 = vrot.slane %v17788_v7, 3 }
 0x4bc   : > { %v14172_v10 = vpack.c.bf16 %v12270_v9, %v12270_v9  ;;  %v12271_v63 = vmax.f32 %v12135_v50, 0.0  ;;  %v5940_v29 = vor.u32 %v5939_v48, %v5936_v51  ;;  %v11186_v39 = vsel %vm11063_vm7, %v11183_v52, %v11185_v59  ;;  %v20310_v51 = vld [vmem:[%s17886_s27 + $0x218] sm:$0xff]  }
 0x4bd   : > { %v14170_v40 = vpack.c.bf16 %v12268_v2, %v12268_v2  ;;  %v12269_v16 = vmax.f32 %v12133_v54, 0.0  ;;  %v16039_v56 = vpop.f32.mrb[8].mxu0  ;;  %v5932_v53 = vsel %vm5366_vm3, %v5922_v46, %v5931_v12  ;;  %v5945_v57 = vrot.slane %v5943_v43, 1 }
 0x4be   : > { %12951 = vst.msk [vmem:[%s20237_s21 + $0x18] sm:$0xf] %vm12944_vm8, %v14172_v10  ;;  %v14173_v34 = vpack.c.bf16 %v12271_v63, %v12271_v63  ;;  %v16175_v37 = vadd.f32 %v16039_v56, %v19856_v13  ;;  %v11474_v17 = vpop.f32.mrb[9].mxu0  ;;  %v5957_v18 = vrot.slane %v5955_v35, 2  ;;  %v11189_v48 = vrot.slane %v20310_v51, 3  ;;  %v20972_v35 = vld [vmem:[#allocation12_spill] sm:$0xff] }
 0x4bf   : > { %15594 = vmatmul.mubr.msk.bf16.gmra.mrb[116].mxu1 %vm1255_vm2, %v5914_v31  ;;  %12949 = vst.msk [vmem:[%s20237_s21 + $0x10] sm:$0xf] %vm12944_vm8, %v14170_v40  ;;  %v14171_v4 = vpack.c.bf16 %v12269_v16, %v12269_v16  ;;  %v16176_v26 = vadd.f32 %v11474_v17, %v19859_v19  ;;  %v16040_v62 = vpop.f32.mrb[10].mxu0  ;;  %v5948_v31 = vrot.slane %v5946_v41, 2  ;;  %v5961_v8 = vshrl.u32 %v19926_v47, 16  ;;  %v20970_v16 = vld [vmem:[#allocation5_spill] sm:$0xff] }
 0x4c0   : > { %15597 = vmatprep.mubr.msk.bf16.mxu1 %vm1255_vm2, %v5923_v30  ;;  %12952 = vst.msk [vmem:[%s20237_s21 + $0x1c] sm:$0xf] %vm12944_vm8, %v14173_v34  ;;  %v12138_v13 = vadd.f32 %v16175_v37, %v20213_v14  ;;  %v16177_v42 = vadd.f32 %v16040_v62, %v19862_v20  ;;  %v11477_v61 = vpop.f32.mrb[11].mxu0  ;;  %v5954_v20 = vrot.slane %v5952_v36, 1  ;;  %v5941_v30 = vsel %vm5366_vm3, %v5931_v12, %v5940_v29  ;;  %v20971_v37 = vld [vmem:[#allocation6_spill] sm:$0xff]  ;;  %v20973_v62 = vld [vmem:[#allocation7_spill] sm:$0xff] }
 0x4c1   : > { %12950 = vst.msk [vmem:[%s20237_s21 + $0x14] sm:$0xf] %vm12944_vm8, %v14171_v4  ;;  %v12136_v19 = vadd.f32 %v16176_v26, %v20213_v14  ;;  %v16178_v0 = vadd.f32 %v11477_v61, %v19865_v32  ;;  %v11188_v32 = vsel %vm11063_vm7, %v11185_v59, %v11187_v45  ;;  %v5964_v40 = vshll.u32 %v19926_v47, 16  ;;  %v17790_v61 = vld [vmem:[%s17886_s27 + $0x220] sm:$0xff]  }
 0x4c2   : > { %v12274_v9 = vmax.f32 %v12138_v13, 0.0  ;;  %v12139_v50 = vadd.f32 %v16177_v42, %v20213_v14  ;;  %16146 = vmatmul.mubr.msk.bf16.gmra.mrb[116].mxu0 %vm1255_vm2, %v11184_v25  ;;  %v5949_v43 = vor.u32 %v5948_v31, %v5945_v57  ;;  %v5958_v41 = vor.u32 %v5957_v18, %v5954_v20 }
 0x4c3   : > { %v12272_v52 = vmax.f32 %v12136_v19, 0.0  ;;  %v12137_v46 = vadd.f32 %v16178_v0, %v20213_v14  ;;  %16149 = vmatprep.mubr.msk.bf16.mxu0 %vm1255_vm2, %v11186_v39  ;;  %v5970_v47 = vshrl.u32 %v20972_v35, 16  ;;  %v5973_v4 = vshll.u32 %v20972_v35, 16  ;;  %v20974_v19 = vld [vmem:[#allocation10_spill] sm:$0xff] }
 0x4c4   : > { %v14176_v2 = vpack.c.bf16 %v12274_v9, %v12274_v9  ;;  %v12275_v54 = vmax.f32 %v12139_v50, 0.0  ;;  %v11190_v42 = vsel %vm11063_vm7, %v11187_v45, %v11189_v48  ;;  %v11191_v39 = vrot.slane %v17790_v61, 3 }
 0x4c5   : > { %v14174_v25 = vpack.c.bf16 %v12272_v52, %v12272_v52  ;;  %v12273_v10 = vmax.f32 %v12137_v46, 0.0  ;;  %v16043_v63 = vpop.f32.mrb[12].mxu0  ;;  %v5963_v57 = vrot.slane %v5961_v8, 1  ;;  %v5966_v31 = vrot.slane %v5964_v40, 2 }
 0x4c6   : > { %12955 = vst.msk [vmem:[%s20237_s21 + $0x28] sm:$0xf] %vm12944_vm8, %v14176_v2  ;;  %v14177_v12 = vpack.c.bf16 %v12275_v54, %v12275_v54  ;;  %v16179_v59 = vadd.f32 %v16043_v63, %v20970_v16  ;;  %v11490_v56 = vpop.f32.mrb[13].mxu0  ;;  %v5950_v20 = vsel %vm5366_vm3, %v5940_v29, %v5949_v43  ;;  %v5959_v45 = vsel %vm5366_vm3, %v5949_v43, %v5958_v41 }
 0x4c7   : > { %15598 = vmatmul.mubr.msk.bf16.gmra.mrb[120].mxu1 %vm1255_vm2, %v5932_v53  ;;  %12953 = vst.msk [vmem:[%s20237_s21 + $0x20] sm:$0xf] %vm12944_vm8, %v14174_v25  ;;  %v14175_v34 = vpack.c.bf16 %v12273_v10, %v12273_v10  ;;  %v16180_v17 = vadd.f32 %v11490_v56, %v20971_v37  ;;  %v16044_v36 = vpop.f32.mrb[14].mxu0  ;;  %v5972_v46 = vrot.slane %v5970_v47, 1  ;;  %v17791_v25 = vld [vmem:[%s17886_s27 + $0x228] sm:$0xff]   ;;  %v5967_v29 = vor.u32 %v5966_v31, %v5963_v57 }
 0x4c8   : > { %15601 = vmatprep.mubr.msk.bf16.mxu1 %vm1255_vm2, %v5941_v30  ;;  %12956 = vst.msk [vmem:[%s20237_s21 + $0x2c] sm:$0xf] %vm12944_vm8, %v14177_v12  ;;  %v12142_v26 = vadd.f32 %v16179_v59, %v20213_v14  ;;  %v16181_v7 = vadd.f32 %v16044_v36, %v20973_v62  ;;  %v11493_v13 = vpop.f32.mrb[15].mxu0  ;;  %v5975_v30 = vrot.slane %v5973_v4, 2  ;;  %v11193_v10 = vrot.slane %v17791_v25, 3  ;;  %v20975_v12 = vld [vmem:[#allocation8_spill] sm:$0xff] }
 0x4c9   : > { %12954 = vst.msk [vmem:[%s20237_s21 + $0x24] sm:$0xf] %vm12944_vm8, %v14175_v34  ;;  %v12140_v53 = vadd.f32 %v16180_v17, %v20213_v14  ;;  %v16182_v0 = vadd.f32 %v11493_v13, %v20974_v19  ;;  %v17792_v56 = vld [vmem:[%s17886_s27 + $0x230] ss:$0 sps:$4 sm:$0x33]   ;;  %v20976_v17 = vld [vmem:[#allocation9_spill] sm:$0xff]  ;;  %v11192_v47 = vsel %vm11063_vm7, %v11189_v48, %v11191_v39  ;;  %v5968_v48 = vsel %vm5366_vm3, %v5958_v41, %v5967_v29 }
 0x4ca   : > { %v12278_v9 = vmax.f32 %v12142_v26, 0.0  ;;  %v12143_v50 = vadd.f32 %v16181_v7, %v20213_v14  ;;  %16150 = vmatmul.mubr.msk.bf16.gmra.mrb[120].mxu0 %vm1255_vm2, %v11188_v32  ;;  %v5979_v43 = vshrl.u32 %v17792_v56, 16  ;;  %v5982_v34 = vshll.u32 %v17792_v56, 16  ;;  %v20977_v62 = vld [vmem:[#allocation11_spill] sm:$0xff] }
 0x4cb   : > { %v12276_v18 = vmax.f32 %v12140_v53, 0.0  ;;  %v12141_v52 = vadd.f32 %v16182_v0, %v20213_v14  ;;  %16153 = vmatprep.mubr.msk.bf16.mxu0 %vm1255_vm2, %v11190_v42  ;;  %v5976_v4 = vor.u32 %v5975_v30, %v5972_v46  ;;  %v11194_v42 = vsel %vm11063_vm7, %v11191_v39, %v11193_v10  ;;  %v20978_v53 = vld [vmem:[#allocation14_spill] sm:$0xff] }
 0x4cc   : > { %v14180_v2 = vpack.c.bf16 %v12278_v9, %v12278_v9  ;;  %v12279_v54 = vmax.f32 %v12143_v50, 0.0  ;;  %v5981_v57 = vrot.slane %v5979_v43, 1  ;;  %v5984_v31 = vrot.slane %v5982_v34, 2  ;;  %v17793_v50 = vld [vmem:[%s17886_s27 + $0x230] sm:$0xff]   ;;  %v20981_v34 = vld [vmem:[#allocation18_spill] sm:$0xff] }
 0x4cd   : > { %v14178_v63 = vpack.c.bf16 %v12276_v18, %v12276_v18  ;;  %v12277_v32 = vmax.f32 %v12141_v52, 0.0  ;;  %v16047_v8 = vpop.f32.mrb[16].mxu0  ;;  %v17794_v52 = vld [vmem:[%s17886_s27 + $0x238] sm:$0xff]  }
 0x4ce   : > { %12959 = vst.msk [vmem:[%s20237_s21 + $0x38] sm:$0xf] %vm12944_vm8, %v14180_v2  ;;  %v14181_v40 = vpack.c.bf16 %v12279_v54, %v12279_v54  ;;  %v16183_v16 = vadd.f32 %v16047_v8, %v20975_v12  ;;  %v11506_v59 = vpop.f32.mrb[17].mxu0  ;;  %v11197_v46 = vrot.slane %v17794_v52, 3  ;;  %v20980_v12 = vld [vmem:[#allocation15_spill] sm:$0xff] }
 0x4cf   : > { %15602 = vmatmul.mubr.msk.bf16.gmra.mrb[124].mxu1 %vm1255_vm2, %v5950_v20  ;;  %12957 = vst.msk [vmem:[%s20237_s21 + $0x30] sm:$0xf] %vm12944_vm8, %v14178_v63  ;;  %v14179_v37 = vpack.c.bf16 %v12277_v32, %v12277_v32  ;;  %v16184_v36 = vadd.f32 %v11506_v59, %v20976_v17  ;;  %v16048_v35 = vpop.f32.mrb[18].mxu0  ;;  %v11195_v20 = vrot.slane %v17793_v50, 3  ;;  %v20979_v63 = vld [vmem:[#allocation13_spill] sm:$0xff] }
 0x4d0   : > { %15605 = vmatprep.mubr.msk.bf16.mxu1 %vm1255_vm2, %v5959_v45  ;;  %12960 = vst.msk [vmem:[%s20237_s21 + $0x3c] sm:$0xf] %vm12944_vm8, %v14181_v40  ;;  %v12146_v26 = vadd.f32 %v16183_v16, %v20213_v14  ;;  %v16185_v7 = vadd.f32 %v16048_v35, %v20977_v62  ;;  %v11509_v13 = vpop.f32.mrb[19].mxu0  ;;  %v5977_v45 = vsel %vm5366_vm3, %v5967_v29, %v5976_v4 }
 0x4d1   : > { %12958 = vst.msk [vmem:[%s20237_s21 + $0x34] sm:$0xf] %vm12944_vm8, %v14179_v37  ;;  %v12144_v61 = vadd.f32 %v16184_v36, %v20213_v14  ;;  %v16186_v51 = vadd.f32 %v11509_v13, %v20978_v53  ;;  %v5985_v29 = vor.u32 %v5984_v31, %v5981_v57  ;;  %v11196_v56 = vsel %vm11063_vm7, %v11193_v10, %v11195_v20  ;;  %v20983_v31 = vld [vmem:[#allocation17_spill] sm:$0xff] }
 0x4d2   : > { %v12282_v19 = vmax.f32 %v12146_v26, 0.0  ;;  %v12147_v0 = vadd.f32 %v16185_v7, %v20213_v14  ;;  %16154 = vmatmul.mubr.msk.bf16.gmra.mrb[124].mxu0 %vm1255_vm2, %v11192_v47  ;;  %v11198_v36 = vsel %vm11063_vm7, %v11195_v20, %v11197_v46  ;;  %v20982_v47 = vld [vmem:[#allocation16_spill] sm:$0xff]  ;;  %v20984_v20 = vld [vmem:[#allocation19_spill] sm:$0xff] }
 0x4d3   : > { %v12280_v9 = vmax.f32 %v12144_v61, 0.0  ;;  %v12145_v39 = vadd.f32 %v16186_v51, %v20213_v14  ;;  %16157 = vmatprep.mubr.msk.bf16.mxu0 %vm1255_vm2, %v11194_v42  ;;  %v5986_v7 = vsel %vm5366_vm3, %v5976_v4, %v5985_v29  ;;  %v17795_v61 = vld [vmem:[%s17886_s27 + $0x240] ss:$0 sps:$4 sm:$0x77]  }
 0x4d4   : > { %v14184_v18 = vpack.c.bf16 %v12282_v19, %v12282_v19  ;;  %v12283_v41 = vmax.f32 %v12147_v0, 0.0  ;;  %v11199_v53 = vrot.slane %v17795_v61, 3 }
 0x4d5   : > { %v14182_v30 = vpack.c.bf16 %v12280_v9, %v12280_v9  ;;  %v12281_v2 = vmax.f32 %v12145_v39, 0.0  ;;  %v16051_v54 = vpop.f32.mrb[20].mxu0 }
 0x4d6   : > { %12963 = vst.msk [vmem:[%s20237_s21 + $0x48] sm:$0xf] %vm12944_vm8, %v14184_v18  ;;  %v14185_v25 = vpack.c.bf16 %v12283_v41, %v12283_v41  ;;  %v16187_v32 = vadd.f32 %v16051_v54, %v20979_v63  ;;  %v11522_v8 = vpop.f32.mrb[21].mxu0  ;;  %v11200_v41 = vsel %vm11063_vm7, %v11197_v46, %v11199_v53 }
 0x4d7   : > { %15606 = vmatmul.mubr.msk.bf16.gmra.mrb[128].mxu1 %vm1255_vm2, %v5968_v48  ;;  %12961 = vst.msk [vmem:[%s20237_s21 + $0x40] sm:$0xf] %vm12944_vm8, %v14182_v30  ;;  %v14183_v40 = vpack.c.bf16 %v12281_v2, %v12281_v2  ;;  %v16188_v16 = vadd.f32 %v11522_v8, %v20980_v12  ;;  %v16052_v59 = vpop.f32.mrb[22].mxu0 }
 0x4d8   : > { %15609 = vmatprep.mubr.msk.bf16.mxu1 %vm1255_vm2, %v5977_v45  ;;  %12964 = vst.msk [vmem:[%s20237_s21 + $0x4c] sm:$0xf] %vm12944_vm8, %v14185_v25  ;;  %v12150_v43 = vadd.f32 %v16187_v32, %v20213_v14  ;;  %v16189_v37 = vadd.f32 %v16052_v59, %v20981_v34  ;;  %v11525_v17 = vpop.f32.mrb[23].mxu0  ;;  %v20985_v34 = vld [vmem:[#allocation22_spill] sm:$0xff] }
 0x4d9   : > { %12962 = vst.msk [vmem:[%s20237_s21 + $0x44] sm:$0xf] %vm12944_vm8, %v14183_v40  ;;  %v12148_v35 = vadd.f32 %v16188_v16, %v20213_v14  ;;  %v16190_v26 = vadd.f32 %v11525_v17, %v20982_v47 }
 0x4da   : > { %v12286_v62 = vmax.f32 %v12150_v43, 0.0  ;;  %v12151_v10 = vadd.f32 %v16189_v37, %v20213_v14  ;;  %16158 = vmatmul.mubr.msk.bf16.gmra.mrb[128].mxu0 %vm1255_vm2, %v11196_v56 }
 0x4db   : > { %v12284_v13 = vmax.f32 %v12148_v35, 0.0  ;;  %v12149_v42 = vadd.f32 %v16190_v26, %v20213_v14  ;;  %16161 = vmatprep.mubr.msk.bf16.mxu0 %vm1255_vm2, %v11198_v36 }
 0x4dc   : > { %v14188_v51 = vpack.c.bf16 %v12286_v62, %v12286_v62  ;;  %v12287_v48 = vmax.f32 %v12151_v10, 0.0 }
 0x4dd   : > { %v14186_v19 = vpack.c.bf16 %v12284_v13, %v12284_v13  ;;  %v12285_v0 = vmax.f32 %v12149_v42, 0.0  ;;  %v16055_v57 = vpop.f32.mrb[24].mxu0 }
 0x4de   : > { %12967 = vst.msk [vmem:[%s20237_s21 + $0x58] sm:$0xf] %vm12944_vm8, %v14188_v51  ;;  %v14189_v4 = vpack.c.bf16 %v12287_v48, %v12287_v48  ;;  %v16191_v9 = vadd.f32 %v16055_v57, %v20983_v31  ;;  %v11538_v39 = vpop.f32.mrb[25].mxu0 }
 0x4df   : > { %15610 = vmatmul.mubr.msk.bf16.gmra.mrb[132].mxu1 %vm1255_vm2, %v5986_v7  ;;  %12965 = vst.msk [vmem:[%s20237_s21 + $0x50] sm:$0xf] %vm12944_vm8, %v14186_v19  ;;  %v14187_v50 = vpack.c.bf16 %v12285_v0, %v12285_v0  ;;  %v16192_v45 = vadd.f32 %v11538_v39, %v20984_v20  ;;  %v16056_v18 = vpop.f32.mrb[26].mxu0  ;;  %v20986_v19 = vld [vmem:[#allocation20_spill] sm:$0xff] }
 0x4e0   : > { %12968 = vst.msk [vmem:[%s20237_s21 + $0x5c] sm:$0xf] %vm12944_vm8, %v14189_v4  ;;  %v12154_v52 = vadd.f32 %v16191_v9, %v20213_v14  ;;  %v16193_v30 = vadd.f32 %v16056_v18, %v19965_v23  ;;  %v11541_v2 = vpop.f32.mrb[27].mxu0  ;;  %v20987_v4 = vld [vmem:[#allocation21_spill] sm:$0xff] }
 0x4e1   : > { %12966 = vst.msk [vmem:[%s20237_s21 + $0x54] sm:$0xf] %vm12944_vm8, %v14187_v50  ;;  %v12152_v54 = vadd.f32 %v16192_v45, %v20213_v14  ;;  %v16194_v25 = vadd.f32 %v11541_v2, %v19968_v60 }
 0x4e2   : > { %v12290_v63 = vmax.f32 %v12154_v52, 0.0  ;;  %v12155_v32 = vadd.f32 %v16193_v30, %v20213_v14  ;;  %16162 = vmatmul.mubr.msk.bf16.gmra.mrb[132].mxu0 %vm1255_vm2, %v11200_v41 }
 0x4e3   : > { %v12288_v46 = vmax.f32 %v12152_v54, 0.0  ;;  %v12153_v8 = vadd.f32 %v16194_v25, %v20213_v14 }
 0x4e4   : > { %v14192_v29 = vpack.c.bf16 %v12290_v63, %v12290_v63  ;;  %v12291_v40 = vmax.f32 %v12155_v32, 0.0 }
 0x4e5   : > { %v14190_v23 = vpack.c.bf16 %v12288_v46, %v12288_v46  ;;  %v12289_v12 = vmax.f32 %v12153_v8, 0.0  ;;  %v16059_v16 = vpop.f32.mrb[28].mxu0  ;;  %v20988_v8 = vld [vmem:[#allocation23_spill] sm:$0xff] }
 0x4e6   : > { %12971 = vst.msk [vmem:[%s20237_s21 + $0x68] sm:$0xf] %vm12944_vm8, %v14192_v29  ;;  %v14193_v59 = vpack.c.bf16 %v12291_v40, %v12291_v40  ;;  %v16195_v60 = vadd.f32 %v16059_v16, %v19982_v27  ;;  %v11554_v56 = vpop.f32.mrb[29].mxu0 }
 0x4e7   : > { %12969 = vst.msk [vmem:[%s20237_s21 + $0x60] sm:$0xf] %vm12944_vm8, %v14190_v23  ;;  %v14191_v43 = vpack.c.bf16 %v12289_v12, %v12289_v12  ;;  %v16196_v37 = vadd.f32 %v11554_v56, %v20985_v34  ;;  %v16060_v17 = vpop.f32.mrb[30].mxu0  ;;  %v20989_v23 = vld [vmem:[#allocation26_spill] sm:$0xff] }
 0x4e8   : > { %12972 = vst.msk [vmem:[%s20237_s21 + $0x6c] sm:$0xf] %vm12944_vm8, %v14193_v59  ;;  %v12158_v36 = vadd.f32 %v16195_v60, %v20213_v14  ;;  %v16197_v35 = vadd.f32 %v16060_v17, %v19988_v1  ;;  %v11557_v47 = vpop.f32.mrb[31].mxu0 }
 0x4e9   : > { %12970 = vst.msk [vmem:[%s20237_s21 + $0x64] sm:$0xf] %vm12944_vm8, %v14191_v43  ;;  %v12156_v27 = vadd.f32 %v16196_v37, %v20213_v14  ;;  %v16198_v26 = vadd.f32 %v11557_v47, %v19991_v6 }
 0x4ea   : > { %v12294_v62 = vmax.f32 %v12158_v36, 0.0  ;;  %v12159_v10 = vadd.f32 %v16197_v35, %v20213_v14 }
 0x4eb   : > { %v12292_v7 = vmax.f32 %v12156_v27, 0.0  ;;  %v12157_v13 = vadd.f32 %v16198_v26, %v20213_v14 }
 0x4ec   : > { %v14196_v42 = vpack.c.bf16 %v12294_v62, %v12294_v62  ;;  %v12295_v61 = vmax.f32 %v12159_v10, 0.0 }
 0x4ed   : > { %v14194_v53 = vpack.c.bf16 %v12292_v7, %v12292_v7  ;;  %v12293_v1 = vmax.f32 %v12157_v13, 0.0  ;;  %v16063_v51 = vpop.f32.mrb[32].mxu0  ;;  %v20990_v7 = vld [vmem:[#allocation24_spill] sm:$0xff] }
 0x4ee   : > { %12975 = vst.msk [vmem:[%s20237_s21 + $0x78] sm:$0xf] %vm12944_vm8, %v14196_v42  ;;  %v14197_v48 = vpack.c.bf16 %v12295_v61, %v12295_v61  ;;  %v16199_v0 = vadd.f32 %v16063_v51, %v20986_v19  ;;  %v11570_v57 = vpop.f32.mrb[33].mxu0  ;;  %v20991_v61 = vld [vmem:[#allocation25_spill] sm:$0xff] }
 0x4ef   : > { %12973 = vst.msk [vmem:[%s20237_s21 + $0x70] sm:$0xf] %vm12944_vm8, %v14194_v53  ;;  %v14195_v6 = vpack.c.bf16 %v12293_v1, %v12293_v1  ;;  %v16200_v31 = vadd.f32 %v11570_v57, %v20987_v4  ;;  %v16064_v9 = vpop.f32.mrb[34].mxu0 }
 0x4f0   : > { %12976 = vst.msk [vmem:[%s20237_s21 + $0x7c] sm:$0xf] %vm12944_vm8, %v14197_v48  ;;  %v12162_v39 = vadd.f32 %v16199_v0, %v20213_v14  ;;  %v16201_v50 = vadd.f32 %v16064_v9, %v20010_v58  ;;  %v11573_v20 = vpop.f32.mrb[35].mxu0 }
 0x4f1   : > { %12974 = vst.msk [vmem:[%s20237_s21 + $0x74] sm:$0xf] %vm12944_vm8, %v14195_v6  ;;  %v12160_v45 = vadd.f32 %v16200_v31, %v20213_v14  ;;  %v16202_v18 = vadd.f32 %v11573_v20, %v20013_v3 }
 0x4f2   : > { %v12298_v41 = vmax.f32 %v12162_v39, 0.0  ;;  %v12163_v52 = vadd.f32 %v16201_v50, %v20213_v14 }
 0x4f3   : > { %v12296_v30 = vmax.f32 %v12160_v45, 0.0  ;;  %v12161_v2 = vadd.f32 %v16202_v18, %v20213_v14 }
 0x4f4   : > { %v14200_v54 = vpack.c.bf16 %v12298_v41, %v12298_v41  ;;  %v12299_v25 = vmax.f32 %v12163_v52, 0.0  ;;  %v20992_v41 = vld [vmem:[#allocation27_spill] sm:$0xff] }
 0x4f5   : > { %v14198_v63 = vpack.c.bf16 %v12296_v30, %v12296_v30  ;;  %v12297_v58 = vmax.f32 %v12161_v2, 0.0  ;;  %v16067_v32 = vpop.f32.mrb[36].mxu0  ;;  %v20993_v2 = vld [vmem:[#allocation30_spill] sm:$0xff] }
 0x4f6   : > { %12979 = vst.msk [vmem:[%s20237_s21 + $0x88] sm:$0xf] %vm12944_vm8, %v14200_v54  ;;  %v14201_v46 = vpack.c.bf16 %v12299_v25, %v12299_v25  ;;  %v16203_v29 = vadd.f32 %v16067_v32, %v20988_v8  ;;  %v11586_v40 = vpop.f32.mrb[37].mxu0 }
 0x4f7   : > { %12977 = vst.msk [vmem:[%s20237_s21 + $0x80] sm:$0xf] %vm12944_vm8, %v14198_v63  ;;  %v14199_v3 = vpack.c.bf16 %v12297_v58, %v12297_v58  ;;  %v16204_v12 = vadd.f32 %v11586_v40, %v20989_v23  ;;  %v16068_v16 = vpop.f32.mrb[38].mxu0 }
 0x4f8   : > { %12980 = vst.msk [vmem:[%s20237_s21 + $0x8c] sm:$0xf] %vm12944_vm8, %v14201_v46  ;;  %v12166_v59 = vadd.f32 %v16203_v29, %v20213_v14  ;;  %v16205_v60 = vadd.f32 %v16068_v16, %v20032_v33  ;;  %v11589_v56 = vpop.f32.mrb[39].mxu0 }
 0x4f9   : > { %12978 = vst.msk [vmem:[%s20237_s21 + $0x84] sm:$0xf] %vm12944_vm8, %v14199_v3  ;;  %v12164_v43 = vadd.f32 %v16204_v12, %v20213_v14  ;;  %v16206_v34 = vadd.f32 %v11589_v56, %v20035_v15 }
 0x4fa   : > { %v12302_v37 = vmax.f32 %v12166_v59, 0.0  ;;  %v12167_v17 = vadd.f32 %v16205_v60, %v20213_v14 }
 0x4fb   : > { %v12300_v36 = vmax.f32 %v12164_v43, 0.0  ;;  %v12165_v35 = vadd.f32 %v16206_v34, %v20213_v14  ;;  %v20994_v43 = vld [vmem:[#allocation28_spill] sm:$0xff] }
 0x4fc   : > { %v14204_v47 = vpack.c.bf16 %v12302_v37, %v12302_v37  ;;  %v12303_v27 = vmax.f32 %v12167_v17, 0.0  ;;  %v20995_v17 = vld [vmem:[#allocation29_spill] sm:$0xff] }
 0x4fd   : > { %v14202_v26 = vpack.c.bf16 %v12300_v36, %v12300_v36  ;;  %v12301_v33 = vmax.f32 %v12165_v35, 0.0  ;;  %v16071_v62 = vpop.f32.mrb[40].mxu0 }
 0x4fe   : > { %12983 = vst.msk [vmem:[%s20237_s21 + $0x98] sm:$0xf] %vm12944_vm8, %v14204_v47  ;;  %v14205_v10 = vpack.c.bf16 %v12303_v27, %v12303_v27  ;;  %v16207_v13 = vadd.f32 %v16071_v62, %v20990_v7  ;;  %v11602_v42 = vpop.f32.mrb[41].mxu0 }
 0x4ff   : > { %12981 = vst.msk [vmem:[%s20237_s21 + $0x90] sm:$0xf] %vm12944_vm8, %v14202_v26  ;;  %v14203_v15 = vpack.c.bf16 %v12301_v33, %v12301_v33  ;;  %v16208_v53 = vadd.f32 %v11602_v42, %v20991_v61  ;;  %v16072_v1 = vpop.f32.mrb[42].mxu0 }
 0x500   : > { %12984 = vst.msk [vmem:[%s20237_s21 + $0x9c] sm:$0xf] %vm12944_vm8, %v14205_v10  ;;  %v12170_v51 = vadd.f32 %v16207_v13, %v20213_v14  ;;  %v16209_v48 = vadd.f32 %v16072_v1, %v20054_v22  ;;  %v11605_v19 = vpop.f32.mrb[43].mxu0 }
 0x501   : > { %12982 = vst.msk [vmem:[%s20237_s21 + $0x94] sm:$0xf] %vm12944_vm8, %v14203_v15  ;;  %v12168_v0 = vadd.f32 %v16208_v53, %v20213_v14  ;;  %v16210_v57 = vadd.f32 %v11605_v19, %v20057_v44 }
 0x502   : > { %v12306_v6 = vmax.f32 %v12170_v51, 0.0  ;;  %v12171_v4 = vadd.f32 %v16209_v48, %v20213_v14  ;;  %v20996_v48 = vld [vmem:[#allocation31_spill] sm:$0xff] }
 0x503   : > { %v12304_v31 = vmax.f32 %v12168_v0, 0.0  ;;  %v12169_v9 = vadd.f32 %v16210_v57, %v20213_v14  ;;  %v20997_v57 = vld [vmem:[#allocation34_spill] sm:$0xff] }
 0x504   : > { %v14208_v39 = vpack.c.bf16 %v12306_v6, %v12306_v6  ;;  %v12307_v50 = vmax.f32 %v12171_v4, 0.0 }
 0x505   : > { %v14206_v20 = vpack.c.bf16 %v12304_v31, %v12304_v31  ;;  %v12305_v22 = vmax.f32 %v12169_v9, 0.0  ;;  %v16075_v45 = vpop.f32.mrb[44].mxu0 }
 0x506   : > { %12987 = vst.msk [vmem:[%s20237_s21 + $0xa8] sm:$0xf] %vm12944_vm8, %v14208_v39  ;;  %v14209_v18 = vpack.c.bf16 %v12307_v50, %v12307_v50  ;;  %v16211_v52 = vadd.f32 %v16075_v45, %v20992_v41  ;;  %v11618_v30 = vpop.f32.mrb[45].mxu0 }
 0x507   : > { %12985 = vst.msk [vmem:[%s20237_s21 + $0xa0] sm:$0xf] %vm12944_vm8, %v14206_v20  ;;  %v14207_v44 = vpack.c.bf16 %v12305_v22, %v12305_v22  ;;  %v16212_v54 = vadd.f32 %v11618_v30, %v20993_v2  ;;  %v16076_v25 = vpop.f32.mrb[46].mxu0 }
 0x508   : > { %12988 = vst.msk [vmem:[%s20237_s21 + $0xac] sm:$0xf] %vm12944_vm8, %v14209_v18  ;;  %v12174_v63 = vadd.f32 %v16211_v52, %v20213_v14  ;;  %v16213_v58 = vadd.f32 %v16076_v25, %v20076_v55  ;;  %v11621_v32 = vpop.f32.mrb[47].mxu0  ;;  %v20998_v25 = vld [vmem:[#allocation32_spill] sm:$0xff] }
 0x509   : > { %12986 = vst.msk [vmem:[%s20237_s21 + $0xa4] sm:$0xf] %vm12944_vm8, %v14207_v44  ;;  %v12172_v46 = vadd.f32 %v16212_v54, %v20213_v14  ;;  %v16214_v8 = vadd.f32 %v11621_v32, %v20079_v21  ;;  %v20999_v32 = vld [vmem:[#allocation33_spill] sm:$0xff] }
 0x50a   : > { %v12310_v29 = vmax.f32 %v12174_v63, 0.0  ;;  %v12175_v40 = vadd.f32 %v16213_v58, %v20213_v14 }
 0x50b   : > { %v12308_v3 = vmax.f32 %v12172_v46, 0.0  ;;  %v12173_v23 = vadd.f32 %v16214_v8, %v20213_v14 }
 0x50c   : > { %v14212_v12 = vpack.c.bf16 %v12310_v29, %v12310_v29  ;;  %v12311_v16 = vmax.f32 %v12175_v40, 0.0 }
 0x50d   : > { %v14210_v59 = vpack.c.bf16 %v12308_v3, %v12308_v3  ;;  %v12309_v55 = vmax.f32 %v12173_v23, 0.0  ;;  %v16079_v60 = vpop.f32.mrb[48].mxu0 }
 0x50e   : > { %12991 = vst.msk [vmem:[%s20237_s21 + $0xb8] sm:$0xf] %vm12944_vm8, %v14212_v12  ;;  %v14213_v56 = vpack.c.bf16 %v12311_v16, %v12311_v16  ;;  %v16215_v34 = vadd.f32 %v16079_v60, %v20994_v43  ;;  %v11634_v37 = vpop.f32.mrb[49].mxu0 }
 0x50f   : > { %12989 = vst.msk [vmem:[%s20237_s21 + $0xb0] sm:$0xf] %vm12944_vm8, %v14210_v59  ;;  %v14211_v21 = vpack.c.bf16 %v12309_v55, %v12309_v55  ;;  %v16216_v36 = vadd.f32 %v11634_v37, %v20995_v17  ;;  %v16080_v35 = vpop.f32.mrb[50].mxu0  ;;  %v21000_v17 = vld [vmem:[#allocation35_spill] sm:$0xff] }
 0x510   : > { %12992 = vst.msk [vmem:[%s20237_s21 + $0xbc] sm:$0xf] %vm12944_vm8, %v14213_v56  ;;  %v12178_v47 = vadd.f32 %v16215_v34, %v20213_v14  ;;  %v16217_v27 = vadd.f32 %v16080_v35, %v20098_v49  ;;  %v11637_v26 = vpop.f32.mrb[51].mxu0 }
 0x511   : > { %12990 = vst.msk [vmem:[%s20237_s21 + $0xb4] sm:$0xf] %vm12944_vm8, %v14211_v21  ;;  %v12176_v33 = vadd.f32 %v16216_v36, %v20213_v14  ;;  %v16218_v62 = vadd.f32 %v11637_v26, %v20101_v5 }
 0x512   : > { %v12314_v10 = vmax.f32 %v12178_v47, 0.0  ;;  %v12179_v7 = vadd.f32 %v16217_v27, %v20213_v14  ;;  %v21001_v47 = vld [vmem:[#allocation36_spill] sm:$0xff] }
 0x513   : > { %v12312_v13 = vmax.f32 %v12176_v33, 0.0  ;;  %v12177_v42 = vadd.f32 %v16218_v62, %v20213_v14  ;;  %v21002_v62 = vld [vmem:[#allocation37_spill] sm:$0xff] }
 0x514   : > { %v14216_v15 = vpack.c.bf16 %v12314_v10, %v12314_v10  ;;  %v12315_v61 = vmax.f32 %v12179_v7, 0.0 }
 0x515   : > { %v14214_v53 = vpack.c.bf16 %v12312_v13, %v12312_v13  ;;  %v12313_v49 = vmax.f32 %v12177_v42, 0.0  ;;  %v16083_v1 = vpop.f32.mrb[52].mxu0  ;;  %v21003_v42 = vld [vmem:[#allocation3_spill] sm:$0xff] }
 0x516   : > { %12995 = vst.msk [vmem:[%s20237_s21 + $0xc8] sm:$0xf] %vm12944_vm8, %v14216_v15  ;;  %v14217_v51 = vpack.c.bf16 %v12315_v61, %v12315_v61  ;;  %v16219_v19 = vadd.f32 %v16083_v1, %v20996_v48  ;;  %v11650_v0 = vpop.f32.mrb[53].mxu0 }
 0x517   : > { %12993 = vst.msk [vmem:[%s20237_s21 + $0xc0] sm:$0xf] %vm12944_vm8, %v14214_v53  ;;  %v14215_v5 = vpack.c.bf16 %v12313_v49, %v12313_v49  ;;  %v16220_v6 = vadd.f32 %v11650_v0, %v20997_v57  ;;  %v16084_v4 = vpop.f32.mrb[54].mxu0 }
 0x518   : > { %12996 = vst.msk [vmem:[%s20237_s21 + $0xcc] sm:$0xf] %vm12944_vm8, %v14217_v51  ;;  %v12182_v31 = vadd.f32 %v16219_v19, %v20213_v14  ;;  %v16221_v9 = vadd.f32 %v16084_v4, %v20120_v28  ;;  %v11653_v39 = vpop.f32.mrb[55].mxu0 }
 0x519   : > { %12994 = vst.msk [vmem:[%s20237_s21 + $0xc4] sm:$0xf] %vm12944_vm8, %v14215_v5  ;;  %v12180_v50 = vadd.f32 %v16220_v6, %v20213_v14  ;;  %v16222_v20 = vadd.f32 %v11653_v39, %v20123_v11  ;;  %v21004_v6 = vld [vmem:[#allocation2_spill] sm:$0xff]  ;;  %v21005_v39 = vld [vmem:[#allocation4_spill] sm:$0xff] }
 0x51a   : > { %v12318_v22 = vmax.f32 %v12182_v31, 0.0  ;;  %v12183_v45 = vadd.f32 %v16221_v9, %v20213_v14 }
 0x51b   : > { %v12316_v18 = vmax.f32 %v12180_v50, 0.0  ;;  %v12181_v41 = vadd.f32 %v16222_v20, %v20213_v14 }
 0x51c   : > { %v14220_v52 = vpack.c.bf16 %v12318_v22, %v12318_v22  ;;  %v12319_v30 = vmax.f32 %v12183_v45, 0.0  ;;  %v21006_v45 = vld [vmem:[#allocation38_spill] sm:$0xff] }
 0x51d   : > { %v14218_v44 = vpack.c.bf16 %v12316_v18, %v12316_v18  ;;  %v12317_v28 = vmax.f32 %v12181_v41, 0.0  ;;  %v16087_v2 = vpop.f32.mrb[56].mxu0 }
 0x51e   : > { %12999 = vst.msk [vmem:[%s20237_s21 + $0xd8] sm:$0xf] %vm12944_vm8, %v14220_v52  ;;  %v14221_v54 = vpack.c.bf16 %v12319_v30, %v12319_v30  ;;  %v16223_v63 = vadd.f32 %v16087_v2, %v20998_v25  ;;  %v11666_v58 = vpop.f32.mrb[57].mxu0 }
 0x51f   : > { %12997 = vst.msk [vmem:[%s20237_s21 + $0xd0] sm:$0xf] %vm12944_vm8, %v14218_v44  ;;  %v14219_v11 = vpack.c.bf16 %v12317_v28, %v12317_v28  ;;  %v16224_v46 = vadd.f32 %v11666_v58, %v20999_v32  ;;  %v16088_v8 = vpop.f32.mrb[58].mxu0  ;;  %v21007_v44 = vld [vmem:[#allocation39_spill] sm:$0xff] }
 0x520   : > { %13000 = vst.msk [vmem:[%s20237_s21 + $0xdc] sm:$0xf] %vm12944_vm8, %v14221_v54  ;;  %v12186_v29 = vadd.f32 %v16223_v63, %v20213_v14  ;;  %v16225_v40 = vadd.f32 %v16088_v8, %v20142_v38  ;;  %v11669_v3 = vpop.f32.mrb[59].mxu0 }
 0x521   : > { %12998 = vst.msk [vmem:[%s20237_s21 + $0xd4] sm:$0xf] %vm12944_vm8, %v14219_v11  ;;  %v12184_v23 = vadd.f32 %v16224_v46, %v20213_v14  ;;  %v16226_v12 = vadd.f32 %v11669_v3, %v20145_v24 }
 0x522   : > { %v12322_v16 = vmax.f32 %v12186_v29, 0.0  ;;  %v12187_v59 = vadd.f32 %v16225_v40, %v20213_v14 }
 0x523   : > { %v12320_v55 = vmax.f32 %v12184_v23, 0.0  ;;  %v12185_v60 = vadd.f32 %v16226_v12, %v20213_v14 }
 0x524   : > { %v14224_v56 = vpack.c.bf16 %v12322_v16, %v12322_v16  ;;  %v12323_v43 = vmax.f32 %v12187_v59, 0.0 }
 0x525   : > { %v14222_v34 = vpack.c.bf16 %v12320_v55, %v12320_v55  ;;  %v12321_v38 = vmax.f32 %v12185_v60, 0.0  ;;  %v16091_v37 = vpop.f32.mrb[60].mxu0 }
 0x526   : > { %13003 = vst.msk [vmem:[%s20237_s21 + $0xe8] sm:$0xf] %vm12944_vm8, %v14224_v56  ;;  %v14225_v21 = vpack.c.bf16 %v12323_v43, %v12323_v43  ;;  %v16227_v36 = vadd.f32 %v16091_v37, %v21000_v17  ;;  %v11682_v35 = vpop.f32.mrb[61].mxu0 }
 0x527   : > { %13001 = vst.msk [vmem:[%s20237_s21 + $0xe0] sm:$0xf] %vm12944_vm8, %v14222_v34  ;;  %v14223_v24 = vpack.c.bf16 %v12321_v38, %v12321_v38  ;;  %v16228_v27 = vadd.f32 %v11682_v35, %v21001_v47  ;;  %v16092_v26 = vpop.f32.mrb[62].mxu0 }
 0x528   : > { %13004 = vst.msk [vmem:[%s20237_s21 + $0xec] sm:$0xf] %vm12944_vm8, %v14225_v21  ;;  %v12190_v33 = vadd.f32 %v16227_v36, %v20213_v14  ;;  %v16229_v10 = vadd.f32 %v16092_v26, %v21002_v62  ;;  %v11685_v7 = vpop.f32.mrb[63].mxu0 }
 0x529   : > { %13002 = vst.msk [vmem:[%s20237_s21 + $0xe4] sm:$0xf] %vm12944_vm8, %v14223_v24  ;;  %v12188_v13 = vadd.f32 %v16228_v27, %v20213_v14  ;;  %v16230_v15 = vadd.f32 %v11685_v7, %v21003_v42 }
 0x52a   : > { %v12326_v61 = vmax.f32 %v12190_v33, 0.0  ;;  %v12191_v53 = vadd.f32 %v16229_v10, %v20213_v14 }
 0x52b   : > { %v12324_v49 = vmax.f32 %v12188_v13, 0.0  ;;  %v12189_v1 = vadd.f32 %v16230_v15, %v20213_v14 }
 0x52c   : > { %v14228_v51 = vpack.c.bf16 %v12326_v61, %v12326_v61  ;;  %v12327_v48 = vmax.f32 %v12191_v53, 0.0 }
 0x52d   : > { %v14226_v19 = vpack.c.bf16 %v12324_v49, %v12324_v49  ;;  %v12325_v0 = vmax.f32 %v12189_v1, 0.0  ;;  %v16095_v5 = vpop.f32.mrb[64].mxu0 }
 0x52e   : > { %13007 = vst.msk [vmem:[%s20237_s21 + $0xf8] sm:$0xf] %vm12944_vm8, %v14228_v51  ;;  %v14229_v57 = vpack.c.bf16 %v12327_v48, %v12327_v48  ;;  %v16231_v4 = vadd.f32 %v16095_v5, %v21004_v6  ;;  %v11698_v31 = vpop.f32.mrb[65].mxu0 }
 0x52f   : > { %13005 = vst.msk [vmem:[%s20237_s21 + $0xf0] sm:$0xf] %vm12944_vm8, %v14226_v19  ;;  %v14227_v9 = vpack.c.bf16 %v12325_v0, %v12325_v0  ;;  %v16232_v50 = vadd.f32 %v11698_v31, %v21005_v39  ;;  %v16096_v20 = vpop.f32.mrb[66].mxu0 }
 0x530   : > { %13008 = vst.msk [vmem:[%s20237_s21 + $0xfc] sm:$0xf] %vm12944_vm8, %v14229_v57  ;;  %v12194_v22 = vadd.f32 %v16231_v4, %v20213_v14  ;;  %v16233_v18 = vadd.f32 %v16096_v20, %v21006_v45  ;;  %v11701_v41 = vpop.f32.mrb[67].mxu0 }
 0x531   : > { %13006 = vst.msk [vmem:[%s20237_s21 + $0xf4] sm:$0xf] %vm12944_vm8, %v14227_v9  ;;  %v12192_v30 = vadd.f32 %v16232_v50, %v20213_v14  ;;  %v16234_v28 = vadd.f32 %v11701_v41, %v21007_v44 }
 0x532   : > { %v15547_v52 = vpop.f32.mrb[68].mxu1  ;;  %v12330_v54 = vmax.f32 %v12194_v22, 0.0  ;;  %v12195_v25 = vadd.f32 %v16233_v18, %v20213_v14 }
 0x533   : > { %v6500_v2 = vpop.f32.mrb[69].mxu1  ;;  %v12328_v58 = vmax.f32 %v12192_v30, 0.0  ;;  %v12193_v11 = vadd.f32 %v16234_v28, %v20213_v14  ;;  %v20585_v14 = vld [vmem:[%s20804_s2] ss:$0 sm:$0xff] }
 0x534   : > { %v15548_v63 = vpop.f32.mrb[70].mxu1  ;;  %v14232_v46 = vpack.c.bf16 %v12330_v54, %v12330_v54  ;;  %v12331_v8 = vmax.f32 %v12195_v25, 0.0 }
 0x535   : > { %v6503_v32 = vpop.f32.mrb[71].mxu1  ;;  %v14230_v29 = vpack.c.bf16 %v12328_v58, %v12328_v58  ;;  %v12329_v40 = vmax.f32 %v12193_v11, 0.0  ;;  %v16099_v3 = vpop.f32.mrb[68].mxu0 }
 0x536   : > { %13011 = vst.msk [vmem:[%s20237_s21 + $0x108] sm:$0xf] %vm12944_vm8, %v14232_v46  ;;  %v14233_v23 = vpack.c.bf16 %v12331_v8, %v12331_v8  ;;  %v16235_v12 = vadd.f32 %v16099_v3, %v15547_v52  ;;  %v11714_v16 = vpop.f32.mrb[69].mxu0 }
 0x537   : > { %13009 = vst.msk [vmem:[%s20237_s21 + $0x100] sm:$0xf] %vm12944_vm8, %v14230_v29  ;;  %v14231_v59 = vpack.c.bf16 %v12329_v40, %v12329_v40  ;;  %v16236_v55 = vadd.f32 %v11714_v16, %v6500_v2  ;;  %v16100_v60 = vpop.f32.mrb[70].mxu0 }
 0x538   : > { %13012 = vst.msk [vmem:[%s20237_s21 + $0x10c] sm:$0xf] %vm12944_vm8, %v14233_v23  ;;  %v12198_v56 = vadd.f32 %v20585_v14, %v16235_v12  ;;  %v16237_v43 = vadd.f32 %v16100_v60, %v15548_v63  ;;  %v11717_v34 = vpop.f32.mrb[71].mxu0 }
 0x539   : > { %13010 = vst.msk [vmem:[%s20237_s21 + $0x104] sm:$0xf] %vm12944_vm8, %v14231_v59  ;;  %v12196_v37 = vadd.f32 %v20585_v14, %v16236_v55  ;;  %v16238_v21 = vadd.f32 %v11717_v34, %v6503_v32 }
 0x53a   : > { %v15551_v38 = vpop.f32.mrb[72].mxu1  ;;  %v12334_v36 = vmax.f32 %v12198_v56, 0.0  ;;  %v12199_v35 = vadd.f32 %v20585_v14, %v16237_v43 }
 0x53b   : > { %v6516_v17 = vpop.f32.mrb[73].mxu1  ;;  %v12332_v47 = vmax.f32 %v12196_v37, 0.0  ;;  %v12197_v27 = vadd.f32 %v20585_v14, %v16238_v21 }
 0x53c   : > { %v15552_v24 = vpop.f32.mrb[74].mxu1  ;;  %v14236_v33 = vpack.c.bf16 %v12334_v36, %v12334_v36  ;;  %v12335_v62 = vmax.f32 %v12199_v35, 0.0 }
 0x53d   : > { %v6519_v26 = vpop.f32.mrb[75].mxu1  ;;  %v14234_v10 = vpack.c.bf16 %v12332_v47, %v12332_v47  ;;  %v12333_v7 = vmax.f32 %v12197_v27, 0.0  ;;  %v16103_v13 = vpop.f32.mrb[72].mxu0 }
 0x53e   : > { %13015 = vst.msk [vmem:[%s20237_s21 + $0x118] sm:$0xf] %vm12944_vm8, %v14236_v33  ;;  %v14237_v42 = vpack.c.bf16 %v12335_v62, %v12335_v62  ;;  %v16239_v15 = vadd.f32 %v16103_v13, %v15551_v38  ;;  %v11730_v61 = vpop.f32.mrb[73].mxu0 }
 0x53f   : > { %13013 = vst.msk [vmem:[%s20237_s21 + $0x110] sm:$0xf] %vm12944_vm8, %v14234_v10  ;;  %v14235_v53 = vpack.c.bf16 %v12333_v7, %v12333_v7  ;;  %v16240_v49 = vadd.f32 %v11730_v61, %v6516_v17  ;;  %v16104_v1 = vpop.f32.mrb[74].mxu0 }
 0x540   : > { %13016 = vst.msk [vmem:[%s20237_s21 + $0x11c] sm:$0xf] %vm12944_vm8, %v14237_v42  ;;  %v12202_v51 = vadd.f32 %v20585_v14, %v16239_v15  ;;  %v16241_v48 = vadd.f32 %v16104_v1, %v15552_v24  ;;  %v11733_v19 = vpop.f32.mrb[75].mxu0 }
 0x541   : > { %13014 = vst.msk [vmem:[%s20237_s21 + $0x114] sm:$0xf] %vm12944_vm8, %v14235_v53  ;;  %v12200_v5 = vadd.f32 %v20585_v14, %v16240_v49  ;;  %v16242_v57 = vadd.f32 %v11733_v19, %v6519_v26 }
 0x542   : > { %v15555_v0 = vpop.f32.mrb[76].mxu1  ;;  %v12338_v4 = vmax.f32 %v12202_v51, 0.0  ;;  %v12203_v31 = vadd.f32 %v20585_v14, %v16241_v48 }
 0x543   : > { %v6532_v6 = vpop.f32.mrb[77].mxu1  ;;  %v12336_v39 = vmax.f32 %v12200_v5, 0.0  ;;  %v12201_v50 = vadd.f32 %v20585_v14, %v16242_v57 }
 0x544   : > { %v15556_v9 = vpop.f32.mrb[78].mxu1  ;;  %v14240_v22 = vpack.c.bf16 %v12338_v4, %v12338_v4  ;;  %v12339_v45 = vmax.f32 %v12203_v31, 0.0 }
 0x545   : > { %v6535_v20 = vpop.f32.mrb[79].mxu1  ;;  %v14238_v18 = vpack.c.bf16 %v12336_v39, %v12336_v39  ;;  %v12337_v41 = vmax.f32 %v12201_v50, 0.0  ;;  %v16107_v52 = vpop.f32.mrb[76].mxu0 }
 0x546   : > { %13019 = vst.msk [vmem:[%s20237_s21 + $0x128] sm:$0xf] %vm12944_vm8, %v14240_v22  ;;  %v14241_v30 = vpack.c.bf16 %v12339_v45, %v12339_v45  ;;  %v16243_v44 = vadd.f32 %v16107_v52, %v15555_v0  ;;  %v11746_v28 = vpop.f32.mrb[77].mxu0 }
 0x547   : > { %13017 = vst.msk [vmem:[%s20237_s21 + $0x120] sm:$0xf] %vm12944_vm8, %v14238_v18  ;;  %v14239_v2 = vpack.c.bf16 %v12337_v41, %v12337_v41  ;;  %v16244_v54 = vadd.f32 %v11746_v28, %v6532_v6  ;;  %v16108_v25 = vpop.f32.mrb[78].mxu0 }
 0x548   : > { %13020 = vst.msk [vmem:[%s20237_s21 + $0x12c] sm:$0xf] %vm12944_vm8, %v14241_v30  ;;  %v12206_v63 = vadd.f32 %v20585_v14, %v16243_v44  ;;  %v16245_v58 = vadd.f32 %v16108_v25, %v15556_v9  ;;  %v11749_v11 = vpop.f32.mrb[79].mxu0 }
 0x549   : > { %13018 = vst.msk [vmem:[%s20237_s21 + $0x124] sm:$0xf] %vm12944_vm8, %v14239_v2  ;;  %v12204_v46 = vadd.f32 %v20585_v14, %v16244_v54  ;;  %v16246_v8 = vadd.f32 %v11749_v11, %v6535_v20 }
 0x54a   : > { %v15559_v32 = vpop.f32.mrb[80].mxu1  ;;  %v12342_v40 = vmax.f32 %v12206_v63, 0.0  ;;  %v12207_v3 = vadd.f32 %v20585_v14, %v16245_v58 }
 0x54b   : > { %v6548_v29 = vpop.f32.mrb[81].mxu1  ;;  %v12340_v12 = vmax.f32 %v12204_v46, 0.0  ;;  %v12205_v16 = vadd.f32 %v20585_v14, %v16246_v8 }
 0x54c   : > { %v15560_v23 = vpop.f32.mrb[82].mxu1  ;;  %v14244_v55 = vpack.c.bf16 %v12342_v40, %v12342_v40  ;;  %v12343_v60 = vmax.f32 %v12207_v3, 0.0 }
 0x54d   : > { %v6551_v59 = vpop.f32.mrb[83].mxu1  ;;  %v14242_v56 = vpack.c.bf16 %v12340_v12, %v12340_v12  ;;  %v12341_v43 = vmax.f32 %v12205_v16, 0.0  ;;  %v16111_v34 = vpop.f32.mrb[80].mxu0 }
 0x54e   : > { %13023 = vst.msk [vmem:[%s20237_s21 + $0x138] sm:$0xf] %vm12944_vm8, %v14244_v55  ;;  %v14245_v38 = vpack.c.bf16 %v12343_v60, %v12343_v60  ;;  %v16247_v37 = vadd.f32 %v16111_v34, %v15559_v32  ;;  %v11762_v21 = vpop.f32.mrb[81].mxu0 }
 0x54f   : > { %13021 = vst.msk [vmem:[%s20237_s21 + $0x130] sm:$0xf] %vm12944_vm8, %v14242_v56  ;;  %v14243_v17 = vpack.c.bf16 %v12341_v43, %v12341_v43  ;;  %v16248_v36 = vadd.f32 %v11762_v21, %v6548_v29  ;;  %v16112_v35 = vpop.f32.mrb[82].mxu0 }
 0x550   : > { %13024 = vst.msk [vmem:[%s20237_s21 + $0x13c] sm:$0xf] %vm12944_vm8, %v14245_v38  ;;  %v12210_v24 = vadd.f32 %v20585_v14, %v16247_v37  ;;  %v16249_v47 = vadd.f32 %v16112_v35, %v15560_v23  ;;  %v11765_v27 = vpop.f32.mrb[83].mxu0 }
 0x551   : > { %13022 = vst.msk [vmem:[%s20237_s21 + $0x134] sm:$0xf] %vm12944_vm8, %v14243_v17  ;;  %v12208_v33 = vadd.f32 %v20585_v14, %v16248_v36  ;;  %v16250_v62 = vadd.f32 %v11765_v27, %v6551_v59 }
 0x552   : > { %v15563_v26 = vpop.f32.mrb[84].mxu1  ;;  %v12346_v7 = vmax.f32 %v12210_v24, 0.0  ;;  %v12211_v13 = vadd.f32 %v20585_v14, %v16249_v47 }
 0x553   : > { %v6564_v10 = vpop.f32.mrb[85].mxu1  ;;  %v12344_v15 = vmax.f32 %v12208_v33, 0.0  ;;  %v12209_v61 = vadd.f32 %v20585_v14, %v16250_v62 }
 0x554   : > { %v15564_v42 = vpop.f32.mrb[86].mxu1  ;;  %v14248_v49 = vpack.c.bf16 %v12346_v7, %v12346_v7  ;;  %v12347_v1 = vmax.f32 %v12211_v13, 0.0 }
 0x555   : > { %v6567_v53 = vpop.f32.mrb[87].mxu1  ;;  %v14246_v51 = vpack.c.bf16 %v12344_v15, %v12344_v15  ;;  %v12345_v48 = vmax.f32 %v12209_v61, 0.0  ;;  %v16115_v19 = vpop.f32.mrb[84].mxu0 }
 0x556   : > { %13027 = vst.msk [vmem:[%s20237_s21 + $0x148] sm:$0xf] %vm12944_vm8, %v14248_v49  ;;  %v14249_v0 = vpack.c.bf16 %v12347_v1, %v12347_v1  ;;  %v16251_v5 = vadd.f32 %v16115_v19, %v15563_v26  ;;  %v11778_v57 = vpop.f32.mrb[85].mxu0 }
 0x557   : > { %13025 = vst.msk [vmem:[%s20237_s21 + $0x140] sm:$0xf] %vm12944_vm8, %v14246_v51  ;;  %v14247_v6 = vpack.c.bf16 %v12345_v48, %v12345_v48  ;;  %v16252_v4 = vadd.f32 %v11778_v57, %v6564_v10  ;;  %v16116_v31 = vpop.f32.mrb[86].mxu0 }
 0x558   : > { %13028 = vst.msk [vmem:[%s20237_s21 + $0x14c] sm:$0xf] %vm12944_vm8, %v14249_v0  ;;  %v12214_v9 = vadd.f32 %v20585_v14, %v16251_v5  ;;  %v16253_v39 = vadd.f32 %v16116_v31, %v15564_v42  ;;  %v11781_v50 = vpop.f32.mrb[87].mxu0 }
 0x559   : > { %13026 = vst.msk [vmem:[%s20237_s21 + $0x144] sm:$0xf] %vm12944_vm8, %v14247_v6  ;;  %v12212_v22 = vadd.f32 %v20585_v14, %v16252_v4  ;;  %v16254_v45 = vadd.f32 %v11781_v50, %v6567_v53 }
 0x55a   : > { %v15567_v20 = vpop.f32.mrb[88].mxu1  ;;  %v12350_v41 = vmax.f32 %v12214_v9, 0.0  ;;  %v12215_v52 = vadd.f32 %v20585_v14, %v16253_v39 }
 0x55b   : > { %v6580_v18 = vpop.f32.mrb[89].mxu1  ;;  %v12348_v44 = vmax.f32 %v12212_v22, 0.0  ;;  %v12213_v28 = vadd.f32 %v20585_v14, %v16254_v45 }
 0x55c   : > { %v15568_v30 = vpop.f32.mrb[90].mxu1  ;;  %v14252_v54 = vpack.c.bf16 %v12350_v41, %v12350_v41  ;;  %v12351_v25 = vmax.f32 %v12215_v52, 0.0 }
 0x55d   : > { %v6583_v2 = vpop.f32.mrb[91].mxu1  ;;  %v14250_v63 = vpack.c.bf16 %v12348_v44, %v12348_v44  ;;  %v12349_v58 = vmax.f32 %v12213_v28, 0.0  ;;  %v16119_v11 = vpop.f32.mrb[88].mxu0 }
 0x55e   : > { %13031 = vst.msk [vmem:[%s20237_s21 + $0x158] sm:$0xf] %vm12944_vm8, %v14252_v54  ;;  %v14253_v32 = vpack.c.bf16 %v12351_v25, %v12351_v25  ;;  %v16255_v46 = vadd.f32 %v16119_v11, %v15567_v20  ;;  %v11794_v8 = vpop.f32.mrb[89].mxu0 }
 0x55f   : > { %13029 = vst.msk [vmem:[%s20237_s21 + $0x150] sm:$0xf] %vm12944_vm8, %v14250_v63  ;;  %v14251_v29 = vpack.c.bf16 %v12349_v58, %v12349_v58  ;;  %v16256_v40 = vadd.f32 %v11794_v8, %v6580_v18  ;;  %v16120_v3 = vpop.f32.mrb[90].mxu0 }
 0x560   : > { %13032 = vst.msk [vmem:[%s20237_s21 + $0x15c] sm:$0xf] %vm12944_vm8, %v14253_v32  ;;  %v12218_v23 = vadd.f32 %v20585_v14, %v16255_v46  ;;  %v16257_v12 = vadd.f32 %v16120_v3, %v15568_v30  ;;  %v11797_v16 = vpop.f32.mrb[91].mxu0 }
 0x561   : > { %13030 = vst.msk [vmem:[%s20237_s21 + $0x154] sm:$0xf] %vm12944_vm8, %v14251_v29  ;;  %v12216_v55 = vadd.f32 %v20585_v14, %v16256_v40  ;;  %v16258_v60 = vadd.f32 %v11797_v16, %v6583_v2 }
 0x562   : > { %v15571_v59 = vpop.f32.mrb[92].mxu1  ;;  %v12354_v43 = vmax.f32 %v12218_v23, 0.0  ;;  %v12219_v34 = vadd.f32 %v20585_v14, %v16257_v12 }
 0x563   : > { %v6596_v56 = vpop.f32.mrb[93].mxu1  ;;  %v12352_v37 = vmax.f32 %v12216_v55, 0.0  ;;  %v12217_v21 = vadd.f32 %v20585_v14, %v16258_v60 }
 0x564   : > { %v15572_v38 = vpop.f32.mrb[94].mxu1  ;;  %v14256_v36 = vpack.c.bf16 %v12354_v43, %v12354_v43  ;;  %v12355_v35 = vmax.f32 %v12219_v34, 0.0 }
 0x565   : > { %v6599_v17 = vpop.f32.mrb[95].mxu1  ;;  %v14254_v24 = vpack.c.bf16 %v12352_v37, %v12352_v37  ;;  %v12353_v47 = vmax.f32 %v12217_v21, 0.0  ;;  %v16123_v27 = vpop.f32.mrb[92].mxu0 }
 0x566   : > { %13035 = vst.msk [vmem:[%s20237_s21 + $0x168] sm:$0xf] %vm12944_vm8, %v14256_v36  ;;  %v14257_v26 = vpack.c.bf16 %v12355_v35, %v12355_v35  ;;  %v16259_v33 = vadd.f32 %v16123_v27, %v15571_v59  ;;  %v11810_v62 = vpop.f32.mrb[93].mxu0 }
 0x567   : > { %13033 = vst.msk [vmem:[%s20237_s21 + $0x160] sm:$0xf] %vm12944_vm8, %v14254_v24  ;;  %v14255_v10 = vpack.c.bf16 %v12353_v47, %v12353_v47  ;;  %v16260_v7 = vadd.f32 %v11810_v62, %v6596_v56  ;;  %v16124_v13 = vpop.f32.mrb[94].mxu0 }
 0x568   : > { %13036 = vst.msk [vmem:[%s20237_s21 + $0x16c] sm:$0xf] %vm12944_vm8, %v14257_v26  ;;  %v12222_v42 = vadd.f32 %v20585_v14, %v16259_v33  ;;  %v16261_v15 = vadd.f32 %v16124_v13, %v15572_v38  ;;  %v11813_v61 = vpop.f32.mrb[95].mxu0 }
 0x569   : > { %13034 = vst.msk [vmem:[%s20237_s21 + $0x164] sm:$0xf] %vm12944_vm8, %v14255_v10  ;;  %v12220_v49 = vadd.f32 %v20585_v14, %v16260_v7  ;;  %v16262_v1 = vadd.f32 %v11813_v61, %v6599_v17 }
 0x56a   : > { %v15575_v53 = vpop.f32.mrb[96].mxu1  ;;  %v12358_v48 = vmax.f32 %v12222_v42, 0.0  ;;  %v12223_v19 = vadd.f32 %v20585_v14, %v16261_v15 }
 0x56b   : > { %v6612_v51 = vpop.f32.mrb[97].mxu1  ;;  %v12356_v5 = vmax.f32 %v12220_v49, 0.0  ;;  %v12221_v57 = vadd.f32 %v20585_v14, %v16262_v1 }
 0x56c   : > { %v15576_v0 = vpop.f32.mrb[98].mxu1  ;;  %v14260_v4 = vpack.c.bf16 %v12358_v48, %v12358_v48  ;;  %v12359_v31 = vmax.f32 %v12223_v19, 0.0 }
 0x56d   : > { %v6615_v6 = vpop.f32.mrb[99].mxu1  ;;  %v14258_v9 = vpack.c.bf16 %v12356_v5, %v12356_v5  ;;  %v12357_v39 = vmax.f32 %v12221_v57, 0.0  ;;  %v16127_v50 = vpop.f32.mrb[96].mxu0 }
 0x56e   : > { %13039 = vst.msk [vmem:[%s20237_s21 + $0x178] sm:$0xf] %vm12944_vm8, %v14260_v4  ;;  %v14261_v20 = vpack.c.bf16 %v12359_v31, %v12359_v31  ;;  %v16263_v22 = vadd.f32 %v16127_v50, %v15575_v53  ;;  %v11826_v45 = vpop.f32.mrb[97].mxu0 }
 0x56f   : > { %13037 = vst.msk [vmem:[%s20237_s21 + $0x170] sm:$0xf] %vm12944_vm8, %v14258_v9  ;;  %v14259_v18 = vpack.c.bf16 %v12357_v39, %v12357_v39  ;;  %v16264_v41 = vadd.f32 %v11826_v45, %v6612_v51  ;;  %v16128_v52 = vpop.f32.mrb[98].mxu0 }
 0x570   : > { %13040 = vst.msk [vmem:[%s20237_s21 + $0x17c] sm:$0xf] %vm12944_vm8, %v14261_v20  ;;  %v12226_v30 = vadd.f32 %v20585_v14, %v16263_v22  ;;  %v16265_v44 = vadd.f32 %v16128_v52, %v15576_v0  ;;  %v11829_v28 = vpop.f32.mrb[99].mxu0 }
 0x571   : > { %13038 = vst.msk [vmem:[%s20237_s21 + $0x174] sm:$0xf] %vm12944_vm8, %v14259_v18  ;;  %v12224_v54 = vadd.f32 %v20585_v14, %v16264_v41  ;;  %v16266_v25 = vadd.f32 %v11829_v28, %v6615_v6 }
 0x572   : > { %v15579_v2 = vpop.f32.mrb[100].mxu1  ;;  %v12362_v58 = vmax.f32 %v12226_v30, 0.0  ;;  %v12227_v11 = vadd.f32 %v20585_v14, %v16265_v44 }
 0x573   : > { %v6628_v63 = vpop.f32.mrb[101].mxu1  ;;  %v12360_v46 = vmax.f32 %v12224_v54, 0.0  ;;  %v12225_v8 = vadd.f32 %v20585_v14, %v16266_v25 }
 0x574   : > { %v15580_v32 = vpop.f32.mrb[102].mxu1  ;;  %v14264_v40 = vpack.c.bf16 %v12362_v58, %v12362_v58  ;;  %v12363_v3 = vmax.f32 %v12227_v11, 0.0 }
 0x575   : > { %v6631_v29 = vpop.f32.mrb[103].mxu1  ;;  %v14262_v23 = vpack.c.bf16 %v12360_v46, %v12360_v46  ;;  %v12361_v12 = vmax.f32 %v12225_v8, 0.0  ;;  %v16131_v16 = vpop.f32.mrb[100].mxu0 }
 0x576   : > { %13043 = vst.msk [vmem:[%s20237_s21 + $0x188] sm:$0xf] %vm12944_vm8, %v14264_v40  ;;  %v14265_v59 = vpack.c.bf16 %v12363_v3, %v12363_v3  ;;  %v16267_v55 = vadd.f32 %v16131_v16, %v15579_v2  ;;  %v11842_v60 = vpop.f32.mrb[101].mxu0 }
 0x577   : > { %13041 = vst.msk [vmem:[%s20237_s21 + $0x180] sm:$0xf] %vm12944_vm8, %v14262_v23  ;;  %v14263_v56 = vpack.c.bf16 %v12361_v12, %v12361_v12  ;;  %v16268_v43 = vadd.f32 %v11842_v60, %v6628_v63  ;;  %v16132_v34 = vpop.f32.mrb[102].mxu0 }
 0x578   : > { %13044 = vst.msk [vmem:[%s20237_s21 + $0x18c] sm:$0xf] %vm12944_vm8, %v14265_v59  ;;  %v12230_v38 = vadd.f32 %v20585_v14, %v16267_v55  ;;  %v16269_v37 = vadd.f32 %v16132_v34, %v15580_v32  ;;  %v11845_v21 = vpop.f32.mrb[103].mxu0 }
 0x579   : > { %13042 = vst.msk [vmem:[%s20237_s21 + $0x184] sm:$0xf] %vm12944_vm8, %v14263_v56  ;;  %v12228_v36 = vadd.f32 %v20585_v14, %v16268_v43  ;;  %v16270_v35 = vadd.f32 %v11845_v21, %v6631_v29 }
 0x57a   : > { %v15583_v17 = vpop.f32.mrb[104].mxu1  ;;  %v12366_v47 = vmax.f32 %v12230_v38, 0.0  ;;  %v12231_v27 = vadd.f32 %v20585_v14, %v16269_v37 }
 0x57b   : > { %v6644_v24 = vpop.f32.mrb[105].mxu1  ;;  %v12364_v33 = vmax.f32 %v12228_v36, 0.0  ;;  %v12229_v62 = vadd.f32 %v20585_v14, %v16270_v35 }
 0x57c   : > { %v15584_v26 = vpop.f32.mrb[106].mxu1  ;;  %v14268_v7 = vpack.c.bf16 %v12366_v47, %v12366_v47  ;;  %v12367_v13 = vmax.f32 %v12231_v27, 0.0 }
 0x57d   : > { %v6647_v10 = vpop.f32.mrb[107].mxu1  ;;  %v14266_v42 = vpack.c.bf16 %v12364_v33, %v12364_v33  ;;  %v12365_v15 = vmax.f32 %v12229_v62, 0.0  ;;  %v16135_v61 = vpop.f32.mrb[104].mxu0 }
 0x57e   : > { %13047 = vst.msk [vmem:[%s20237_s21 + $0x198] sm:$0xf] %vm12944_vm8, %v14268_v7  ;;  %v14269_v53 = vpack.c.bf16 %v12367_v13, %v12367_v13  ;;  %v16271_v49 = vadd.f32 %v16135_v61, %v15583_v17  ;;  %v11858_v1 = vpop.f32.mrb[105].mxu0 }
 0x57f   : > { %13045 = vst.msk [vmem:[%s20237_s21 + $0x190] sm:$0xf] %vm12944_vm8, %v14266_v42  ;;  %v14267_v51 = vpack.c.bf16 %v12365_v15, %v12365_v15  ;;  %v16272_v48 = vadd.f32 %v11858_v1, %v6644_v24  ;;  %v16136_v19 = vpop.f32.mrb[106].mxu0 }
 0x580   : > { %13048 = vst.msk [vmem:[%s20237_s21 + $0x19c] sm:$0xf] %vm12944_vm8, %v14269_v53  ;;  %v12234_v0 = vadd.f32 %v20585_v14, %v16271_v49  ;;  %v16273_v5 = vadd.f32 %v16136_v19, %v15584_v26  ;;  %v11861_v57 = vpop.f32.mrb[107].mxu0 }
 0x581   : > { %13046 = vst.msk [vmem:[%s20237_s21 + $0x194] sm:$0xf] %vm12944_vm8, %v14267_v51  ;;  %v12232_v4 = vadd.f32 %v20585_v14, %v16272_v48  ;;  %v16274_v31 = vadd.f32 %v11861_v57, %v6647_v10 }
 0x582   : > { %v15587_v6 = vpop.f32.mrb[108].mxu1  ;;  %v12370_v39 = vmax.f32 %v12234_v0, 0.0  ;;  %v12235_v50 = vadd.f32 %v20585_v14, %v16273_v5 }
 0x583   : > { %v6660_v9 = vpop.f32.mrb[109].mxu1  ;;  %v12368_v22 = vmax.f32 %v12232_v4, 0.0  ;;  %v12233_v45 = vadd.f32 %v20585_v14, %v16274_v31 }
 0x584   : > { %v15588_v20 = vpop.f32.mrb[110].mxu1  ;;  %v14272_v41 = vpack.c.bf16 %v12370_v39, %v12370_v39  ;;  %v12371_v52 = vmax.f32 %v12235_v50, 0.0 }
 0x585   : > { %v6663_v18 = vpop.f32.mrb[111].mxu1  ;;  %v14270_v30 = vpack.c.bf16 %v12368_v22, %v12368_v22  ;;  %v12369_v44 = vmax.f32 %v12233_v45, 0.0  ;;  %v16139_v28 = vpop.f32.mrb[108].mxu0 }
 0x586   : > { %13051 = vst.msk [vmem:[%s20237_s21 + $0x1a8] sm:$0xf] %vm12944_vm8, %v14272_v41  ;;  %v14273_v2 = vpack.c.bf16 %v12371_v52, %v12371_v52  ;;  %v16275_v54 = vadd.f32 %v16139_v28, %v15587_v6  ;;  %v11874_v25 = vpop.f32.mrb[109].mxu0 }
 0x587   : > { %13049 = vst.msk [vmem:[%s20237_s21 + $0x1a0] sm:$0xf] %vm12944_vm8, %v14270_v30  ;;  %v14271_v63 = vpack.c.bf16 %v12369_v44, %v12369_v44  ;;  %v16276_v58 = vadd.f32 %v11874_v25, %v6660_v9  ;;  %v16140_v11 = vpop.f32.mrb[110].mxu0 }
 0x588   : > { %13052 = vst.msk [vmem:[%s20237_s21 + $0x1ac] sm:$0xf] %vm12944_vm8, %v14273_v2  ;;  %v12238_v32 = vadd.f32 %v20585_v14, %v16275_v54  ;;  %v16277_v46 = vadd.f32 %v16140_v11, %v15588_v20  ;;  %v11877_v8 = vpop.f32.mrb[111].mxu0 }
 0x589   : > { %13050 = vst.msk [vmem:[%s20237_s21 + $0x1a4] sm:$0xf] %vm12944_vm8, %v14271_v63  ;;  %v12236_v40 = vadd.f32 %v20585_v14, %v16276_v58  ;;  %v16278_v3 = vadd.f32 %v11877_v8, %v6663_v18 }
 0x58a   : > { %v15591_v29 = vpop.f32.mrb[112].mxu1  ;;  %v12374_v12 = vmax.f32 %v12238_v32, 0.0  ;;  %v12239_v16 = vadd.f32 %v20585_v14, %v16277_v46 }
 0x58b   : > { %v6676_v23 = vpop.f32.mrb[113].mxu1  ;;  %v12372_v55 = vmax.f32 %v12236_v40, 0.0  ;;  %v12237_v60 = vadd.f32 %v20585_v14, %v16278_v3 }
 0x58c   : > { %v15592_v59 = vpop.f32.mrb[114].mxu1  ;;  %v14276_v43 = vpack.c.bf16 %v12374_v12, %v12374_v12  ;;  %v12375_v34 = vmax.f32 %v12239_v16, 0.0 }
 0x58d   : > { %v6679_v56 = vpop.f32.mrb[115].mxu1  ;;  %v14274_v38 = vpack.c.bf16 %v12372_v55, %v12372_v55  ;;  %v12373_v37 = vmax.f32 %v12237_v60, 0.0  ;;  %v16143_v21 = vpop.f32.mrb[112].mxu0 }
 0x58e   : > { %13055 = vst.msk [vmem:[%s20237_s21 + $0x1b8] sm:$0xf] %vm12944_vm8, %v14276_v43  ;;  %v14277_v17 = vpack.c.bf16 %v12375_v34, %v12375_v34  ;;  %v16279_v36 = vadd.f32 %v16143_v21, %v15591_v29  ;;  %v11890_v35 = vpop.f32.mrb[113].mxu0 }
 0x58f   : > { %13053 = vst.msk [vmem:[%s20237_s21 + $0x1b0] sm:$0xf] %vm12944_vm8, %v14274_v38  ;;  %v14275_v24 = vpack.c.bf16 %v12373_v37, %v12373_v37  ;;  %v16280_v47 = vadd.f32 %v11890_v35, %v6676_v23  ;;  %v16144_v27 = vpop.f32.mrb[114].mxu0 }
 0x590   : > { %13056 = vst.msk [vmem:[%s20237_s21 + $0x1bc] sm:$0xf] %vm12944_vm8, %v14277_v17  ;;  %v12242_v26 = vadd.f32 %v20585_v14, %v16279_v36  ;;  %v16281_v33 = vadd.f32 %v16144_v27, %v15592_v59  ;;  %v11893_v62 = vpop.f32.mrb[115].mxu0 }
 0x591   : > { %13054 = vst.msk [vmem:[%s20237_s21 + $0x1b4] sm:$0xf] %vm12944_vm8, %v14275_v24  ;;  %v12240_v7 = vadd.f32 %v20585_v14, %v16280_v47  ;;  %v16282_v13 = vadd.f32 %v11893_v62, %v6679_v56 }
 0x592   : > { %v15595_v10 = vpop.f32.mrb[116].mxu1  ;;  %v12378_v15 = vmax.f32 %v12242_v26, 0.0  ;;  %v12243_v61 = vadd.f32 %v20585_v14, %v16281_v33 }
 0x593   : > { %v6692_v42 = vpop.f32.mrb[117].mxu1  ;;  %v12376_v49 = vmax.f32 %v12240_v7, 0.0  ;;  %v12241_v1 = vadd.f32 %v20585_v14, %v16282_v13 }
 0x594   : > { %v15596_v53 = vpop.f32.mrb[118].mxu1  ;;  %v14280_v48 = vpack.c.bf16 %v12378_v15, %v12378_v15  ;;  %v12379_v19 = vmax.f32 %v12243_v61, 0.0 }
 0x595   : > { %v6695_v51 = vpop.f32.mrb[119].mxu1  ;;  %v14278_v0 = vpack.c.bf16 %v12376_v49, %v12376_v49  ;;  %v12377_v5 = vmax.f32 %v12241_v1, 0.0  ;;  %v16147_v57 = vpop.f32.mrb[116].mxu0 }
 0x596   : > { %13059 = vst.msk [vmem:[%s20237_s21 + $0x1c8] sm:$0xf] %vm12944_vm8, %v14280_v48  ;;  %v14281_v6 = vpack.c.bf16 %v12379_v19, %v12379_v19  ;;  %v16283_v4 = vadd.f32 %v16147_v57, %v15595_v10  ;;  %v11906_v31 = vpop.f32.mrb[117].mxu0 }
 0x597   : > { %13057 = vst.msk [vmem:[%s20237_s21 + $0x1c0] sm:$0xf] %vm12944_vm8, %v14278_v0  ;;  %v14279_v9 = vpack.c.bf16 %v12377_v5, %v12377_v5  ;;  %v16284_v39 = vadd.f32 %v11906_v31, %v6692_v42  ;;  %v16148_v50 = vpop.f32.mrb[118].mxu0 }
 0x598   : > { %13060 = vst.msk [vmem:[%s20237_s21 + $0x1cc] sm:$0xf] %vm12944_vm8, %v14281_v6  ;;  %v12246_v20 = vadd.f32 %v20585_v14, %v16283_v4  ;;  %v16285_v22 = vadd.f32 %v16148_v50, %v15596_v53  ;;  %v11909_v45 = vpop.f32.mrb[119].mxu0 }
 0x599   : > { %13058 = vst.msk [vmem:[%s20237_s21 + $0x1c4] sm:$0xf] %vm12944_vm8, %v14279_v9  ;;  %v12244_v41 = vadd.f32 %v20585_v14, %v16284_v39  ;;  %v16286_v52 = vadd.f32 %v11909_v45, %v6695_v51 }
 0x59a   : > { %v15599_v18 = vpop.f32.mrb[120].mxu1  ;;  %v12382_v44 = vmax.f32 %v12246_v20, 0.0  ;;  %v12247_v28 = vadd.f32 %v20585_v14, %v16285_v22 }
 0x59b   : > { %v6708_v30 = vpop.f32.mrb[121].mxu1  ;;  %v12380_v54 = vmax.f32 %v12244_v41, 0.0  ;;  %v12245_v25 = vadd.f32 %v20585_v14, %v16286_v52 }
 0x59c   : > { %v15600_v2 = vpop.f32.mrb[122].mxu1  ;;  %v14284_v58 = vpack.c.bf16 %v12382_v44, %v12382_v44  ;;  %v12383_v11 = vmax.f32 %v12247_v28, 0.0 }
 0x59d   : > { %v6711_v63 = vpop.f32.mrb[123].mxu1  ;;  %v14282_v32 = vpack.c.bf16 %v12380_v54, %v12380_v54  ;;  %v12381_v46 = vmax.f32 %v12245_v25, 0.0  ;;  %v16151_v8 = vpop.f32.mrb[120].mxu0 }
 0x59e   : > { %13063 = vst.msk [vmem:[%s20237_s21 + $0x1d8] sm:$0xf] %vm12944_vm8, %v14284_v58  ;;  %v14285_v29 = vpack.c.bf16 %v12383_v11, %v12383_v11  ;;  %v16287_v40 = vadd.f32 %v16151_v8, %v15599_v18  ;;  %v11922_v3 = vpop.f32.mrb[121].mxu0 }
 0x59f   : > { %13061 = vst.msk [vmem:[%s20237_s21 + $0x1d0] sm:$0xf] %vm12944_vm8, %v14282_v32  ;;  %v14283_v23 = vpack.c.bf16 %v12381_v46, %v12381_v46  ;;  %v16288_v12 = vadd.f32 %v11922_v3, %v6708_v30  ;;  %v16152_v16 = vpop.f32.mrb[122].mxu0 }
 0x5a0   : > { %13064 = vst.msk [vmem:[%s20237_s21 + $0x1dc] sm:$0xf] %vm12944_vm8, %v14285_v29  ;;  %v12250_v59 = vadd.f32 %v20585_v14, %v16287_v40  ;;  %v16289_v55 = vadd.f32 %v16152_v16, %v15600_v2  ;;  %v11925_v60 = vpop.f32.mrb[123].mxu0 }
 0x5a1   : > { %13062 = vst.msk [vmem:[%s20237_s21 + $0x1d4] sm:$0xf] %vm12944_vm8, %v14283_v23  ;;  %v12248_v43 = vadd.f32 %v20585_v14, %v16288_v12  ;;  %v16290_v34 = vadd.f32 %v11925_v60, %v6711_v63 }
 0x5a2   : > { %v15603_v56 = vpop.f32.mrb[124].mxu1  ;;  %v12386_v37 = vmax.f32 %v12250_v59, 0.0  ;;  %v12251_v21 = vadd.f32 %v20585_v14, %v16289_v55 }
 0x5a3   : > { %v6724_v38 = vpop.f32.mrb[125].mxu1  ;;  %v12384_v36 = vmax.f32 %v12248_v43, 0.0  ;;  %v12249_v35 = vadd.f32 %v20585_v14, %v16290_v34 }
 0x5a4   : > { %v15604_v17 = vpop.f32.mrb[126].mxu1  ;;  %v14288_v47 = vpack.c.bf16 %v12386_v37, %v12386_v37  ;;  %v12387_v27 = vmax.f32 %v12251_v21, 0.0 }
 0x5a5   : > { %v6727_v24 = vpop.f32.mrb[127].mxu1  ;;  %v14286_v26 = vpack.c.bf16 %v12384_v36, %v12384_v36  ;;  %v12385_v33 = vmax.f32 %v12249_v35, 0.0  ;;  %v16155_v62 = vpop.f32.mrb[124].mxu0 }
 0x5a6   : > { %13067 = vst.msk [vmem:[%s20237_s21 + $0x1e8] sm:$0xf] %vm12944_vm8, %v14288_v47  ;;  %v14289_v10 = vpack.c.bf16 %v12387_v27, %v12387_v27  ;;  %v16291_v7 = vadd.f32 %v16155_v62, %v15603_v56  ;;  %v11938_v13 = vpop.f32.mrb[125].mxu0 }
 0x5a7   : > { %13065 = vst.msk [vmem:[%s20237_s21 + $0x1e0] sm:$0xf] %vm12944_vm8, %v14286_v26  ;;  %v14287_v42 = vpack.c.bf16 %v12385_v33, %v12385_v33  ;;  %v16292_v15 = vadd.f32 %v11938_v13, %v6724_v38  ;;  %v16156_v61 = vpop.f32.mrb[126].mxu0 }
 0x5a8   : > { %13068 = vst.msk [vmem:[%s20237_s21 + $0x1ec] sm:$0xf] %vm12944_vm8, %v14289_v10  ;;  %v12254_v53 = vadd.f32 %v20585_v14, %v16291_v7  ;;  %v16293_v49 = vadd.f32 %v16156_v61, %v15604_v17  ;;  %v11941_v1 = vpop.f32.mrb[127].mxu0 }
 0x5a9   : > { %13066 = vst.msk [vmem:[%s20237_s21 + $0x1e4] sm:$0xf] %vm12944_vm8, %v14287_v42  ;;  %v12252_v48 = vadd.f32 %v20585_v14, %v16292_v15  ;;  %v16294_v19 = vadd.f32 %v11941_v1, %v6727_v24 }
 0x5aa   : > { %v15607_v51 = vpop.f32.mrb[128].mxu1  ;;  %v12390_v5 = vmax.f32 %v12254_v53, 0.0  ;;  %v12255_v57 = vadd.f32 %v20585_v14, %v16293_v49 }
 0x5ab   : > { %v6740_v0 = vpop.f32.mrb[129].mxu1  ;;  %v12388_v4 = vmax.f32 %v12252_v48, 0.0  ;;  %v12253_v31 = vadd.f32 %v20585_v14, %v16294_v19 }
 0x5ac   : > { %v15608_v6 = vpop.f32.mrb[130].mxu1  ;;  %v14292_v39 = vpack.c.bf16 %v12390_v5, %v12390_v5  ;;  %v12391_v50 = vmax.f32 %v12255_v57, 0.0 }
 0x5ad   : > { %v6743_v9 = vpop.f32.mrb[131].mxu1  ;;  %v14290_v20 = vpack.c.bf16 %v12388_v4, %v12388_v4  ;;  %v12389_v22 = vmax.f32 %v12253_v31, 0.0  ;;  %v16159_v45 = vpop.f32.mrb[128].mxu0 }
 0x5ae   : > { %13071 = vst.msk [vmem:[%s20237_s21 + $0x1f8] sm:$0xf] %vm12944_vm8, %v14292_v39  ;;  %v14293_v18 = vpack.c.bf16 %v12391_v50, %v12391_v50  ;;  %v16295_v41 = vadd.f32 %v16159_v45, %v15607_v51  ;;  %v11954_v52 = vpop.f32.mrb[129].mxu0 }
 0x5af   : > { %13069 = vst.msk [vmem:[%s20237_s21 + $0x1f0] sm:$0xf] %vm12944_vm8, %v14290_v20  ;;  %v14291_v30 = vpack.c.bf16 %v12389_v22, %v12389_v22  ;;  %v16296_v44 = vadd.f32 %v11954_v52, %v6740_v0  ;;  %v16160_v28 = vpop.f32.mrb[130].mxu0 }
 0x5b0   : > { %13072 = vst.msk [vmem:[%s20237_s21 + $0x1fc] sm:$0xf] %vm12944_vm8, %v14293_v18  ;;  %v12258_v2 = vadd.f32 %v20585_v14, %v16295_v41  ;;  %v16297_v54 = vadd.f32 %v16160_v28, %v15608_v6  ;;  %v11957_v25 = vpop.f32.mrb[131].mxu0 }
 0x5b1   : > { %13070 = vst.msk [vmem:[%s20237_s21 + $0x1f4] sm:$0xf] %vm12944_vm8, %v14291_v30  ;;  %v12256_v58 = vadd.f32 %v20585_v14, %v16296_v44  ;;  %v16298_v11 = vadd.f32 %v11957_v25, %v6743_v9 }
 0x5b2   : > { %v15611_v63 = vpop.f32.mrb[132].mxu1  ;;  %v12394_v46 = vmax.f32 %v12258_v2, 0.0  ;;  %v12259_v8 = vadd.f32 %v20585_v14, %v16297_v54 }
 0x5b3   : > { %v6756_v32 = vpop.f32.mrb[133].mxu1  ;;  %v12392_v40 = vmax.f32 %v12256_v58, 0.0  ;;  %v12257_v3 = vadd.f32 %v20585_v14, %v16298_v11 }
 0x5b4   : > { %v15612_v29 = vpop.f32.mrb[134].mxu1  ;;  %v14296_v12 = vpack.c.bf16 %v12394_v46, %v12394_v46  ;;  %v12395_v16 = vmax.f32 %v12259_v8, 0.0 }
 0x5b5   : > { %v6759_v23 = vpop.f32.mrb[135].mxu1  ;;  %v14294_v59 = vpack.c.bf16 %v12392_v40, %v12392_v40  ;;  %v12393_v55 = vmax.f32 %v12257_v3, 0.0  ;;  %v16163_v60 = vpop.f32.mrb[132].mxu0 }
 0x5b6   : > { %13075 = vst.msk [vmem:[%s20237_s21 + $0x208] sm:$0xf] %vm12944_vm8, %v14296_v12  ;;  %v14297_v56 = vpack.c.bf16 %v12395_v16, %v12395_v16  ;;  %v16299_v43 = vadd.f32 %v16163_v60, %v15611_v63  ;;  %v11970_v34 = vpop.f32.mrb[133].mxu0 }
 0x5b7   : > { %13073 = vst.msk [vmem:[%s20237_s21 + $0x200] sm:$0xf] %vm12944_vm8, %v14294_v59  ;;  %v14295_v38 = vpack.c.bf16 %v12393_v55, %v12393_v55  ;;  %v16300_v37 = vadd.f32 %v11970_v34, %v6756_v32  ;;  %v16164_v21 = vpop.f32.mrb[134].mxu0 }
 0x5b8   : > { %13076 = vst.msk [vmem:[%s20237_s21 + $0x20c] sm:$0xf] %vm12944_vm8, %v14297_v56  ;;  %v12262_v17 = vadd.f32 %v20585_v14, %v16299_v43  ;;  %v16301_v36 = vadd.f32 %v16164_v21, %v15612_v29  ;;  %v11973_v35 = vpop.f32.mrb[135].mxu0 }
 0x5b9   : > { %13074 = vst.msk [vmem:[%s20237_s21 + $0x204] sm:$0xf] %vm12944_vm8, %v14295_v38  ;;  %v12260_v24 = vadd.f32 %v20585_v14, %v16300_v37  ;;  %v16302_v47 = vadd.f32 %v11973_v35, %v6759_v23 }
 0x5ba   : > { %v12398_v27 = vmax.f32 %v12262_v17, 0.0  ;;  %v12263_v26 = vadd.f32 %v20585_v14, %v16301_v36 }
 0x5bb   : > { %v12396_v33 = vmax.f32 %v12260_v24, 0.0  ;;  %v12261_v62 = vadd.f32 %v20585_v14, %v16302_v47 }
 0x5bc   : > { %v14300_v10 = vpack.c.bf16 %v12398_v27, %v12398_v27  ;;  %v12399_v7 = vmax.f32 %v12263_v26, 0.0 }
 0x5bd   : > { %v14298_v13 = vpack.c.bf16 %v12396_v33, %v12396_v33  ;;  %v12397_v42 = vmax.f32 %v12261_v62, 0.0 }
 0x5be   : > { %13079 = vst.msk [vmem:[%s20237_s21 + $0x218] sm:$0xf] %vm12944_vm8, %v14300_v10  ;;  %v14301_v15 = vpack.c.bf16 %v12399_v7, %v12399_v7 }
 0x5bf   : > { %13077 = vst.msk [vmem:[%s20237_s21 + $0x210] sm:$0xf] %vm12944_vm8, %v14298_v13  ;;  %v14299_v61 = vpack.c.bf16 %v12397_v42, %v12397_v42 }
 0x5c0   : > { %13080 = vst.msk [vmem:[%s20237_s21 + $0x21c] sm:$0xf] %vm12944_vm8, %v14301_v15 }
 0x5c1   : > { %13078 = vst.msk [vmem:[%s20237_s21 + $0x214] sm:$0xf] %vm12944_vm8, %v14299_v61 }
 0x5c2 PF: > { %s13_s14 = sadd.s32 1, %s17819_s14   ;;  %s21008_s12 = smov %s17815_s13 }
 0x5c3   : > { %p10_p5 = scmp.ge.s32.totalorder %s13_s14, 4   ;;  %s21009_s13 = smov %s21011_s15 }
 0x5c5   :  { %12 = sbr.rel (!%p10_p5) target bundleno = 2 (0x2), region = 76 }

</bundles_post_ra>
